<compile_context>
chip_gen: v5e
topology: v5e:2x2
jax: 0.10.0
libtpu: 0.0.40
codegen_flags: <defaults>
</compile_context>

<pallas_src>
import jax
import jax.numpy as jnp
import numpy as np
from jax.experimental import pallas as pl
from jax.experimental.pallas import tpu as pltpu


# ------------------------------ Fused encoder kernel ------------------------------
def _make_encoder_kernel(n_layers, t_blk, b_pad, hdim):
    rows = t_blk * b_pad

    def kernel(ids_ref,                      # SMEM (scalar prefetch): (T*b_pad,) int32
               emb_hbm,                      # HBM (pl.ANY): (V, d_model) f32
               wih0_ref,                     # VMEM: (d_model, 4H) bf16  (layer 0)
               wihr_ref,                     # VMEM: (max(L-1,1), H, 4H) bf16 (layers 1..)
               whh_ref,                      # VMEM: (L, H, 4H) bf16
               bias_ref,                     # VMEM: (L, 1, 4H) f32
               y_ref,                        # out:  (t_blk, b_pad, H) f32
               h_out_ref, c_out_ref,         # out:  (L, b_pad, H) f32
               x_sc,                         # VMEM scratch: (rows, d_model) f32
               act_sc,                       # VMEM scratch: (rows, H) f32
               gx_sc,                        # VMEM scratch: (t_blk, b_pad, 4H) f32
               h_sc, c_sc,                   # VMEM scratch: (L, b_pad, H) f32
               gsem):                        # DMA semaphore: (1,)
        tb = pl.program_id(0)

        @pl.when(tb == 0)
        def _():
            h_sc[...] = jnp.zeros_like(h_sc)
            c_sc[...] = jnp.zeros_like(c_sc)

        # ---- Embedding gather, fused into layer-0 phase 1 ---------------------------
        # One small DMA per (timestep, batch-slot) row; all starts are issued back-to-back
        # so the copies overlap, then a single wait pass drains the shared semaphore.
        # The table never leaves HBM (scales to real vocab sizes).
        base = tb * rows
        for r in range(rows):
            tok = ids_ref[base + r]
            pltpu.make_async_copy(emb_hbm.at[pl.ds(tok, 1)],
                                  x_sc.at[pl.ds(r, 1)],
                                  gsem.at[0]).start()
        for r in range(rows):
            pltpu.make_async_copy(emb_hbm.at[pl.ds(0, 1)],
                                  x_sc.at[pl.ds(r, 1)],
                                  gsem.at[0]).wait()

        def run_layer(layer, x_in, wih):
            # Phase 1: hoisted input projection for the whole time block — one big-M MXU
            # matmul (M = t_blk*b_pad) instead of T tiny matmuls on the serial path.  The
            # result is staged (t_blk, b_pad, 4H) so phase 2 reads sublane-aligned slabs
            # via leading-axis indexing.
            gx = (jnp.dot(x_in.astype(jnp.bfloat16), wih,
                          preferred_element_type=jnp.float32)
                  + bias_ref[layer])
            for tt in range(t_blk):
                gx_sc[tt] = gx[tt * b_pad:(tt + 1) * b_pad, :]

            whh = whh_ref[layer]              # (H, 4H) bf16, hoisted out of the loop
            h = h_sc[layer]
            c = c_sc[layer]
            last_layer = layer == n_layers - 1

            # Phase 2: serial recurrence (statically unrolled; t_blk is small here — use
            # lax.fori_loop(..., unroll=4..8) for long blocks to bound vreg live ranges).
            for tt in range(t_blk):
                g = gx_sc[tt] + jnp.dot(h.astype(jnp.bfloat16), whh,
                                        preferred_element_type=jnp.float32)
                # gate order i, f, g, o (matches nn.LSTM); gate math / state stay in f32.
                i_g = jax.nn.sigmoid(g[:, 0 * hdim:1 * hdim])
                f_g = jax.nn.sigmoid(g[:, 1 * hdim:2 * hdim])
                g_g = jnp.tanh(g[:, 2 * hdim:3 * hdim])
                o_g = jax.nn.sigmoid(g[:, 3 * hdim:4 * hdim])
                c = f_g * c + i_g * g_g
                h = o_g * jnp.tanh(c)
                if last_layer:
                    y_ref[tt] = h                                   # full (b_pad, H) slab
                else:
                    act_sc[tt * b_pad:(tt + 1) * b_pad, :] = h      # aligned 8-row strip
            h_sc[layer] = h
            c_sc[layer] = c
            # Written every block (cheap) rather than only under pl.when(last step).
            h_out_ref[layer] = h
            c_out_ref[layer] = c

        run_layer(0, x_sc[...], wih0_ref[...])
        for layer in range(1, n_layers):
            run_layer(layer, act_sc[...], wihr_ref[layer - 1])

    return kernel


def encoder_forward(params, enc_inputs, *, t_blk=None):
    """enc_inputs: (B, T) int32 -> (enc_outputs (B,T,H), (h (L,B,H), c (L,B,H)))."""
    B, T = enc_inputs.shape
    emb = params["emb"]
    d_model = emb.shape[1]
    layers = params["lstm"]
    n_layers = len(layers)
    hdim = layers[0]["w_hh_t"].shape[0]
    if t_blk is None:
        t_blk = T                 # whole sequence per grid step at small T; divisor of T else
    assert T % t_blk == 0
    n_blocks = T // t_blk
    b_pad = ((B + 7) // 8) * 8    # pad batch to a sublane tile (8 rows)
    rows = t_blk * b_pad

    # Flat time-major padded ids (row = t*b_pad + b); pad slots use token 0 (padding_idx).
    ids_pad = jnp.zeros((b_pad, T), jnp.int32).at[:B, :].set(enc_inputs.astype(jnp.int32))
    ids_tm = jnp.transpose(ids_pad, (1, 0)).reshape(-1)

    wih0 = layers[0]["w_ih_t"]                                        # (d_model, 4H) bf16
    if n_layers > 1:
        wihr = jnp.stack([layers[l]["w_ih_t"] for l in range(1, n_layers)], axis=0)
    else:
        wihr = jnp.zeros((1, hdim, 4 * hdim), jnp.bfloat16)           # unused placeholder
    whh_all = jnp.stack([layers[l]["w_hh_t"] for l in range(n_layers)], axis=0)
    bias_all = jnp.stack([layers[l]["bias"] for l in range(n_layers)], axis=0)   # (L,1,4H)

    kernel = _make_encoder_kernel(n_layers, t_blk, b_pad, hdim)

    y, h_out, c_out = pl.pallas_call(
        kernel,
        out_shape=(jax.ShapeDtypeStruct((T, b_pad, hdim), jnp.float32),
                   jax.ShapeDtypeStruct((n_layers, b_pad, hdim), jnp.float32),
                   jax.ShapeDtypeStruct((n_layers, b_pad, hdim), jnp.float32)),
        grid_spec=pltpu.PrefetchScalarGridSpec(
            num_scalar_prefetch=1,
            grid=(n_blocks,),
            in_specs=[
                pl.BlockSpec(memory_space=pl.ANY),                    # emb table stays in HBM
                # Constant-index weight specs.  (On v7x at real sizes, add
                # pipeline_mode=pl.Buffered(1) here to single-buffer them in 64 MiB VMEM.)
                pl.BlockSpec((d_model, 4 * hdim), lambda i, ids: (0, 0)),
                pl.BlockSpec(wihr.shape, lambda i, ids: (0, 0, 0)),
                pl.BlockSpec(whh_all.shape, lambda i, ids: (0, 0, 0)),
                pl.BlockSpec(bias_all.shape, lambda i, ids: (0, 0, 0)),
            ],
            out_specs=[
                pl.BlockSpec((t_blk, b_pad, hdim), lambda i, ids: (i, 0, 0)),
                pl.BlockSpec((n_layers, b_pad, hdim), lambda i, ids: (0, 0, 0)),
                pl.BlockSpec((n_layers, b_pad, hdim), lambda i, ids: (0, 0, 0)),
            ],
            scratch_shapes=[
                pltpu.VMEM((rows, d_model), jnp.float32),             # gathered embeddings
                pltpu.VMEM((rows, hdim), jnp.float32),                # inter-layer activations
                pltpu.VMEM((t_blk, b_pad, 4 * hdim), jnp.float32),    # hoisted gate pre-acts
                pltpu.VMEM((n_layers, b_pad, hdim), jnp.float32),     # h state (per layer)
                pltpu.VMEM((n_layers, b_pad, hdim), jnp.float32),     # c state (per layer)
                pltpu.SemaphoreType.DMA((1,)),                        # gather DMA semaphore
            ]),
        compiler_params=pltpu.CompilerParams(
            dimension_semantics=("arbitrary",),        # recurrence is serial in time
            vmem_limit_bytes=48 * 1024 * 1024),        # explicit budget, fits every TPU gen
    )(ids_tm, emb, wih0, wihr, whh_all, bias_all)

    enc_outputs = jnp.transpose(y[:, :B, :], (1, 0, 2))               # back to batch_first
    return enc_outputs, (h_out[:, :B, :], c_out[:, :B, :])


# ------------------------- Pure-JAX reference (check) -------------------------
def reference_forward(params, enc_inputs):
    """Matches the kernel's math (bf16 MXU operands, f32 accumulation / gate math)."""
    x = jnp.take(params["emb"], enc_inputs, axis=0)                   # (B, T, D) f32
    hs, cs = [], []
    for layer in params["lstm"]:
        w_ih_t, w_hh_t = layer["w_ih_t"], layer["w_hh_t"]             # bf16
        b = layer["bias"][0]
        H = w_hh_t.shape[0]

        def step(carry, x_t, w_ih_t=w_ih_t, w_hh_t=w_hh_t, b=b, H=H):
            h, c = carry
            gates = (jnp.dot(x_t.astype(jnp.bfloat16), w_ih_t,
                             preferred_element_type=jnp.float32)
                     + jnp.dot(h.astype(jnp.bfloat16), w_hh_t,
                               preferred_element_type=jnp.float32)
                     + b)
            i = jax.nn.sigmoid(gates[:, :H])
            f = jax.nn.sigmoid(gates[:, H:2 * H])
            g = jnp.tanh(gates[:, 2 * H:3 * H])
            o = jax.nn.sigmoid(gates[:, 3 * H:])
            c = f * c + i * g
            h = o * jnp.tanh(c)
            return (h, c), h

        Bsz = x.shape[0]
        init = (jnp.zeros((Bsz, H), jnp.float32), jnp.zeros((Bsz, H), jnp.float32))
        (h, c), ys = jax.lax.scan(step, init, jnp.transpose(x, (1, 0, 2)))
        x = jnp.transpose(ys, (1, 0, 2))
        hs.append(h)
        cs.append(c)
    return x, (jnp.stack(hs, 0), jnp.stack(cs, 0))


# ------------------------------ Param init (synthetic) ------------------------
def init_params(key, vocab_size, d_model, d_ff, n_layers):
    k_emb, key = jax.random.split(key)
    emb = jax.random.normal(k_emb, (vocab_size, d_model), jnp.float32)
    emb = emb.at[0].set(0.0)                                          # padding_idx=0
    layers = []
    bound = 1.0 / np.sqrt(d_ff)
    d_in = d_model
    for _ in range(n_layers):
        key, k1, k2, k3, k4 = jax.random.split(key, 5)
        w_ih = jax.random.uniform(k1, (4 * d_ff, d_in), jnp.float32, -bound, bound)
        w_hh = jax.random.uniform(k2, (4 * d_ff, d_ff), jnp.float32, -bound, bound)
        b_ih = jax.random.uniform(k3, (4 * d_ff,), jnp.float32, -bound, bound)
        b_hh = jax.random.uniform(k4, (4 * d_ff,), jnp.float32, -bound, bound)
        layers.append({"w_ih_t": w_ih.T.astype(jnp.bfloat16),         # (D_in, 4H) bf16 (MXU)
                       "w_hh_t": w_hh.T.astype(jnp.bfloat16),         # (H, 4H)   bf16 (MXU)
                       "bias": (b_ih + b_hh).reshape(1, -1)})          # (1, 4H)   f32
        d_in = d_ff
    return {"emb": emb, "lstm": layers}


if __name__ == "__main__":
    # Small shapes implied by the module: batch=2, seq=8, vocab=16,
    # hidden_units (d_model)=32, feed_forward_units (d_ff)=32, num_lstm_layers=2.
    B, T = 2, 8
    VOCAB, D_MODEL, D_FF, N_LAYERS = 16, 32, 32, 2

    key = jax.random.PRNGKey(0)
    k_ids, k_params = jax.random.split(key)
    enc_inputs = jax.random.randint(k_ids, (B, T), 0, VOCAB, dtype=jnp.int32)
    params = init_params(k_params, VOCAB, D_MODEL, D_FF, N_LAYERS)

    enc_out, (h, c) = encoder_forward(params, enc_inputs)
    jax.block_until_ready((enc_out, h, c))

    ref_out, (ref_h, ref_c) = reference_forward(params, enc_inputs)
    np.testing.assert_allclose(np.asarray(enc_out), np.asarray(ref_out), rtol=5e-3, atol=5e-3)
    np.testing.assert_allclose(np.asarray(h), np.asarray(ref_h), rtol=5e-3, atol=5e-3)
    np.testing.assert_allclose(np.asarray(c), np.asarray(ref_c), rtol=5e-3, atol=5e-3)

    assert enc_out.shape == (B, T, D_FF)
    assert h.shape == (N_LAYERS, B, D_FF) and c.shape == (N_LAYERS, B, D_FF)
    print("KERNEL_OK")
</pallas_src>

<mosaic_0001>
module attributes {stable_mosaic.version = 11 : i64} {
  func.func @kernel(%arg0: i32, %arg1: memref<64xi32, #tpu.memory_space<smem>>, %arg2: memref<16x32xf32, #tpu.memory_space<any>>, %arg3: memref<32x128xbf16, #tpu.memory_space<vmem>>, %arg4: memref<1x32x128xbf16, #tpu.memory_space<vmem>>, %arg5: memref<2x32x128xbf16, #tpu.memory_space<vmem>>, %arg6: memref<2x1x128xf32, #tpu.memory_space<vmem>>, %arg7: memref<8x8x32xf32, #tpu.memory_space<vmem>>, %arg8: memref<2x8x32xf32, #tpu.memory_space<vmem>>, %arg9: memref<2x8x32xf32, #tpu.memory_space<vmem>>, %arg10: memref<64x32xf32, #tpu.memory_space<vmem>>, %arg11: memref<64x32xf32, #tpu.memory_space<vmem>>, %arg12: memref<8x8x128xf32, #tpu.memory_space<vmem>>, %arg13: memref<2x8x32xf32, #tpu.memory_space<vmem>>, %arg14: memref<2x8x32xf32, #tpu.memory_space<vmem>>, %arg15: memref<1x!tpu.dma_semaphore, #tpu.memory_space<semaphore_mem>>) attributes {dimension_semantics = [#tpu.dimension_semantics<arbitrary>], iteration_bounds = array<i64: 1>, scalar_prefetch = 1 : i64, scratch_operands = 6 : i64, tpu.core_type = #tpu.core_type<tc>, window_params = [{}, {pipeline_mode = #tpu.pipeline_mode<synchronous>, transform_indices = @transform_1, window_bounds = array<i64: 32, 128>}, {pipeline_mode = #tpu.pipeline_mode<synchronous>, transform_indices = @transform_2, window_bounds = array<i64: 1, 32, 128>}, {pipeline_mode = #tpu.pipeline_mode<synchronous>, transform_indices = @transform_3, window_bounds = array<i64: 2, 32, 128>}, {pipeline_mode = #tpu.pipeline_mode<synchronous>, transform_indices = @transform_4, window_bounds = array<i64: 2, 1, 128>}, {transform_indices = @transform_5, window_bounds = array<i64: 8, 8, 32>}, {pipeline_mode = #tpu.pipeline_mode<synchronous>, transform_indices = @transform_6, window_bounds = array<i64: 2, 8, 32>}, {pipeline_mode = #tpu.pipeline_mode<synchronous>, transform_indices = @transform_7, window_bounds = array<i64: 2, 8, 32>}]} {
    %c0_i32 = arith.constant 0 : i32
    %0 = arith.cmpi eq, %arg0, %c0_i32 : i32
    %1 = arith.extui %0 : i1 to i32
    %c0_i32_0 = arith.constant 0 : i32
    %2 = arith.cmpi ne, %1, %c0_i32_0 : i32
    scf.if %2 {
      %cst_821 = arith.constant 0.000000e+00 : f32
      %1337 = vector.broadcast %cst_821 : f32 to vector<2x8x32xf32>
      %c0_822 = arith.constant 0 : index
      %c0_823 = arith.constant 0 : index
      %c0_824 = arith.constant 0 : index
      %1338 = vector.load %arg13[%c0_822, %c0_823, %c0_824] : memref<2x8x32xf32, #tpu.memory_space<vmem>>, vector<2x8x32xf32>
      tpu.vector_store %arg13[%c0_822, %c0_823, %c0_824], %1337 {strides = array<i32>} : memref<2x8x32xf32, #tpu.memory_space<vmem>>, vector<2x8x32xf32>,
      %cst_825 = arith.constant 0.000000e+00 : f32
      %1339 = vector.broadcast %cst_825 : f32 to vector<2x8x32xf32>
      %c0_826 = arith.constant 0 : index
      %c0_827 = arith.constant 0 : index
      %c0_828 = arith.constant 0 : index
      %1340 = vector.load %arg14[%c0_826, %c0_827, %c0_828] : memref<2x8x32xf32, #tpu.memory_space<vmem>>, vector<2x8x32xf32>
      tpu.vector_store %arg14[%c0_826, %c0_827, %c0_828], %1339 {strides = array<i32>} : memref<2x8x32xf32, #tpu.memory_space<vmem>>, vector<2x8x32xf32>,
    } else {
    }
    %c64_i32 = arith.constant 64 : i32
    %3 = arith.muli %arg0, %c64_i32 : i32
    %c0_i32_1 = arith.constant 0 : i32
    %4 = arith.addi %3, %c0_i32_1 : i32
    %5 = arith.index_cast %4 : i32 to index
    %6 = memref.load %arg1[%5] : memref<64xi32, #tpu.memory_space<smem>>
    %c0_i32_2 = arith.constant 0 : i32
    %c0_i32_3 = arith.constant 0 : i32
    %7 = tpu.memref_slice %arg2[%6, %c0_i32_3] : memref<16x32xf32, #tpu.memory_space<any>> -> memref<1x32xf32, #tpu.memory_space<any>>
    %c0_i32_4 = arith.constant 0 : i32
    %c0_i32_5 = arith.constant 0 : i32
    %8 = tpu.memref_slice %arg10[%c0_i32_4, %c0_i32_5] : memref<64x32xf32, #tpu.memory_space<vmem>> -> memref<1x32xf32, #tpu.memory_space<vmem>>
    %9 = tpu.memref_slice %arg15[%c0_i32_2] : memref<1x!tpu.dma_semaphore, #tpu.memory_space<semaphore_mem>> -> memref<1x!tpu.dma_semaphore, #tpu.memory_space<semaphore_mem>>
    %10 = tpu.memref_squeeze %9 : memref<1x!tpu.dma_semaphore, #tpu.memory_space<semaphore_mem>> -> memref<!tpu.dma_semaphore, #tpu.memory_space<semaphore_mem>>
    tpu.enqueue_dma source(%7 : memref<1x32xf32, #tpu.memory_space<any>>) target(%8 : memref<1x32xf32, #tpu.memory_space<vmem>>) target_semaphore(%10 : memref<!tpu.dma_semaphore, #tpu.memory_space<semaphore_mem>>)
    %c1_i32 = arith.constant 1 : i32
    %11 = arith.addi %3, %c1_i32 : i32
    %12 = arith.index_cast %11 : i32 to index
    %13 = memref.load %arg1[%12] : memref<64xi32, #tpu.memory_space<smem>>
    %c0_i32_6 = arith.constant 0 : i32
    %c0_i32_7 = arith.constant 0 : i32
    %14 = tpu.memref_slice %arg2[%13, %c0_i32_7] : memref<16x32xf32, #tpu.memory_space<any>> -> memref<1x32xf32, #tpu.memory_space<any>>
    %c1_i32_8 = arith.constant 1 : i32
    %c0_i32_9 = arith.constant 0 : i32
    %15 = tpu.memref_slice %arg10[%c1_i32_8, %c0_i32_9] : memref<64x32xf32, #tpu.memory_space<vmem>> -> memref<1x32xf32, #tpu.memory_space<vmem>>
    %16 = tpu.memref_slice %arg15[%c0_i32_6] : memref<1x!tpu.dma_semaphore, #tpu.memory_space<semaphore_mem>> -> memref<1x!tpu.dma_semaphore, #tpu.memory_space<semaphore_mem>>
    %17 = tpu.memref_squeeze %16 : memref<1x!tpu.dma_semaphore, #tpu.memory_space<semaphore_mem>> -> memref<!tpu.dma_semaphore, #tpu.memory_space<semaphore_mem>>
    tpu.enqueue_dma source(%14 : memref<1x32xf32, #tpu.memory_space<any>>) target(%15 : memref<1x32xf32, #tpu.memory_space<vmem>>) target_semaphore(%17 : memref<!tpu.dma_semaphore, #tpu.memory_space<semaphore_mem>>)
    %c2_i32 = arith.constant 2 : i32
    %18 = arith.addi %3, %c2_i32 : i32
    %19 = arith.index_cast %18 : i32 to index
    %20 = memref.load %arg1[%19] : memref<64xi32, #tpu.memory_space<smem>>
    %c0_i32_10 = arith.constant 0 : i32
    %c0_i32_11 = arith.constant 0 : i32
    %21 = tpu.memref_slice %arg2[%20, %c0_i32_11] : memref<16x32xf32, #tpu.memory_space<any>> -> memref<1x32xf32, #tpu.memory_space<any>>
    %c2_i32_12 = arith.constant 2 : i32
    %c0_i32_13 = arith.constant 0 : i32
    %22 = tpu.memref_slice %arg10[%c2_i32_12, %c0_i32_13] : memref<64x32xf32, #tpu.memory_space<vmem>> -> memref<1x32xf32, #tpu.memory_space<vmem>>
    %23 = tpu.memref_slice %arg15[%c0_i32_10] : memref<1x!tpu.dma_semaphore, #tpu.memory_space<semaphore_mem>> -> memref<1x!tpu.dma_semaphore, #tpu.memory_space<semaphore_mem>>
    %24 = tpu.memref_squeeze %23 : memref<1x!tpu.dma_semaphore, #tpu.memory_space<semaphore_mem>> -> memref<!tpu.dma_semaphore, #tpu.memory_space<semaphore_mem>>
    tpu.enqueue_dma source(%21 : memref<1x32xf32, #tpu.memory_space<any>>) target(%22 : memref<1x32xf32, #tpu.memory_space<vmem>>) target_semaphore(%24 : memref<!tpu.dma_semaphore, #tpu.memory_space<semaphore_mem>>)
    %c3_i32 = arith.constant 3 : i32
    %25 = arith.addi %3, %c3_i32 : i32
    %26 = arith.index_cast %25 : i32 to index
    %27 = memref.load %arg1[%26] : memref<64xi32, #tpu.memory_space<smem>>
    %c0_i32_14 = arith.constant 0 : i32
    %c0_i32_15 = arith.constant 0 : i32
    %28 = tpu.memref_slice %arg2[%27, %c0_i32_15] : memref<16x32xf32, #tpu.memory_space<any>> -> memref<1x32xf32, #tpu.memory_space<any>>
    %c3_i32_16 = arith.constant 3 : i32
    %c0_i32_17 = arith.constant 0 : i32
    %29 = tpu.memref_slice %arg10[%c3_i32_16, %c0_i32_17] : memref<64x32xf32, #tpu.memory_space<vmem>> -> memref<1x32xf32, #tpu.memory_space<vmem>>
    %30 = tpu.memref_slice %arg15[%c0_i32_14] : memref<1x!tpu.dma_semaphore, #tpu.memory_space<semaphore_mem>> -> memref<1x!tpu.dma_semaphore, #tpu.memory_space<semaphore_mem>>
    %31 = tpu.memref_squeeze %30 : memref<1x!tpu.dma_semaphore, #tpu.memory_space<semaphore_mem>> -> memref<!tpu.dma_semaphore, #tpu.memory_space<semaphore_mem>>
    tpu.enqueue_dma source(%28 : memref<1x32xf32, #tpu.memory_space<any>>) target(%29 : memref<1x32xf32, #tpu.memory_space<vmem>>) target_semaphore(%31 : memref<!tpu.dma_semaphore, #tpu.memory_space<semaphore_mem>>)
    %c4_i32 = arith.constant 4 : i32
    %32 = arith.addi %3, %c4_i32 : i32
    %33 = arith.index_cast %32 : i32 to index
    %34 = memref.load %arg1[%33] : memref<64xi32, #tpu.memory_space<smem>>
    %c0_i32_18 = arith.constant 0 : i32
    %c0_i32_19 = arith.constant 0 : i32
    %35 = tpu.memref_slice %arg2[%34, %c0_i32_19] : memref<16x32xf32, #tpu.memory_space<any>> -> memref<1x32xf32, #tpu.memory_space<any>>
    %c4_i32_20 = arith.constant 4 : i32
    %c0_i32_21 = arith.constant 0 : i32
    %36 = tpu.memref_slice %arg10[%c4_i32_20, %c0_i32_21] : memref<64x32xf32, #tpu.memory_space<vmem>> -> memref<1x32xf32, #tpu.memory_space<vmem>>
    %37 = tpu.memref_slice %arg15[%c0_i32_18] : memref<1x!tpu.dma_semaphore, #tpu.memory_space<semaphore_mem>> -> memref<1x!tpu.dma_semaphore, #tpu.memory_space<semaphore_mem>>
    %38 = tpu.memref_squeeze %37 : memref<1x!tpu.dma_semaphore, #tpu.memory_space<semaphore_mem>> -> memref<!tpu.dma_semaphore, #tpu.memory_space<semaphore_mem>>
    tpu.enqueue_dma source(%35 : memref<1x32xf32, #tpu.memory_space<any>>) target(%36 : memref<1x32xf32, #tpu.memory_space<vmem>>) target_semaphore(%38 : memref<!tpu.dma_semaphore, #tpu.memory_space<semaphore_mem>>)
    %c5_i32 = arith.constant 5 : i32
    %39 = arith.addi %3, %c5_i32 : i32
    %40 = arith.index_cast %39 : i32 to index
    %41 = memref.load %arg1[%40] : memref<64xi32, #tpu.memory_space<smem>>
    %c0_i32_22 = arith.constant 0 : i32
    %c0_i32_23 = arith.constant 0 : i32
    %42 = tpu.memref_slice %arg2[%41, %c0_i32_23] : memref<16x32xf32, #tpu.memory_space<any>> -> memref<1x32xf32, #tpu.memory_space<any>>
    %c5_i32_24 = arith.constant 5 : i32
    %c0_i32_25 = arith.constant 0 : i32
    %43 = tpu.memref_slice %arg10[%c5_i32_24, %c0_i32_25] : memref<64x32xf32, #tpu.memory_space<vmem>> -> memref<1x32xf32, #tpu.memory_space<vmem>>
    %44 = tpu.memref_slice %arg15[%c0_i32_22] : memref<1x!tpu.dma_semaphore, #tpu.memory_space<semaphore_mem>> -> memref<1x!tpu.dma_semaphore, #tpu.memory_space<semaphore_mem>>
    %45 = tpu.memref_squeeze %44 : memref<1x!tpu.dma_semaphore, #tpu.memory_space<semaphore_mem>> -> memref<!tpu.dma_semaphore, #tpu.memory_space<semaphore_mem>>
    tpu.enqueue_dma source(%42 : memref<1x32xf32, #tpu.memory_space<any>>) target(%43 : memref<1x32xf32, #tpu.memory_space<vmem>>) target_semaphore(%45 : memref<!tpu.dma_semaphore, #tpu.memory_space<semaphore_mem>>)
    %c6_i32 = arith.constant 6 : i32
    %46 = arith.addi %3, %c6_i32 : i32
    %47 = arith.index_cast %46 : i32 to index
    %48 = memref.load %arg1[%47] : memref<64xi32, #tpu.memory_space<smem>>
    %c0_i32_26 = arith.constant 0 : i32
    %c0_i32_27 = arith.constant 0 : i32
    %49 = tpu.memref_slice %arg2[%48, %c0_i32_27] : memref<16x32xf32, #tpu.memory_space<any>> -> memref<1x32xf32, #tpu.memory_space<any>>
    %c6_i32_28 = arith.constant 6 : i32
    %c0_i32_29 = arith.constant 0 : i32
    %50 = tpu.memref_slice %arg10[%c6_i32_28, %c0_i32_29] : memref<64x32xf32, #tpu.memory_space<vmem>> -> memref<1x32xf32, #tpu.memory_space<vmem>>
    %51 = tpu.memref_slice %arg15[%c0_i32_26] : memref<1x!tpu.dma_semaphore, #tpu.memory_space<semaphore_mem>> -> memref<1x!tpu.dma_semaphore, #tpu.memory_space<semaphore_mem>>
    %52 = tpu.memref_squeeze %51 : memref<1x!tpu.dma_semaphore, #tpu.memory_space<semaphore_mem>> -> memref<!tpu.dma_semaphore, #tpu.memory_space<semaphore_mem>>
    tpu.enqueue_dma source(%49 : memref<1x32xf32, #tpu.memory_space<any>>) target(%50 : memref<1x32xf32, #tpu.memory_space<vmem>>) target_semaphore(%52 : memref<!tpu.dma_semaphore, #tpu.memory_space<semaphore_mem>>)
    %c7_i32 = arith.constant 7 : i32
    %53 = arith.addi %3, %c7_i32 : i32
    %54 = arith.index_cast %53 : i32 to index
    %55 = memref.load %arg1[%54] : memref<64xi32, #tpu.memory_space<smem>>
    %c0_i32_30 = arith.constant 0 : i32
    %c0_i32_31 = arith.constant 0 : i32
    %56 = tpu.memref_slice %arg2[%55, %c0_i32_31] : memref<16x32xf32, #tpu.memory_space<any>> -> memref<1x32xf32, #tpu.memory_space<any>>
    %c7_i32_32 = arith.constant 7 : i32
    %c0_i32_33 = arith.constant 0 : i32
    %57 = tpu.memref_slice %arg10[%c7_i32_32, %c0_i32_33] : memref<64x32xf32, #tpu.memory_space<vmem>> -> memref<1x32xf32, #tpu.memory_space<vmem>>
    %58 = tpu.memref_slice %arg15[%c0_i32_30] : memref<1x!tpu.dma_semaphore, #tpu.memory_space<semaphore_mem>> -> memref<1x!tpu.dma_semaphore, #tpu.memory_space<semaphore_mem>>
    %59 = tpu.memref_squeeze %58 : memref<1x!tpu.dma_semaphore, #tpu.memory_space<semaphore_mem>> -> memref<!tpu.dma_semaphore, #tpu.memory_space<semaphore_mem>>
    tpu.enqueue_dma source(%56 : memref<1x32xf32, #tpu.memory_space<any>>) target(%57 : memref<1x32xf32, #tpu.memory_space<vmem>>) target_semaphore(%59 : memref<!tpu.dma_semaphore, #tpu.memory_space<semaphore_mem>>)
    %c8_i32 = arith.constant 8 : i32
    %60 = arith.addi %3, %c8_i32 : i32
    %61 = arith.index_cast %60 : i32 to index
    %62 = memref.load %arg1[%61] : memref<64xi32, #tpu.memory_space<smem>>
    %c0_i32_34 = arith.constant 0 : i32
    %c0_i32_35 = arith.constant 0 : i32
    %63 = tpu.memref_slice %arg2[%62, %c0_i32_35] : memref<16x32xf32, #tpu.memory_space<any>> -> memref<1x32xf32, #tpu.memory_space<any>>
    %c8_i32_36 = arith.constant 8 : i32
    %c0_i32_37 = arith.constant 0 : i32
    %64 = tpu.memref_slice %arg10[%c8_i32_36, %c0_i32_37] : memref<64x32xf32, #tpu.memory_space<vmem>> -> memref<1x32xf32, #tpu.memory_space<vmem>>
    %65 = tpu.memref_slice %arg15[%c0_i32_34] : memref<1x!tpu.dma_semaphore, #tpu.memory_space<semaphore_mem>> -> memref<1x!tpu.dma_semaphore, #tpu.memory_space<semaphore_mem>>
    %66 = tpu.memref_squeeze %65 : memref<1x!tpu.dma_semaphore, #tpu.memory_space<semaphore_mem>> -> memref<!tpu.dma_semaphore, #tpu.memory_space<semaphore_mem>>
    tpu.enqueue_dma source(%63 : memref<1x32xf32, #tpu.memory_space<any>>) target(%64 : memref<1x32xf32, #tpu.memory_space<vmem>>) target_semaphore(%66 : memref<!tpu.dma_semaphore, #tpu.memory_space<semaphore_mem>>)
    %c9_i32 = arith.constant 9 : i32
    %67 = arith.addi %3, %c9_i32 : i32
    %68 = arith.index_cast %67 : i32 to index
    %69 = memref.load %arg1[%68] : memref<64xi32, #tpu.memory_space<smem>>
    %c0_i32_38 = arith.constant 0 : i32
    %c0_i32_39 = arith.constant 0 : i32
    %70 = tpu.memref_slice %arg2[%69, %c0_i32_39] : memref<16x32xf32, #tpu.memory_space<any>> -> memref<1x32xf32, #tpu.memory_space<any>>
    %c9_i32_40 = arith.constant 9 : i32
    %c0_i32_41 = arith.constant 0 : i32
    %71 = tpu.memref_slice %arg10[%c9_i32_40, %c0_i32_41] : memref<64x32xf32, #tpu.memory_space<vmem>> -> memref<1x32xf32, #tpu.memory_space<vmem>>
    %72 = tpu.memref_slice %arg15[%c0_i32_38] : memref<1x!tpu.dma_semaphore, #tpu.memory_space<semaphore_mem>> -> memref<1x!tpu.dma_semaphore, #tpu.memory_space<semaphore_mem>>
    %73 = tpu.memref_squeeze %72 : memref<1x!tpu.dma_semaphore, #tpu.memory_space<semaphore_mem>> -> memref<!tpu.dma_semaphore, #tpu.memory_space<semaphore_mem>>
    tpu.enqueue_dma source(%70 : memref<1x32xf32, #tpu.memory_space<any>>) target(%71 : memref<1x32xf32, #tpu.memory_space<vmem>>) target_semaphore(%73 : memref<!tpu.dma_semaphore, #tpu.memory_space<semaphore_mem>>)
    %c10_i32 = arith.constant 10 : i32
    %74 = arith.addi %3, %c10_i32 : i32
    %75 = arith.index_cast %74 : i32 to index
    %76 = memref.load %arg1[%75] : memref<64xi32, #tpu.memory_space<smem>>
    %c0_i32_42 = arith.constant 0 : i32
    %c0_i32_43 = arith.constant 0 : i32
    %77 = tpu.memref_slice %arg2[%76, %c0_i32_43] : memref<16x32xf32, #tpu.memory_space<any>> -> memref<1x32xf32, #tpu.memory_space<any>>
    %c10_i32_44 = arith.constant 10 : i32
    %c0_i32_45 = arith.constant 0 : i32
    %78 = tpu.memref_slice %arg10[%c10_i32_44, %c0_i32_45] : memref<64x32xf32, #tpu.memory_space<vmem>> -> memref<1x32xf32, #tpu.memory_space<vmem>>
    %79 = tpu.memref_slice %arg15[%c0_i32_42] : memref<1x!tpu.dma_semaphore, #tpu.memory_space<semaphore_mem>> -> memref<1x!tpu.dma_semaphore, #tpu.memory_space<semaphore_mem>>
    %80 = tpu.memref_squeeze %79 : memref<1x!tpu.dma_semaphore, #tpu.memory_space<semaphore_mem>> -> memref<!tpu.dma_semaphore, #tpu.memory_space<semaphore_mem>>
    tpu.enqueue_dma source(%77 : memref<1x32xf32, #tpu.memory_space<any>>) target(%78 : memref<1x32xf32, #tpu.memory_space<vmem>>) target_semaphore(%80 : memref<!tpu.dma_semaphore, #tpu.memory_space<semaphore_mem>>)
    %c11_i32 = arith.constant 11 : i32
    %81 = arith.addi %3, %c11_i32 : i32
    %82 = arith.index_cast %81 : i32 to index
    %83 = memref.load %arg1[%82] : memref<64xi32, #tpu.memory_space<smem>>
    %c0_i32_46 = arith.constant 0 : i32
    %c0_i32_47 = arith.constant 0 : i32
    %84 = tpu.memref_slice %arg2[%83, %c0_i32_47] : memref<16x32xf32, #tpu.memory_space<any>> -> memref<1x32xf32, #tpu.memory_space<any>>
    %c11_i32_48 = arith.constant 11 : i32
    %c0_i32_49 = arith.constant 0 : i32
    %85 = tpu.memref_slice %arg10[%c11_i32_48, %c0_i32_49] : memref<64x32xf32, #tpu.memory_space<vmem>> -> memref<1x32xf32, #tpu.memory_space<vmem>>
    %86 = tpu.memref_slice %arg15[%c0_i32_46] : memref<1x!tpu.dma_semaphore, #tpu.memory_space<semaphore_mem>> -> memref<1x!tpu.dma_semaphore, #tpu.memory_space<semaphore_mem>>
    %87 = tpu.memref_squeeze %86 : memref<1x!tpu.dma_semaphore, #tpu.memory_space<semaphore_mem>> -> memref<!tpu.dma_semaphore, #tpu.memory_space<semaphore_mem>>
    tpu.enqueue_dma source(%84 : memref<1x32xf32, #tpu.memory_space<any>>) target(%85 : memref<1x32xf32, #tpu.memory_space<vmem>>) target_semaphore(%87 : memref<!tpu.dma_semaphore, #tpu.memory_space<semaphore_mem>>)
    %c12_i32 = arith.constant 12 : i32
    %88 = arith.addi %3, %c12_i32 : i32
    %89 = arith.index_cast %88 : i32 to index
    %90 = memref.load %arg1[%89] : memref<64xi32, #tpu.memory_space<smem>>
    %c0_i32_50 = arith.constant 0 : i32
    %c0_i32_51 = arith.constant 0 : i32
    %91 = tpu.memref_slice %arg2[%90, %c0_i32_51] : memref<16x32xf32, #tpu.memory_space<any>> -> memref<1x32xf32, #tpu.memory_space<any>>
    %c12_i32_52 = arith.constant 12 : i32
    %c0_i32_53 = arith.constant 0 : i32
    %92 = tpu.memref_slice %arg10[%c12_i32_52, %c0_i32_53] : memref<64x32xf32, #tpu.memory_space<vmem>> -> memref<1x32xf32, #tpu.memory_space<vmem>>
    %93 = tpu.memref_slice %arg15[%c0_i32_50] : memref<1x!tpu.dma_semaphore, #tpu.memory_space<semaphore_mem>> -> memref<1x!tpu.dma_semaphore, #tpu.memory_space<semaphore_mem>>
    %94 = tpu.memref_squeeze %93 : memref<1x!tpu.dma_semaphore, #tpu.memory_space<semaphore_mem>> -> memref<!tpu.dma_semaphore, #tpu.memory_space<semaphore_mem>>
    tpu.enqueue_dma source(%91 : memref<1x32xf32, #tpu.memory_space<any>>) target(%92 : memref<1x32xf32, #tpu.memory_space<vmem>>) target_semaphore(%94 : memref<!tpu.dma_semaphore, #tpu.memory_space<semaphore_mem>>)
    %c13_i32 = arith.constant 13 : i32
    %95 = arith.addi %3, %c13_i32 : i32
    %96 = arith.index_cast %95 : i32 to index
    %97 = memref.load %arg1[%96] : memref<64xi32, #tpu.memory_space<smem>>
    %c0_i32_54 = arith.constant 0 : i32
    %c0_i32_55 = arith.constant 0 : i32
    %98 = tpu.memref_slice %arg2[%97, %c0_i32_55] : memref<16x32xf32, #tpu.memory_space<any>> -> memref<1x32xf32, #tpu.memory_space<any>>
    %c13_i32_56 = arith.constant 13 : i32
    %c0_i32_57 = arith.constant 0 : i32
    %99 = tpu.memref_slice %arg10[%c13_i32_56, %c0_i32_57] : memref<64x32xf32, #tpu.memory_space<vmem>> -> memref<1x32xf32, #tpu.memory_space<vmem>>
    %100 = tpu.memref_slice %arg15[%c0_i32_54] : memref<1x!tpu.dma_semaphore, #tpu.memory_space<semaphore_mem>> -> memref<1x!tpu.dma_semaphore, #tpu.memory_space<semaphore_mem>>
    %101 = tpu.memref_squeeze %100 : memref<1x!tpu.dma_semaphore, #tpu.memory_space<semaphore_mem>> -> memref<!tpu.dma_semaphore, #tpu.memory_space<semaphore_mem>>
    tpu.enqueue_dma source(%98 : memref<1x32xf32, #tpu.memory_space<any>>) target(%99 : memref<1x32xf32, #tpu.memory_space<vmem>>) target_semaphore(%101 : memref<!tpu.dma_semaphore, #tpu.memory_space<semaphore_mem>>)
    %c14_i32 = arith.constant 14 : i32
    %102 = arith.addi %3, %c14_i32 : i32
    %103 = arith.index_cast %102 : i32 to index
    %104 = memref.load %arg1[%103] : memref<64xi32, #tpu.memory_space<smem>>
    %c0_i32_58 = arith.constant 0 : i32
    %c0_i32_59 = arith.constant 0 : i32
    %105 = tpu.memref_slice %arg2[%104, %c0_i32_59] : memref<16x32xf32, #tpu.memory_space<any>> -> memref<1x32xf32, #tpu.memory_space<any>>
    %c14_i32_60 = arith.constant 14 : i32
    %c0_i32_61 = arith.constant 0 : i32
    %106 = tpu.memref_slice %arg10[%c14_i32_60, %c0_i32_61] : memref<64x32xf32, #tpu.memory_space<vmem>> -> memref<1x32xf32, #tpu.memory_space<vmem>>
    %107 = tpu.memref_slice %arg15[%c0_i32_58] : memref<1x!tpu.dma_semaphore, #tpu.memory_space<semaphore_mem>> -> memref<1x!tpu.dma_semaphore, #tpu.memory_space<semaphore_mem>>
    %108 = tpu.memref_squeeze %107 : memref<1x!tpu.dma_semaphore, #tpu.memory_space<semaphore_mem>> -> memref<!tpu.dma_semaphore, #tpu.memory_space<semaphore_mem>>
    tpu.enqueue_dma source(%105 : memref<1x32xf32, #tpu.memory_space<any>>) target(%106 : memref<1x32xf32, #tpu.memory_space<vmem>>) target_semaphore(%108 : memref<!tpu.dma_semaphore, #tpu.memory_space<semaphore_mem>>)
    %c15_i32 = arith.constant 15 : i32
    %109 = arith.addi %3, %c15_i32 : i32
    %110 = arith.index_cast %109 : i32 to index
    %111 = memref.load %arg1[%110] : memref<64xi32, #tpu.memory_space<smem>>
    %c0_i32_62 = arith.constant 0 : i32
    %c0_i32_63 = arith.constant 0 : i32
    %112 = tpu.memref_slice %arg2[%111, %c0_i32_63] : memref<16x32xf32, #tpu.memory_space<any>> -> memref<1x32xf32, #tpu.memory_space<any>>
    %c15_i32_64 = arith.constant 15 : i32
    %c0_i32_65 = arith.constant 0 : i32
    %113 = tpu.memref_slice %arg10[%c15_i32_64, %c0_i32_65] : memref<64x32xf32, #tpu.memory_space<vmem>> -> memref<1x32xf32, #tpu.memory_space<vmem>>
    %114 = tpu.memref_slice %arg15[%c0_i32_62] : memref<1x!tpu.dma_semaphore, #tpu.memory_space<semaphore_mem>> -> memref<1x!tpu.dma_semaphore, #tpu.memory_space<semaphore_mem>>
    %115 = tpu.memref_squeeze %114 : memref<1x!tpu.dma_semaphore, #tpu.memory_space<semaphore_mem>> -> memref<!tpu.dma_semaphore, #tpu.memory_space<semaphore_mem>>
    tpu.enqueue_dma source(%112 : memref<1x32xf32, #tpu.memory_space<any>>) target(%113 : memref<1x32xf32, #tpu.memory_space<vmem>>) target_semaphore(%115 : memref<!tpu.dma_semaphore, #tpu.memory_space<semaphore_mem>>)
    %c16_i32 = arith.constant 16 : i32
    %116 = arith.addi %3, %c16_i32 : i32
    %117 = arith.index_cast %116 : i32 to index
    %118 = memref.load %arg1[%117] : memref<64xi32, #tpu.memory_space<smem>>
    %c0_i32_66 = arith.constant 0 : i32
    %c0_i32_67 = arith.constant 0 : i32
    %119 = tpu.memref_slice %arg2[%118, %c0_i32_67] : memref<16x32xf32, #tpu.memory_space<any>> -> memref<1x32xf32, #tpu.memory_space<any>>
    %c16_i32_68 = arith.constant 16 : i32
    %c0_i32_69 = arith.constant 0 : i32
    %120 = tpu.memref_slice %arg10[%c16_i32_68, %c0_i32_69] : memref<64x32xf32, #tpu.memory_space<vmem>> -> memref<1x32xf32, #tpu.memory_space<vmem>>
    %121 = tpu.memref_slice %arg15[%c0_i32_66] : memref<1x!tpu.dma_semaphore, #tpu.memory_space<semaphore_mem>> -> memref<1x!tpu.dma_semaphore, #tpu.memory_space<semaphore_mem>>
    %122 = tpu.memref_squeeze %121 : memref<1x!tpu.dma_semaphore, #tpu.memory_space<semaphore_mem>> -> memref<!tpu.dma_semaphore, #tpu.memory_space<semaphore_mem>>
    tpu.enqueue_dma source(%119 : memref<1x32xf32, #tpu.memory_space<any>>) target(%120 : memref<1x32xf32, #tpu.memory_space<vmem>>) target_semaphore(%122 : memref<!tpu.dma_semaphore, #tpu.memory_space<semaphore_mem>>)
    %c17_i32 = arith.constant 17 : i32
    %123 = arith.addi %3, %c17_i32 : i32
    %124 = arith.index_cast %123 : i32 to index
    %125 = memref.load %arg1[%124] : memref<64xi32, #tpu.memory_space<smem>>
    %c0_i32_70 = arith.constant 0 : i32
    %c0_i32_71 = arith.constant 0 : i32
    %126 = tpu.memref_slice %arg2[%125, %c0_i32_71] : memref<16x32xf32, #tpu.memory_space<any>> -> memref<1x32xf32, #tpu.memory_space<any>>
    %c17_i32_72 = arith.constant 17 : i32
    %c0_i32_73 = arith.constant 0 : i32
    %127 = tpu.memref_slice %arg10[%c17_i32_72, %c0_i32_73] : memref<64x32xf32, #tpu.memory_space<vmem>> -> memref<1x32xf32, #tpu.memory_space<vmem>>
    %128 = tpu.memref_slice %arg15[%c0_i32_70] : memref<1x!tpu.dma_semaphore, #tpu.memory_space<semaphore_mem>> -> memref<1x!tpu.dma_semaphore, #tpu.memory_space<semaphore_mem>>
    %129 = tpu.memref_squeeze %128 : memref<1x!tpu.dma_semaphore, #tpu.memory_space<semaphore_mem>> -> memref<!tpu.dma_semaphore, #tpu.memory_space<semaphore_mem>>
    tpu.enqueue_dma source(%126 : memref<1x32xf32, #tpu.memory_space<any>>) target(%127 : memref<1x32xf32, #tpu.memory_space<vmem>>) target_semaphore(%129 : memref<!tpu.dma_semaphore, #tpu.memory_space<semaphore_mem>>)
    %c18_i32 = arith.constant 18 : i32
    %130 = arith.addi %3, %c18_i32 : i32
    %131 = arith.index_cast %130 : i32 to index
    %132 = memref.load %arg1[%131] : memref<64xi32, #tpu.memory_space<smem>>
    %c0_i32_74 = arith.constant 0 : i32
    %c0_i32_75 = arith.constant 0 : i32
    %133 = tpu.memref_slice %arg2[%132, %c0_i32_75] : memref<16x32xf32, #tpu.memory_space<any>> -> memref<1x32xf32, #tpu.memory_space<any>>
    %c18_i32_76 = arith.constant 18 : i32
    %c0_i32_77 = arith.constant 0 : i32
    %134 = tpu.memref_slice %arg10[%c18_i32_76, %c0_i32_77] : memref<64x32xf32, #tpu.memory_space<vmem>> -> memref<1x32xf32, #tpu.memory_space<vmem>>
    %135 = tpu.memref_slice %arg15[%c0_i32_74] : memref<1x!tpu.dma_semaphore, #tpu.memory_space<semaphore_mem>> -> memref<1x!tpu.dma_semaphore, #tpu.memory_space<semaphore_mem>>
    %136 = tpu.memref_squeeze %135 : memref<1x!tpu.dma_semaphore, #tpu.memory_space<semaphore_mem>> -> memref<!tpu.dma_semaphore, #tpu.memory_space<semaphore_mem>>
    tpu.enqueue_dma source(%133 : memref<1x32xf32, #tpu.memory_space<any>>) target(%134 : memref<1x32xf32, #tpu.memory_space<vmem>>) target_semaphore(%136 : memref<!tpu.dma_semaphore, #tpu.memory_space<semaphore_mem>>)
    %c19_i32 = arith.constant 19 : i32
    %137 = arith.addi %3, %c19_i32 : i32
    %138 = arith.index_cast %137 : i32 to index
    %139 = memref.load %arg1[%138] : memref<64xi32, #tpu.memory_space<smem>>
    %c0_i32_78 = arith.constant 0 : i32
    %c0_i32_79 = arith.constant 0 : i32
    %140 = tpu.memref_slice %arg2[%139, %c0_i32_79] : memref<16x32xf32, #tpu.memory_space<any>> -> memref<1x32xf32, #tpu.memory_space<any>>
    %c19_i32_80 = arith.constant 19 : i32
    %c0_i32_81 = arith.constant 0 : i32
    %141 = tpu.memref_slice %arg10[%c19_i32_80, %c0_i32_81] : memref<64x32xf32, #tpu.memory_space<vmem>> -> memref<1x32xf32, #tpu.memory_space<vmem>>
    %142 = tpu.memref_slice %arg15[%c0_i32_78] : memref<1x!tpu.dma_semaphore, #tpu.memory_space<semaphore_mem>> -> memref<1x!tpu.dma_semaphore, #tpu.memory_space<semaphore_mem>>
    %143 = tpu.memref_squeeze %142 : memref<1x!tpu.dma_semaphore, #tpu.memory_space<semaphore_mem>> -> memref<!tpu.dma_semaphore, #tpu.memory_space<semaphore_mem>>
    tpu.enqueue_dma source(%140 : memref<1x32xf32, #tpu.memory_space<any>>) target(%141 : memref<1x32xf32, #tpu.memory_space<vmem>>) target_semaphore(%143 : memref<!tpu.dma_semaphore, #tpu.memory_space<semaphore_mem>>)
    %c20_i32 = arith.constant 20 : i32
    %144 = arith.addi %3, %c20_i32 : i32
    %145 = arith.index_cast %144 : i32 to index
    %146 = memref.load %arg1[%145] : memref<64xi32, #tpu.memory_space<smem>>
    %c0_i32_82 = arith.constant 0 : i32
    %c0_i32_83 = arith.constant 0 : i32
    %147 = tpu.memref_slice %arg2[%146, %c0_i32_83] : memref<16x32xf32, #tpu.memory_space<any>> -> memref<1x32xf32, #tpu.memory_space<any>>
    %c20_i32_84 = arith.constant 20 : i32
    %c0_i32_85 = arith.constant 0 : i32
    %148 = tpu.memref_slice %arg10[%c20_i32_84, %c0_i32_85] : memref<64x32xf32, #tpu.memory_space<vmem>> -> memref<1x32xf32, #tpu.memory_space<vmem>>
    %149 = tpu.memref_slice %arg15[%c0_i32_82] : memref<1x!tpu.dma_semaphore, #tpu.memory_space<semaphore_mem>> -> memref<1x!tpu.dma_semaphore, #tpu.memory_space<semaphore_mem>>
    %150 = tpu.memref_squeeze %149 : memref<1x!tpu.dma_semaphore, #tpu.memory_space<semaphore_mem>> -> memref<!tpu.dma_semaphore, #tpu.memory_space<semaphore_mem>>
    tpu.enqueue_dma source(%147 : memref<1x32xf32, #tpu.memory_space<any>>) target(%148 : memref<1x32xf32, #tpu.memory_space<vmem>>) target_semaphore(%150 : memref<!tpu.dma_semaphore, #tpu.memory_space<semaphore_mem>>)
    %c21_i32 = arith.constant 21 : i32
    %151 = arith.addi %3, %c21_i32 : i32
    %152 = arith.index_cast %151 : i32 to index
    %153 = memref.load %arg1[%152] : memref<64xi32, #tpu.memory_space<smem>>
    %c0_i32_86 = arith.constant 0 : i32
    %c0_i32_87 = arith.constant 0 : i32
    %154 = tpu.memref_slice %arg2[%153, %c0_i32_87] : memref<16x32xf32, #tpu.memory_space<any>> -> memref<1x32xf32, #tpu.memory_space<any>>
    %c21_i32_88 = arith.constant 21 : i32
    %c0_i32_89 = arith.constant 0 : i32
    %155 = tpu.memref_slice %arg10[%c21_i32_88, %c0_i32_89] : memref<64x32xf32, #tpu.memory_space<vmem>> -> memref<1x32xf32, #tpu.memory_space<vmem>>
    %156 = tpu.memref_slice %arg15[%c0_i32_86] : memref<1x!tpu.dma_semaphore, #tpu.memory_space<semaphore_mem>> -> memref<1x!tpu.dma_semaphore, #tpu.memory_space<semaphore_mem>>
    %157 = tpu.memref_squeeze %156 : memref<1x!tpu.dma_semaphore, #tpu.memory_space<semaphore_mem>> -> memref<!tpu.dma_semaphore, #tpu.memory_space<semaphore_mem>>
    tpu.enqueue_dma source(%154 : memref<1x32xf32, #tpu.memory_space<any>>) target(%155 : memref<1x32xf32, #tpu.memory_space<vmem>>) target_semaphore(%157 : memref<!tpu.dma_semaphore, #tpu.memory_space<semaphore_mem>>)
    %c22_i32 = arith.constant 22 : i32
    %158 = arith.addi %3, %c22_i32 : i32
    %159 = arith.index_cast %158 : i32 to index
    %160 = memref.load %arg1[%159] : memref<64xi32, #tpu.memory_space<smem>>
    %c0_i32_90 = arith.constant 0 : i32
    %c0_i32_91 = arith.constant 0 : i32
    %161 = tpu.memref_slice %arg2[%160, %c0_i32_91] : memref<16x32xf32, #tpu.memory_space<any>> -> memref<1x32xf32, #tpu.memory_space<any>>
    %c22_i32_92 = arith.constant 22 : i32
    %c0_i32_93 = arith.constant 0 : i32
    %162 = tpu.memref_slice %arg10[%c22_i32_92, %c0_i32_93] : memref<64x32xf32, #tpu.memory_space<vmem>> -> memref<1x32xf32, #tpu.memory_space<vmem>>
    %163 = tpu.memref_slice %arg15[%c0_i32_90] : memref<1x!tpu.dma_semaphore, #tpu.memory_space<semaphore_mem>> -> memref<1x!tpu.dma_semaphore, #tpu.memory_space<semaphore_mem>>
    %164 = tpu.memref_squeeze %163 : memref<1x!tpu.dma_semaphore, #tpu.memory_space<semaphore_mem>> -> memref<!tpu.dma_semaphore, #tpu.memory_space<semaphore_mem>>
    tpu.enqueue_dma source(%161 : memref<1x32xf32, #tpu.memory_space<any>>) target(%162 : memref<1x32xf32, #tpu.memory_space<vmem>>) target_semaphore(%164 : memref<!tpu.dma_semaphore, #tpu.memory_space<semaphore_mem>>)
    %c23_i32 = arith.constant 23 : i32
    %165 = arith.addi %3, %c23_i32 : i32
    %166 = arith.index_cast %165 : i32 to index
    %167 = memref.load %arg1[%166] : memref<64xi32, #tpu.memory_space<smem>>
    %c0_i32_94 = arith.constant 0 : i32
    %c0_i32_95 = arith.constant 0 : i32
    %168 = tpu.memref_slice %arg2[%167, %c0_i32_95] : memref<16x32xf32, #tpu.memory_space<any>> -> memref<1x32xf32, #tpu.memory_space<any>>
    %c23_i32_96 = arith.constant 23 : i32
    %c0_i32_97 = arith.constant 0 : i32
    %169 = tpu.memref_slice %arg10[%c23_i32_96, %c0_i32_97] : memref<64x32xf32, #tpu.memory_space<vmem>> -> memref<1x32xf32, #tpu.memory_space<vmem>>
    %170 = tpu.memref_slice %arg15[%c0_i32_94] : memref<1x!tpu.dma_semaphore, #tpu.memory_space<semaphore_mem>> -> memref<1x!tpu.dma_semaphore, #tpu.memory_space<semaphore_mem>>
    %171 = tpu.memref_squeeze %170 : memref<1x!tpu.dma_semaphore, #tpu.memory_space<semaphore_mem>> -> memref<!tpu.dma_semaphore, #tpu.memory_space<semaphore_mem>>
    tpu.enqueue_dma source(%168 : memref<1x32xf32, #tpu.memory_space<any>>) target(%169 : memref<1x32xf32, #tpu.memory_space<vmem>>) target_semaphore(%171 : memref<!tpu.dma_semaphore, #tpu.memory_space<semaphore_mem>>)
    %c24_i32 = arith.constant 24 : i32
    %172 = arith.addi %3, %c24_i32 : i32
    %173 = arith.index_cast %172 : i32 to index
    %174 = memref.load %arg1[%173] : memref<64xi32, #tpu.memory_space<smem>>
    %c0_i32_98 = arith.constant 0 : i32
    %c0_i32_99 = arith.constant 0 : i32
    %175 = tpu.memref_slice %arg2[%174, %c0_i32_99] : memref<16x32xf32, #tpu.memory_space<any>> -> memref<1x32xf32, #tpu.memory_space<any>>
    %c24_i32_100 = arith.constant 24 : i32
    %c0_i32_101 = arith.constant 0 : i32
    %176 = tpu.memref_slice %arg10[%c24_i32_100, %c0_i32_101] : memref<64x32xf32, #tpu.memory_space<vmem>> -> memref<1x32xf32, #tpu.memory_space<vmem>>
    %177 = tpu.memref_slice %arg15[%c0_i32_98] : memref<1x!tpu.dma_semaphore, #tpu.memory_space<semaphore_mem>> -> memref<1x!tpu.dma_semaphore, #tpu.memory_space<semaphore_mem>>
    %178 = tpu.memref_squeeze %177 : memref<1x!tpu.dma_semaphore, #tpu.memory_space<semaphore_mem>> -> memref<!tpu.dma_semaphore, #tpu.memory_space<semaphore_mem>>
    tpu.enqueue_dma source(%175 : memref<1x32xf32, #tpu.memory_space<any>>) target(%176 : memref<1x32xf32, #tpu.memory_space<vmem>>) target_semaphore(%178 : memref<!tpu.dma_semaphore, #tpu.memory_space<semaphore_mem>>)
    %c25_i32 = arith.constant 25 : i32
    %179 = arith.addi %3, %c25_i32 : i32
    %180 = arith.index_cast %179 : i32 to index
    %181 = memref.load %arg1[%180] : memref<64xi32, #tpu.memory_space<smem>>
    %c0_i32_102 = arith.constant 0 : i32
    %c0_i32_103 = arith.constant 0 : i32
    %182 = tpu.memref_slice %arg2[%181, %c0_i32_103] : memref<16x32xf32, #tpu.memory_space<any>> -> memref<1x32xf32, #tpu.memory_space<any>>
    %c25_i32_104 = arith.constant 25 : i32
    %c0_i32_105 = arith.constant 0 : i32
    %183 = tpu.memref_slice %arg10[%c25_i32_104, %c0_i32_105] : memref<64x32xf32, #tpu.memory_space<vmem>> -> memref<1x32xf32, #tpu.memory_space<vmem>>
    %184 = tpu.memref_slice %arg15[%c0_i32_102] : memref<1x!tpu.dma_semaphore, #tpu.memory_space<semaphore_mem>> -> memref<1x!tpu.dma_semaphore, #tpu.memory_space<semaphore_mem>>
    %185 = tpu.memref_squeeze %184 : memref<1x!tpu.dma_semaphore, #tpu.memory_space<semaphore_mem>> -> memref<!tpu.dma_semaphore, #tpu.memory_space<semaphore_mem>>
    tpu.enqueue_dma source(%182 : memref<1x32xf32, #tpu.memory_space<any>>) target(%183 : memref<1x32xf32, #tpu.memory_space<vmem>>) target_semaphore(%185 : memref<!tpu.dma_semaphore, #tpu.memory_space<semaphore_mem>>)
    %c26_i32 = arith.constant 26 : i32
    %186 = arith.addi %3, %c26_i32 : i32
    %187 = arith.index_cast %186 : i32 to index
    %188 = memref.load %arg1[%187] : memref<64xi32, #tpu.memory_space<smem>>
    %c0_i32_106 = arith.constant 0 : i32
    %c0_i32_107 = arith.constant 0 : i32
    %189 = tpu.memref_slice %arg2[%188, %c0_i32_107] : memref<16x32xf32, #tpu.memory_space<any>> -> memref<1x32xf32, #tpu.memory_space<any>>
    %c26_i32_108 = arith.constant 26 : i32
    %c0_i32_109 = arith.constant 0 : i32
    %190 = tpu.memref_slice %arg10[%c26_i32_108, %c0_i32_109] : memref<64x32xf32, #tpu.memory_space<vmem>> -> memref<1x32xf32, #tpu.memory_space<vmem>>
    %191 = tpu.memref_slice %arg15[%c0_i32_106] : memref<1x!tpu.dma_semaphore, #tpu.memory_space<semaphore_mem>> -> memref<1x!tpu.dma_semaphore, #tpu.memory_space<semaphore_mem>>
    %192 = tpu.memref_squeeze %191 : memref<1x!tpu.dma_semaphore, #tpu.memory_space<semaphore_mem>> -> memref<!tpu.dma_semaphore, #tpu.memory_space<semaphore_mem>>
    tpu.enqueue_dma source(%189 : memref<1x32xf32, #tpu.memory_space<any>>) target(%190 : memref<1x32xf32, #tpu.memory_space<vmem>>) target_semaphore(%192 : memref<!tpu.dma_semaphore, #tpu.memory_space<semaphore_mem>>)
    %c27_i32 = arith.constant 27 : i32
    %193 = arith.addi %3, %c27_i32 : i32
    %194 = arith.index_cast %193 : i32 to index
    %195 = memref.load %arg1[%194] : memref<64xi32, #tpu.memory_space<smem>>
    %c0_i32_110 = arith.constant 0 : i32
    %c0_i32_111 = arith.constant 0 : i32
    %196 = tpu.memref_slice %arg2[%195, %c0_i32_111] : memref<16x32xf32, #tpu.memory_space<any>> -> memref<1x32xf32, #tpu.memory_space<any>>
    %c27_i32_112 = arith.constant 27 : i32
    %c0_i32_113 = arith.constant 0 : i32
    %197 = tpu.memref_slice %arg10[%c27_i32_112, %c0_i32_113] : memref<64x32xf32, #tpu.memory_space<vmem>> -> memref<1x32xf32, #tpu.memory_space<vmem>>
    %198 = tpu.memref_slice %arg15[%c0_i32_110] : memref<1x!tpu.dma_semaphore, #tpu.memory_space<semaphore_mem>> -> memref<1x!tpu.dma_semaphore, #tpu.memory_space<semaphore_mem>>
    %199 = tpu.memref_squeeze %198 : memref<1x!tpu.dma_semaphore, #tpu.memory_space<semaphore_mem>> -> memref<!tpu.dma_semaphore, #tpu.memory_space<semaphore_mem>>
    tpu.enqueue_dma source(%196 : memref<1x32xf32, #tpu.memory_space<any>>) target(%197 : memref<1x32xf32, #tpu.memory_space<vmem>>) target_semaphore(%199 : memref<!tpu.dma_semaphore, #tpu.memory_space<semaphore_mem>>)
    %c28_i32 = arith.constant 28 : i32
    %200 = arith.addi %3, %c28_i32 : i32
    %201 = arith.index_cast %200 : i32 to index
    %202 = memref.load %arg1[%201] : memref<64xi32, #tpu.memory_space<smem>>
    %c0_i32_114 = arith.constant 0 : i32
    %c0_i32_115 = arith.constant 0 : i32
    %203 = tpu.memref_slice %arg2[%202, %c0_i32_115] : memref<16x32xf32, #tpu.memory_space<any>> -> memref<1x32xf32, #tpu.memory_space<any>>
    %c28_i32_116 = arith.constant 28 : i32
    %c0_i32_117 = arith.constant 0 : i32
    %204 = tpu.memref_slice %arg10[%c28_i32_116, %c0_i32_117] : memref<64x32xf32, #tpu.memory_space<vmem>> -> memref<1x32xf32, #tpu.memory_space<vmem>>
    %205 = tpu.memref_slice %arg15[%c0_i32_114] : memref<1x!tpu.dma_semaphore, #tpu.memory_space<semaphore_mem>> -> memref<1x!tpu.dma_semaphore, #tpu.memory_space<semaphore_mem>>
    %206 = tpu.memref_squeeze %205 : memref<1x!tpu.dma_semaphore, #tpu.memory_space<semaphore_mem>> -> memref<!tpu.dma_semaphore, #tpu.memory_space<semaphore_mem>>
    tpu.enqueue_dma source(%203 : memref<1x32xf32, #tpu.memory_space<any>>) target(%204 : memref<1x32xf32, #tpu.memory_space<vmem>>) target_semaphore(%206 : memref<!tpu.dma_semaphore, #tpu.memory_space<semaphore_mem>>)
    %c29_i32 = arith.constant 29 : i32
    %207 = arith.addi %3, %c29_i32 : i32
    %208 = arith.index_cast %207 : i32 to index
    %209 = memref.load %arg1[%208] : memref<64xi32, #tpu.memory_space<smem>>
    %c0_i32_118 = arith.constant 0 : i32
    %c0_i32_119 = arith.constant 0 : i32
    %210 = tpu.memref_slice %arg2[%209, %c0_i32_119] : memref<16x32xf32, #tpu.memory_space<any>> -> memref<1x32xf32, #tpu.memory_space<any>>
    %c29_i32_120 = arith.constant 29 : i32
    %c0_i32_121 = arith.constant 0 : i32
    %211 = tpu.memref_slice %arg10[%c29_i32_120, %c0_i32_121] : memref<64x32xf32, #tpu.memory_space<vmem>> -> memref<1x32xf32, #tpu.memory_space<vmem>>
    %212 = tpu.memref_slice %arg15[%c0_i32_118] : memref<1x!tpu.dma_semaphore, #tpu.memory_space<semaphore_mem>> -> memref<1x!tpu.dma_semaphore, #tpu.memory_space<semaphore_mem>>
    %213 = tpu.memref_squeeze %212 : memref<1x!tpu.dma_semaphore, #tpu.memory_space<semaphore_mem>> -> memref<!tpu.dma_semaphore, #tpu.memory_space<semaphore_mem>>
    tpu.enqueue_dma source(%210 : memref<1x32xf32, #tpu.memory_space<any>>) target(%211 : memref<1x32xf32, #tpu.memory_space<vmem>>) target_semaphore(%213 : memref<!tpu.dma_semaphore, #tpu.memory_space<semaphore_mem>>)
    %c30_i32 = arith.constant 30 : i32
    %214 = arith.addi %3, %c30_i32 : i32
    %215 = arith.index_cast %214 : i32 to index
    %216 = memref.load %arg1[%215] : memref<64xi32, #tpu.memory_space<smem>>
    %c0_i32_122 = arith.constant 0 : i32
    %c0_i32_123 = arith.constant 0 : i32
    %217 = tpu.memref_slice %arg2[%216, %c0_i32_123] : memref<16x32xf32, #tpu.memory_space<any>> -> memref<1x32xf32, #tpu.memory_space<any>>
    %c30_i32_124 = arith.constant 30 : i32
    %c0_i32_125 = arith.constant 0 : i32
    %218 = tpu.memref_slice %arg10[%c30_i32_124, %c0_i32_125] : memref<64x32xf32, #tpu.memory_space<vmem>> -> memref<1x32xf32, #tpu.memory_space<vmem>>
    %219 = tpu.memref_slice %arg15[%c0_i32_122] : memref<1x!tpu.dma_semaphore, #tpu.memory_space<semaphore_mem>> -> memref<1x!tpu.dma_semaphore, #tpu.memory_space<semaphore_mem>>
    %220 = tpu.memref_squeeze %219 : memref<1x!tpu.dma_semaphore, #tpu.memory_space<semaphore_mem>> -> memref<!tpu.dma_semaphore, #tpu.memory_space<semaphore_mem>>
    tpu.enqueue_dma source(%217 : memref<1x32xf32, #tpu.memory_space<any>>) target(%218 : memref<1x32xf32, #tpu.memory_space<vmem>>) target_semaphore(%220 : memref<!tpu.dma_semaphore, #tpu.memory_space<semaphore_mem>>)
    %c31_i32 = arith.constant 31 : i32
    %221 = arith.addi %3, %c31_i32 : i32
    %222 = arith.index_cast %221 : i32 to index
    %223 = memref.load %arg1[%222] : memref<64xi32, #tpu.memory_space<smem>>
    %c0_i32_126 = arith.constant 0 : i32
    %c0_i32_127 = arith.constant 0 : i32
    %224 = tpu.memref_slice %arg2[%223, %c0_i32_127] : memref<16x32xf32, #tpu.memory_space<any>> -> memref<1x32xf32, #tpu.memory_space<any>>
    %c31_i32_128 = arith.constant 31 : i32
    %c0_i32_129 = arith.constant 0 : i32
    %225 = tpu.memref_slice %arg10[%c31_i32_128, %c0_i32_129] : memref<64x32xf32, #tpu.memory_space<vmem>> -> memref<1x32xf32, #tpu.memory_space<vmem>>
    %226 = tpu.memref_slice %arg15[%c0_i32_126] : memref<1x!tpu.dma_semaphore, #tpu.memory_space<semaphore_mem>> -> memref<1x!tpu.dma_semaphore, #tpu.memory_space<semaphore_mem>>
    %227 = tpu.memref_squeeze %226 : memref<1x!tpu.dma_semaphore, #tpu.memory_space<semaphore_mem>> -> memref<!tpu.dma_semaphore, #tpu.memory_space<semaphore_mem>>
    tpu.enqueue_dma source(%224 : memref<1x32xf32, #tpu.memory_space<any>>) target(%225 : memref<1x32xf32, #tpu.memory_space<vmem>>) target_semaphore(%227 : memref<!tpu.dma_semaphore, #tpu.memory_space<semaphore_mem>>)
    %c32_i32 = arith.constant 32 : i32
    %228 = arith.addi %3, %c32_i32 : i32
    %229 = arith.index_cast %228 : i32 to index
    %230 = memref.load %arg1[%229] : memref<64xi32, #tpu.memory_space<smem>>
    %c0_i32_130 = arith.constant 0 : i32
    %c0_i32_131 = arith.constant 0 : i32
    %231 = tpu.memref_slice %arg2[%230, %c0_i32_131] : memref<16x32xf32, #tpu.memory_space<any>> -> memref<1x32xf32, #tpu.memory_space<any>>
    %c32_i32_132 = arith.constant 32 : i32
    %c0_i32_133 = arith.constant 0 : i32
    %232 = tpu.memref_slice %arg10[%c32_i32_132, %c0_i32_133] : memref<64x32xf32, #tpu.memory_space<vmem>> -> memref<1x32xf32, #tpu.memory_space<vmem>>
    %233 = tpu.memref_slice %arg15[%c0_i32_130] : memref<1x!tpu.dma_semaphore, #tpu.memory_space<semaphore_mem>> -> memref<1x!tpu.dma_semaphore, #tpu.memory_space<semaphore_mem>>
    %234 = tpu.memref_squeeze %233 : memref<1x!tpu.dma_semaphore, #tpu.memory_space<semaphore_mem>> -> memref<!tpu.dma_semaphore, #tpu.memory_space<semaphore_mem>>
    tpu.enqueue_dma source(%231 : memref<1x32xf32, #tpu.memory_space<any>>) target(%232 : memref<1x32xf32, #tpu.memory_space<vmem>>) target_semaphore(%234 : memref<!tpu.dma_semaphore, #tpu.memory_space<semaphore_mem>>)
    %c33_i32 = arith.constant 33 : i32
    %235 = arith.addi %3, %c33_i32 : i32
    %236 = arith.index_cast %235 : i32 to index
    %237 = memref.load %arg1[%236] : memref<64xi32, #tpu.memory_space<smem>>
    %c0_i32_134 = arith.constant 0 : i32
    %c0_i32_135 = arith.constant 0 : i32
    %238 = tpu.memref_slice %arg2[%237, %c0_i32_135] : memref<16x32xf32, #tpu.memory_space<any>> -> memref<1x32xf32, #tpu.memory_space<any>>
    %c33_i32_136 = arith.constant 33 : i32
    %c0_i32_137 = arith.constant 0 : i32
    %239 = tpu.memref_slice %arg10[%c33_i32_136, %c0_i32_137] : memref<64x32xf32, #tpu.memory_space<vmem>> -> memref<1x32xf32, #tpu.memory_space<vmem>>
    %240 = tpu.memref_slice %arg15[%c0_i32_134] : memref<1x!tpu.dma_semaphore, #tpu.memory_space<semaphore_mem>> -> memref<1x!tpu.dma_semaphore, #tpu.memory_space<semaphore_mem>>
    %241 = tpu.memref_squeeze %240 : memref<1x!tpu.dma_semaphore, #tpu.memory_space<semaphore_mem>> -> memref<!tpu.dma_semaphore, #tpu.memory_space<semaphore_mem>>
    tpu.enqueue_dma source(%238 : memref<1x32xf32, #tpu.memory_space<any>>) target(%239 : memref<1x32xf32, #tpu.memory_space<vmem>>) target_semaphore(%241 : memref<!tpu.dma_semaphore, #tpu.memory_space<semaphore_mem>>)
    %c34_i32 = arith.constant 34 : i32
    %242 = arith.addi %3, %c34_i32 : i32
    %243 = arith.index_cast %242 : i32 to index
    %244 = memref.load %arg1[%243] : memref<64xi32, #tpu.memory_space<smem>>
    %c0_i32_138 = arith.constant 0 : i32
    %c0_i32_139 = arith.constant 0 : i32
    %245 = tpu.memref_slice %arg2[%244, %c0_i32_139] : memref<16x32xf32, #tpu.memory_space<any>> -> memref<1x32xf32, #tpu.memory_space<any>>
    %c34_i32_140 = arith.constant 34 : i32
    %c0_i32_141 = arith.constant 0 : i32
    %246 = tpu.memref_slice %arg10[%c34_i32_140, %c0_i32_141] : memref<64x32xf32, #tpu.memory_space<vmem>> -> memref<1x32xf32, #tpu.memory_space<vmem>>
    %247 = tpu.memref_slice %arg15[%c0_i32_138] : memref<1x!tpu.dma_semaphore, #tpu.memory_space<semaphore_mem>> -> memref<1x!tpu.dma_semaphore, #tpu.memory_space<semaphore_mem>>
    %248 = tpu.memref_squeeze %247 : memref<1x!tpu.dma_semaphore, #tpu.memory_space<semaphore_mem>> -> memref<!tpu.dma_semaphore, #tpu.memory_space<semaphore_mem>>
    tpu.enqueue_dma source(%245 : memref<1x32xf32, #tpu.memory_space<any>>) target(%246 : memref<1x32xf32, #tpu.memory_space<vmem>>) target_semaphore(%248 : memref<!tpu.dma_semaphore, #tpu.memory_space<semaphore_mem>>)
    %c35_i32 = arith.constant 35 : i32
    %249 = arith.addi %3, %c35_i32 : i32
    %250 = arith.index_cast %249 : i32 to index
    %251 = memref.load %arg1[%250] : memref<64xi32, #tpu.memory_space<smem>>
    %c0_i32_142 = arith.constant 0 : i32
    %c0_i32_143 = arith.constant 0 : i32
    %252 = tpu.memref_slice %arg2[%251, %c0_i32_143] : memref<16x32xf32, #tpu.memory_space<any>> -> memref<1x32xf32, #tpu.memory_space<any>>
    %c35_i32_144 = arith.constant 35 : i32
    %c0_i32_145 = arith.constant 0 : i32
    %253 = tpu.memref_slice %arg10[%c35_i32_144, %c0_i32_145] : memref<64x32xf32, #tpu.memory_space<vmem>> -> memref<1x32xf32, #tpu.memory_space<vmem>>
    %254 = tpu.memref_slice %arg15[%c0_i32_142] : memref<1x!tpu.dma_semaphore, #tpu.memory_space<semaphore_mem>> -> memref<1x!tpu.dma_semaphore, #tpu.memory_space<semaphore_mem>>
    %255 = tpu.memref_squeeze %254 : memref<1x!tpu.dma_semaphore, #tpu.memory_space<semaphore_mem>> -> memref<!tpu.dma_semaphore, #tpu.memory_space<semaphore_mem>>
    tpu.enqueue_dma source(%252 : memref<1x32xf32, #tpu.memory_space<any>>) target(%253 : memref<1x32xf32, #tpu.memory_space<vmem>>) target_semaphore(%255 : memref<!tpu.dma_semaphore, #tpu.memory_space<semaphore_mem>>)
    %c36_i32 = arith.constant 36 : i32
    %256 = arith.addi %3, %c36_i32 : i32
    %257 = arith.index_cast %256 : i32 to index
    %258 = memref.load %arg1[%257] : memref<64xi32, #tpu.memory_space<smem>>
    %c0_i32_146 = arith.constant 0 : i32
    %c0_i32_147 = arith.constant 0 : i32
    %259 = tpu.memref_slice %arg2[%258, %c0_i32_147] : memref<16x32xf32, #tpu.memory_space<any>> -> memref<1x32xf32, #tpu.memory_space<any>>
    %c36_i32_148 = arith.constant 36 : i32
    %c0_i32_149 = arith.constant 0 : i32
    %260 = tpu.memref_slice %arg10[%c36_i32_148, %c0_i32_149] : memref<64x32xf32, #tpu.memory_space<vmem>> -> memref<1x32xf32, #tpu.memory_space<vmem>>
    %261 = tpu.memref_slice %arg15[%c0_i32_146] : memref<1x!tpu.dma_semaphore, #tpu.memory_space<semaphore_mem>> -> memref<1x!tpu.dma_semaphore, #tpu.memory_space<semaphore_mem>>
    %262 = tpu.memref_squeeze %261 : memref<1x!tpu.dma_semaphore, #tpu.memory_space<semaphore_mem>> -> memref<!tpu.dma_semaphore, #tpu.memory_space<semaphore_mem>>
    tpu.enqueue_dma source(%259 : memref<1x32xf32, #tpu.memory_space<any>>) target(%260 : memref<1x32xf32, #tpu.memory_space<vmem>>) target_semaphore(%262 : memref<!tpu.dma_semaphore, #tpu.memory_space<semaphore_mem>>)
    %c37_i32 = arith.constant 37 : i32
    %263 = arith.addi %3, %c37_i32 : i32
    %264 = arith.index_cast %263 : i32 to index
    %265 = memref.load %arg1[%264] : memref<64xi32, #tpu.memory_space<smem>>
    %c0_i32_150 = arith.constant 0 : i32
    %c0_i32_151 = arith.constant 0 : i32
    %266 = tpu.memref_slice %arg2[%265, %c0_i32_151] : memref<16x32xf32, #tpu.memory_space<any>> -> memref<1x32xf32, #tpu.memory_space<any>>
    %c37_i32_152 = arith.constant 37 : i32
    %c0_i32_153 = arith.constant 0 : i32
    %267 = tpu.memref_slice %arg10[%c37_i32_152, %c0_i32_153] : memref<64x32xf32, #tpu.memory_space<vmem>> -> memref<1x32xf32, #tpu.memory_space<vmem>>
    %268 = tpu.memref_slice %arg15[%c0_i32_150] : memref<1x!tpu.dma_semaphore, #tpu.memory_space<semaphore_mem>> -> memref<1x!tpu.dma_semaphore, #tpu.memory_space<semaphore_mem>>
    %269 = tpu.memref_squeeze %268 : memref<1x!tpu.dma_semaphore, #tpu.memory_space<semaphore_mem>> -> memref<!tpu.dma_semaphore, #tpu.memory_space<semaphore_mem>>
    tpu.enqueue_dma source(%266 : memref<1x32xf32, #tpu.memory_space<any>>) target(%267 : memref<1x32xf32, #tpu.memory_space<vmem>>) target_semaphore(%269 : memref<!tpu.dma_semaphore, #tpu.memory_space<semaphore_mem>>)
    %c38_i32 = arith.constant 38 : i32
    %270 = arith.addi %3, %c38_i32 : i32
    %271 = arith.index_cast %270 : i32 to index
    %272 = memref.load %arg1[%271] : memref<64xi32, #tpu.memory_space<smem>>
    %c0_i32_154 = arith.constant 0 : i32
    %c0_i32_155 = arith.constant 0 : i32
    %273 = tpu.memref_slice %arg2[%272, %c0_i32_155] : memref<16x32xf32, #tpu.memory_space<any>> -> memref<1x32xf32, #tpu.memory_space<any>>
    %c38_i32_156 = arith.constant 38 : i32
    %c0_i32_157 = arith.constant 0 : i32
    %274 = tpu.memref_slice %arg10[%c38_i32_156, %c0_i32_157] : memref<64x32xf32, #tpu.memory_space<vmem>> -> memref<1x32xf32, #tpu.memory_space<vmem>>
    %275 = tpu.memref_slice %arg15[%c0_i32_154] : memref<1x!tpu.dma_semaphore, #tpu.memory_space<semaphore_mem>> -> memref<1x!tpu.dma_semaphore, #tpu.memory_space<semaphore_mem>>
    %276 = tpu.memref_squeeze %275 : memref<1x!tpu.dma_semaphore, #tpu.memory_space<semaphore_mem>> -> memref<!tpu.dma_semaphore, #tpu.memory_space<semaphore_mem>>
    tpu.enqueue_dma source(%273 : memref<1x32xf32, #tpu.memory_space<any>>) target(%274 : memref<1x32xf32, #tpu.memory_space<vmem>>) target_semaphore(%276 : memref<!tpu.dma_semaphore, #tpu.memory_space<semaphore_mem>>)
    %c39_i32 = arith.constant 39 : i32
    %277 = arith.addi %3, %c39_i32 : i32
    %278 = arith.index_cast %277 : i32 to index
    %279 = memref.load %arg1[%278] : memref<64xi32, #tpu.memory_space<smem>>
    %c0_i32_158 = arith.constant 0 : i32
    %c0_i32_159 = arith.constant 0 : i32
    %280 = tpu.memref_slice %arg2[%279, %c0_i32_159] : memref<16x32xf32, #tpu.memory_space<any>> -> memref<1x32xf32, #tpu.memory_space<any>>
    %c39_i32_160 = arith.constant 39 : i32
    %c0_i32_161 = arith.constant 0 : i32
    %281 = tpu.memref_slice %arg10[%c39_i32_160, %c0_i32_161] : memref<64x32xf32, #tpu.memory_space<vmem>> -> memref<1x32xf32, #tpu.memory_space<vmem>>
    %282 = tpu.memref_slice %arg15[%c0_i32_158] : memref<1x!tpu.dma_semaphore, #tpu.memory_space<semaphore_mem>> -> memref<1x!tpu.dma_semaphore, #tpu.memory_space<semaphore_mem>>
    %283 = tpu.memref_squeeze %282 : memref<1x!tpu.dma_semaphore, #tpu.memory_space<semaphore_mem>> -> memref<!tpu.dma_semaphore, #tpu.memory_space<semaphore_mem>>
    tpu.enqueue_dma source(%280 : memref<1x32xf32, #tpu.memory_space<any>>) target(%281 : memref<1x32xf32, #tpu.memory_space<vmem>>) target_semaphore(%283 : memref<!tpu.dma_semaphore, #tpu.memory_space<semaphore_mem>>)
    %c40_i32 = arith.constant 40 : i32
    %284 = arith.addi %3, %c40_i32 : i32
    %285 = arith.index_cast %284 : i32 to index
    %286 = memref.load %arg1[%285] : memref<64xi32, #tpu.memory_space<smem>>
    %c0_i32_162 = arith.constant 0 : i32
    %c0_i32_163 = arith.constant 0 : i32
    %287 = tpu.memref_slice %arg2[%286, %c0_i32_163] : memref<16x32xf32, #tpu.memory_space<any>> -> memref<1x32xf32, #tpu.memory_space<any>>
    %c40_i32_164 = arith.constant 40 : i32
    %c0_i32_165 = arith.constant 0 : i32
    %288 = tpu.memref_slice %arg10[%c40_i32_164, %c0_i32_165] : memref<64x32xf32, #tpu.memory_space<vmem>> -> memref<1x32xf32, #tpu.memory_space<vmem>>
    %289 = tpu.memref_slice %arg15[%c0_i32_162] : memref<1x!tpu.dma_semaphore, #tpu.memory_space<semaphore_mem>> -> memref<1x!tpu.dma_semaphore, #tpu.memory_space<semaphore_mem>>
    %290 = tpu.memref_squeeze %289 : memref<1x!tpu.dma_semaphore, #tpu.memory_space<semaphore_mem>> -> memref<!tpu.dma_semaphore, #tpu.memory_space<semaphore_mem>>
    tpu.enqueue_dma source(%287 : memref<1x32xf32, #tpu.memory_space<any>>) target(%288 : memref<1x32xf32, #tpu.memory_space<vmem>>) target_semaphore(%290 : memref<!tpu.dma_semaphore, #tpu.memory_space<semaphore_mem>>)
    %c41_i32 = arith.constant 41 : i32
    %291 = arith.addi %3, %c41_i32 : i32
    %292 = arith.index_cast %291 : i32 to index
    %293 = memref.load %arg1[%292] : memref<64xi32, #tpu.memory_space<smem>>
    %c0_i32_166 = arith.constant 0 : i32
    %c0_i32_167 = arith.constant 0 : i32
    %294 = tpu.memref_slice %arg2[%293, %c0_i32_167] : memref<16x32xf32, #tpu.memory_space<any>> -> memref<1x32xf32, #tpu.memory_space<any>>
    %c41_i32_168 = arith.constant 41 : i32
    %c0_i32_169 = arith.constant 0 : i32
    %295 = tpu.memref_slice %arg10[%c41_i32_168, %c0_i32_169] : memref<64x32xf32, #tpu.memory_space<vmem>> -> memref<1x32xf32, #tpu.memory_space<vmem>>
    %296 = tpu.memref_slice %arg15[%c0_i32_166] : memref<1x!tpu.dma_semaphore, #tpu.memory_space<semaphore_mem>> -> memref<1x!tpu.dma_semaphore, #tpu.memory_space<semaphore_mem>>
    %297 = tpu.memref_squeeze %296 : memref<1x!tpu.dma_semaphore, #tpu.memory_space<semaphore_mem>> -> memref<!tpu.dma_semaphore, #tpu.memory_space<semaphore_mem>>
    tpu.enqueue_dma source(%294 : memref<1x32xf32, #tpu.memory_space<any>>) target(%295 : memref<1x32xf32, #tpu.memory_space<vmem>>) target_semaphore(%297 : memref<!tpu.dma_semaphore, #tpu.memory_space<semaphore_mem>>)
    %c42_i32 = arith.constant 42 : i32
    %298 = arith.addi %3, %c42_i32 : i32
    %299 = arith.index_cast %298 : i32 to index
    %300 = memref.load %arg1[%299] : memref<64xi32, #tpu.memory_space<smem>>
    %c0_i32_170 = arith.constant 0 : i32
    %c0_i32_171 = arith.constant 0 : i32
    %301 = tpu.memref_slice %arg2[%300, %c0_i32_171] : memref<16x32xf32, #tpu.memory_space<any>> -> memref<1x32xf32, #tpu.memory_space<any>>
    %c42_i32_172 = arith.constant 42 : i32
    %c0_i32_173 = arith.constant 0 : i32
    %302 = tpu.memref_slice %arg10[%c42_i32_172, %c0_i32_173] : memref<64x32xf32, #tpu.memory_space<vmem>> -> memref<1x32xf32, #tpu.memory_space<vmem>>
    %303 = tpu.memref_slice %arg15[%c0_i32_170] : memref<1x!tpu.dma_semaphore, #tpu.memory_space<semaphore_mem>> -> memref<1x!tpu.dma_semaphore, #tpu.memory_space<semaphore_mem>>
    %304 = tpu.memref_squeeze %303 : memref<1x!tpu.dma_semaphore, #tpu.memory_space<semaphore_mem>> -> memref<!tpu.dma_semaphore, #tpu.memory_space<semaphore_mem>>
    tpu.enqueue_dma source(%301 : memref<1x32xf32, #tpu.memory_space<any>>) target(%302 : memref<1x32xf32, #tpu.memory_space<vmem>>) target_semaphore(%304 : memref<!tpu.dma_semaphore, #tpu.memory_space<semaphore_mem>>)
    %c43_i32 = arith.constant 43 : i32
    %305 = arith.addi %3, %c43_i32 : i32
    %306 = arith.index_cast %305 : i32 to index
    %307 = memref.load %arg1[%306] : memref<64xi32, #tpu.memory_space<smem>>
    %c0_i32_174 = arith.constant 0 : i32
    %c0_i32_175 = arith.constant 0 : i32
    %308 = tpu.memref_slice %arg2[%307, %c0_i32_175] : memref<16x32xf32, #tpu.memory_space<any>> -> memref<1x32xf32, #tpu.memory_space<any>>
    %c43_i32_176 = arith.constant 43 : i32
    %c0_i32_177 = arith.constant 0 : i32
    %309 = tpu.memref_slice %arg10[%c43_i32_176, %c0_i32_177] : memref<64x32xf32, #tpu.memory_space<vmem>> -> memref<1x32xf32, #tpu.memory_space<vmem>>
    %310 = tpu.memref_slice %arg15[%c0_i32_174] : memref<1x!tpu.dma_semaphore, #tpu.memory_space<semaphore_mem>> -> memref<1x!tpu.dma_semaphore, #tpu.memory_space<semaphore_mem>>
    %311 = tpu.memref_squeeze %310 : memref<1x!tpu.dma_semaphore, #tpu.memory_space<semaphore_mem>> -> memref<!tpu.dma_semaphore, #tpu.memory_space<semaphore_mem>>
    tpu.enqueue_dma source(%308 : memref<1x32xf32, #tpu.memory_space<any>>) target(%309 : memref<1x32xf32, #tpu.memory_space<vmem>>) target_semaphore(%311 : memref<!tpu.dma_semaphore, #tpu.memory_space<semaphore_mem>>)
    %c44_i32 = arith.constant 44 : i32
    %312 = arith.addi %3, %c44_i32 : i32
    %313 = arith.index_cast %312 : i32 to index
    %314 = memref.load %arg1[%313] : memref<64xi32, #tpu.memory_space<smem>>
    %c0_i32_178 = arith.constant 0 : i32
    %c0_i32_179 = arith.constant 0 : i32
    %315 = tpu.memref_slice %arg2[%314, %c0_i32_179] : memref<16x32xf32, #tpu.memory_space<any>> -> memref<1x32xf32, #tpu.memory_space<any>>
    %c44_i32_180 = arith.constant 44 : i32
    %c0_i32_181 = arith.constant 0 : i32
    %316 = tpu.memref_slice %arg10[%c44_i32_180, %c0_i32_181] : memref<64x32xf32, #tpu.memory_space<vmem>> -> memref<1x32xf32, #tpu.memory_space<vmem>>
    %317 = tpu.memref_slice %arg15[%c0_i32_178] : memref<1x!tpu.dma_semaphore, #tpu.memory_space<semaphore_mem>> -> memref<1x!tpu.dma_semaphore, #tpu.memory_space<semaphore_mem>>
    %318 = tpu.memref_squeeze %317 : memref<1x!tpu.dma_semaphore, #tpu.memory_space<semaphore_mem>> -> memref<!tpu.dma_semaphore, #tpu.memory_space<semaphore_mem>>
    tpu.enqueue_dma source(%315 : memref<1x32xf32, #tpu.memory_space<any>>) target(%316 : memref<1x32xf32, #tpu.memory_space<vmem>>) target_semaphore(%318 : memref<!tpu.dma_semaphore, #tpu.memory_space<semaphore_mem>>)
    %c45_i32 = arith.constant 45 : i32
    %319 = arith.addi %3, %c45_i32 : i32
    %320 = arith.index_cast %319 : i32 to index
    %321 = memref.load %arg1[%320] : memref<64xi32, #tpu.memory_space<smem>>
    %c0_i32_182 = arith.constant 0 : i32
    %c0_i32_183 = arith.constant 0 : i32
    %322 = tpu.memref_slice %arg2[%321, %c0_i32_183] : memref<16x32xf32, #tpu.memory_space<any>> -> memref<1x32xf32, #tpu.memory_space<any>>
    %c45_i32_184 = arith.constant 45 : i32
    %c0_i32_185 = arith.constant 0 : i32
    %323 = tpu.memref_slice %arg10[%c45_i32_184, %c0_i32_185] : memref<64x32xf32, #tpu.memory_space<vmem>> -> memref<1x32xf32, #tpu.memory_space<vmem>>
    %324 = tpu.memref_slice %arg15[%c0_i32_182] : memref<1x!tpu.dma_semaphore, #tpu.memory_space<semaphore_mem>> -> memref<1x!tpu.dma_semaphore, #tpu.memory_space<semaphore_mem>>
    %325 = tpu.memref_squeeze %324 : memref<1x!tpu.dma_semaphore, #tpu.memory_space<semaphore_mem>> -> memref<!tpu.dma_semaphore, #tpu.memory_space<semaphore_mem>>
    tpu.enqueue_dma source(%322 : memref<1x32xf32, #tpu.memory_space<any>>) target(%323 : memref<1x32xf32, #tpu.memory_space<vmem>>) target_semaphore(%325 : memref<!tpu.dma_semaphore, #tpu.memory_space<semaphore_mem>>)
    %c46_i32 = arith.constant 46 : i32
    %326 = arith.addi %3, %c46_i32 : i32
    %327 = arith.index_cast %326 : i32 to index
    %328 = memref.load %arg1[%327] : memref<64xi32, #tpu.memory_space<smem>>
    %c0_i32_186 = arith.constant 0 : i32
    %c0_i32_187 = arith.constant 0 : i32
    %329 = tpu.memref_slice %arg2[%328, %c0_i32_187] : memref<16x32xf32, #tpu.memory_space<any>> -> memref<1x32xf32, #tpu.memory_space<any>>
    %c46_i32_188 = arith.constant 46 : i32
    %c0_i32_189 = arith.constant 0 : i32
    %330 = tpu.memref_slice %arg10[%c46_i32_188, %c0_i32_189] : memref<64x32xf32, #tpu.memory_space<vmem>> -> memref<1x32xf32, #tpu.memory_space<vmem>>
    %331 = tpu.memref_slice %arg15[%c0_i32_186] : memref<1x!tpu.dma_semaphore, #tpu.memory_space<semaphore_mem>> -> memref<1x!tpu.dma_semaphore, #tpu.memory_space<semaphore_mem>>
    %332 = tpu.memref_squeeze %331 : memref<1x!tpu.dma_semaphore, #tpu.memory_space<semaphore_mem>> -> memref<!tpu.dma_semaphore, #tpu.memory_space<semaphore_mem>>
    tpu.enqueue_dma source(%329 : memref<1x32xf32, #tpu.memory_space<any>>) target(%330 : memref<1x32xf32, #tpu.memory_space<vmem>>) target_semaphore(%332 : memref<!tpu.dma_semaphore, #tpu.memory_space<semaphore_mem>>)
    %c47_i32 = arith.constant 47 : i32
    %333 = arith.addi %3, %c47_i32 : i32
    %334 = arith.index_cast %333 : i32 to index
    %335 = memref.load %arg1[%334] : memref<64xi32, #tpu.memory_space<smem>>
    %c0_i32_190 = arith.constant 0 : i32
    %c0_i32_191 = arith.constant 0 : i32
    %336 = tpu.memref_slice %arg2[%335, %c0_i32_191] : memref<16x32xf32, #tpu.memory_space<any>> -> memref<1x32xf32, #tpu.memory_space<any>>
    %c47_i32_192 = arith.constant 47 : i32
    %c0_i32_193 = arith.constant 0 : i32
    %337 = tpu.memref_slice %arg10[%c47_i32_192, %c0_i32_193] : memref<64x32xf32, #tpu.memory_space<vmem>> -> memref<1x32xf32, #tpu.memory_space<vmem>>
    %338 = tpu.memref_slice %arg15[%c0_i32_190] : memref<1x!tpu.dma_semaphore, #tpu.memory_space<semaphore_mem>> -> memref<1x!tpu.dma_semaphore, #tpu.memory_space<semaphore_mem>>
    %339 = tpu.memref_squeeze %338 : memref<1x!tpu.dma_semaphore, #tpu.memory_space<semaphore_mem>> -> memref<!tpu.dma_semaphore, #tpu.memory_space<semaphore_mem>>
    tpu.enqueue_dma source(%336 : memref<1x32xf32, #tpu.memory_space<any>>) target(%337 : memref<1x32xf32, #tpu.memory_space<vmem>>) target_semaphore(%339 : memref<!tpu.dma_semaphore, #tpu.memory_space<semaphore_mem>>)
    %c48_i32 = arith.constant 48 : i32
    %340 = arith.addi %3, %c48_i32 : i32
    %341 = arith.index_cast %340 : i32 to index
    %342 = memref.load %arg1[%341] : memref<64xi32, #tpu.memory_space<smem>>
    %c0_i32_194 = arith.constant 0 : i32
    %c0_i32_195 = arith.constant 0 : i32
    %343 = tpu.memref_slice %arg2[%342, %c0_i32_195] : memref<16x32xf32, #tpu.memory_space<any>> -> memref<1x32xf32, #tpu.memory_space<any>>
    %c48_i32_196 = arith.constant 48 : i32
    %c0_i32_197 = arith.constant 0 : i32
    %344 = tpu.memref_slice %arg10[%c48_i32_196, %c0_i32_197] : memref<64x32xf32, #tpu.memory_space<vmem>> -> memref<1x32xf32, #tpu.memory_space<vmem>>
    %345 = tpu.memref_slice %arg15[%c0_i32_194] : memref<1x!tpu.dma_semaphore, #tpu.memory_space<semaphore_mem>> -> memref<1x!tpu.dma_semaphore, #tpu.memory_space<semaphore_mem>>
    %346 = tpu.memref_squeeze %345 : memref<1x!tpu.dma_semaphore, #tpu.memory_space<semaphore_mem>> -> memref<!tpu.dma_semaphore, #tpu.memory_space<semaphore_mem>>
    tpu.enqueue_dma source(%343 : memref<1x32xf32, #tpu.memory_space<any>>) target(%344 : memref<1x32xf32, #tpu.memory_space<vmem>>) target_semaphore(%346 : memref<!tpu.dma_semaphore, #tpu.memory_space<semaphore_mem>>)
    %c49_i32 = arith.constant 49 : i32
    %347 = arith.addi %3, %c49_i32 : i32
    %348 = arith.index_cast %347 : i32 to index
    %349 = memref.load %arg1[%348] : memref<64xi32, #tpu.memory_space<smem>>
    %c0_i32_198 = arith.constant 0 : i32
    %c0_i32_199 = arith.constant 0 : i32
    %350 = tpu.memref_slice %arg2[%349, %c0_i32_199] : memref<16x32xf32, #tpu.memory_space<any>> -> memref<1x32xf32, #tpu.memory_space<any>>
    %c49_i32_200 = arith.constant 49 : i32
    %c0_i32_201 = arith.constant 0 : i32
    %351 = tpu.memref_slice %arg10[%c49_i32_200, %c0_i32_201] : memref<64x32xf32, #tpu.memory_space<vmem>> -> memref<1x32xf32, #tpu.memory_space<vmem>>
    %352 = tpu.memref_slice %arg15[%c0_i32_198] : memref<1x!tpu.dma_semaphore, #tpu.memory_space<semaphore_mem>> -> memref<1x!tpu.dma_semaphore, #tpu.memory_space<semaphore_mem>>
    %353 = tpu.memref_squeeze %352 : memref<1x!tpu.dma_semaphore, #tpu.memory_space<semaphore_mem>> -> memref<!tpu.dma_semaphore, #tpu.memory_space<semaphore_mem>>
    tpu.enqueue_dma source(%350 : memref<1x32xf32, #tpu.memory_space<any>>) target(%351 : memref<1x32xf32, #tpu.memory_space<vmem>>) target_semaphore(%353 : memref<!tpu.dma_semaphore, #tpu.memory_space<semaphore_mem>>)
    %c50_i32 = arith.constant 50 : i32
    %354 = arith.addi %3, %c50_i32 : i32
    %355 = arith.index_cast %354 : i32 to index
    %356 = memref.load %arg1[%355] : memref<64xi32, #tpu.memory_space<smem>>
    %c0_i32_202 = arith.constant 0 : i32
    %c0_i32_203 = arith.constant 0 : i32
    %357 = tpu.memref_slice %arg2[%356, %c0_i32_203] : memref<16x32xf32, #tpu.memory_space<any>> -> memref<1x32xf32, #tpu.memory_space<any>>
    %c50_i32_204 = arith.constant 50 : i32
    %c0_i32_205 = arith.constant 0 : i32
    %358 = tpu.memref_slice %arg10[%c50_i32_204, %c0_i32_205] : memref<64x32xf32, #tpu.memory_space<vmem>> -> memref<1x32xf32, #tpu.memory_space<vmem>>
    %359 = tpu.memref_slice %arg15[%c0_i32_202] : memref<1x!tpu.dma_semaphore, #tpu.memory_space<semaphore_mem>> -> memref<1x!tpu.dma_semaphore, #tpu.memory_space<semaphore_mem>>
    %360 = tpu.memref_squeeze %359 : memref<1x!tpu.dma_semaphore, #tpu.memory_space<semaphore_mem>> -> memref<!tpu.dma_semaphore, #tpu.memory_space<semaphore_mem>>
    tpu.enqueue_dma source(%357 : memref<1x32xf32, #tpu.memory_space<any>>) target(%358 : memref<1x32xf32, #tpu.memory_space<vmem>>) target_semaphore(%360 : memref<!tpu.dma_semaphore, #tpu.memory_space<semaphore_mem>>)
    %c51_i32 = arith.constant 51 : i32
    %361 = arith.addi %3, %c51_i32 : i32
    %362 = arith.index_cast %361 : i32 to index
    %363 = memref.load %arg1[%362] : memref<64xi32, #tpu.memory_space<smem>>
    %c0_i32_206 = arith.constant 0 : i32
    %c0_i32_207 = arith.constant 0 : i32
    %364 = tpu.memref_slice %arg2[%363, %c0_i32_207] : memref<16x32xf32, #tpu.memory_space<any>> -> memref<1x32xf32, #tpu.memory_space<any>>
    %c51_i32_208 = arith.constant 51 : i32
    %c0_i32_209 = arith.constant 0 : i32
    %365 = tpu.memref_slice %arg10[%c51_i32_208, %c0_i32_209] : memref<64x32xf32, #tpu.memory_space<vmem>> -> memref<1x32xf32, #tpu.memory_space<vmem>>
    %366 = tpu.memref_slice %arg15[%c0_i32_206] : memref<1x!tpu.dma_semaphore, #tpu.memory_space<semaphore_mem>> -> memref<1x!tpu.dma_semaphore, #tpu.memory_space<semaphore_mem>>
    %367 = tpu.memref_squeeze %366 : memref<1x!tpu.dma_semaphore, #tpu.memory_space<semaphore_mem>> -> memref<!tpu.dma_semaphore, #tpu.memory_space<semaphore_mem>>
    tpu.enqueue_dma source(%364 : memref<1x32xf32, #tpu.memory_space<any>>) target(%365 : memref<1x32xf32, #tpu.memory_space<vmem>>) target_semaphore(%367 : memref<!tpu.dma_semaphore, #tpu.memory_space<semaphore_mem>>)
    %c52_i32 = arith.constant 52 : i32
    %368 = arith.addi %3, %c52_i32 : i32
    %369 = arith.index_cast %368 : i32 to index
    %370 = memref.load %arg1[%369] : memref<64xi32, #tpu.memory_space<smem>>
    %c0_i32_210 = arith.constant 0 : i32
    %c0_i32_211 = arith.constant 0 : i32
    %371 = tpu.memref_slice %arg2[%370, %c0_i32_211] : memref<16x32xf32, #tpu.memory_space<any>> -> memref<1x32xf32, #tpu.memory_space<any>>
    %c52_i32_212 = arith.constant 52 : i32
    %c0_i32_213 = arith.constant 0 : i32
    %372 = tpu.memref_slice %arg10[%c52_i32_212, %c0_i32_213] : memref<64x32xf32, #tpu.memory_space<vmem>> -> memref<1x32xf32, #tpu.memory_space<vmem>>
    %373 = tpu.memref_slice %arg15[%c0_i32_210] : memref<1x!tpu.dma_semaphore, #tpu.memory_space<semaphore_mem>> -> memref<1x!tpu.dma_semaphore, #tpu.memory_space<semaphore_mem>>
    %374 = tpu.memref_squeeze %373 : memref<1x!tpu.dma_semaphore, #tpu.memory_space<semaphore_mem>> -> memref<!tpu.dma_semaphore, #tpu.memory_space<semaphore_mem>>
    tpu.enqueue_dma source(%371 : memref<1x32xf32, #tpu.memory_space<any>>) target(%372 : memref<1x32xf32, #tpu.memory_space<vmem>>) target_semaphore(%374 : memref<!tpu.dma_semaphore, #tpu.memory_space<semaphore_mem>>)
    %c53_i32 = arith.constant 53 : i32
    %375 = arith.addi %3, %c53_i32 : i32
    %376 = arith.index_cast %375 : i32 to index
    %377 = memref.load %arg1[%376] : memref<64xi32, #tpu.memory_space<smem>>
    %c0_i32_214 = arith.constant 0 : i32
    %c0_i32_215 = arith.constant 0 : i32
    %378 = tpu.memref_slice %arg2[%377, %c0_i32_215] : memref<16x32xf32, #tpu.memory_space<any>> -> memref<1x32xf32, #tpu.memory_space<any>>
    %c53_i32_216 = arith.constant 53 : i32
    %c0_i32_217 = arith.constant 0 : i32
    %379 = tpu.memref_slice %arg10[%c53_i32_216, %c0_i32_217] : memref<64x32xf32, #tpu.memory_space<vmem>> -> memref<1x32xf32, #tpu.memory_space<vmem>>
    %380 = tpu.memref_slice %arg15[%c0_i32_214] : memref<1x!tpu.dma_semaphore, #tpu.memory_space<semaphore_mem>> -> memref<1x!tpu.dma_semaphore, #tpu.memory_space<semaphore_mem>>
    %381 = tpu.memref_squeeze %380 : memref<1x!tpu.dma_semaphore, #tpu.memory_space<semaphore_mem>> -> memref<!tpu.dma_semaphore, #tpu.memory_space<semaphore_mem>>
    tpu.enqueue_dma source(%378 : memref<1x32xf32, #tpu.memory_space<any>>) target(%379 : memref<1x32xf32, #tpu.memory_space<vmem>>) target_semaphore(%381 : memref<!tpu.dma_semaphore, #tpu.memory_space<semaphore_mem>>)
    %c54_i32 = arith.constant 54 : i32
    %382 = arith.addi %3, %c54_i32 : i32
    %383 = arith.index_cast %382 : i32 to index
    %384 = memref.load %arg1[%383] : memref<64xi32, #tpu.memory_space<smem>>
    %c0_i32_218 = arith.constant 0 : i32
    %c0_i32_219 = arith.constant 0 : i32
    %385 = tpu.memref_slice %arg2[%384, %c0_i32_219] : memref<16x32xf32, #tpu.memory_space<any>> -> memref<1x32xf32, #tpu.memory_space<any>>
    %c54_i32_220 = arith.constant 54 : i32
    %c0_i32_221 = arith.constant 0 : i32
    %386 = tpu.memref_slice %arg10[%c54_i32_220, %c0_i32_221] : memref<64x32xf32, #tpu.memory_space<vmem>> -> memref<1x32xf32, #tpu.memory_space<vmem>>
    %387 = tpu.memref_slice %arg15[%c0_i32_218] : memref<1x!tpu.dma_semaphore, #tpu.memory_space<semaphore_mem>> -> memref<1x!tpu.dma_semaphore, #tpu.memory_space<semaphore_mem>>
    %388 = tpu.memref_squeeze %387 : memref<1x!tpu.dma_semaphore, #tpu.memory_space<semaphore_mem>> -> memref<!tpu.dma_semaphore, #tpu.memory_space<semaphore_mem>>
    tpu.enqueue_dma source(%385 : memref<1x32xf32, #tpu.memory_space<any>>) target(%386 : memref<1x32xf32, #tpu.memory_space<vmem>>) target_semaphore(%388 : memref<!tpu.dma_semaphore, #tpu.memory_space<semaphore_mem>>)
    %c55_i32 = arith.constant 55 : i32
    %389 = arith.addi %3, %c55_i32 : i32
    %390 = arith.index_cast %389 : i32 to index
    %391 = memref.load %arg1[%390] : memref<64xi32, #tpu.memory_space<smem>>
    %c0_i32_222 = arith.constant 0 : i32
    %c0_i32_223 = arith.constant 0 : i32
    %392 = tpu.memref_slice %arg2[%391, %c0_i32_223] : memref<16x32xf32, #tpu.memory_space<any>> -> memref<1x32xf32, #tpu.memory_space<any>>
    %c55_i32_224 = arith.constant 55 : i32
    %c0_i32_225 = arith.constant 0 : i32
    %393 = tpu.memref_slice %arg10[%c55_i32_224, %c0_i32_225] : memref<64x32xf32, #tpu.memory_space<vmem>> -> memref<1x32xf32, #tpu.memory_space<vmem>>
    %394 = tpu.memref_slice %arg15[%c0_i32_222] : memref<1x!tpu.dma_semaphore, #tpu.memory_space<semaphore_mem>> -> memref<1x!tpu.dma_semaphore, #tpu.memory_space<semaphore_mem>>
    %395 = tpu.memref_squeeze %394 : memref<1x!tpu.dma_semaphore, #tpu.memory_space<semaphore_mem>> -> memref<!tpu.dma_semaphore, #tpu.memory_space<semaphore_mem>>
    tpu.enqueue_dma source(%392 : memref<1x32xf32, #tpu.memory_space<any>>) target(%393 : memref<1x32xf32, #tpu.memory_space<vmem>>) target_semaphore(%395 : memref<!tpu.dma_semaphore, #tpu.memory_space<semaphore_mem>>)
    %c56_i32 = arith.constant 56 : i32
    %396 = arith.addi %3, %c56_i32 : i32
    %397 = arith.index_cast %396 : i32 to index
    %398 = memref.load %arg1[%397] : memref<64xi32, #tpu.memory_space<smem>>
    %c0_i32_226 = arith.constant 0 : i32
    %c0_i32_227 = arith.constant 0 : i32
    %399 = tpu.memref_slice %arg2[%398, %c0_i32_227] : memref<16x32xf32, #tpu.memory_space<any>> -> memref<1x32xf32, #tpu.memory_space<any>>
    %c56_i32_228 = arith.constant 56 : i32
    %c0_i32_229 = arith.constant 0 : i32
    %400 = tpu.memref_slice %arg10[%c56_i32_228, %c0_i32_229] : memref<64x32xf32, #tpu.memory_space<vmem>> -> memref<1x32xf32, #tpu.memory_space<vmem>>
    %401 = tpu.memref_slice %arg15[%c0_i32_226] : memref<1x!tpu.dma_semaphore, #tpu.memory_space<semaphore_mem>> -> memref<1x!tpu.dma_semaphore, #tpu.memory_space<semaphore_mem>>
    %402 = tpu.memref_squeeze %401 : memref<1x!tpu.dma_semaphore, #tpu.memory_space<semaphore_mem>> -> memref<!tpu.dma_semaphore, #tpu.memory_space<semaphore_mem>>
    tpu.enqueue_dma source(%399 : memref<1x32xf32, #tpu.memory_space<any>>) target(%400 : memref<1x32xf32, #tpu.memory_space<vmem>>) target_semaphore(%402 : memref<!tpu.dma_semaphore, #tpu.memory_space<semaphore_mem>>)
    %c57_i32 = arith.constant 57 : i32
    %403 = arith.addi %3, %c57_i32 : i32
    %404 = arith.index_cast %403 : i32 to index
    %405 = memref.load %arg1[%404] : memref<64xi32, #tpu.memory_space<smem>>
    %c0_i32_230 = arith.constant 0 : i32
    %c0_i32_231 = arith.constant 0 : i32
    %406 = tpu.memref_slice %arg2[%405, %c0_i32_231] : memref<16x32xf32, #tpu.memory_space<any>> -> memref<1x32xf32, #tpu.memory_space<any>>
    %c57_i32_232 = arith.constant 57 : i32
    %c0_i32_233 = arith.constant 0 : i32
    %407 = tpu.memref_slice %arg10[%c57_i32_232, %c0_i32_233] : memref<64x32xf32, #tpu.memory_space<vmem>> -> memref<1x32xf32, #tpu.memory_space<vmem>>
    %408 = tpu.memref_slice %arg15[%c0_i32_230] : memref<1x!tpu.dma_semaphore, #tpu.memory_space<semaphore_mem>> -> memref<1x!tpu.dma_semaphore, #tpu.memory_space<semaphore_mem>>
    %409 = tpu.memref_squeeze %408 : memref<1x!tpu.dma_semaphore, #tpu.memory_space<semaphore_mem>> -> memref<!tpu.dma_semaphore, #tpu.memory_space<semaphore_mem>>
    tpu.enqueue_dma source(%406 : memref<1x32xf32, #tpu.memory_space<any>>) target(%407 : memref<1x32xf32, #tpu.memory_space<vmem>>) target_semaphore(%409 : memref<!tpu.dma_semaphore, #tpu.memory_space<semaphore_mem>>)
    %c58_i32 = arith.constant 58 : i32
    %410 = arith.addi %3, %c58_i32 : i32
    %411 = arith.index_cast %410 : i32 to index
    %412 = memref.load %arg1[%411] : memref<64xi32, #tpu.memory_space<smem>>
    %c0_i32_234 = arith.constant 0 : i32
    %c0_i32_235 = arith.constant 0 : i32
    %413 = tpu.memref_slice %arg2[%412, %c0_i32_235] : memref<16x32xf32, #tpu.memory_space<any>> -> memref<1x32xf32, #tpu.memory_space<any>>
    %c58_i32_236 = arith.constant 58 : i32
    %c0_i32_237 = arith.constant 0 : i32
    %414 = tpu.memref_slice %arg10[%c58_i32_236, %c0_i32_237] : memref<64x32xf32, #tpu.memory_space<vmem>> -> memref<1x32xf32, #tpu.memory_space<vmem>>
    %415 = tpu.memref_slice %arg15[%c0_i32_234] : memref<1x!tpu.dma_semaphore, #tpu.memory_space<semaphore_mem>> -> memref<1x!tpu.dma_semaphore, #tpu.memory_space<semaphore_mem>>
    %416 = tpu.memref_squeeze %415 : memref<1x!tpu.dma_semaphore, #tpu.memory_space<semaphore_mem>> -> memref<!tpu.dma_semaphore, #tpu.memory_space<semaphore_mem>>
    tpu.enqueue_dma source(%413 : memref<1x32xf32, #tpu.memory_space<any>>) target(%414 : memref<1x32xf32, #tpu.memory_space<vmem>>) target_semaphore(%416 : memref<!tpu.dma_semaphore, #tpu.memory_space<semaphore_mem>>)
    %c59_i32 = arith.constant 59 : i32
    %417 = arith.addi %3, %c59_i32 : i32
    %418 = arith.index_cast %417 : i32 to index
    %419 = memref.load %arg1[%418] : memref<64xi32, #tpu.memory_space<smem>>
    %c0_i32_238 = arith.constant 0 : i32
    %c0_i32_239 = arith.constant 0 : i32
    %420 = tpu.memref_slice %arg2[%419, %c0_i32_239] : memref<16x32xf32, #tpu.memory_space<any>> -> memref<1x32xf32, #tpu.memory_space<any>>
    %c59_i32_240 = arith.constant 59 : i32
    %c0_i32_241 = arith.constant 0 : i32
    %421 = tpu.memref_slice %arg10[%c59_i32_240, %c0_i32_241] : memref<64x32xf32, #tpu.memory_space<vmem>> -> memref<1x32xf32, #tpu.memory_space<vmem>>
    %422 = tpu.memref_slice %arg15[%c0_i32_238] : memref<1x!tpu.dma_semaphore, #tpu.memory_space<semaphore_mem>> -> memref<1x!tpu.dma_semaphore, #tpu.memory_space<semaphore_mem>>
    %423 = tpu.memref_squeeze %422 : memref<1x!tpu.dma_semaphore, #tpu.memory_space<semaphore_mem>> -> memref<!tpu.dma_semaphore, #tpu.memory_space<semaphore_mem>>
    tpu.enqueue_dma source(%420 : memref<1x32xf32, #tpu.memory_space<any>>) target(%421 : memref<1x32xf32, #tpu.memory_space<vmem>>) target_semaphore(%423 : memref<!tpu.dma_semaphore, #tpu.memory_space<semaphore_mem>>)
    %c60_i32 = arith.constant 60 : i32
    %424 = arith.addi %3, %c60_i32 : i32
    %425 = arith.index_cast %424 : i32 to index
    %426 = memref.load %arg1[%425] : memref<64xi32, #tpu.memory_space<smem>>
    %c0_i32_242 = arith.constant 0 : i32
    %c0_i32_243 = arith.constant 0 : i32
    %427 = tpu.memref_slice %arg2[%426, %c0_i32_243] : memref<16x32xf32, #tpu.memory_space<any>> -> memref<1x32xf32, #tpu.memory_space<any>>
    %c60_i32_244 = arith.constant 60 : i32
    %c0_i32_245 = arith.constant 0 : i32
    %428 = tpu.memref_slice %arg10[%c60_i32_244, %c0_i32_245] : memref<64x32xf32, #tpu.memory_space<vmem>> -> memref<1x32xf32, #tpu.memory_space<vmem>>
    %429 = tpu.memref_slice %arg15[%c0_i32_242] : memref<1x!tpu.dma_semaphore, #tpu.memory_space<semaphore_mem>> -> memref<1x!tpu.dma_semaphore, #tpu.memory_space<semaphore_mem>>
    %430 = tpu.memref_squeeze %429 : memref<1x!tpu.dma_semaphore, #tpu.memory_space<semaphore_mem>> -> memref<!tpu.dma_semaphore, #tpu.memory_space<semaphore_mem>>
    tpu.enqueue_dma source(%427 : memref<1x32xf32, #tpu.memory_space<any>>) target(%428 : memref<1x32xf32, #tpu.memory_space<vmem>>) target_semaphore(%430 : memref<!tpu.dma_semaphore, #tpu.memory_space<semaphore_mem>>)
    %c61_i32 = arith.constant 61 : i32
    %431 = arith.addi %3, %c61_i32 : i32
    %432 = arith.index_cast %431 : i32 to index
    %433 = memref.load %arg1[%432] : memref<64xi32, #tpu.memory_space<smem>>
    %c0_i32_246 = arith.constant 0 : i32
    %c0_i32_247 = arith.constant 0 : i32
    %434 = tpu.memref_slice %arg2[%433, %c0_i32_247] : memref<16x32xf32, #tpu.memory_space<any>> -> memref<1x32xf32, #tpu.memory_space<any>>
    %c61_i32_248 = arith.constant 61 : i32
    %c0_i32_249 = arith.constant 0 : i32
    %435 = tpu.memref_slice %arg10[%c61_i32_248, %c0_i32_249] : memref<64x32xf32, #tpu.memory_space<vmem>> -> memref<1x32xf32, #tpu.memory_space<vmem>>
    %436 = tpu.memref_slice %arg15[%c0_i32_246] : memref<1x!tpu.dma_semaphore, #tpu.memory_space<semaphore_mem>> -> memref<1x!tpu.dma_semaphore, #tpu.memory_space<semaphore_mem>>
    %437 = tpu.memref_squeeze %436 : memref<1x!tpu.dma_semaphore, #tpu.memory_space<semaphore_mem>> -> memref<!tpu.dma_semaphore, #tpu.memory_space<semaphore_mem>>
    tpu.enqueue_dma source(%434 : memref<1x32xf32, #tpu.memory_space<any>>) target(%435 : memref<1x32xf32, #tpu.memory_space<vmem>>) target_semaphore(%437 : memref<!tpu.dma_semaphore, #tpu.memory_space<semaphore_mem>>)
    %c62_i32 = arith.constant 62 : i32
    %438 = arith.addi %3, %c62_i32 : i32
    %439 = arith.index_cast %438 : i32 to index
    %440 = memref.load %arg1[%439] : memref<64xi32, #tpu.memory_space<smem>>
    %c0_i32_250 = arith.constant 0 : i32
    %c0_i32_251 = arith.constant 0 : i32
    %441 = tpu.memref_slice %arg2[%440, %c0_i32_251] : memref<16x32xf32, #tpu.memory_space<any>> -> memref<1x32xf32, #tpu.memory_space<any>>
    %c62_i32_252 = arith.constant 62 : i32
    %c0_i32_253 = arith.constant 0 : i32
    %442 = tpu.memref_slice %arg10[%c62_i32_252, %c0_i32_253] : memref<64x32xf32, #tpu.memory_space<vmem>> -> memref<1x32xf32, #tpu.memory_space<vmem>>
    %443 = tpu.memref_slice %arg15[%c0_i32_250] : memref<1x!tpu.dma_semaphore, #tpu.memory_space<semaphore_mem>> -> memref<1x!tpu.dma_semaphore, #tpu.memory_space<semaphore_mem>>
    %444 = tpu.memref_squeeze %443 : memref<1x!tpu.dma_semaphore, #tpu.memory_space<semaphore_mem>> -> memref<!tpu.dma_semaphore, #tpu.memory_space<semaphore_mem>>
    tpu.enqueue_dma source(%441 : memref<1x32xf32, #tpu.memory_space<any>>) target(%442 : memref<1x32xf32, #tpu.memory_space<vmem>>) target_semaphore(%444 : memref<!tpu.dma_semaphore, #tpu.memory_space<semaphore_mem>>)
    %c63_i32 = arith.constant 63 : i32
    %445 = arith.addi %3, %c63_i32 : i32
    %446 = arith.index_cast %445 : i32 to index
    %447 = memref.load %arg1[%446] : memref<64xi32, #tpu.memory_space<smem>>
    %c0_i32_254 = arith.constant 0 : i32
    %c0_i32_255 = arith.constant 0 : i32
    %448 = tpu.memref_slice %arg2[%447, %c0_i32_255] : memref<16x32xf32, #tpu.memory_space<any>> -> memref<1x32xf32, #tpu.memory_space<any>>
    %c63_i32_256 = arith.constant 63 : i32
    %c0_i32_257 = arith.constant 0 : i32
    %449 = tpu.memref_slice %arg10[%c63_i32_256, %c0_i32_257] : memref<64x32xf32, #tpu.memory_space<vmem>> -> memref<1x32xf32, #tpu.memory_space<vmem>>
    %450 = tpu.memref_slice %arg15[%c0_i32_254] : memref<1x!tpu.dma_semaphore, #tpu.memory_space<semaphore_mem>> -> memref<1x!tpu.dma_semaphore, #tpu.memory_space<semaphore_mem>>
    %451 = tpu.memref_squeeze %450 : memref<1x!tpu.dma_semaphore, #tpu.memory_space<semaphore_mem>> -> memref<!tpu.dma_semaphore, #tpu.memory_space<semaphore_mem>>
    tpu.enqueue_dma source(%448 : memref<1x32xf32, #tpu.memory_space<any>>) target(%449 : memref<1x32xf32, #tpu.memory_space<vmem>>) target_semaphore(%451 : memref<!tpu.dma_semaphore, #tpu.memory_space<semaphore_mem>>)
    %c0_i32_258 = arith.constant 0 : i32
    %c0_i32_259 = arith.constant 0 : i32
    %c0_i32_260 = arith.constant 0 : i32
    %452 = tpu.memref_slice %arg2[%c0_i32_259, %c0_i32_260] : memref<16x32xf32, #tpu.memory_space<any>> -> memref<1x32xf32, #tpu.memory_space<any>>
    %c0_i32_261 = arith.constant 0 : i32
    %c0_i32_262 = arith.constant 0 : i32
    %453 = tpu.memref_slice %arg10[%c0_i32_261, %c0_i32_262] : memref<64x32xf32, #tpu.memory_space<vmem>> -> memref<1x32xf32, #tpu.memory_space<vmem>>
    %454 = tpu.memref_slice %arg15[%c0_i32_258] : memref<1x!tpu.dma_semaphore, #tpu.memory_space<semaphore_mem>> -> memref<1x!tpu.dma_semaphore, #tpu.memory_space<semaphore_mem>>
    %455 = tpu.memref_squeeze %454 : memref<1x!tpu.dma_semaphore, #tpu.memory_space<semaphore_mem>> -> memref<!tpu.dma_semaphore, #tpu.memory_space<semaphore_mem>>
    tpu.wait_dma2 semaphore(%455 : memref<!tpu.dma_semaphore, #tpu.memory_space<semaphore_mem>>) src(%452 : memref<1x32xf32, #tpu.memory_space<any>>) dst(%453 : memref<1x32xf32, #tpu.memory_space<vmem>>)
    %c0_i32_263 = arith.constant 0 : i32
    %c0_i32_264 = arith.constant 0 : i32
    %c0_i32_265 = arith.constant 0 : i32
    %456 = tpu.memref_slice %arg2[%c0_i32_264, %c0_i32_265] : memref<16x32xf32, #tpu.memory_space<any>> -> memref<1x32xf32, #tpu.memory_space<any>>
    %c1_i32_266 = arith.constant 1 : i32
    %c0_i32_267 = arith.constant 0 : i32
    %457 = tpu.memref_slice %arg10[%c1_i32_266, %c0_i32_267] : memref<64x32xf32, #tpu.memory_space<vmem>> -> memref<1x32xf32, #tpu.memory_space<vmem>>
    %458 = tpu.memref_slice %arg15[%c0_i32_263] : memref<1x!tpu.dma_semaphore, #tpu.memory_space<semaphore_mem>> -> memref<1x!tpu.dma_semaphore, #tpu.memory_space<semaphore_mem>>
    %459 = tpu.memref_squeeze %458 : memref<1x!tpu.dma_semaphore, #tpu.memory_space<semaphore_mem>> -> memref<!tpu.dma_semaphore, #tpu.memory_space<semaphore_mem>>
    tpu.wait_dma2 semaphore(%459 : memref<!tpu.dma_semaphore, #tpu.memory_space<semaphore_mem>>) src(%456 : memref<1x32xf32, #tpu.memory_space<any>>) dst(%457 : memref<1x32xf32, #tpu.memory_space<vmem>>)
    %c0_i32_268 = arith.constant 0 : i32
    %c0_i32_269 = arith.constant 0 : i32
    %c0_i32_270 = arith.constant 0 : i32
    %460 = tpu.memref_slice %arg2[%c0_i32_269, %c0_i32_270] : memref<16x32xf32, #tpu.memory_space<any>> -> memref<1x32xf32, #tpu.memory_space<any>>
    %c2_i32_271 = arith.constant 2 : i32
    %c0_i32_272 = arith.constant 0 : i32
    %461 = tpu.memref_slice %arg10[%c2_i32_271, %c0_i32_272] : memref<64x32xf32, #tpu.memory_space<vmem>> -> memref<1x32xf32, #tpu.memory_space<vmem>>
    %462 = tpu.memref_slice %arg15[%c0_i32_268] : memref<1x!tpu.dma_semaphore, #tpu.memory_space<semaphore_mem>> -> memref<1x!tpu.dma_semaphore, #tpu.memory_space<semaphore_mem>>
    %463 = tpu.memref_squeeze %462 : memref<1x!tpu.dma_semaphore, #tpu.memory_space<semaphore_mem>> -> memref<!tpu.dma_semaphore, #tpu.memory_space<semaphore_mem>>
    tpu.wait_dma2 semaphore(%463 : memref<!tpu.dma_semaphore, #tpu.memory_space<semaphore_mem>>) src(%460 : memref<1x32xf32, #tpu.memory_space<any>>) dst(%461 : memref<1x32xf32, #tpu.memory_space<vmem>>)
    %c0_i32_273 = arith.constant 0 : i32
    %c0_i32_274 = arith.constant 0 : i32
    %c0_i32_275 = arith.constant 0 : i32
    %464 = tpu.memref_slice %arg2[%c0_i32_274, %c0_i32_275] : memref<16x32xf32, #tpu.memory_space<any>> -> memref<1x32xf32, #tpu.memory_space<any>>
    %c3_i32_276 = arith.constant 3 : i32
    %c0_i32_277 = arith.constant 0 : i32
    %465 = tpu.memref_slice %arg10[%c3_i32_276, %c0_i32_277] : memref<64x32xf32, #tpu.memory_space<vmem>> -> memref<1x32xf32, #tpu.memory_space<vmem>>
    %466 = tpu.memref_slice %arg15[%c0_i32_273] : memref<1x!tpu.dma_semaphore, #tpu.memory_space<semaphore_mem>> -> memref<1x!tpu.dma_semaphore, #tpu.memory_space<semaphore_mem>>
    %467 = tpu.memref_squeeze %466 : memref<1x!tpu.dma_semaphore, #tpu.memory_space<semaphore_mem>> -> memref<!tpu.dma_semaphore, #tpu.memory_space<semaphore_mem>>
    tpu.wait_dma2 semaphore(%467 : memref<!tpu.dma_semaphore, #tpu.memory_space<semaphore_mem>>) src(%464 : memref<1x32xf32, #tpu.memory_space<any>>) dst(%465 : memref<1x32xf32, #tpu.memory_space<vmem>>)
    %c0_i32_278 = arith.constant 0 : i32
    %c0_i32_279 = arith.constant 0 : i32
    %c0_i32_280 = arith.constant 0 : i32
    %468 = tpu.memref_slice %arg2[%c0_i32_279, %c0_i32_280] : memref<16x32xf32, #tpu.memory_space<any>> -> memref<1x32xf32, #tpu.memory_space<any>>
    %c4_i32_281 = arith.constant 4 : i32
    %c0_i32_282 = arith.constant 0 : i32
    %469 = tpu.memref_slice %arg10[%c4_i32_281, %c0_i32_282] : memref<64x32xf32, #tpu.memory_space<vmem>> -> memref<1x32xf32, #tpu.memory_space<vmem>>
    %470 = tpu.memref_slice %arg15[%c0_i32_278] : memref<1x!tpu.dma_semaphore, #tpu.memory_space<semaphore_mem>> -> memref<1x!tpu.dma_semaphore, #tpu.memory_space<semaphore_mem>>
    %471 = tpu.memref_squeeze %470 : memref<1x!tpu.dma_semaphore, #tpu.memory_space<semaphore_mem>> -> memref<!tpu.dma_semaphore, #tpu.memory_space<semaphore_mem>>
    tpu.wait_dma2 semaphore(%471 : memref<!tpu.dma_semaphore, #tpu.memory_space<semaphore_mem>>) src(%468 : memref<1x32xf32, #tpu.memory_space<any>>) dst(%469 : memref<1x32xf32, #tpu.memory_space<vmem>>)
    %c0_i32_283 = arith.constant 0 : i32
    %c0_i32_284 = arith.constant 0 : i32
    %c0_i32_285 = arith.constant 0 : i32
    %472 = tpu.memref_slice %arg2[%c0_i32_284, %c0_i32_285] : memref<16x32xf32, #tpu.memory_space<any>> -> memref<1x32xf32, #tpu.memory_space<any>>
    %c5_i32_286 = arith.constant 5 : i32
    %c0_i32_287 = arith.constant 0 : i32
    %473 = tpu.memref_slice %arg10[%c5_i32_286, %c0_i32_287] : memref<64x32xf32, #tpu.memory_space<vmem>> -> memref<1x32xf32, #tpu.memory_space<vmem>>
    %474 = tpu.memref_slice %arg15[%c0_i32_283] : memref<1x!tpu.dma_semaphore, #tpu.memory_space<semaphore_mem>> -> memref<1x!tpu.dma_semaphore, #tpu.memory_space<semaphore_mem>>
    %475 = tpu.memref_squeeze %474 : memref<1x!tpu.dma_semaphore, #tpu.memory_space<semaphore_mem>> -> memref<!tpu.dma_semaphore, #tpu.memory_space<semaphore_mem>>
    tpu.wait_dma2 semaphore(%475 : memref<!tpu.dma_semaphore, #tpu.memory_space<semaphore_mem>>) src(%472 : memref<1x32xf32, #tpu.memory_space<any>>) dst(%473 : memref<1x32xf32, #tpu.memory_space<vmem>>)
    %c0_i32_288 = arith.constant 0 : i32
    %c0_i32_289 = arith.constant 0 : i32
    %c0_i32_290 = arith.constant 0 : i32
    %476 = tpu.memref_slice %arg2[%c0_i32_289, %c0_i32_290] : memref<16x32xf32, #tpu.memory_space<any>> -> memref<1x32xf32, #tpu.memory_space<any>>
    %c6_i32_291 = arith.constant 6 : i32
    %c0_i32_292 = arith.constant 0 : i32
    %477 = tpu.memref_slice %arg10[%c6_i32_291, %c0_i32_292] : memref<64x32xf32, #tpu.memory_space<vmem>> -> memref<1x32xf32, #tpu.memory_space<vmem>>
    %478 = tpu.memref_slice %arg15[%c0_i32_288] : memref<1x!tpu.dma_semaphore, #tpu.memory_space<semaphore_mem>> -> memref<1x!tpu.dma_semaphore, #tpu.memory_space<semaphore_mem>>
    %479 = tpu.memref_squeeze %478 : memref<1x!tpu.dma_semaphore, #tpu.memory_space<semaphore_mem>> -> memref<!tpu.dma_semaphore, #tpu.memory_space<semaphore_mem>>
    tpu.wait_dma2 semaphore(%479 : memref<!tpu.dma_semaphore, #tpu.memory_space<semaphore_mem>>) src(%476 : memref<1x32xf32, #tpu.memory_space<any>>) dst(%477 : memref<1x32xf32, #tpu.memory_space<vmem>>)
    %c0_i32_293 = arith.constant 0 : i32
    %c0_i32_294 = arith.constant 0 : i32
    %c0_i32_295 = arith.constant 0 : i32
    %480 = tpu.memref_slice %arg2[%c0_i32_294, %c0_i32_295] : memref<16x32xf32, #tpu.memory_space<any>> -> memref<1x32xf32, #tpu.memory_space<any>>
    %c7_i32_296 = arith.constant 7 : i32
    %c0_i32_297 = arith.constant 0 : i32
    %481 = tpu.memref_slice %arg10[%c7_i32_296, %c0_i32_297] : memref<64x32xf32, #tpu.memory_space<vmem>> -> memref<1x32xf32, #tpu.memory_space<vmem>>
    %482 = tpu.memref_slice %arg15[%c0_i32_293] : memref<1x!tpu.dma_semaphore, #tpu.memory_space<semaphore_mem>> -> memref<1x!tpu.dma_semaphore, #tpu.memory_space<semaphore_mem>>
    %483 = tpu.memref_squeeze %482 : memref<1x!tpu.dma_semaphore, #tpu.memory_space<semaphore_mem>> -> memref<!tpu.dma_semaphore, #tpu.memory_space<semaphore_mem>>
    tpu.wait_dma2 semaphore(%483 : memref<!tpu.dma_semaphore, #tpu.memory_space<semaphore_mem>>) src(%480 : memref<1x32xf32, #tpu.memory_space<any>>) dst(%481 : memref<1x32xf32, #tpu.memory_space<vmem>>)
    %c0_i32_298 = arith.constant 0 : i32
    %c0_i32_299 = arith.constant 0 : i32
    %c0_i32_300 = arith.constant 0 : i32
    %484 = tpu.memref_slice %arg2[%c0_i32_299, %c0_i32_300] : memref<16x32xf32, #tpu.memory_space<any>> -> memref<1x32xf32, #tpu.memory_space<any>>
    %c8_i32_301 = arith.constant 8 : i32
    %c0_i32_302 = arith.constant 0 : i32
    %485 = tpu.memref_slice %arg10[%c8_i32_301, %c0_i32_302] : memref<64x32xf32, #tpu.memory_space<vmem>> -> memref<1x32xf32, #tpu.memory_space<vmem>>
    %486 = tpu.memref_slice %arg15[%c0_i32_298] : memref<1x!tpu.dma_semaphore, #tpu.memory_space<semaphore_mem>> -> memref<1x!tpu.dma_semaphore, #tpu.memory_space<semaphore_mem>>
    %487 = tpu.memref_squeeze %486 : memref<1x!tpu.dma_semaphore, #tpu.memory_space<semaphore_mem>> -> memref<!tpu.dma_semaphore, #tpu.memory_space<semaphore_mem>>
    tpu.wait_dma2 semaphore(%487 : memref<!tpu.dma_semaphore, #tpu.memory_space<semaphore_mem>>) src(%484 : memref<1x32xf32, #tpu.memory_space<any>>) dst(%485 : memref<1x32xf32, #tpu.memory_space<vmem>>)
    %c0_i32_303 = arith.constant 0 : i32
    %c0_i32_304 = arith.constant 0 : i32
    %c0_i32_305 = arith.constant 0 : i32
    %488 = tpu.memref_slice %arg2[%c0_i32_304, %c0_i32_305] : memref<16x32xf32, #tpu.memory_space<any>> -> memref<1x32xf32, #tpu.memory_space<any>>
    %c9_i32_306 = arith.constant 9 : i32
    %c0_i32_307 = arith.constant 0 : i32
    %489 = tpu.memref_slice %arg10[%c9_i32_306, %c0_i32_307] : memref<64x32xf32, #tpu.memory_space<vmem>> -> memref<1x32xf32, #tpu.memory_space<vmem>>
    %490 = tpu.memref_slice %arg15[%c0_i32_303] : memref<1x!tpu.dma_semaphore, #tpu.memory_space<semaphore_mem>> -> memref<1x!tpu.dma_semaphore, #tpu.memory_space<semaphore_mem>>
    %491 = tpu.memref_squeeze %490 : memref<1x!tpu.dma_semaphore, #tpu.memory_space<semaphore_mem>> -> memref<!tpu.dma_semaphore, #tpu.memory_space<semaphore_mem>>
    tpu.wait_dma2 semaphore(%491 : memref<!tpu.dma_semaphore, #tpu.memory_space<semaphore_mem>>) src(%488 : memref<1x32xf32, #tpu.memory_space<any>>) dst(%489 : memref<1x32xf32, #tpu.memory_space<vmem>>)
    %c0_i32_308 = arith.constant 0 : i32
    %c0_i32_309 = arith.constant 0 : i32
    %c0_i32_310 = arith.constant 0 : i32
    %492 = tpu.memref_slice %arg2[%c0_i32_309, %c0_i32_310] : memref<16x32xf32, #tpu.memory_space<any>> -> memref<1x32xf32, #tpu.memory_space<any>>
    %c10_i32_311 = arith.constant 10 : i32
    %c0_i32_312 = arith.constant 0 : i32
    %493 = tpu.memref_slice %arg10[%c10_i32_311, %c0_i32_312] : memref<64x32xf32, #tpu.memory_space<vmem>> -> memref<1x32xf32, #tpu.memory_space<vmem>>
    %494 = tpu.memref_slice %arg15[%c0_i32_308] : memref<1x!tpu.dma_semaphore, #tpu.memory_space<semaphore_mem>> -> memref<1x!tpu.dma_semaphore, #tpu.memory_space<semaphore_mem>>
    %495 = tpu.memref_squeeze %494 : memref<1x!tpu.dma_semaphore, #tpu.memory_space<semaphore_mem>> -> memref<!tpu.dma_semaphore, #tpu.memory_space<semaphore_mem>>
    tpu.wait_dma2 semaphore(%495 : memref<!tpu.dma_semaphore, #tpu.memory_space<semaphore_mem>>) src(%492 : memref<1x32xf32, #tpu.memory_space<any>>) dst(%493 : memref<1x32xf32, #tpu.memory_space<vmem>>)
    %c0_i32_313 = arith.constant 0 : i32
    %c0_i32_314 = arith.constant 0 : i32
    %c0_i32_315 = arith.constant 0 : i32
    %496 = tpu.memref_slice %arg2[%c0_i32_314, %c0_i32_315] : memref<16x32xf32, #tpu.memory_space<any>> -> memref<1x32xf32, #tpu.memory_space<any>>
    %c11_i32_316 = arith.constant 11 : i32
    %c0_i32_317 = arith.constant 0 : i32
    %497 = tpu.memref_slice %arg10[%c11_i32_316, %c0_i32_317] : memref<64x32xf32, #tpu.memory_space<vmem>> -> memref<1x32xf32, #tpu.memory_space<vmem>>
    %498 = tpu.memref_slice %arg15[%c0_i32_313] : memref<1x!tpu.dma_semaphore, #tpu.memory_space<semaphore_mem>> -> memref<1x!tpu.dma_semaphore, #tpu.memory_space<semaphore_mem>>
    %499 = tpu.memref_squeeze %498 : memref<1x!tpu.dma_semaphore, #tpu.memory_space<semaphore_mem>> -> memref<!tpu.dma_semaphore, #tpu.memory_space<semaphore_mem>>
    tpu.wait_dma2 semaphore(%499 : memref<!tpu.dma_semaphore, #tpu.memory_space<semaphore_mem>>) src(%496 : memref<1x32xf32, #tpu.memory_space<any>>) dst(%497 : memref<1x32xf32, #tpu.memory_space<vmem>>)
    %c0_i32_318 = arith.constant 0 : i32
    %c0_i32_319 = arith.constant 0 : i32
    %c0_i32_320 = arith.constant 0 : i32
    %500 = tpu.memref_slice %arg2[%c0_i32_319, %c0_i32_320] : memref<16x32xf32, #tpu.memory_space<any>> -> memref<1x32xf32, #tpu.memory_space<any>>
    %c12_i32_321 = arith.constant 12 : i32
    %c0_i32_322 = arith.constant 0 : i32
    %501 = tpu.memref_slice %arg10[%c12_i32_321, %c0_i32_322] : memref<64x32xf32, #tpu.memory_space<vmem>> -> memref<1x32xf32, #tpu.memory_space<vmem>>
    %502 = tpu.memref_slice %arg15[%c0_i32_318] : memref<1x!tpu.dma_semaphore, #tpu.memory_space<semaphore_mem>> -> memref<1x!tpu.dma_semaphore, #tpu.memory_space<semaphore_mem>>
    %503 = tpu.memref_squeeze %502 : memref<1x!tpu.dma_semaphore, #tpu.memory_space<semaphore_mem>> -> memref<!tpu.dma_semaphore, #tpu.memory_space<semaphore_mem>>
    tpu.wait_dma2 semaphore(%503 : memref<!tpu.dma_semaphore, #tpu.memory_space<semaphore_mem>>) src(%500 : memref<1x32xf32, #tpu.memory_space<any>>) dst(%501 : memref<1x32xf32, #tpu.memory_space<vmem>>)
    %c0_i32_323 = arith.constant 0 : i32
    %c0_i32_324 = arith.constant 0 : i32
    %c0_i32_325 = arith.constant 0 : i32
    %504 = tpu.memref_slice %arg2[%c0_i32_324, %c0_i32_325] : memref<16x32xf32, #tpu.memory_space<any>> -> memref<1x32xf32, #tpu.memory_space<any>>
    %c13_i32_326 = arith.constant 13 : i32
    %c0_i32_327 = arith.constant 0 : i32
    %505 = tpu.memref_slice %arg10[%c13_i32_326, %c0_i32_327] : memref<64x32xf32, #tpu.memory_space<vmem>> -> memref<1x32xf32, #tpu.memory_space<vmem>>
    %506 = tpu.memref_slice %arg15[%c0_i32_323] : memref<1x!tpu.dma_semaphore, #tpu.memory_space<semaphore_mem>> -> memref<1x!tpu.dma_semaphore, #tpu.memory_space<semaphore_mem>>
    %507 = tpu.memref_squeeze %506 : memref<1x!tpu.dma_semaphore, #tpu.memory_space<semaphore_mem>> -> memref<!tpu.dma_semaphore, #tpu.memory_space<semaphore_mem>>
    tpu.wait_dma2 semaphore(%507 : memref<!tpu.dma_semaphore, #tpu.memory_space<semaphore_mem>>) src(%504 : memref<1x32xf32, #tpu.memory_space<any>>) dst(%505 : memref<1x32xf32, #tpu.memory_space<vmem>>)
    %c0_i32_328 = arith.constant 0 : i32
    %c0_i32_329 = arith.constant 0 : i32
    %c0_i32_330 = arith.constant 0 : i32
    %508 = tpu.memref_slice %arg2[%c0_i32_329, %c0_i32_330] : memref<16x32xf32, #tpu.memory_space<any>> -> memref<1x32xf32, #tpu.memory_space<any>>
    %c14_i32_331 = arith.constant 14 : i32
    %c0_i32_332 = arith.constant 0 : i32
    %509 = tpu.memref_slice %arg10[%c14_i32_331, %c0_i32_332] : memref<64x32xf32, #tpu.memory_space<vmem>> -> memref<1x32xf32, #tpu.memory_space<vmem>>
    %510 = tpu.memref_slice %arg15[%c0_i32_328] : memref<1x!tpu.dma_semaphore, #tpu.memory_space<semaphore_mem>> -> memref<1x!tpu.dma_semaphore, #tpu.memory_space<semaphore_mem>>
    %511 = tpu.memref_squeeze %510 : memref<1x!tpu.dma_semaphore, #tpu.memory_space<semaphore_mem>> -> memref<!tpu.dma_semaphore, #tpu.memory_space<semaphore_mem>>
    tpu.wait_dma2 semaphore(%511 : memref<!tpu.dma_semaphore, #tpu.memory_space<semaphore_mem>>) src(%508 : memref<1x32xf32, #tpu.memory_space<any>>) dst(%509 : memref<1x32xf32, #tpu.memory_space<vmem>>)
    %c0_i32_333 = arith.constant 0 : i32
    %c0_i32_334 = arith.constant 0 : i32
    %c0_i32_335 = arith.constant 0 : i32
    %512 = tpu.memref_slice %arg2[%c0_i32_334, %c0_i32_335] : memref<16x32xf32, #tpu.memory_space<any>> -> memref<1x32xf32, #tpu.memory_space<any>>
    %c15_i32_336 = arith.constant 15 : i32
    %c0_i32_337 = arith.constant 0 : i32
    %513 = tpu.memref_slice %arg10[%c15_i32_336, %c0_i32_337] : memref<64x32xf32, #tpu.memory_space<vmem>> -> memref<1x32xf32, #tpu.memory_space<vmem>>
    %514 = tpu.memref_slice %arg15[%c0_i32_333] : memref<1x!tpu.dma_semaphore, #tpu.memory_space<semaphore_mem>> -> memref<1x!tpu.dma_semaphore, #tpu.memory_space<semaphore_mem>>
    %515 = tpu.memref_squeeze %514 : memref<1x!tpu.dma_semaphore, #tpu.memory_space<semaphore_mem>> -> memref<!tpu.dma_semaphore, #tpu.memory_space<semaphore_mem>>
    tpu.wait_dma2 semaphore(%515 : memref<!tpu.dma_semaphore, #tpu.memory_space<semaphore_mem>>) src(%512 : memref<1x32xf32, #tpu.memory_space<any>>) dst(%513 : memref<1x32xf32, #tpu.memory_space<vmem>>)
    %c0_i32_338 = arith.constant 0 : i32
    %c0_i32_339 = arith.constant 0 : i32
    %c0_i32_340 = arith.constant 0 : i32
    %516 = tpu.memref_slice %arg2[%c0_i32_339, %c0_i32_340] : memref<16x32xf32, #tpu.memory_space<any>> -> memref<1x32xf32, #tpu.memory_space<any>>
    %c16_i32_341 = arith.constant 16 : i32
    %c0_i32_342 = arith.constant 0 : i32
    %517 = tpu.memref_slice %arg10[%c16_i32_341, %c0_i32_342] : memref<64x32xf32, #tpu.memory_space<vmem>> -> memref<1x32xf32, #tpu.memory_space<vmem>>
    %518 = tpu.memref_slice %arg15[%c0_i32_338] : memref<1x!tpu.dma_semaphore, #tpu.memory_space<semaphore_mem>> -> memref<1x!tpu.dma_semaphore, #tpu.memory_space<semaphore_mem>>
    %519 = tpu.memref_squeeze %518 : memref<1x!tpu.dma_semaphore, #tpu.memory_space<semaphore_mem>> -> memref<!tpu.dma_semaphore, #tpu.memory_space<semaphore_mem>>
    tpu.wait_dma2 semaphore(%519 : memref<!tpu.dma_semaphore, #tpu.memory_space<semaphore_mem>>) src(%516 : memref<1x32xf32, #tpu.memory_space<any>>) dst(%517 : memref<1x32xf32, #tpu.memory_space<vmem>>)
    %c0_i32_343 = arith.constant 0 : i32
    %c0_i32_344 = arith.constant 0 : i32
    %c0_i32_345 = arith.constant 0 : i32
    %520 = tpu.memref_slice %arg2[%c0_i32_344, %c0_i32_345] : memref<16x32xf32, #tpu.memory_space<any>> -> memref<1x32xf32, #tpu.memory_space<any>>
    %c17_i32_346 = arith.constant 17 : i32
    %c0_i32_347 = arith.constant 0 : i32
    %521 = tpu.memref_slice %arg10[%c17_i32_346, %c0_i32_347] : memref<64x32xf32, #tpu.memory_space<vmem>> -> memref<1x32xf32, #tpu.memory_space<vmem>>
    %522 = tpu.memref_slice %arg15[%c0_i32_343] : memref<1x!tpu.dma_semaphore, #tpu.memory_space<semaphore_mem>> -> memref<1x!tpu.dma_semaphore, #tpu.memory_space<semaphore_mem>>
    %523 = tpu.memref_squeeze %522 : memref<1x!tpu.dma_semaphore, #tpu.memory_space<semaphore_mem>> -> memref<!tpu.dma_semaphore, #tpu.memory_space<semaphore_mem>>
    tpu.wait_dma2 semaphore(%523 : memref<!tpu.dma_semaphore, #tpu.memory_space<semaphore_mem>>) src(%520 : memref<1x32xf32, #tpu.memory_space<any>>) dst(%521 : memref<1x32xf32, #tpu.memory_space<vmem>>)
    %c0_i32_348 = arith.constant 0 : i32
    %c0_i32_349 = arith.constant 0 : i32
    %c0_i32_350 = arith.constant 0 : i32
    %524 = tpu.memref_slice %arg2[%c0_i32_349, %c0_i32_350] : memref<16x32xf32, #tpu.memory_space<any>> -> memref<1x32xf32, #tpu.memory_space<any>>
    %c18_i32_351 = arith.constant 18 : i32
    %c0_i32_352 = arith.constant 0 : i32
    %525 = tpu.memref_slice %arg10[%c18_i32_351, %c0_i32_352] : memref<64x32xf32, #tpu.memory_space<vmem>> -> memref<1x32xf32, #tpu.memory_space<vmem>>
    %526 = tpu.memref_slice %arg15[%c0_i32_348] : memref<1x!tpu.dma_semaphore, #tpu.memory_space<semaphore_mem>> -> memref<1x!tpu.dma_semaphore, #tpu.memory_space<semaphore_mem>>
    %527 = tpu.memref_squeeze %526 : memref<1x!tpu.dma_semaphore, #tpu.memory_space<semaphore_mem>> -> memref<!tpu.dma_semaphore, #tpu.memory_space<semaphore_mem>>
    tpu.wait_dma2 semaphore(%527 : memref<!tpu.dma_semaphore, #tpu.memory_space<semaphore_mem>>) src(%524 : memref<1x32xf32, #tpu.memory_space<any>>) dst(%525 : memref<1x32xf32, #tpu.memory_space<vmem>>)
    %c0_i32_353 = arith.constant 0 : i32
    %c0_i32_354 = arith.constant 0 : i32
    %c0_i32_355 = arith.constant 0 : i32
    %528 = tpu.memref_slice %arg2[%c0_i32_354, %c0_i32_355] : memref<16x32xf32, #tpu.memory_space<any>> -> memref<1x32xf32, #tpu.memory_space<any>>
    %c19_i32_356 = arith.constant 19 : i32
    %c0_i32_357 = arith.constant 0 : i32
    %529 = tpu.memref_slice %arg10[%c19_i32_356, %c0_i32_357] : memref<64x32xf32, #tpu.memory_space<vmem>> -> memref<1x32xf32, #tpu.memory_space<vmem>>
    %530 = tpu.memref_slice %arg15[%c0_i32_353] : memref<1x!tpu.dma_semaphore, #tpu.memory_space<semaphore_mem>> -> memref<1x!tpu.dma_semaphore, #tpu.memory_space<semaphore_mem>>
    %531 = tpu.memref_squeeze %530 : memref<1x!tpu.dma_semaphore, #tpu.memory_space<semaphore_mem>> -> memref<!tpu.dma_semaphore, #tpu.memory_space<semaphore_mem>>
    tpu.wait_dma2 semaphore(%531 : memref<!tpu.dma_semaphore, #tpu.memory_space<semaphore_mem>>) src(%528 : memref<1x32xf32, #tpu.memory_space<any>>) dst(%529 : memref<1x32xf32, #tpu.memory_space<vmem>>)
    %c0_i32_358 = arith.constant 0 : i32
    %c0_i32_359 = arith.constant 0 : i32
    %c0_i32_360 = arith.constant 0 : i32
    %532 = tpu.memref_slice %arg2[%c0_i32_359, %c0_i32_360] : memref<16x32xf32, #tpu.memory_space<any>> -> memref<1x32xf32, #tpu.memory_space<any>>
    %c20_i32_361 = arith.constant 20 : i32
    %c0_i32_362 = arith.constant 0 : i32
    %533 = tpu.memref_slice %arg10[%c20_i32_361, %c0_i32_362] : memref<64x32xf32, #tpu.memory_space<vmem>> -> memref<1x32xf32, #tpu.memory_space<vmem>>
    %534 = tpu.memref_slice %arg15[%c0_i32_358] : memref<1x!tpu.dma_semaphore, #tpu.memory_space<semaphore_mem>> -> memref<1x!tpu.dma_semaphore, #tpu.memory_space<semaphore_mem>>
    %535 = tpu.memref_squeeze %534 : memref<1x!tpu.dma_semaphore, #tpu.memory_space<semaphore_mem>> -> memref<!tpu.dma_semaphore, #tpu.memory_space<semaphore_mem>>
    tpu.wait_dma2 semaphore(%535 : memref<!tpu.dma_semaphore, #tpu.memory_space<semaphore_mem>>) src(%532 : memref<1x32xf32, #tpu.memory_space<any>>) dst(%533 : memref<1x32xf32, #tpu.memory_space<vmem>>)
    %c0_i32_363 = arith.constant 0 : i32
    %c0_i32_364 = arith.constant 0 : i32
    %c0_i32_365 = arith.constant 0 : i32
    %536 = tpu.memref_slice %arg2[%c0_i32_364, %c0_i32_365] : memref<16x32xf32, #tpu.memory_space<any>> -> memref<1x32xf32, #tpu.memory_space<any>>
    %c21_i32_366 = arith.constant 21 : i32
    %c0_i32_367 = arith.constant 0 : i32
    %537 = tpu.memref_slice %arg10[%c21_i32_366, %c0_i32_367] : memref<64x32xf32, #tpu.memory_space<vmem>> -> memref<1x32xf32, #tpu.memory_space<vmem>>
    %538 = tpu.memref_slice %arg15[%c0_i32_363] : memref<1x!tpu.dma_semaphore, #tpu.memory_space<semaphore_mem>> -> memref<1x!tpu.dma_semaphore, #tpu.memory_space<semaphore_mem>>
    %539 = tpu.memref_squeeze %538 : memref<1x!tpu.dma_semaphore, #tpu.memory_space<semaphore_mem>> -> memref<!tpu.dma_semaphore, #tpu.memory_space<semaphore_mem>>
    tpu.wait_dma2 semaphore(%539 : memref<!tpu.dma_semaphore, #tpu.memory_space<semaphore_mem>>) src(%536 : memref<1x32xf32, #tpu.memory_space<any>>) dst(%537 : memref<1x32xf32, #tpu.memory_space<vmem>>)
    %c0_i32_368 = arith.constant 0 : i32
    %c0_i32_369 = arith.constant 0 : i32
    %c0_i32_370 = arith.constant 0 : i32
    %540 = tpu.memref_slice %arg2[%c0_i32_369, %c0_i32_370] : memref<16x32xf32, #tpu.memory_space<any>> -> memref<1x32xf32, #tpu.memory_space<any>>
    %c22_i32_371 = arith.constant 22 : i32
    %c0_i32_372 = arith.constant 0 : i32
    %541 = tpu.memref_slice %arg10[%c22_i32_371, %c0_i32_372] : memref<64x32xf32, #tpu.memory_space<vmem>> -> memref<1x32xf32, #tpu.memory_space<vmem>>
    %542 = tpu.memref_slice %arg15[%c0_i32_368] : memref<1x!tpu.dma_semaphore, #tpu.memory_space<semaphore_mem>> -> memref<1x!tpu.dma_semaphore, #tpu.memory_space<semaphore_mem>>
    %543 = tpu.memref_squeeze %542 : memref<1x!tpu.dma_semaphore, #tpu.memory_space<semaphore_mem>> -> memref<!tpu.dma_semaphore, #tpu.memory_space<semaphore_mem>>
    tpu.wait_dma2 semaphore(%543 : memref<!tpu.dma_semaphore, #tpu.memory_space<semaphore_mem>>) src(%540 : memref<1x32xf32, #tpu.memory_space<any>>) dst(%541 : memref<1x32xf32, #tpu.memory_space<vmem>>)
    %c0_i32_373 = arith.constant 0 : i32
    %c0_i32_374 = arith.constant 0 : i32
    %c0_i32_375 = arith.constant 0 : i32
    %544 = tpu.memref_slice %arg2[%c0_i32_374, %c0_i32_375] : memref<16x32xf32, #tpu.memory_space<any>> -> memref<1x32xf32, #tpu.memory_space<any>>
    %c23_i32_376 = arith.constant 23 : i32
    %c0_i32_377 = arith.constant 0 : i32
    %545 = tpu.memref_slice %arg10[%c23_i32_376, %c0_i32_377] : memref<64x32xf32, #tpu.memory_space<vmem>> -> memref<1x32xf32, #tpu.memory_space<vmem>>
    %546 = tpu.memref_slice %arg15[%c0_i32_373] : memref<1x!tpu.dma_semaphore, #tpu.memory_space<semaphore_mem>> -> memref<1x!tpu.dma_semaphore, #tpu.memory_space<semaphore_mem>>
    %547 = tpu.memref_squeeze %546 : memref<1x!tpu.dma_semaphore, #tpu.memory_space<semaphore_mem>> -> memref<!tpu.dma_semaphore, #tpu.memory_space<semaphore_mem>>
    tpu.wait_dma2 semaphore(%547 : memref<!tpu.dma_semaphore, #tpu.memory_space<semaphore_mem>>) src(%544 : memref<1x32xf32, #tpu.memory_space<any>>) dst(%545 : memref<1x32xf32, #tpu.memory_space<vmem>>)
    %c0_i32_378 = arith.constant 0 : i32
    %c0_i32_379 = arith.constant 0 : i32
    %c0_i32_380 = arith.constant 0 : i32
    %548 = tpu.memref_slice %arg2[%c0_i32_379, %c0_i32_380] : memref<16x32xf32, #tpu.memory_space<any>> -> memref<1x32xf32, #tpu.memory_space<any>>
    %c24_i32_381 = arith.constant 24 : i32
    %c0_i32_382 = arith.constant 0 : i32
    %549 = tpu.memref_slice %arg10[%c24_i32_381, %c0_i32_382] : memref<64x32xf32, #tpu.memory_space<vmem>> -> memref<1x32xf32, #tpu.memory_space<vmem>>
    %550 = tpu.memref_slice %arg15[%c0_i32_378] : memref<1x!tpu.dma_semaphore, #tpu.memory_space<semaphore_mem>> -> memref<1x!tpu.dma_semaphore, #tpu.memory_space<semaphore_mem>>
    %551 = tpu.memref_squeeze %550 : memref<1x!tpu.dma_semaphore, #tpu.memory_space<semaphore_mem>> -> memref<!tpu.dma_semaphore, #tpu.memory_space<semaphore_mem>>
    tpu.wait_dma2 semaphore(%551 : memref<!tpu.dma_semaphore, #tpu.memory_space<semaphore_mem>>) src(%548 : memref<1x32xf32, #tpu.memory_space<any>>) dst(%549 : memref<1x32xf32, #tpu.memory_space<vmem>>)
    %c0_i32_383 = arith.constant 0 : i32
    %c0_i32_384 = arith.constant 0 : i32
    %c0_i32_385 = arith.constant 0 : i32
    %552 = tpu.memref_slice %arg2[%c0_i32_384, %c0_i32_385] : memref<16x32xf32, #tpu.memory_space<any>> -> memref<1x32xf32, #tpu.memory_space<any>>
    %c25_i32_386 = arith.constant 25 : i32
    %c0_i32_387 = arith.constant 0 : i32
    %553 = tpu.memref_slice %arg10[%c25_i32_386, %c0_i32_387] : memref<64x32xf32, #tpu.memory_space<vmem>> -> memref<1x32xf32, #tpu.memory_space<vmem>>
    %554 = tpu.memref_slice %arg15[%c0_i32_383] : memref<1x!tpu.dma_semaphore, #tpu.memory_space<semaphore_mem>> -> memref<1x!tpu.dma_semaphore, #tpu.memory_space<semaphore_mem>>
    %555 = tpu.memref_squeeze %554 : memref<1x!tpu.dma_semaphore, #tpu.memory_space<semaphore_mem>> -> memref<!tpu.dma_semaphore, #tpu.memory_space<semaphore_mem>>
    tpu.wait_dma2 semaphore(%555 : memref<!tpu.dma_semaphore, #tpu.memory_space<semaphore_mem>>) src(%552 : memref<1x32xf32, #tpu.memory_space<any>>) dst(%553 : memref<1x32xf32, #tpu.memory_space<vmem>>)
    %c0_i32_388 = arith.constant 0 : i32
    %c0_i32_389 = arith.constant 0 : i32
    %c0_i32_390 = arith.constant 0 : i32
    %556 = tpu.memref_slice %arg2[%c0_i32_389, %c0_i32_390] : memref<16x32xf32, #tpu.memory_space<any>> -> memref<1x32xf32, #tpu.memory_space<any>>
    %c26_i32_391 = arith.constant 26 : i32
    %c0_i32_392 = arith.constant 0 : i32
    %557 = tpu.memref_slice %arg10[%c26_i32_391, %c0_i32_392] : memref<64x32xf32, #tpu.memory_space<vmem>> -> memref<1x32xf32, #tpu.memory_space<vmem>>
    %558 = tpu.memref_slice %arg15[%c0_i32_388] : memref<1x!tpu.dma_semaphore, #tpu.memory_space<semaphore_mem>> -> memref<1x!tpu.dma_semaphore, #tpu.memory_space<semaphore_mem>>
    %559 = tpu.memref_squeeze %558 : memref<1x!tpu.dma_semaphore, #tpu.memory_space<semaphore_mem>> -> memref<!tpu.dma_semaphore, #tpu.memory_space<semaphore_mem>>
    tpu.wait_dma2 semaphore(%559 : memref<!tpu.dma_semaphore, #tpu.memory_space<semaphore_mem>>) src(%556 : memref<1x32xf32, #tpu.memory_space<any>>) dst(%557 : memref<1x32xf32, #tpu.memory_space<vmem>>)
    %c0_i32_393 = arith.constant 0 : i32
    %c0_i32_394 = arith.constant 0 : i32
    %c0_i32_395 = arith.constant 0 : i32
    %560 = tpu.memref_slice %arg2[%c0_i32_394, %c0_i32_395] : memref<16x32xf32, #tpu.memory_space<any>> -> memref<1x32xf32, #tpu.memory_space<any>>
    %c27_i32_396 = arith.constant 27 : i32
    %c0_i32_397 = arith.constant 0 : i32
    %561 = tpu.memref_slice %arg10[%c27_i32_396, %c0_i32_397] : memref<64x32xf32, #tpu.memory_space<vmem>> -> memref<1x32xf32, #tpu.memory_space<vmem>>
    %562 = tpu.memref_slice %arg15[%c0_i32_393] : memref<1x!tpu.dma_semaphore, #tpu.memory_space<semaphore_mem>> -> memref<1x!tpu.dma_semaphore, #tpu.memory_space<semaphore_mem>>
    %563 = tpu.memref_squeeze %562 : memref<1x!tpu.dma_semaphore, #tpu.memory_space<semaphore_mem>> -> memref<!tpu.dma_semaphore, #tpu.memory_space<semaphore_mem>>
    tpu.wait_dma2 semaphore(%563 : memref<!tpu.dma_semaphore, #tpu.memory_space<semaphore_mem>>) src(%560 : memref<1x32xf32, #tpu.memory_space<any>>) dst(%561 : memref<1x32xf32, #tpu.memory_space<vmem>>)
    %c0_i32_398 = arith.constant 0 : i32
    %c0_i32_399 = arith.constant 0 : i32
    %c0_i32_400 = arith.constant 0 : i32
    %564 = tpu.memref_slice %arg2[%c0_i32_399, %c0_i32_400] : memref<16x32xf32, #tpu.memory_space<any>> -> memref<1x32xf32, #tpu.memory_space<any>>
    %c28_i32_401 = arith.constant 28 : i32
    %c0_i32_402 = arith.constant 0 : i32
    %565 = tpu.memref_slice %arg10[%c28_i32_401, %c0_i32_402] : memref<64x32xf32, #tpu.memory_space<vmem>> -> memref<1x32xf32, #tpu.memory_space<vmem>>
    %566 = tpu.memref_slice %arg15[%c0_i32_398] : memref<1x!tpu.dma_semaphore, #tpu.memory_space<semaphore_mem>> -> memref<1x!tpu.dma_semaphore, #tpu.memory_space<semaphore_mem>>
    %567 = tpu.memref_squeeze %566 : memref<1x!tpu.dma_semaphore, #tpu.memory_space<semaphore_mem>> -> memref<!tpu.dma_semaphore, #tpu.memory_space<semaphore_mem>>
    tpu.wait_dma2 semaphore(%567 : memref<!tpu.dma_semaphore, #tpu.memory_space<semaphore_mem>>) src(%564 : memref<1x32xf32, #tpu.memory_space<any>>) dst(%565 : memref<1x32xf32, #tpu.memory_space<vmem>>)
    %c0_i32_403 = arith.constant 0 : i32
    %c0_i32_404 = arith.constant 0 : i32
    %c0_i32_405 = arith.constant 0 : i32
    %568 = tpu.memref_slice %arg2[%c0_i32_404, %c0_i32_405] : memref<16x32xf32, #tpu.memory_space<any>> -> memref<1x32xf32, #tpu.memory_space<any>>
    %c29_i32_406 = arith.constant 29 : i32
    %c0_i32_407 = arith.constant 0 : i32
    %569 = tpu.memref_slice %arg10[%c29_i32_406, %c0_i32_407] : memref<64x32xf32, #tpu.memory_space<vmem>> -> memref<1x32xf32, #tpu.memory_space<vmem>>
    %570 = tpu.memref_slice %arg15[%c0_i32_403] : memref<1x!tpu.dma_semaphore, #tpu.memory_space<semaphore_mem>> -> memref<1x!tpu.dma_semaphore, #tpu.memory_space<semaphore_mem>>
    %571 = tpu.memref_squeeze %570 : memref<1x!tpu.dma_semaphore, #tpu.memory_space<semaphore_mem>> -> memref<!tpu.dma_semaphore, #tpu.memory_space<semaphore_mem>>
    tpu.wait_dma2 semaphore(%571 : memref<!tpu.dma_semaphore, #tpu.memory_space<semaphore_mem>>) src(%568 : memref<1x32xf32, #tpu.memory_space<any>>) dst(%569 : memref<1x32xf32, #tpu.memory_space<vmem>>)
    %c0_i32_408 = arith.constant 0 : i32
    %c0_i32_409 = arith.constant 0 : i32
    %c0_i32_410 = arith.constant 0 : i32
    %572 = tpu.memref_slice %arg2[%c0_i32_409, %c0_i32_410] : memref<16x32xf32, #tpu.memory_space<any>> -> memref<1x32xf32, #tpu.memory_space<any>>
    %c30_i32_411 = arith.constant 30 : i32
    %c0_i32_412 = arith.constant 0 : i32
    %573 = tpu.memref_slice %arg10[%c30_i32_411, %c0_i32_412] : memref<64x32xf32, #tpu.memory_space<vmem>> -> memref<1x32xf32, #tpu.memory_space<vmem>>
    %574 = tpu.memref_slice %arg15[%c0_i32_408] : memref<1x!tpu.dma_semaphore, #tpu.memory_space<semaphore_mem>> -> memref<1x!tpu.dma_semaphore, #tpu.memory_space<semaphore_mem>>
    %575 = tpu.memref_squeeze %574 : memref<1x!tpu.dma_semaphore, #tpu.memory_space<semaphore_mem>> -> memref<!tpu.dma_semaphore, #tpu.memory_space<semaphore_mem>>
    tpu.wait_dma2 semaphore(%575 : memref<!tpu.dma_semaphore, #tpu.memory_space<semaphore_mem>>) src(%572 : memref<1x32xf32, #tpu.memory_space<any>>) dst(%573 : memref<1x32xf32, #tpu.memory_space<vmem>>)
    %c0_i32_413 = arith.constant 0 : i32
    %c0_i32_414 = arith.constant 0 : i32
    %c0_i32_415 = arith.constant 0 : i32
    %576 = tpu.memref_slice %arg2[%c0_i32_414, %c0_i32_415] : memref<16x32xf32, #tpu.memory_space<any>> -> memref<1x32xf32, #tpu.memory_space<any>>
    %c31_i32_416 = arith.constant 31 : i32
    %c0_i32_417 = arith.constant 0 : i32
    %577 = tpu.memref_slice %arg10[%c31_i32_416, %c0_i32_417] : memref<64x32xf32, #tpu.memory_space<vmem>> -> memref<1x32xf32, #tpu.memory_space<vmem>>
    %578 = tpu.memref_slice %arg15[%c0_i32_413] : memref<1x!tpu.dma_semaphore, #tpu.memory_space<semaphore_mem>> -> memref<1x!tpu.dma_semaphore, #tpu.memory_space<semaphore_mem>>
    %579 = tpu.memref_squeeze %578 : memref<1x!tpu.dma_semaphore, #tpu.memory_space<semaphore_mem>> -> memref<!tpu.dma_semaphore, #tpu.memory_space<semaphore_mem>>
    tpu.wait_dma2 semaphore(%579 : memref<!tpu.dma_semaphore, #tpu.memory_space<semaphore_mem>>) src(%576 : memref<1x32xf32, #tpu.memory_space<any>>) dst(%577 : memref<1x32xf32, #tpu.memory_space<vmem>>)
    %c0_i32_418 = arith.constant 0 : i32
    %c0_i32_419 = arith.constant 0 : i32
    %c0_i32_420 = arith.constant 0 : i32
    %580 = tpu.memref_slice %arg2[%c0_i32_419, %c0_i32_420] : memref<16x32xf32, #tpu.memory_space<any>> -> memref<1x32xf32, #tpu.memory_space<any>>
    %c32_i32_421 = arith.constant 32 : i32
    %c0_i32_422 = arith.constant 0 : i32
    %581 = tpu.memref_slice %arg10[%c32_i32_421, %c0_i32_422] : memref<64x32xf32, #tpu.memory_space<vmem>> -> memref<1x32xf32, #tpu.memory_space<vmem>>
    %582 = tpu.memref_slice %arg15[%c0_i32_418] : memref<1x!tpu.dma_semaphore, #tpu.memory_space<semaphore_mem>> -> memref<1x!tpu.dma_semaphore, #tpu.memory_space<semaphore_mem>>
    %583 = tpu.memref_squeeze %582 : memref<1x!tpu.dma_semaphore, #tpu.memory_space<semaphore_mem>> -> memref<!tpu.dma_semaphore, #tpu.memory_space<semaphore_mem>>
    tpu.wait_dma2 semaphore(%583 : memref<!tpu.dma_semaphore, #tpu.memory_space<semaphore_mem>>) src(%580 : memref<1x32xf32, #tpu.memory_space<any>>) dst(%581 : memref<1x32xf32, #tpu.memory_space<vmem>>)
    %c0_i32_423 = arith.constant 0 : i32
    %c0_i32_424 = arith.constant 0 : i32
    %c0_i32_425 = arith.constant 0 : i32
    %584 = tpu.memref_slice %arg2[%c0_i32_424, %c0_i32_425] : memref<16x32xf32, #tpu.memory_space<any>> -> memref<1x32xf32, #tpu.memory_space<any>>
    %c33_i32_426 = arith.constant 33 : i32
    %c0_i32_427 = arith.constant 0 : i32
    %585 = tpu.memref_slice %arg10[%c33_i32_426, %c0_i32_427] : memref<64x32xf32, #tpu.memory_space<vmem>> -> memref<1x32xf32, #tpu.memory_space<vmem>>
    %586 = tpu.memref_slice %arg15[%c0_i32_423] : memref<1x!tpu.dma_semaphore, #tpu.memory_space<semaphore_mem>> -> memref<1x!tpu.dma_semaphore, #tpu.memory_space<semaphore_mem>>
    %587 = tpu.memref_squeeze %586 : memref<1x!tpu.dma_semaphore, #tpu.memory_space<semaphore_mem>> -> memref<!tpu.dma_semaphore, #tpu.memory_space<semaphore_mem>>
    tpu.wait_dma2 semaphore(%587 : memref<!tpu.dma_semaphore, #tpu.memory_space<semaphore_mem>>) src(%584 : memref<1x32xf32, #tpu.memory_space<any>>) dst(%585 : memref<1x32xf32, #tpu.memory_space<vmem>>)
    %c0_i32_428 = arith.constant 0 : i32
    %c0_i32_429 = arith.constant 0 : i32
    %c0_i32_430 = arith.constant 0 : i32
    %588 = tpu.memref_slice %arg2[%c0_i32_429, %c0_i32_430] : memref<16x32xf32, #tpu.memory_space<any>> -> memref<1x32xf32, #tpu.memory_space<any>>
    %c34_i32_431 = arith.constant 34 : i32
    %c0_i32_432 = arith.constant 0 : i32
    %589 = tpu.memref_slice %arg10[%c34_i32_431, %c0_i32_432] : memref<64x32xf32, #tpu.memory_space<vmem>> -> memref<1x32xf32, #tpu.memory_space<vmem>>
    %590 = tpu.memref_slice %arg15[%c0_i32_428] : memref<1x!tpu.dma_semaphore, #tpu.memory_space<semaphore_mem>> -> memref<1x!tpu.dma_semaphore, #tpu.memory_space<semaphore_mem>>
    %591 = tpu.memref_squeeze %590 : memref<1x!tpu.dma_semaphore, #tpu.memory_space<semaphore_mem>> -> memref<!tpu.dma_semaphore, #tpu.memory_space<semaphore_mem>>
    tpu.wait_dma2 semaphore(%591 : memref<!tpu.dma_semaphore, #tpu.memory_space<semaphore_mem>>) src(%588 : memref<1x32xf32, #tpu.memory_space<any>>) dst(%589 : memref<1x32xf32, #tpu.memory_space<vmem>>)
    %c0_i32_433 = arith.constant 0 : i32
    %c0_i32_434 = arith.constant 0 : i32
    %c0_i32_435 = arith.constant 0 : i32
    %592 = tpu.memref_slice %arg2[%c0_i32_434, %c0_i32_435] : memref<16x32xf32, #tpu.memory_space<any>> -> memref<1x32xf32, #tpu.memory_space<any>>
    %c35_i32_436 = arith.constant 35 : i32
    %c0_i32_437 = arith.constant 0 : i32
    %593 = tpu.memref_slice %arg10[%c35_i32_436, %c0_i32_437] : memref<64x32xf32, #tpu.memory_space<vmem>> -> memref<1x32xf32, #tpu.memory_space<vmem>>
    %594 = tpu.memref_slice %arg15[%c0_i32_433] : memref<1x!tpu.dma_semaphore, #tpu.memory_space<semaphore_mem>> -> memref<1x!tpu.dma_semaphore, #tpu.memory_space<semaphore_mem>>
    %595 = tpu.memref_squeeze %594 : memref<1x!tpu.dma_semaphore, #tpu.memory_space<semaphore_mem>> -> memref<!tpu.dma_semaphore, #tpu.memory_space<semaphore_mem>>
    tpu.wait_dma2 semaphore(%595 : memref<!tpu.dma_semaphore, #tpu.memory_space<semaphore_mem>>) src(%592 : memref<1x32xf32, #tpu.memory_space<any>>) dst(%593 : memref<1x32xf32, #tpu.memory_space<vmem>>)
    %c0_i32_438 = arith.constant 0 : i32
    %c0_i32_439 = arith.constant 0 : i32
    %c0_i32_440 = arith.constant 0 : i32
    %596 = tpu.memref_slice %arg2[%c0_i32_439, %c0_i32_440] : memref<16x32xf32, #tpu.memory_space<any>> -> memref<1x32xf32, #tpu.memory_space<any>>
    %c36_i32_441 = arith.constant 36 : i32
    %c0_i32_442 = arith.constant 0 : i32
    %597 = tpu.memref_slice %arg10[%c36_i32_441, %c0_i32_442] : memref<64x32xf32, #tpu.memory_space<vmem>> -> memref<1x32xf32, #tpu.memory_space<vmem>>
    %598 = tpu.memref_slice %arg15[%c0_i32_438] : memref<1x!tpu.dma_semaphore, #tpu.memory_space<semaphore_mem>> -> memref<1x!tpu.dma_semaphore, #tpu.memory_space<semaphore_mem>>
    %599 = tpu.memref_squeeze %598 : memref<1x!tpu.dma_semaphore, #tpu.memory_space<semaphore_mem>> -> memref<!tpu.dma_semaphore, #tpu.memory_space<semaphore_mem>>
    tpu.wait_dma2 semaphore(%599 : memref<!tpu.dma_semaphore, #tpu.memory_space<semaphore_mem>>) src(%596 : memref<1x32xf32, #tpu.memory_space<any>>) dst(%597 : memref<1x32xf32, #tpu.memory_space<vmem>>)
    %c0_i32_443 = arith.constant 0 : i32
    %c0_i32_444 = arith.constant 0 : i32
    %c0_i32_445 = arith.constant 0 : i32
    %600 = tpu.memref_slice %arg2[%c0_i32_444, %c0_i32_445] : memref<16x32xf32, #tpu.memory_space<any>> -> memref<1x32xf32, #tpu.memory_space<any>>
    %c37_i32_446 = arith.constant 37 : i32
    %c0_i32_447 = arith.constant 0 : i32
    %601 = tpu.memref_slice %arg10[%c37_i32_446, %c0_i32_447] : memref<64x32xf32, #tpu.memory_space<vmem>> -> memref<1x32xf32, #tpu.memory_space<vmem>>
    %602 = tpu.memref_slice %arg15[%c0_i32_443] : memref<1x!tpu.dma_semaphore, #tpu.memory_space<semaphore_mem>> -> memref<1x!tpu.dma_semaphore, #tpu.memory_space<semaphore_mem>>
    %603 = tpu.memref_squeeze %602 : memref<1x!tpu.dma_semaphore, #tpu.memory_space<semaphore_mem>> -> memref<!tpu.dma_semaphore, #tpu.memory_space<semaphore_mem>>
    tpu.wait_dma2 semaphore(%603 : memref<!tpu.dma_semaphore, #tpu.memory_space<semaphore_mem>>) src(%600 : memref<1x32xf32, #tpu.memory_space<any>>) dst(%601 : memref<1x32xf32, #tpu.memory_space<vmem>>)
    %c0_i32_448 = arith.constant 0 : i32
    %c0_i32_449 = arith.constant 0 : i32
    %c0_i32_450 = arith.constant 0 : i32
    %604 = tpu.memref_slice %arg2[%c0_i32_449, %c0_i32_450] : memref<16x32xf32, #tpu.memory_space<any>> -> memref<1x32xf32, #tpu.memory_space<any>>
    %c38_i32_451 = arith.constant 38 : i32
    %c0_i32_452 = arith.constant 0 : i32
    %605 = tpu.memref_slice %arg10[%c38_i32_451, %c0_i32_452] : memref<64x32xf32, #tpu.memory_space<vmem>> -> memref<1x32xf32, #tpu.memory_space<vmem>>
    %606 = tpu.memref_slice %arg15[%c0_i32_448] : memref<1x!tpu.dma_semaphore, #tpu.memory_space<semaphore_mem>> -> memref<1x!tpu.dma_semaphore, #tpu.memory_space<semaphore_mem>>
    %607 = tpu.memref_squeeze %606 : memref<1x!tpu.dma_semaphore, #tpu.memory_space<semaphore_mem>> -> memref<!tpu.dma_semaphore, #tpu.memory_space<semaphore_mem>>
    tpu.wait_dma2 semaphore(%607 : memref<!tpu.dma_semaphore, #tpu.memory_space<semaphore_mem>>) src(%604 : memref<1x32xf32, #tpu.memory_space<any>>) dst(%605 : memref<1x32xf32, #tpu.memory_space<vmem>>)
    %c0_i32_453 = arith.constant 0 : i32
    %c0_i32_454 = arith.constant 0 : i32
    %c0_i32_455 = arith.constant 0 : i32
    %608 = tpu.memref_slice %arg2[%c0_i32_454, %c0_i32_455] : memref<16x32xf32, #tpu.memory_space<any>> -> memref<1x32xf32, #tpu.memory_space<any>>
    %c39_i32_456 = arith.constant 39 : i32
    %c0_i32_457 = arith.constant 0 : i32
    %609 = tpu.memref_slice %arg10[%c39_i32_456, %c0_i32_457] : memref<64x32xf32, #tpu.memory_space<vmem>> -> memref<1x32xf32, #tpu.memory_space<vmem>>
    %610 = tpu.memref_slice %arg15[%c0_i32_453] : memref<1x!tpu.dma_semaphore, #tpu.memory_space<semaphore_mem>> -> memref<1x!tpu.dma_semaphore, #tpu.memory_space<semaphore_mem>>
    %611 = tpu.memref_squeeze %610 : memref<1x!tpu.dma_semaphore, #tpu.memory_space<semaphore_mem>> -> memref<!tpu.dma_semaphore, #tpu.memory_space<semaphore_mem>>
    tpu.wait_dma2 semaphore(%611 : memref<!tpu.dma_semaphore, #tpu.memory_space<semaphore_mem>>) src(%608 : memref<1x32xf32, #tpu.memory_space<any>>) dst(%609 : memref<1x32xf32, #tpu.memory_space<vmem>>)
    %c0_i32_458 = arith.constant 0 : i32
    %c0_i32_459 = arith.constant 0 : i32
    %c0_i32_460 = arith.constant 0 : i32
    %612 = tpu.memref_slice %arg2[%c0_i32_459, %c0_i32_460] : memref<16x32xf32, #tpu.memory_space<any>> -> memref<1x32xf32, #tpu.memory_space<any>>
    %c40_i32_461 = arith.constant 40 : i32
    %c0_i32_462 = arith.constant 0 : i32
    %613 = tpu.memref_slice %arg10[%c40_i32_461, %c0_i32_462] : memref<64x32xf32, #tpu.memory_space<vmem>> -> memref<1x32xf32, #tpu.memory_space<vmem>>
    %614 = tpu.memref_slice %arg15[%c0_i32_458] : memref<1x!tpu.dma_semaphore, #tpu.memory_space<semaphore_mem>> -> memref<1x!tpu.dma_semaphore, #tpu.memory_space<semaphore_mem>>
    %615 = tpu.memref_squeeze %614 : memref<1x!tpu.dma_semaphore, #tpu.memory_space<semaphore_mem>> -> memref<!tpu.dma_semaphore, #tpu.memory_space<semaphore_mem>>
    tpu.wait_dma2 semaphore(%615 : memref<!tpu.dma_semaphore, #tpu.memory_space<semaphore_mem>>) src(%612 : memref<1x32xf32, #tpu.memory_space<any>>) dst(%613 : memref<1x32xf32, #tpu.memory_space<vmem>>)
    %c0_i32_463 = arith.constant 0 : i32
    %c0_i32_464 = arith.constant 0 : i32
    %c0_i32_465 = arith.constant 0 : i32
    %616 = tpu.memref_slice %arg2[%c0_i32_464, %c0_i32_465] : memref<16x32xf32, #tpu.memory_space<any>> -> memref<1x32xf32, #tpu.memory_space<any>>
    %c41_i32_466 = arith.constant 41 : i32
    %c0_i32_467 = arith.constant 0 : i32
    %617 = tpu.memref_slice %arg10[%c41_i32_466, %c0_i32_467] : memref<64x32xf32, #tpu.memory_space<vmem>> -> memref<1x32xf32, #tpu.memory_space<vmem>>
    %618 = tpu.memref_slice %arg15[%c0_i32_463] : memref<1x!tpu.dma_semaphore, #tpu.memory_space<semaphore_mem>> -> memref<1x!tpu.dma_semaphore, #tpu.memory_space<semaphore_mem>>
    %619 = tpu.memref_squeeze %618 : memref<1x!tpu.dma_semaphore, #tpu.memory_space<semaphore_mem>> -> memref<!tpu.dma_semaphore, #tpu.memory_space<semaphore_mem>>
    tpu.wait_dma2 semaphore(%619 : memref<!tpu.dma_semaphore, #tpu.memory_space<semaphore_mem>>) src(%616 : memref<1x32xf32, #tpu.memory_space<any>>) dst(%617 : memref<1x32xf32, #tpu.memory_space<vmem>>)
    %c0_i32_468 = arith.constant 0 : i32
    %c0_i32_469 = arith.constant 0 : i32
    %c0_i32_470 = arith.constant 0 : i32
    %620 = tpu.memref_slice %arg2[%c0_i32_469, %c0_i32_470] : memref<16x32xf32, #tpu.memory_space<any>> -> memref<1x32xf32, #tpu.memory_space<any>>
    %c42_i32_471 = arith.constant 42 : i32
    %c0_i32_472 = arith.constant 0 : i32
    %621 = tpu.memref_slice %arg10[%c42_i32_471, %c0_i32_472] : memref<64x32xf32, #tpu.memory_space<vmem>> -> memref<1x32xf32, #tpu.memory_space<vmem>>
    %622 = tpu.memref_slice %arg15[%c0_i32_468] : memref<1x!tpu.dma_semaphore, #tpu.memory_space<semaphore_mem>> -> memref<1x!tpu.dma_semaphore, #tpu.memory_space<semaphore_mem>>
    %623 = tpu.memref_squeeze %622 : memref<1x!tpu.dma_semaphore, #tpu.memory_space<semaphore_mem>> -> memref<!tpu.dma_semaphore, #tpu.memory_space<semaphore_mem>>
    tpu.wait_dma2 semaphore(%623 : memref<!tpu.dma_semaphore, #tpu.memory_space<semaphore_mem>>) src(%620 : memref<1x32xf32, #tpu.memory_space<any>>) dst(%621 : memref<1x32xf32, #tpu.memory_space<vmem>>)
    %c0_i32_473 = arith.constant 0 : i32
    %c0_i32_474 = arith.constant 0 : i32
    %c0_i32_475 = arith.constant 0 : i32
    %624 = tpu.memref_slice %arg2[%c0_i32_474, %c0_i32_475] : memref<16x32xf32, #tpu.memory_space<any>> -> memref<1x32xf32, #tpu.memory_space<any>>
    %c43_i32_476 = arith.constant 43 : i32
    %c0_i32_477 = arith.constant 0 : i32
    %625 = tpu.memref_slice %arg10[%c43_i32_476, %c0_i32_477] : memref<64x32xf32, #tpu.memory_space<vmem>> -> memref<1x32xf32, #tpu.memory_space<vmem>>
    %626 = tpu.memref_slice %arg15[%c0_i32_473] : memref<1x!tpu.dma_semaphore, #tpu.memory_space<semaphore_mem>> -> memref<1x!tpu.dma_semaphore, #tpu.memory_space<semaphore_mem>>
    %627 = tpu.memref_squeeze %626 : memref<1x!tpu.dma_semaphore, #tpu.memory_space<semaphore_mem>> -> memref<!tpu.dma_semaphore, #tpu.memory_space<semaphore_mem>>
    tpu.wait_dma2 semaphore(%627 : memref<!tpu.dma_semaphore, #tpu.memory_space<semaphore_mem>>) src(%624 : memref<1x32xf32, #tpu.memory_space<any>>) dst(%625 : memref<1x32xf32, #tpu.memory_space<vmem>>)
    %c0_i32_478 = arith.constant 0 : i32
    %c0_i32_479 = arith.constant 0 : i32
    %c0_i32_480 = arith.constant 0 : i32
    %628 = tpu.memref_slice %arg2[%c0_i32_479, %c0_i32_480] : memref<16x32xf32, #tpu.memory_space<any>> -> memref<1x32xf32, #tpu.memory_space<any>>
    %c44_i32_481 = arith.constant 44 : i32
    %c0_i32_482 = arith.constant 0 : i32
    %629 = tpu.memref_slice %arg10[%c44_i32_481, %c0_i32_482] : memref<64x32xf32, #tpu.memory_space<vmem>> -> memref<1x32xf32, #tpu.memory_space<vmem>>
    %630 = tpu.memref_slice %arg15[%c0_i32_478] : memref<1x!tpu.dma_semaphore, #tpu.memory_space<semaphore_mem>> -> memref<1x!tpu.dma_semaphore, #tpu.memory_space<semaphore_mem>>
    %631 = tpu.memref_squeeze %630 : memref<1x!tpu.dma_semaphore, #tpu.memory_space<semaphore_mem>> -> memref<!tpu.dma_semaphore, #tpu.memory_space<semaphore_mem>>
    tpu.wait_dma2 semaphore(%631 : memref<!tpu.dma_semaphore, #tpu.memory_space<semaphore_mem>>) src(%628 : memref<1x32xf32, #tpu.memory_space<any>>) dst(%629 : memref<1x32xf32, #tpu.memory_space<vmem>>)
    %c0_i32_483 = arith.constant 0 : i32
    %c0_i32_484 = arith.constant 0 : i32
    %c0_i32_485 = arith.constant 0 : i32
    %632 = tpu.memref_slice %arg2[%c0_i32_484, %c0_i32_485] : memref<16x32xf32, #tpu.memory_space<any>> -> memref<1x32xf32, #tpu.memory_space<any>>
    %c45_i32_486 = arith.constant 45 : i32
    %c0_i32_487 = arith.constant 0 : i32
    %633 = tpu.memref_slice %arg10[%c45_i32_486, %c0_i32_487] : memref<64x32xf32, #tpu.memory_space<vmem>> -> memref<1x32xf32, #tpu.memory_space<vmem>>
    %634 = tpu.memref_slice %arg15[%c0_i32_483] : memref<1x!tpu.dma_semaphore, #tpu.memory_space<semaphore_mem>> -> memref<1x!tpu.dma_semaphore, #tpu.memory_space<semaphore_mem>>
    %635 = tpu.memref_squeeze %634 : memref<1x!tpu.dma_semaphore, #tpu.memory_space<semaphore_mem>> -> memref<!tpu.dma_semaphore, #tpu.memory_space<semaphore_mem>>
    tpu.wait_dma2 semaphore(%635 : memref<!tpu.dma_semaphore, #tpu.memory_space<semaphore_mem>>) src(%632 : memref<1x32xf32, #tpu.memory_space<any>>) dst(%633 : memref<1x32xf32, #tpu.memory_space<vmem>>)
    %c0_i32_488 = arith.constant 0 : i32
    %c0_i32_489 = arith.constant 0 : i32
    %c0_i32_490 = arith.constant 0 : i32
    %636 = tpu.memref_slice %arg2[%c0_i32_489, %c0_i32_490] : memref<16x32xf32, #tpu.memory_space<any>> -> memref<1x32xf32, #tpu.memory_space<any>>
    %c46_i32_491 = arith.constant 46 : i32
    %c0_i32_492 = arith.constant 0 : i32
    %637 = tpu.memref_slice %arg10[%c46_i32_491, %c0_i32_492] : memref<64x32xf32, #tpu.memory_space<vmem>> -> memref<1x32xf32, #tpu.memory_space<vmem>>
    %638 = tpu.memref_slice %arg15[%c0_i32_488] : memref<1x!tpu.dma_semaphore, #tpu.memory_space<semaphore_mem>> -> memref<1x!tpu.dma_semaphore, #tpu.memory_space<semaphore_mem>>
    %639 = tpu.memref_squeeze %638 : memref<1x!tpu.dma_semaphore, #tpu.memory_space<semaphore_mem>> -> memref<!tpu.dma_semaphore, #tpu.memory_space<semaphore_mem>>
    tpu.wait_dma2 semaphore(%639 : memref<!tpu.dma_semaphore, #tpu.memory_space<semaphore_mem>>) src(%636 : memref<1x32xf32, #tpu.memory_space<any>>) dst(%637 : memref<1x32xf32, #tpu.memory_space<vmem>>)
    %c0_i32_493 = arith.constant 0 : i32
    %c0_i32_494 = arith.constant 0 : i32
    %c0_i32_495 = arith.constant 0 : i32
    %640 = tpu.memref_slice %arg2[%c0_i32_494, %c0_i32_495] : memref<16x32xf32, #tpu.memory_space<any>> -> memref<1x32xf32, #tpu.memory_space<any>>
    %c47_i32_496 = arith.constant 47 : i32
    %c0_i32_497 = arith.constant 0 : i32
    %641 = tpu.memref_slice %arg10[%c47_i32_496, %c0_i32_497] : memref<64x32xf32, #tpu.memory_space<vmem>> -> memref<1x32xf32, #tpu.memory_space<vmem>>
    %642 = tpu.memref_slice %arg15[%c0_i32_493] : memref<1x!tpu.dma_semaphore, #tpu.memory_space<semaphore_mem>> -> memref<1x!tpu.dma_semaphore, #tpu.memory_space<semaphore_mem>>
    %643 = tpu.memref_squeeze %642 : memref<1x!tpu.dma_semaphore, #tpu.memory_space<semaphore_mem>> -> memref<!tpu.dma_semaphore, #tpu.memory_space<semaphore_mem>>
    tpu.wait_dma2 semaphore(%643 : memref<!tpu.dma_semaphore, #tpu.memory_space<semaphore_mem>>) src(%640 : memref<1x32xf32, #tpu.memory_space<any>>) dst(%641 : memref<1x32xf32, #tpu.memory_space<vmem>>)
    %c0_i32_498 = arith.constant 0 : i32
    %c0_i32_499 = arith.constant 0 : i32
    %c0_i32_500 = arith.constant 0 : i32
    %644 = tpu.memref_slice %arg2[%c0_i32_499, %c0_i32_500] : memref<16x32xf32, #tpu.memory_space<any>> -> memref<1x32xf32, #tpu.memory_space<any>>
    %c48_i32_501 = arith.constant 48 : i32
    %c0_i32_502 = arith.constant 0 : i32
    %645 = tpu.memref_slice %arg10[%c48_i32_501, %c0_i32_502] : memref<64x32xf32, #tpu.memory_space<vmem>> -> memref<1x32xf32, #tpu.memory_space<vmem>>
    %646 = tpu.memref_slice %arg15[%c0_i32_498] : memref<1x!tpu.dma_semaphore, #tpu.memory_space<semaphore_mem>> -> memref<1x!tpu.dma_semaphore, #tpu.memory_space<semaphore_mem>>
    %647 = tpu.memref_squeeze %646 : memref<1x!tpu.dma_semaphore, #tpu.memory_space<semaphore_mem>> -> memref<!tpu.dma_semaphore, #tpu.memory_space<semaphore_mem>>
    tpu.wait_dma2 semaphore(%647 : memref<!tpu.dma_semaphore, #tpu.memory_space<semaphore_mem>>) src(%644 : memref<1x32xf32, #tpu.memory_space<any>>) dst(%645 : memref<1x32xf32, #tpu.memory_space<vmem>>)
    %c0_i32_503 = arith.constant 0 : i32
    %c0_i32_504 = arith.constant 0 : i32
    %c0_i32_505 = arith.constant 0 : i32
    %648 = tpu.memref_slice %arg2[%c0_i32_504, %c0_i32_505] : memref<16x32xf32, #tpu.memory_space<any>> -> memref<1x32xf32, #tpu.memory_space<any>>
    %c49_i32_506 = arith.constant 49 : i32
    %c0_i32_507 = arith.constant 0 : i32
    %649 = tpu.memref_slice %arg10[%c49_i32_506, %c0_i32_507] : memref<64x32xf32, #tpu.memory_space<vmem>> -> memref<1x32xf32, #tpu.memory_space<vmem>>
    %650 = tpu.memref_slice %arg15[%c0_i32_503] : memref<1x!tpu.dma_semaphore, #tpu.memory_space<semaphore_mem>> -> memref<1x!tpu.dma_semaphore, #tpu.memory_space<semaphore_mem>>
    %651 = tpu.memref_squeeze %650 : memref<1x!tpu.dma_semaphore, #tpu.memory_space<semaphore_mem>> -> memref<!tpu.dma_semaphore, #tpu.memory_space<semaphore_mem>>
    tpu.wait_dma2 semaphore(%651 : memref<!tpu.dma_semaphore, #tpu.memory_space<semaphore_mem>>) src(%648 : memref<1x32xf32, #tpu.memory_space<any>>) dst(%649 : memref<1x32xf32, #tpu.memory_space<vmem>>)
    %c0_i32_508 = arith.constant 0 : i32
    %c0_i32_509 = arith.constant 0 : i32
    %c0_i32_510 = arith.constant 0 : i32
    %652 = tpu.memref_slice %arg2[%c0_i32_509, %c0_i32_510] : memref<16x32xf32, #tpu.memory_space<any>> -> memref<1x32xf32, #tpu.memory_space<any>>
    %c50_i32_511 = arith.constant 50 : i32
    %c0_i32_512 = arith.constant 0 : i32
    %653 = tpu.memref_slice %arg10[%c50_i32_511, %c0_i32_512] : memref<64x32xf32, #tpu.memory_space<vmem>> -> memref<1x32xf32, #tpu.memory_space<vmem>>
    %654 = tpu.memref_slice %arg15[%c0_i32_508] : memref<1x!tpu.dma_semaphore, #tpu.memory_space<semaphore_mem>> -> memref<1x!tpu.dma_semaphore, #tpu.memory_space<semaphore_mem>>
    %655 = tpu.memref_squeeze %654 : memref<1x!tpu.dma_semaphore, #tpu.memory_space<semaphore_mem>> -> memref<!tpu.dma_semaphore, #tpu.memory_space<semaphore_mem>>
    tpu.wait_dma2 semaphore(%655 : memref<!tpu.dma_semaphore, #tpu.memory_space<semaphore_mem>>) src(%652 : memref<1x32xf32, #tpu.memory_space<any>>) dst(%653 : memref<1x32xf32, #tpu.memory_space<vmem>>)
    %c0_i32_513 = arith.constant 0 : i32
    %c0_i32_514 = arith.constant 0 : i32
    %c0_i32_515 = arith.constant 0 : i32
    %656 = tpu.memref_slice %arg2[%c0_i32_514, %c0_i32_515] : memref<16x32xf32, #tpu.memory_space<any>> -> memref<1x32xf32, #tpu.memory_space<any>>
    %c51_i32_516 = arith.constant 51 : i32
    %c0_i32_517 = arith.constant 0 : i32
    %657 = tpu.memref_slice %arg10[%c51_i32_516, %c0_i32_517] : memref<64x32xf32, #tpu.memory_space<vmem>> -> memref<1x32xf32, #tpu.memory_space<vmem>>
    %658 = tpu.memref_slice %arg15[%c0_i32_513] : memref<1x!tpu.dma_semaphore, #tpu.memory_space<semaphore_mem>> -> memref<1x!tpu.dma_semaphore, #tpu.memory_space<semaphore_mem>>
    %659 = tpu.memref_squeeze %658 : memref<1x!tpu.dma_semaphore, #tpu.memory_space<semaphore_mem>> -> memref<!tpu.dma_semaphore, #tpu.memory_space<semaphore_mem>>
    tpu.wait_dma2 semaphore(%659 : memref<!tpu.dma_semaphore, #tpu.memory_space<semaphore_mem>>) src(%656 : memref<1x32xf32, #tpu.memory_space<any>>) dst(%657 : memref<1x32xf32, #tpu.memory_space<vmem>>)
    %c0_i32_518 = arith.constant 0 : i32
    %c0_i32_519 = arith.constant 0 : i32
    %c0_i32_520 = arith.constant 0 : i32
    %660 = tpu.memref_slice %arg2[%c0_i32_519, %c0_i32_520] : memref<16x32xf32, #tpu.memory_space<any>> -> memref<1x32xf32, #tpu.memory_space<any>>
    %c52_i32_521 = arith.constant 52 : i32
    %c0_i32_522 = arith.constant 0 : i32
    %661 = tpu.memref_slice %arg10[%c52_i32_521, %c0_i32_522] : memref<64x32xf32, #tpu.memory_space<vmem>> -> memref<1x32xf32, #tpu.memory_space<vmem>>
    %662 = tpu.memref_slice %arg15[%c0_i32_518] : memref<1x!tpu.dma_semaphore, #tpu.memory_space<semaphore_mem>> -> memref<1x!tpu.dma_semaphore, #tpu.memory_space<semaphore_mem>>
    %663 = tpu.memref_squeeze %662 : memref<1x!tpu.dma_semaphore, #tpu.memory_space<semaphore_mem>> -> memref<!tpu.dma_semaphore, #tpu.memory_space<semaphore_mem>>
    tpu.wait_dma2 semaphore(%663 : memref<!tpu.dma_semaphore, #tpu.memory_space<semaphore_mem>>) src(%660 : memref<1x32xf32, #tpu.memory_space<any>>) dst(%661 : memref<1x32xf32, #tpu.memory_space<vmem>>)
    %c0_i32_523 = arith.constant 0 : i32
    %c0_i32_524 = arith.constant 0 : i32
    %c0_i32_525 = arith.constant 0 : i32
    %664 = tpu.memref_slice %arg2[%c0_i32_524, %c0_i32_525] : memref<16x32xf32, #tpu.memory_space<any>> -> memref<1x32xf32, #tpu.memory_space<any>>
    %c53_i32_526 = arith.constant 53 : i32
    %c0_i32_527 = arith.constant 0 : i32
    %665 = tpu.memref_slice %arg10[%c53_i32_526, %c0_i32_527] : memref<64x32xf32, #tpu.memory_space<vmem>> -> memref<1x32xf32, #tpu.memory_space<vmem>>
    %666 = tpu.memref_slice %arg15[%c0_i32_523] : memref<1x!tpu.dma_semaphore, #tpu.memory_space<semaphore_mem>> -> memref<1x!tpu.dma_semaphore, #tpu.memory_space<semaphore_mem>>
    %667 = tpu.memref_squeeze %666 : memref<1x!tpu.dma_semaphore, #tpu.memory_space<semaphore_mem>> -> memref<!tpu.dma_semaphore, #tpu.memory_space<semaphore_mem>>
    tpu.wait_dma2 semaphore(%667 : memref<!tpu.dma_semaphore, #tpu.memory_space<semaphore_mem>>) src(%664 : memref<1x32xf32, #tpu.memory_space<any>>) dst(%665 : memref<1x32xf32, #tpu.memory_space<vmem>>)
    %c0_i32_528 = arith.constant 0 : i32
    %c0_i32_529 = arith.constant 0 : i32
    %c0_i32_530 = arith.constant 0 : i32
    %668 = tpu.memref_slice %arg2[%c0_i32_529, %c0_i32_530] : memref<16x32xf32, #tpu.memory_space<any>> -> memref<1x32xf32, #tpu.memory_space<any>>
    %c54_i32_531 = arith.constant 54 : i32
    %c0_i32_532 = arith.constant 0 : i32
    %669 = tpu.memref_slice %arg10[%c54_i32_531, %c0_i32_532] : memref<64x32xf32, #tpu.memory_space<vmem>> -> memref<1x32xf32, #tpu.memory_space<vmem>>
    %670 = tpu.memref_slice %arg15[%c0_i32_528] : memref<1x!tpu.dma_semaphore, #tpu.memory_space<semaphore_mem>> -> memref<1x!tpu.dma_semaphore, #tpu.memory_space<semaphore_mem>>
    %671 = tpu.memref_squeeze %670 : memref<1x!tpu.dma_semaphore, #tpu.memory_space<semaphore_mem>> -> memref<!tpu.dma_semaphore, #tpu.memory_space<semaphore_mem>>
    tpu.wait_dma2 semaphore(%671 : memref<!tpu.dma_semaphore, #tpu.memory_space<semaphore_mem>>) src(%668 : memref<1x32xf32, #tpu.memory_space<any>>) dst(%669 : memref<1x32xf32, #tpu.memory_space<vmem>>)
    %c0_i32_533 = arith.constant 0 : i32
    %c0_i32_534 = arith.constant 0 : i32
    %c0_i32_535 = arith.constant 0 : i32
    %672 = tpu.memref_slice %arg2[%c0_i32_534, %c0_i32_535] : memref<16x32xf32, #tpu.memory_space<any>> -> memref<1x32xf32, #tpu.memory_space<any>>
    %c55_i32_536 = arith.constant 55 : i32
    %c0_i32_537 = arith.constant 0 : i32
    %673 = tpu.memref_slice %arg10[%c55_i32_536, %c0_i32_537] : memref<64x32xf32, #tpu.memory_space<vmem>> -> memref<1x32xf32, #tpu.memory_space<vmem>>
    %674 = tpu.memref_slice %arg15[%c0_i32_533] : memref<1x!tpu.dma_semaphore, #tpu.memory_space<semaphore_mem>> -> memref<1x!tpu.dma_semaphore, #tpu.memory_space<semaphore_mem>>
    %675 = tpu.memref_squeeze %674 : memref<1x!tpu.dma_semaphore, #tpu.memory_space<semaphore_mem>> -> memref<!tpu.dma_semaphore, #tpu.memory_space<semaphore_mem>>
    tpu.wait_dma2 semaphore(%675 : memref<!tpu.dma_semaphore, #tpu.memory_space<semaphore_mem>>) src(%672 : memref<1x32xf32, #tpu.memory_space<any>>) dst(%673 : memref<1x32xf32, #tpu.memory_space<vmem>>)
    %c0_i32_538 = arith.constant 0 : i32
    %c0_i32_539 = arith.constant 0 : i32
    %c0_i32_540 = arith.constant 0 : i32
    %676 = tpu.memref_slice %arg2[%c0_i32_539, %c0_i32_540] : memref<16x32xf32, #tpu.memory_space<any>> -> memref<1x32xf32, #tpu.memory_space<any>>
    %c56_i32_541 = arith.constant 56 : i32
    %c0_i32_542 = arith.constant 0 : i32
    %677 = tpu.memref_slice %arg10[%c56_i32_541, %c0_i32_542] : memref<64x32xf32, #tpu.memory_space<vmem>> -> memref<1x32xf32, #tpu.memory_space<vmem>>
    %678 = tpu.memref_slice %arg15[%c0_i32_538] : memref<1x!tpu.dma_semaphore, #tpu.memory_space<semaphore_mem>> -> memref<1x!tpu.dma_semaphore, #tpu.memory_space<semaphore_mem>>
    %679 = tpu.memref_squeeze %678 : memref<1x!tpu.dma_semaphore, #tpu.memory_space<semaphore_mem>> -> memref<!tpu.dma_semaphore, #tpu.memory_space<semaphore_mem>>
    tpu.wait_dma2 semaphore(%679 : memref<!tpu.dma_semaphore, #tpu.memory_space<semaphore_mem>>) src(%676 : memref<1x32xf32, #tpu.memory_space<any>>) dst(%677 : memref<1x32xf32, #tpu.memory_space<vmem>>)
    %c0_i32_543 = arith.constant 0 : i32
    %c0_i32_544 = arith.constant 0 : i32
    %c0_i32_545 = arith.constant 0 : i32
    %680 = tpu.memref_slice %arg2[%c0_i32_544, %c0_i32_545] : memref<16x32xf32, #tpu.memory_space<any>> -> memref<1x32xf32, #tpu.memory_space<any>>
    %c57_i32_546 = arith.constant 57 : i32
    %c0_i32_547 = arith.constant 0 : i32
    %681 = tpu.memref_slice %arg10[%c57_i32_546, %c0_i32_547] : memref<64x32xf32, #tpu.memory_space<vmem>> -> memref<1x32xf32, #tpu.memory_space<vmem>>
    %682 = tpu.memref_slice %arg15[%c0_i32_543] : memref<1x!tpu.dma_semaphore, #tpu.memory_space<semaphore_mem>> -> memref<1x!tpu.dma_semaphore, #tpu.memory_space<semaphore_mem>>
    %683 = tpu.memref_squeeze %682 : memref<1x!tpu.dma_semaphore, #tpu.memory_space<semaphore_mem>> -> memref<!tpu.dma_semaphore, #tpu.memory_space<semaphore_mem>>
    tpu.wait_dma2 semaphore(%683 : memref<!tpu.dma_semaphore, #tpu.memory_space<semaphore_mem>>) src(%680 : memref<1x32xf32, #tpu.memory_space<any>>) dst(%681 : memref<1x32xf32, #tpu.memory_space<vmem>>)
    %c0_i32_548 = arith.constant 0 : i32
    %c0_i32_549 = arith.constant 0 : i32
    %c0_i32_550 = arith.constant 0 : i32
    %684 = tpu.memref_slice %arg2[%c0_i32_549, %c0_i32_550] : memref<16x32xf32, #tpu.memory_space<any>> -> memref<1x32xf32, #tpu.memory_space<any>>
    %c58_i32_551 = arith.constant 58 : i32
    %c0_i32_552 = arith.constant 0 : i32
    %685 = tpu.memref_slice %arg10[%c58_i32_551, %c0_i32_552] : memref<64x32xf32, #tpu.memory_space<vmem>> -> memref<1x32xf32, #tpu.memory_space<vmem>>
    %686 = tpu.memref_slice %arg15[%c0_i32_548] : memref<1x!tpu.dma_semaphore, #tpu.memory_space<semaphore_mem>> -> memref<1x!tpu.dma_semaphore, #tpu.memory_space<semaphore_mem>>
    %687 = tpu.memref_squeeze %686 : memref<1x!tpu.dma_semaphore, #tpu.memory_space<semaphore_mem>> -> memref<!tpu.dma_semaphore, #tpu.memory_space<semaphore_mem>>
    tpu.wait_dma2 semaphore(%687 : memref<!tpu.dma_semaphore, #tpu.memory_space<semaphore_mem>>) src(%684 : memref<1x32xf32, #tpu.memory_space<any>>) dst(%685 : memref<1x32xf32, #tpu.memory_space<vmem>>)
    %c0_i32_553 = arith.constant 0 : i32
    %c0_i32_554 = arith.constant 0 : i32
    %c0_i32_555 = arith.constant 0 : i32
    %688 = tpu.memref_slice %arg2[%c0_i32_554, %c0_i32_555] : memref<16x32xf32, #tpu.memory_space<any>> -> memref<1x32xf32, #tpu.memory_space<any>>
    %c59_i32_556 = arith.constant 59 : i32
    %c0_i32_557 = arith.constant 0 : i32
    %689 = tpu.memref_slice %arg10[%c59_i32_556, %c0_i32_557] : memref<64x32xf32, #tpu.memory_space<vmem>> -> memref<1x32xf32, #tpu.memory_space<vmem>>
    %690 = tpu.memref_slice %arg15[%c0_i32_553] : memref<1x!tpu.dma_semaphore, #tpu.memory_space<semaphore_mem>> -> memref<1x!tpu.dma_semaphore, #tpu.memory_space<semaphore_mem>>
    %691 = tpu.memref_squeeze %690 : memref<1x!tpu.dma_semaphore, #tpu.memory_space<semaphore_mem>> -> memref<!tpu.dma_semaphore, #tpu.memory_space<semaphore_mem>>
    tpu.wait_dma2 semaphore(%691 : memref<!tpu.dma_semaphore, #tpu.memory_space<semaphore_mem>>) src(%688 : memref<1x32xf32, #tpu.memory_space<any>>) dst(%689 : memref<1x32xf32, #tpu.memory_space<vmem>>)
    %c0_i32_558 = arith.constant 0 : i32
    %c0_i32_559 = arith.constant 0 : i32
    %c0_i32_560 = arith.constant 0 : i32
    %692 = tpu.memref_slice %arg2[%c0_i32_559, %c0_i32_560] : memref<16x32xf32, #tpu.memory_space<any>> -> memref<1x32xf32, #tpu.memory_space<any>>
    %c60_i32_561 = arith.constant 60 : i32
    %c0_i32_562 = arith.constant 0 : i32
    %693 = tpu.memref_slice %arg10[%c60_i32_561, %c0_i32_562] : memref<64x32xf32, #tpu.memory_space<vmem>> -> memref<1x32xf32, #tpu.memory_space<vmem>>
    %694 = tpu.memref_slice %arg15[%c0_i32_558] : memref<1x!tpu.dma_semaphore, #tpu.memory_space<semaphore_mem>> -> memref<1x!tpu.dma_semaphore, #tpu.memory_space<semaphore_mem>>
    %695 = tpu.memref_squeeze %694 : memref<1x!tpu.dma_semaphore, #tpu.memory_space<semaphore_mem>> -> memref<!tpu.dma_semaphore, #tpu.memory_space<semaphore_mem>>
    tpu.wait_dma2 semaphore(%695 : memref<!tpu.dma_semaphore, #tpu.memory_space<semaphore_mem>>) src(%692 : memref<1x32xf32, #tpu.memory_space<any>>) dst(%693 : memref<1x32xf32, #tpu.memory_space<vmem>>)
    %c0_i32_563 = arith.constant 0 : i32
    %c0_i32_564 = arith.constant 0 : i32
    %c0_i32_565 = arith.constant 0 : i32
    %696 = tpu.memref_slice %arg2[%c0_i32_564, %c0_i32_565] : memref<16x32xf32, #tpu.memory_space<any>> -> memref<1x32xf32, #tpu.memory_space<any>>
    %c61_i32_566 = arith.constant 61 : i32
    %c0_i32_567 = arith.constant 0 : i32
    %697 = tpu.memref_slice %arg10[%c61_i32_566, %c0_i32_567] : memref<64x32xf32, #tpu.memory_space<vmem>> -> memref<1x32xf32, #tpu.memory_space<vmem>>
    %698 = tpu.memref_slice %arg15[%c0_i32_563] : memref<1x!tpu.dma_semaphore, #tpu.memory_space<semaphore_mem>> -> memref<1x!tpu.dma_semaphore, #tpu.memory_space<semaphore_mem>>
    %699 = tpu.memref_squeeze %698 : memref<1x!tpu.dma_semaphore, #tpu.memory_space<semaphore_mem>> -> memref<!tpu.dma_semaphore, #tpu.memory_space<semaphore_mem>>
    tpu.wait_dma2 semaphore(%699 : memref<!tpu.dma_semaphore, #tpu.memory_space<semaphore_mem>>) src(%696 : memref<1x32xf32, #tpu.memory_space<any>>) dst(%697 : memref<1x32xf32, #tpu.memory_space<vmem>>)
    %c0_i32_568 = arith.constant 0 : i32
    %c0_i32_569 = arith.constant 0 : i32
    %c0_i32_570 = arith.constant 0 : i32
    %700 = tpu.memref_slice %arg2[%c0_i32_569, %c0_i32_570] : memref<16x32xf32, #tpu.memory_space<any>> -> memref<1x32xf32, #tpu.memory_space<any>>
    %c62_i32_571 = arith.constant 62 : i32
    %c0_i32_572 = arith.constant 0 : i32
    %701 = tpu.memref_slice %arg10[%c62_i32_571, %c0_i32_572] : memref<64x32xf32, #tpu.memory_space<vmem>> -> memref<1x32xf32, #tpu.memory_space<vmem>>
    %702 = tpu.memref_slice %arg15[%c0_i32_568] : memref<1x!tpu.dma_semaphore, #tpu.memory_space<semaphore_mem>> -> memref<1x!tpu.dma_semaphore, #tpu.memory_space<semaphore_mem>>
    %703 = tpu.memref_squeeze %702 : memref<1x!tpu.dma_semaphore, #tpu.memory_space<semaphore_mem>> -> memref<!tpu.dma_semaphore, #tpu.memory_space<semaphore_mem>>
    tpu.wait_dma2 semaphore(%703 : memref<!tpu.dma_semaphore, #tpu.memory_space<semaphore_mem>>) src(%700 : memref<1x32xf32, #tpu.memory_space<any>>) dst(%701 : memref<1x32xf32, #tpu.memory_space<vmem>>)
    %c0_i32_573 = arith.constant 0 : i32
    %c0_i32_574 = arith.constant 0 : i32
    %c0_i32_575 = arith.constant 0 : i32
    %704 = tpu.memref_slice %arg2[%c0_i32_574, %c0_i32_575] : memref<16x32xf32, #tpu.memory_space<any>> -> memref<1x32xf32, #tpu.memory_space<any>>
    %c63_i32_576 = arith.constant 63 : i32
    %c0_i32_577 = arith.constant 0 : i32
    %705 = tpu.memref_slice %arg10[%c63_i32_576, %c0_i32_577] : memref<64x32xf32, #tpu.memory_space<vmem>> -> memref<1x32xf32, #tpu.memory_space<vmem>>
    %706 = tpu.memref_slice %arg15[%c0_i32_573] : memref<1x!tpu.dma_semaphore, #tpu.memory_space<semaphore_mem>> -> memref<1x!tpu.dma_semaphore, #tpu.memory_space<semaphore_mem>>
    %707 = tpu.memref_squeeze %706 : memref<1x!tpu.dma_semaphore, #tpu.memory_space<semaphore_mem>> -> memref<!tpu.dma_semaphore, #tpu.memory_space<semaphore_mem>>
    tpu.wait_dma2 semaphore(%707 : memref<!tpu.dma_semaphore, #tpu.memory_space<semaphore_mem>>) src(%704 : memref<1x32xf32, #tpu.memory_space<any>>) dst(%705 : memref<1x32xf32, #tpu.memory_space<vmem>>)
    %c0 = arith.constant 0 : index
    %c0_578 = arith.constant 0 : index
    %708 = vector.load %arg10[%c0, %c0_578] : memref<64x32xf32, #tpu.memory_space<vmem>>, vector<64x32xf32>
    %c0_579 = arith.constant 0 : index
    %c0_580 = arith.constant 0 : index
    %709 = vector.load %arg3[%c0_579, %c0_580] : memref<32x128xbf16, #tpu.memory_space<vmem>>, vector<32x128xbf16>
    %710 = arith.truncf %708 : vector<64x32xf32> to vector<64x32xbf16>
    %cst = arith.constant dense<0.000000e+00> : vector<64x128xf32>
    %711 = tpu.matmul %710, %709, %cst {dimension_numbers = #tpu.dot_dimension_numbers<[1], [0], [0], [1], [0, 0, 1, 1], [], []>} : vector<64x32xbf16>, vector<32x128xbf16>, vector<64x128xf32> -> vector<64x128xf32>
    %c0_581 = arith.constant 0 : index
    %c0_582 = arith.constant 0 : index
    %c0_583 = arith.constant 0 : index
    %712 = vector.load %arg6[%c0_581, %c0_582, %c0_583] : memref<2x1x128xf32, #tpu.memory_space<vmem>>, vector<1x1x128xf32>
    %713 = vector.shape_cast %712 : vector<1x1x128xf32> to vector<1x128xf32>
    %714 = vector.broadcast %713 : vector<1x128xf32> to vector<64x128xf32>
    %715 = arith.addf %711, %714 : vector<64x128xf32>
    %716 = vector.extract_strided_slice %715 {offsets = [0, 0], sizes = [8, 128], strides = [1, 1]} : vector<64x128xf32> to vector<8x128xf32>
    %c0_584 = arith.constant 0 : index
    %c0_585 = arith.constant 0 : index
    %c0_586 = arith.constant 0 : index
    %717 = vector.load %arg12[%c0_584, %c0_585, %c0_586] : memref<8x8x128xf32, #tpu.memory_space<vmem>>, vector<1x8x128xf32>
    %718 = vector.shape_cast %717 : vector<1x8x128xf32> to vector<8x128xf32>
    %719 = vector.shape_cast %716 : vector<8x128xf32> to vector<1x8x128xf32>
    tpu.vector_store %arg12[%c0_584, %c0_585, %c0_586], %719 {strides = array<i32>} : memref<8x8x128xf32, #tpu.memory_space<vmem>>, vector<1x8x128xf32>,
    %720 = vector.extract_strided_slice %715 {offsets = [8, 0], sizes = [8, 128], strides = [1, 1]} : vector<64x128xf32> to vector<8x128xf32>
    %c1 = arith.constant 1 : index
    %c0_587 = arith.constant 0 : index
    %c0_588 = arith.constant 0 : index
    %721 = vector.load %arg12[%c1, %c0_587, %c0_588] : memref<8x8x128xf32, #tpu.memory_space<vmem>>, vector<1x8x128xf32>
    %722 = vector.shape_cast %721 : vector<1x8x128xf32> to vector<8x128xf32>
    %723 = vector.shape_cast %720 : vector<8x128xf32> to vector<1x8x128xf32>
    tpu.vector_store %arg12[%c1, %c0_587, %c0_588], %723 {strides = array<i32>} : memref<8x8x128xf32, #tpu.memory_space<vmem>>, vector<1x8x128xf32>,
    %724 = vector.extract_strided_slice %715 {offsets = [16, 0], sizes = [8, 128], strides = [1, 1]} : vector<64x128xf32> to vector<8x128xf32>
    %c2 = arith.constant 2 : index
    %c0_589 = arith.constant 0 : index
    %c0_590 = arith.constant 0 : index
    %725 = vector.load %arg12[%c2, %c0_589, %c0_590] : memref<8x8x128xf32, #tpu.memory_space<vmem>>, vector<1x8x128xf32>
    %726 = vector.shape_cast %725 : vector<1x8x128xf32> to vector<8x128xf32>
    %727 = vector.shape_cast %724 : vector<8x128xf32> to vector<1x8x128xf32>
    tpu.vector_store %arg12[%c2, %c0_589, %c0_590], %727 {strides = array<i32>} : memref<8x8x128xf32, #tpu.memory_space<vmem>>, vector<1x8x128xf32>,
    %728 = vector.extract_strided_slice %715 {offsets = [24, 0], sizes = [8, 128], strides = [1, 1]} : vector<64x128xf32> to vector<8x128xf32>
    %c3 = arith.constant 3 : index
    %c0_591 = arith.constant 0 : index
    %c0_592 = arith.constant 0 : index
    %729 = vector.load %arg12[%c3, %c0_591, %c0_592] : memref<8x8x128xf32, #tpu.memory_space<vmem>>, vector<1x8x128xf32>
    %730 = vector.shape_cast %729 : vector<1x8x128xf32> to vector<8x128xf32>
    %731 = vector.shape_cast %728 : vector<8x128xf32> to vector<1x8x128xf32>
    tpu.vector_store %arg12[%c3, %c0_591, %c0_592], %731 {strides = array<i32>} : memref<8x8x128xf32, #tpu.memory_space<vmem>>, vector<1x8x128xf32>,
    %732 = vector.extract_strided_slice %715 {offsets = [32, 0], sizes = [8, 128], strides = [1, 1]} : vector<64x128xf32> to vector<8x128xf32>
    %c4 = arith.constant 4 : index
    %c0_593 = arith.constant 0 : index
    %c0_594 = arith.constant 0 : index
    %733 = vector.load %arg12[%c4, %c0_593, %c0_594] : memref<8x8x128xf32, #tpu.memory_space<vmem>>, vector<1x8x128xf32>
    %734 = vector.shape_cast %733 : vector<1x8x128xf32> to vector<8x128xf32>
    %735 = vector.shape_cast %732 : vector<8x128xf32> to vector<1x8x128xf32>
    tpu.vector_store %arg12[%c4, %c0_593, %c0_594], %735 {strides = array<i32>} : memref<8x8x128xf32, #tpu.memory_space<vmem>>, vector<1x8x128xf32>,
    %736 = vector.extract_strided_slice %715 {offsets = [40, 0], sizes = [8, 128], strides = [1, 1]} : vector<64x128xf32> to vector<8x128xf32>
    %c5 = arith.constant 5 : index
    %c0_595 = arith.constant 0 : index
    %c0_596 = arith.constant 0 : index
    %737 = vector.load %arg12[%c5, %c0_595, %c0_596] : memref<8x8x128xf32, #tpu.memory_space<vmem>>, vector<1x8x128xf32>
    %738 = vector.shape_cast %737 : vector<1x8x128xf32> to vector<8x128xf32>
    %739 = vector.shape_cast %736 : vector<8x128xf32> to vector<1x8x128xf32>
    tpu.vector_store %arg12[%c5, %c0_595, %c0_596], %739 {strides = array<i32>} : memref<8x8x128xf32, #tpu.memory_space<vmem>>, vector<1x8x128xf32>,
    %740 = vector.extract_strided_slice %715 {offsets = [48, 0], sizes = [8, 128], strides = [1, 1]} : vector<64x128xf32> to vector<8x128xf32>
    %c6 = arith.constant 6 : index
    %c0_597 = arith.constant 0 : index
    %c0_598 = arith.constant 0 : index
    %741 = vector.load %arg12[%c6, %c0_597, %c0_598] : memref<8x8x128xf32, #tpu.memory_space<vmem>>, vector<1x8x128xf32>
    %742 = vector.shape_cast %741 : vector<1x8x128xf32> to vector<8x128xf32>
    %743 = vector.shape_cast %740 : vector<8x128xf32> to vector<1x8x128xf32>
    tpu.vector_store %arg12[%c6, %c0_597, %c0_598], %743 {strides = array<i32>} : memref<8x8x128xf32, #tpu.memory_space<vmem>>, vector<1x8x128xf32>,
    %744 = vector.extract_strided_slice %715 {offsets = [56, 0], sizes = [8, 128], strides = [1, 1]} : vector<64x128xf32> to vector<8x128xf32>
    %c7 = arith.constant 7 : index
    %c0_599 = arith.constant 0 : index
    %c0_600 = arith.constant 0 : index
    %745 = vector.load %arg12[%c7, %c0_599, %c0_600] : memref<8x8x128xf32, #tpu.memory_space<vmem>>, vector<1x8x128xf32>
    %746 = vector.shape_cast %745 : vector<1x8x128xf32> to vector<8x128xf32>
    %747 = vector.shape_cast %744 : vector<8x128xf32> to vector<1x8x128xf32>
    tpu.vector_store %arg12[%c7, %c0_599, %c0_600], %747 {strides = array<i32>} : memref<8x8x128xf32, #tpu.memory_space<vmem>>, vector<1x8x128xf32>,
    %c0_601 = arith.constant 0 : index
    %c0_602 = arith.constant 0 : index
    %c0_603 = arith.constant 0 : index
    %748 = vector.load %arg5[%c0_601, %c0_602, %c0_603] : memref<2x32x128xbf16, #tpu.memory_space<vmem>>, vector<1x32x128xbf16>
    %749 = vector.shape_cast %748 : vector<1x32x128xbf16> to vector<32x128xbf16>
    %c0_604 = arith.constant 0 : index
    %c0_605 = arith.constant 0 : index
    %c0_606 = arith.constant 0 : index
    %750 = vector.load %arg13[%c0_604, %c0_605, %c0_606] : memref<2x8x32xf32, #tpu.memory_space<vmem>>, vector<1x8x32xf32>
    %751 = vector.shape_cast %750 : vector<1x8x32xf32> to vector<8x32xf32>
    %c0_607 = arith.constant 0 : index
    %c0_608 = arith.constant 0 : index
    %c0_609 = arith.constant 0 : index
    %752 = vector.load %arg14[%c0_607, %c0_608, %c0_609] : memref<2x8x32xf32, #tpu.memory_space<vmem>>, vector<1x8x32xf32>
    %753 = vector.shape_cast %752 : vector<1x8x32xf32> to vector<8x32xf32>
    %c0_610 = arith.constant 0 : index
    %c0_611 = arith.constant 0 : index
    %c0_612 = arith.constant 0 : index
    %754 = vector.load %arg12[%c0_610, %c0_611, %c0_612] : memref<8x8x128xf32, #tpu.memory_space<vmem>>, vector<1x8x128xf32>
    %755 = vector.shape_cast %754 : vector<1x8x128xf32> to vector<8x128xf32>
    %756 = arith.truncf %751 : vector<8x32xf32> to vector<8x32xbf16>
    %cst_613 = arith.constant dense<0.000000e+00> : vector<8x128xf32>
    %757 = tpu.matmul %756, %749, %cst_613 {dimension_numbers = #tpu.dot_dimension_numbers<[1], [0], [0], [1], [0, 0, 1, 1], [], []>} : vector<8x32xbf16>, vector<32x128xbf16>, vector<8x128xf32> -> vector<8x128xf32>
    %758 = arith.addf %755, %757 : vector<8x128xf32>
    %759 = vector.extract_strided_slice %758 {offsets = [0, 0], sizes = [8, 32], strides = [1, 1]} : vector<8x128xf32> to vector<8x32xf32>
    %760 = arith.negf %759 : vector<8x32xf32>
    %761 = math.exp %760 : vector<8x32xf32>
    %cst_614 = arith.constant 1.000000e+00 : f32
    %762 = vector.broadcast %cst_614 : f32 to vector<8x32xf32>
    %763 = arith.addf %762, %761 : vector<8x32xf32>
    %764 = arith.divf %762, %763 : vector<8x32xf32>
    %765 = vector.extract_strided_slice %758 {offsets = [0, 32], sizes = [8, 32], strides = [1, 1]} : vector<8x128xf32> to vector<8x32xf32>
    %766 = arith.negf %765 : vector<8x32xf32>
    %767 = math.exp %766 : vector<8x32xf32>
    %cst_615 = arith.constant 1.000000e+00 : f32
    %768 = vector.broadcast %cst_615 : f32 to vector<8x32xf32>
    %769 = arith.addf %768, %767 : vector<8x32xf32>
    %770 = arith.divf %768, %769 : vector<8x32xf32>
    %771 = vector.extract_strided_slice %758 {offsets = [0, 64], sizes = [8, 32], strides = [1, 1]} : vector<8x128xf32> to vector<8x32xf32>
    %772 = math.tanh %771 : vector<8x32xf32>
    %773 = vector.extract_strided_slice %758 {offsets = [0, 96], sizes = [8, 32], strides = [1, 1]} : vector<8x128xf32> to vector<8x32xf32>
    %774 = arith.negf %773 : vector<8x32xf32>
    %775 = math.exp %774 : vector<8x32xf32>
    %cst_616 = arith.constant 1.000000e+00 : f32
    %776 = vector.broadcast %cst_616 : f32 to vector<8x32xf32>
    %777 = arith.addf %776, %775 : vector<8x32xf32>
    %778 = arith.divf %776, %777 : vector<8x32xf32>
    %779 = arith.mulf %770, %753 : vector<8x32xf32>
    %780 = arith.mulf %764, %772 : vector<8x32xf32>
    %781 = arith.addf %779, %780 : vector<8x32xf32>
    %782 = math.tanh %781 : vector<8x32xf32>
    %783 = arith.mulf %778, %782 : vector<8x32xf32>
    %c0_617 = arith.constant 0 : index
    %c0_618 = arith.constant 0 : index
    %784 = vector.load %arg11[%c0_617, %c0_618] : memref<64x32xf32, #tpu.memory_space<vmem>>, vector<8x32xf32>
    tpu.vector_store %arg11[%c0_617, %c0_618], %783 {strides = array<i32>} : memref<64x32xf32, #tpu.memory_space<vmem>>, vector<8x32xf32>,
    %c1_619 = arith.constant 1 : index
    %c0_620 = arith.constant 0 : index
    %c0_621 = arith.constant 0 : index
    %785 = vector.load %arg12[%c1_619, %c0_620, %c0_621] : memref<8x8x128xf32, #tpu.memory_space<vmem>>, vector<1x8x128xf32>
    %786 = vector.shape_cast %785 : vector<1x8x128xf32> to vector<8x128xf32>
    %787 = arith.truncf %783 : vector<8x32xf32> to vector<8x32xbf16>
    %cst_622 = arith.constant dense<0.000000e+00> : vector<8x128xf32>
    %788 = tpu.matmul %787, %749, %cst_622 {dimension_numbers = #tpu.dot_dimension_numbers<[1], [0], [0], [1], [0, 0, 1, 1], [], []>} : vector<8x32xbf16>, vector<32x128xbf16>, vector<8x128xf32> -> vector<8x128xf32>
    %789 = arith.addf %786, %788 : vector<8x128xf32>
    %790 = vector.extract_strided_slice %789 {offsets = [0, 0], sizes = [8, 32], strides = [1, 1]} : vector<8x128xf32> to vector<8x32xf32>
    %791 = arith.negf %790 : vector<8x32xf32>
    %792 = math.exp %791 : vector<8x32xf32>
    %cst_623 = arith.constant 1.000000e+00 : f32
    %793 = vector.broadcast %cst_623 : f32 to vector<8x32xf32>
    %794 = arith.addf %793, %792 : vector<8x32xf32>
    %795 = arith.divf %793, %794 : vector<8x32xf32>
    %796 = vector.extract_strided_slice %789 {offsets = [0, 32], sizes = [8, 32], strides = [1, 1]} : vector<8x128xf32> to vector<8x32xf32>
    %797 = arith.negf %796 : vector<8x32xf32>
    %798 = math.exp %797 : vector<8x32xf32>
    %cst_624 = arith.constant 1.000000e+00 : f32
    %799 = vector.broadcast %cst_624 : f32 to vector<8x32xf32>
    %800 = arith.addf %799, %798 : vector<8x32xf32>
    %801 = arith.divf %799, %800 : vector<8x32xf32>
    %802 = vector.extract_strided_slice %789 {offsets = [0, 64], sizes = [8, 32], strides = [1, 1]} : vector<8x128xf32> to vector<8x32xf32>
    %803 = math.tanh %802 : vector<8x32xf32>
    %804 = vector.extract_strided_slice %789 {offsets = [0, 96], sizes = [8, 32], strides = [1, 1]} : vector<8x128xf32> to vector<8x32xf32>
    %805 = arith.negf %804 : vector<8x32xf32>
    %806 = math.exp %805 : vector<8x32xf32>
    %cst_625 = arith.constant 1.000000e+00 : f32
    %807 = vector.broadcast %cst_625 : f32 to vector<8x32xf32>
    %808 = arith.addf %807, %806 : vector<8x32xf32>
    %809 = arith.divf %807, %808 : vector<8x32xf32>
    %810 = arith.mulf %801, %781 : vector<8x32xf32>
    %811 = arith.mulf %795, %803 : vector<8x32xf32>
    %812 = arith.addf %810, %811 : vector<8x32xf32>
    %813 = math.tanh %812 : vector<8x32xf32>
    %814 = arith.mulf %809, %813 : vector<8x32xf32>
    %c8 = arith.constant 8 : index
    %c0_626 = arith.constant 0 : index
    %815 = vector.load %arg11[%c8, %c0_626] : memref<64x32xf32, #tpu.memory_space<vmem>>, vector<8x32xf32>
    tpu.vector_store %arg11[%c8, %c0_626], %814 {strides = array<i32>} : memref<64x32xf32, #tpu.memory_space<vmem>>, vector<8x32xf32>,
    %c2_627 = arith.constant 2 : index
    %c0_628 = arith.constant 0 : index
    %c0_629 = arith.constant 0 : index
    %816 = vector.load %arg12[%c2_627, %c0_628, %c0_629] : memref<8x8x128xf32, #tpu.memory_space<vmem>>, vector<1x8x128xf32>
    %817 = vector.shape_cast %816 : vector<1x8x128xf32> to vector<8x128xf32>
    %818 = arith.truncf %814 : vector<8x32xf32> to vector<8x32xbf16>
    %cst_630 = arith.constant dense<0.000000e+00> : vector<8x128xf32>
    %819 = tpu.matmul %818, %749, %cst_630 {dimension_numbers = #tpu.dot_dimension_numbers<[1], [0], [0], [1], [0, 0, 1, 1], [], []>} : vector<8x32xbf16>, vector<32x128xbf16>, vector<8x128xf32> -> vector<8x128xf32>
    %820 = arith.addf %817, %819 : vector<8x128xf32>
    %821 = vector.extract_strided_slice %820 {offsets = [0, 0], sizes = [8, 32], strides = [1, 1]} : vector<8x128xf32> to vector<8x32xf32>
    %822 = arith.negf %821 : vector<8x32xf32>
    %823 = math.exp %822 : vector<8x32xf32>
    %cst_631 = arith.constant 1.000000e+00 : f32
    %824 = vector.broadcast %cst_631 : f32 to vector<8x32xf32>
    %825 = arith.addf %824, %823 : vector<8x32xf32>
    %826 = arith.divf %824, %825 : vector<8x32xf32>
    %827 = vector.extract_strided_slice %820 {offsets = [0, 32], sizes = [8, 32], strides = [1, 1]} : vector<8x128xf32> to vector<8x32xf32>
    %828 = arith.negf %827 : vector<8x32xf32>
    %829 = math.exp %828 : vector<8x32xf32>
    %cst_632 = arith.constant 1.000000e+00 : f32
    %830 = vector.broadcast %cst_632 : f32 to vector<8x32xf32>
    %831 = arith.addf %830, %829 : vector<8x32xf32>
    %832 = arith.divf %830, %831 : vector<8x32xf32>
    %833 = vector.extract_strided_slice %820 {offsets = [0, 64], sizes = [8, 32], strides = [1, 1]} : vector<8x128xf32> to vector<8x32xf32>
    %834 = math.tanh %833 : vector<8x32xf32>
    %835 = vector.extract_strided_slice %820 {offsets = [0, 96], sizes = [8, 32], strides = [1, 1]} : vector<8x128xf32> to vector<8x32xf32>
    %836 = arith.negf %835 : vector<8x32xf32>
    %837 = math.exp %836 : vector<8x32xf32>
    %cst_633 = arith.constant 1.000000e+00 : f32
    %838 = vector.broadcast %cst_633 : f32 to vector<8x32xf32>
    %839 = arith.addf %838, %837 : vector<8x32xf32>
    %840 = arith.divf %838, %839 : vector<8x32xf32>
    %841 = arith.mulf %832, %812 : vector<8x32xf32>
    %842 = arith.mulf %826, %834 : vector<8x32xf32>
    %843 = arith.addf %841, %842 : vector<8x32xf32>
    %844 = math.tanh %843 : vector<8x32xf32>
    %845 = arith.mulf %840, %844 : vector<8x32xf32>
    %c16 = arith.constant 16 : index
    %c0_634 = arith.constant 0 : index
    %846 = vector.load %arg11[%c16, %c0_634] : memref<64x32xf32, #tpu.memory_space<vmem>>, vector<8x32xf32>
    tpu.vector_store %arg11[%c16, %c0_634], %845 {strides = array<i32>} : memref<64x32xf32, #tpu.memory_space<vmem>>, vector<8x32xf32>,
    %c3_635 = arith.constant 3 : index
    %c0_636 = arith.constant 0 : index
    %c0_637 = arith.constant 0 : index
    %847 = vector.load %arg12[%c3_635, %c0_636, %c0_637] : memref<8x8x128xf32, #tpu.memory_space<vmem>>, vector<1x8x128xf32>
    %848 = vector.shape_cast %847 : vector<1x8x128xf32> to vector<8x128xf32>
    %849 = arith.truncf %845 : vector<8x32xf32> to vector<8x32xbf16>
    %cst_638 = arith.constant dense<0.000000e+00> : vector<8x128xf32>
    %850 = tpu.matmul %849, %749, %cst_638 {dimension_numbers = #tpu.dot_dimension_numbers<[1], [0], [0], [1], [0, 0, 1, 1], [], []>} : vector<8x32xbf16>, vector<32x128xbf16>, vector<8x128xf32> -> vector<8x128xf32>
    %851 = arith.addf %848, %850 : vector<8x128xf32>
    %852 = vector.extract_strided_slice %851 {offsets = [0, 0], sizes = [8, 32], strides = [1, 1]} : vector<8x128xf32> to vector<8x32xf32>
    %853 = arith.negf %852 : vector<8x32xf32>
    %854 = math.exp %853 : vector<8x32xf32>
    %cst_639 = arith.constant 1.000000e+00 : f32
    %855 = vector.broadcast %cst_639 : f32 to vector<8x32xf32>
    %856 = arith.addf %855, %854 : vector<8x32xf32>
    %857 = arith.divf %855, %856 : vector<8x32xf32>
    %858 = vector.extract_strided_slice %851 {offsets = [0, 32], sizes = [8, 32], strides = [1, 1]} : vector<8x128xf32> to vector<8x32xf32>
    %859 = arith.negf %858 : vector<8x32xf32>
    %860 = math.exp %859 : vector<8x32xf32>
    %cst_640 = arith.constant 1.000000e+00 : f32
    %861 = vector.broadcast %cst_640 : f32 to vector<8x32xf32>
    %862 = arith.addf %861, %860 : vector<8x32xf32>
    %863 = arith.divf %861, %862 : vector<8x32xf32>
    %864 = vector.extract_strided_slice %851 {offsets = [0, 64], sizes = [8, 32], strides = [1, 1]} : vector<8x128xf32> to vector<8x32xf32>
    %865 = math.tanh %864 : vector<8x32xf32>
    %866 = vector.extract_strided_slice %851 {offsets = [0, 96], sizes = [8, 32], strides = [1, 1]} : vector<8x128xf32> to vector<8x32xf32>
    %867 = arith.negf %866 : vector<8x32xf32>
    %868 = math.exp %867 : vector<8x32xf32>
    %cst_641 = arith.constant 1.000000e+00 : f32
    %869 = vector.broadcast %cst_641 : f32 to vector<8x32xf32>
    %870 = arith.addf %869, %868 : vector<8x32xf32>
    %871 = arith.divf %869, %870 : vector<8x32xf32>
    %872 = arith.mulf %863, %843 : vector<8x32xf32>
    %873 = arith.mulf %857, %865 : vector<8x32xf32>
    %874 = arith.addf %872, %873 : vector<8x32xf32>
    %875 = math.tanh %874 : vector<8x32xf32>
    %876 = arith.mulf %871, %875 : vector<8x32xf32>
    %c24 = arith.constant 24 : index
    %c0_642 = arith.constant 0 : index
    %877 = vector.load %arg11[%c24, %c0_642] : memref<64x32xf32, #tpu.memory_space<vmem>>, vector<8x32xf32>
    tpu.vector_store %arg11[%c24, %c0_642], %876 {strides = array<i32>} : memref<64x32xf32, #tpu.memory_space<vmem>>, vector<8x32xf32>,
    %c4_643 = arith.constant 4 : index
    %c0_644 = arith.constant 0 : index
    %c0_645 = arith.constant 0 : index
    %878 = vector.load %arg12[%c4_643, %c0_644, %c0_645] : memref<8x8x128xf32, #tpu.memory_space<vmem>>, vector<1x8x128xf32>
    %879 = vector.shape_cast %878 : vector<1x8x128xf32> to vector<8x128xf32>
    %880 = arith.truncf %876 : vector<8x32xf32> to vector<8x32xbf16>
    %cst_646 = arith.constant dense<0.000000e+00> : vector<8x128xf32>
    %881 = tpu.matmul %880, %749, %cst_646 {dimension_numbers = #tpu.dot_dimension_numbers<[1], [0], [0], [1], [0, 0, 1, 1], [], []>} : vector<8x32xbf16>, vector<32x128xbf16>, vector<8x128xf32> -> vector<8x128xf32>
    %882 = arith.addf %879, %881 : vector<8x128xf32>
    %883 = vector.extract_strided_slice %882 {offsets = [0, 0], sizes = [8, 32], strides = [1, 1]} : vector<8x128xf32> to vector<8x32xf32>
    %884 = arith.negf %883 : vector<8x32xf32>
    %885 = math.exp %884 : vector<8x32xf32>
    %cst_647 = arith.constant 1.000000e+00 : f32
    %886 = vector.broadcast %cst_647 : f32 to vector<8x32xf32>
    %887 = arith.addf %886, %885 : vector<8x32xf32>
    %888 = arith.divf %886, %887 : vector<8x32xf32>
    %889 = vector.extract_strided_slice %882 {offsets = [0, 32], sizes = [8, 32], strides = [1, 1]} : vector<8x128xf32> to vector<8x32xf32>
    %890 = arith.negf %889 : vector<8x32xf32>
    %891 = math.exp %890 : vector<8x32xf32>
    %cst_648 = arith.constant 1.000000e+00 : f32
    %892 = vector.broadcast %cst_648 : f32 to vector<8x32xf32>
    %893 = arith.addf %892, %891 : vector<8x32xf32>
    %894 = arith.divf %892, %893 : vector<8x32xf32>
    %895 = vector.extract_strided_slice %882 {offsets = [0, 64], sizes = [8, 32], strides = [1, 1]} : vector<8x128xf32> to vector<8x32xf32>
    %896 = math.tanh %895 : vector<8x32xf32>
    %897 = vector.extract_strided_slice %882 {offsets = [0, 96], sizes = [8, 32], strides = [1, 1]} : vector<8x128xf32> to vector<8x32xf32>
    %898 = arith.negf %897 : vector<8x32xf32>
    %899 = math.exp %898 : vector<8x32xf32>
    %cst_649 = arith.constant 1.000000e+00 : f32
    %900 = vector.broadcast %cst_649 : f32 to vector<8x32xf32>
    %901 = arith.addf %900, %899 : vector<8x32xf32>
    %902 = arith.divf %900, %901 : vector<8x32xf32>
    %903 = arith.mulf %894, %874 : vector<8x32xf32>
    %904 = arith.mulf %888, %896 : vector<8x32xf32>
    %905 = arith.addf %903, %904 : vector<8x32xf32>
    %906 = math.tanh %905 : vector<8x32xf32>
    %907 = arith.mulf %902, %906 : vector<8x32xf32>
    %c32 = arith.constant 32 : index
    %c0_650 = arith.constant 0 : index
    %908 = vector.load %arg11[%c32, %c0_650] : memref<64x32xf32, #tpu.memory_space<vmem>>, vector<8x32xf32>
    tpu.vector_store %arg11[%c32, %c0_650], %907 {strides = array<i32>} : memref<64x32xf32, #tpu.memory_space<vmem>>, vector<8x32xf32>,
    %c5_651 = arith.constant 5 : index
    %c0_652 = arith.constant 0 : index
    %c0_653 = arith.constant 0 : index
    %909 = vector.load %arg12[%c5_651, %c0_652, %c0_653] : memref<8x8x128xf32, #tpu.memory_space<vmem>>, vector<1x8x128xf32>
    %910 = vector.shape_cast %909 : vector<1x8x128xf32> to vector<8x128xf32>
    %911 = arith.truncf %907 : vector<8x32xf32> to vector<8x32xbf16>
    %cst_654 = arith.constant dense<0.000000e+00> : vector<8x128xf32>
    %912 = tpu.matmul %911, %749, %cst_654 {dimension_numbers = #tpu.dot_dimension_numbers<[1], [0], [0], [1], [0, 0, 1, 1], [], []>} : vector<8x32xbf16>, vector<32x128xbf16>, vector<8x128xf32> -> vector<8x128xf32>
    %913 = arith.addf %910, %912 : vector<8x128xf32>
    %914 = vector.extract_strided_slice %913 {offsets = [0, 0], sizes = [8, 32], strides = [1, 1]} : vector<8x128xf32> to vector<8x32xf32>
    %915 = arith.negf %914 : vector<8x32xf32>
    %916 = math.exp %915 : vector<8x32xf32>
    %cst_655 = arith.constant 1.000000e+00 : f32
    %917 = vector.broadcast %cst_655 : f32 to vector<8x32xf32>
    %918 = arith.addf %917, %916 : vector<8x32xf32>
    %919 = arith.divf %917, %918 : vector<8x32xf32>
    %920 = vector.extract_strided_slice %913 {offsets = [0, 32], sizes = [8, 32], strides = [1, 1]} : vector<8x128xf32> to vector<8x32xf32>
    %921 = arith.negf %920 : vector<8x32xf32>
    %922 = math.exp %921 : vector<8x32xf32>
    %cst_656 = arith.constant 1.000000e+00 : f32
    %923 = vector.broadcast %cst_656 : f32 to vector<8x32xf32>
    %924 = arith.addf %923, %922 : vector<8x32xf32>
    %925 = arith.divf %923, %924 : vector<8x32xf32>
    %926 = vector.extract_strided_slice %913 {offsets = [0, 64], sizes = [8, 32], strides = [1, 1]} : vector<8x128xf32> to vector<8x32xf32>
    %927 = math.tanh %926 : vector<8x32xf32>
    %928 = vector.extract_strided_slice %913 {offsets = [0, 96], sizes = [8, 32], strides = [1, 1]} : vector<8x128xf32> to vector<8x32xf32>
    %929 = arith.negf %928 : vector<8x32xf32>
    %930 = math.exp %929 : vector<8x32xf32>
    %cst_657 = arith.constant 1.000000e+00 : f32
    %931 = vector.broadcast %cst_657 : f32 to vector<8x32xf32>
    %932 = arith.addf %931, %930 : vector<8x32xf32>
    %933 = arith.divf %931, %932 : vector<8x32xf32>
    %934 = arith.mulf %925, %905 : vector<8x32xf32>
    %935 = arith.mulf %919, %927 : vector<8x32xf32>
    %936 = arith.addf %934, %935 : vector<8x32xf32>
    %937 = math.tanh %936 : vector<8x32xf32>
    %938 = arith.mulf %933, %937 : vector<8x32xf32>
    %c40 = arith.constant 40 : index
    %c0_658 = arith.constant 0 : index
    %939 = vector.load %arg11[%c40, %c0_658] : memref<64x32xf32, #tpu.memory_space<vmem>>, vector<8x32xf32>
    tpu.vector_store %arg11[%c40, %c0_658], %938 {strides = array<i32>} : memref<64x32xf32, #tpu.memory_space<vmem>>, vector<8x32xf32>,
    %c6_659 = arith.constant 6 : index
    %c0_660 = arith.constant 0 : index
    %c0_661 = arith.constant 0 : index
    %940 = vector.load %arg12[%c6_659, %c0_660, %c0_661] : memref<8x8x128xf32, #tpu.memory_space<vmem>>, vector<1x8x128xf32>
    %941 = vector.shape_cast %940 : vector<1x8x128xf32> to vector<8x128xf32>
    %942 = arith.truncf %938 : vector<8x32xf32> to vector<8x32xbf16>
    %cst_662 = arith.constant dense<0.000000e+00> : vector<8x128xf32>
    %943 = tpu.matmul %942, %749, %cst_662 {dimension_numbers = #tpu.dot_dimension_numbers<[1], [0], [0], [1], [0, 0, 1, 1], [], []>} : vector<8x32xbf16>, vector<32x128xbf16>, vector<8x128xf32> -> vector<8x128xf32>
    %944 = arith.addf %941, %943 : vector<8x128xf32>
    %945 = vector.extract_strided_slice %944 {offsets = [0, 0], sizes = [8, 32], strides = [1, 1]} : vector<8x128xf32> to vector<8x32xf32>
    %946 = arith.negf %945 : vector<8x32xf32>
    %947 = math.exp %946 : vector<8x32xf32>
    %cst_663 = arith.constant 1.000000e+00 : f32
    %948 = vector.broadcast %cst_663 : f32 to vector<8x32xf32>
    %949 = arith.addf %948, %947 : vector<8x32xf32>
    %950 = arith.divf %948, %949 : vector<8x32xf32>
    %951 = vector.extract_strided_slice %944 {offsets = [0, 32], sizes = [8, 32], strides = [1, 1]} : vector<8x128xf32> to vector<8x32xf32>
    %952 = arith.negf %951 : vector<8x32xf32>
    %953 = math.exp %952 : vector<8x32xf32>
    %cst_664 = arith.constant 1.000000e+00 : f32
    %954 = vector.broadcast %cst_664 : f32 to vector<8x32xf32>
    %955 = arith.addf %954, %953 : vector<8x32xf32>
    %956 = arith.divf %954, %955 : vector<8x32xf32>
    %957 = vector.extract_strided_slice %944 {offsets = [0, 64], sizes = [8, 32], strides = [1, 1]} : vector<8x128xf32> to vector<8x32xf32>
    %958 = math.tanh %957 : vector<8x32xf32>
    %959 = vector.extract_strided_slice %944 {offsets = [0, 96], sizes = [8, 32], strides = [1, 1]} : vector<8x128xf32> to vector<8x32xf32>
    %960 = arith.negf %959 : vector<8x32xf32>
    %961 = math.exp %960 : vector<8x32xf32>
    %cst_665 = arith.constant 1.000000e+00 : f32
    %962 = vector.broadcast %cst_665 : f32 to vector<8x32xf32>
    %963 = arith.addf %962, %961 : vector<8x32xf32>
    %964 = arith.divf %962, %963 : vector<8x32xf32>
    %965 = arith.mulf %956, %936 : vector<8x32xf32>
    %966 = arith.mulf %950, %958 : vector<8x32xf32>
    %967 = arith.addf %965, %966 : vector<8x32xf32>
    %968 = math.tanh %967 : vector<8x32xf32>
    %969 = arith.mulf %964, %968 : vector<8x32xf32>
    %c48 = arith.constant 48 : index
    %c0_666 = arith.constant 0 : index
    %970 = vector.load %arg11[%c48, %c0_666] : memref<64x32xf32, #tpu.memory_space<vmem>>, vector<8x32xf32>
    tpu.vector_store %arg11[%c48, %c0_666], %969 {strides = array<i32>} : memref<64x32xf32, #tpu.memory_space<vmem>>, vector<8x32xf32>,
    %c7_667 = arith.constant 7 : index
    %c0_668 = arith.constant 0 : index
    %c0_669 = arith.constant 0 : index
    %971 = vector.load %arg12[%c7_667, %c0_668, %c0_669] : memref<8x8x128xf32, #tpu.memory_space<vmem>>, vector<1x8x128xf32>
    %972 = vector.shape_cast %971 : vector<1x8x128xf32> to vector<8x128xf32>
    %973 = arith.truncf %969 : vector<8x32xf32> to vector<8x32xbf16>
    %cst_670 = arith.constant dense<0.000000e+00> : vector<8x128xf32>
    %974 = tpu.matmul %973, %749, %cst_670 {dimension_numbers = #tpu.dot_dimension_numbers<[1], [0], [0], [1], [0, 0, 1, 1], [], []>} : vector<8x32xbf16>, vector<32x128xbf16>, vector<8x128xf32> -> vector<8x128xf32>
    %975 = arith.addf %972, %974 : vector<8x128xf32>
    %976 = vector.extract_strided_slice %975 {offsets = [0, 0], sizes = [8, 32], strides = [1, 1]} : vector<8x128xf32> to vector<8x32xf32>
    %977 = arith.negf %976 : vector<8x32xf32>
    %978 = math.exp %977 : vector<8x32xf32>
    %cst_671 = arith.constant 1.000000e+00 : f32
    %979 = vector.broadcast %cst_671 : f32 to vector<8x32xf32>
    %980 = arith.addf %979, %978 : vector<8x32xf32>
    %981 = arith.divf %979, %980 : vector<8x32xf32>
    %982 = vector.extract_strided_slice %975 {offsets = [0, 32], sizes = [8, 32], strides = [1, 1]} : vector<8x128xf32> to vector<8x32xf32>
    %983 = arith.negf %982 : vector<8x32xf32>
    %984 = math.exp %983 : vector<8x32xf32>
    %cst_672 = arith.constant 1.000000e+00 : f32
    %985 = vector.broadcast %cst_672 : f32 to vector<8x32xf32>
    %986 = arith.addf %985, %984 : vector<8x32xf32>
    %987 = arith.divf %985, %986 : vector<8x32xf32>
    %988 = vector.extract_strided_slice %975 {offsets = [0, 64], sizes = [8, 32], strides = [1, 1]} : vector<8x128xf32> to vector<8x32xf32>
    %989 = math.tanh %988 : vector<8x32xf32>
    %990 = vector.extract_strided_slice %975 {offsets = [0, 96], sizes = [8, 32], strides = [1, 1]} : vector<8x128xf32> to vector<8x32xf32>
    %991 = arith.negf %990 : vector<8x32xf32>
    %992 = math.exp %991 : vector<8x32xf32>
    %cst_673 = arith.constant 1.000000e+00 : f32
    %993 = vector.broadcast %cst_673 : f32 to vector<8x32xf32>
    %994 = arith.addf %993, %992 : vector<8x32xf32>
    %995 = arith.divf %993, %994 : vector<8x32xf32>
    %996 = arith.mulf %987, %967 : vector<8x32xf32>
    %997 = arith.mulf %981, %989 : vector<8x32xf32>
    %998 = arith.addf %996, %997 : vector<8x32xf32>
    %999 = math.tanh %998 : vector<8x32xf32>
    %1000 = arith.mulf %995, %999 : vector<8x32xf32>
    %c56 = arith.constant 56 : index
    %c0_674 = arith.constant 0 : index
    %1001 = vector.load %arg11[%c56, %c0_674] : memref<64x32xf32, #tpu.memory_space<vmem>>, vector<8x32xf32>
    tpu.vector_store %arg11[%c56, %c0_674], %1000 {strides = array<i32>} : memref<64x32xf32, #tpu.memory_space<vmem>>, vector<8x32xf32>,
    %c0_675 = arith.constant 0 : index
    %c0_676 = arith.constant 0 : index
    %c0_677 = arith.constant 0 : index
    %1002 = vector.load %arg13[%c0_675, %c0_676, %c0_677] : memref<2x8x32xf32, #tpu.memory_space<vmem>>, vector<1x8x32xf32>
    %1003 = vector.shape_cast %1002 : vector<1x8x32xf32> to vector<8x32xf32>
    %1004 = vector.shape_cast %1000 : vector<8x32xf32> to vector<1x8x32xf32>
    tpu.vector_store %arg13[%c0_675, %c0_676, %c0_677], %1004 {strides = array<i32>} : memref<2x8x32xf32, #tpu.memory_space<vmem>>, vector<1x8x32xf32>,
    %c0_678 = arith.constant 0 : index
    %c0_679 = arith.constant 0 : index
    %c0_680 = arith.constant 0 : index
    %1005 = vector.load %arg14[%c0_678, %c0_679, %c0_680] : memref<2x8x32xf32, #tpu.memory_space<vmem>>, vector<1x8x32xf32>
    %1006 = vector.shape_cast %1005 : vector<1x8x32xf32> to vector<8x32xf32>
    %1007 = vector.shape_cast %998 : vector<8x32xf32> to vector<1x8x32xf32>
    tpu.vector_store %arg14[%c0_678, %c0_679, %c0_680], %1007 {strides = array<i32>} : memref<2x8x32xf32, #tpu.memory_space<vmem>>, vector<1x8x32xf32>,
    %c0_681 = arith.constant 0 : index
    %c0_682 = arith.constant 0 : index
    %c0_683 = arith.constant 0 : index
    %1008 = vector.load %arg8[%c0_681, %c0_682, %c0_683] : memref<2x8x32xf32, #tpu.memory_space<vmem>>, vector<1x8x32xf32>
    %1009 = vector.shape_cast %1008 : vector<1x8x32xf32> to vector<8x32xf32>
    %1010 = vector.shape_cast %1000 : vector<8x32xf32> to vector<1x8x32xf32>
    tpu.vector_store %arg8[%c0_681, %c0_682, %c0_683], %1010 {strides = array<i32>} : memref<2x8x32xf32, #tpu.memory_space<vmem>>, vector<1x8x32xf32>,
    %c0_684 = arith.constant 0 : index
    %c0_685 = arith.constant 0 : index
    %c0_686 = arith.constant 0 : index
    %1011 = vector.load %arg9[%c0_684, %c0_685, %c0_686] : memref<2x8x32xf32, #tpu.memory_space<vmem>>, vector<1x8x32xf32>
    %1012 = vector.shape_cast %1011 : vector<1x8x32xf32> to vector<8x32xf32>
    %1013 = vector.shape_cast %998 : vector<8x32xf32> to vector<1x8x32xf32>
    tpu.vector_store %arg9[%c0_684, %c0_685, %c0_686], %1013 {strides = array<i32>} : memref<2x8x32xf32, #tpu.memory_space<vmem>>, vector<1x8x32xf32>,
    %c0_687 = arith.constant 0 : index
    %c0_688 = arith.constant 0 : index
    %1014 = vector.load %arg11[%c0_687, %c0_688] : memref<64x32xf32, #tpu.memory_space<vmem>>, vector<64x32xf32>
    %c0_689 = arith.constant 0 : index
    %c0_690 = arith.constant 0 : index
    %c0_691 = arith.constant 0 : index
    %1015 = vector.load %arg4[%c0_689, %c0_690, %c0_691] : memref<1x32x128xbf16, #tpu.memory_space<vmem>>, vector<1x32x128xbf16>
    %1016 = vector.shape_cast %1015 : vector<1x32x128xbf16> to vector<32x128xbf16>
    %1017 = arith.truncf %1014 : vector<64x32xf32> to vector<64x32xbf16>
    %cst_692 = arith.constant dense<0.000000e+00> : vector<64x128xf32>
    %1018 = tpu.matmul %1017, %1016, %cst_692 {dimension_numbers = #tpu.dot_dimension_numbers<[1], [0], [0], [1], [0, 0, 1, 1], [], []>} : vector<64x32xbf16>, vector<32x128xbf16>, vector<64x128xf32> -> vector<64x128xf32>
    %c1_693 = arith.constant 1 : index
    %c0_694 = arith.constant 0 : index
    %c0_695 = arith.constant 0 : index
    %1019 = vector.load %arg6[%c1_693, %c0_694, %c0_695] : memref<2x1x128xf32, #tpu.memory_space<vmem>>, vector<1x1x128xf32>
    %1020 = vector.shape_cast %1019 : vector<1x1x128xf32> to vector<1x128xf32>
    %1021 = vector.broadcast %1020 : vector<1x128xf32> to vector<64x128xf32>
    %1022 = arith.addf %1018, %1021 : vector<64x128xf32>
    %1023 = vector.extract_strided_slice %1022 {offsets = [0, 0], sizes = [8, 128], strides = [1, 1]} : vector<64x128xf32> to vector<8x128xf32>
    %c0_696 = arith.constant 0 : index
    %c0_697 = arith.constant 0 : index
    %c0_698 = arith.constant 0 : index
    %1024 = vector.load %arg12[%c0_696, %c0_697, %c0_698] : memref<8x8x128xf32, #tpu.memory_space<vmem>>, vector<1x8x128xf32>
    %1025 = vector.shape_cast %1024 : vector<1x8x128xf32> to vector<8x128xf32>
    %1026 = vector.shape_cast %1023 : vector<8x128xf32> to vector<1x8x128xf32>
    tpu.vector_store %arg12[%c0_696, %c0_697, %c0_698], %1026 {strides = array<i32>} : memref<8x8x128xf32, #tpu.memory_space<vmem>>, vector<1x8x128xf32>,
    %1027 = vector.extract_strided_slice %1022 {offsets = [8, 0], sizes = [8, 128], strides = [1, 1]} : vector<64x128xf32> to vector<8x128xf32>
    %c1_699 = arith.constant 1 : index
    %c0_700 = arith.constant 0 : index
    %c0_701 = arith.constant 0 : index
    %1028 = vector.load %arg12[%c1_699, %c0_700, %c0_701] : memref<8x8x128xf32, #tpu.memory_space<vmem>>, vector<1x8x128xf32>
    %1029 = vector.shape_cast %1028 : vector<1x8x128xf32> to vector<8x128xf32>
    %1030 = vector.shape_cast %1027 : vector<8x128xf32> to vector<1x8x128xf32>
    tpu.vector_store %arg12[%c1_699, %c0_700, %c0_701], %1030 {strides = array<i32>} : memref<8x8x128xf32, #tpu.memory_space<vmem>>, vector<1x8x128xf32>,
    %1031 = vector.extract_strided_slice %1022 {offsets = [16, 0], sizes = [8, 128], strides = [1, 1]} : vector<64x128xf32> to vector<8x128xf32>
    %c2_702 = arith.constant 2 : index
    %c0_703 = arith.constant 0 : index
    %c0_704 = arith.constant 0 : index
    %1032 = vector.load %arg12[%c2_702, %c0_703, %c0_704] : memref<8x8x128xf32, #tpu.memory_space<vmem>>, vector<1x8x128xf32>
    %1033 = vector.shape_cast %1032 : vector<1x8x128xf32> to vector<8x128xf32>
    %1034 = vector.shape_cast %1031 : vector<8x128xf32> to vector<1x8x128xf32>
    tpu.vector_store %arg12[%c2_702, %c0_703, %c0_704], %1034 {strides = array<i32>} : memref<8x8x128xf32, #tpu.memory_space<vmem>>, vector<1x8x128xf32>,
    %1035 = vector.extract_strided_slice %1022 {offsets = [24, 0], sizes = [8, 128], strides = [1, 1]} : vector<64x128xf32> to vector<8x128xf32>
    %c3_705 = arith.constant 3 : index
    %c0_706 = arith.constant 0 : index
    %c0_707 = arith.constant 0 : index
    %1036 = vector.load %arg12[%c3_705, %c0_706, %c0_707] : memref<8x8x128xf32, #tpu.memory_space<vmem>>, vector<1x8x128xf32>
    %1037 = vector.shape_cast %1036 : vector<1x8x128xf32> to vector<8x128xf32>
    %1038 = vector.shape_cast %1035 : vector<8x128xf32> to vector<1x8x128xf32>
    tpu.vector_store %arg12[%c3_705, %c0_706, %c0_707], %1038 {strides = array<i32>} : memref<8x8x128xf32, #tpu.memory_space<vmem>>, vector<1x8x128xf32>,
    %1039 = vector.extract_strided_slice %1022 {offsets = [32, 0], sizes = [8, 128], strides = [1, 1]} : vector<64x128xf32> to vector<8x128xf32>
    %c4_708 = arith.constant 4 : index
    %c0_709 = arith.constant 0 : index
    %c0_710 = arith.constant 0 : index
    %1040 = vector.load %arg12[%c4_708, %c0_709, %c0_710] : memref<8x8x128xf32, #tpu.memory_space<vmem>>, vector<1x8x128xf32>
    %1041 = vector.shape_cast %1040 : vector<1x8x128xf32> to vector<8x128xf32>
    %1042 = vector.shape_cast %1039 : vector<8x128xf32> to vector<1x8x128xf32>
    tpu.vector_store %arg12[%c4_708, %c0_709, %c0_710], %1042 {strides = array<i32>} : memref<8x8x128xf32, #tpu.memory_space<vmem>>, vector<1x8x128xf32>,
    %1043 = vector.extract_strided_slice %1022 {offsets = [40, 0], sizes = [8, 128], strides = [1, 1]} : vector<64x128xf32> to vector<8x128xf32>
    %c5_711 = arith.constant 5 : index
    %c0_712 = arith.constant 0 : index
    %c0_713 = arith.constant 0 : index
    %1044 = vector.load %arg12[%c5_711, %c0_712, %c0_713] : memref<8x8x128xf32, #tpu.memory_space<vmem>>, vector<1x8x128xf32>
    %1045 = vector.shape_cast %1044 : vector<1x8x128xf32> to vector<8x128xf32>
    %1046 = vector.shape_cast %1043 : vector<8x128xf32> to vector<1x8x128xf32>
    tpu.vector_store %arg12[%c5_711, %c0_712, %c0_713], %1046 {strides = array<i32>} : memref<8x8x128xf32, #tpu.memory_space<vmem>>, vector<1x8x128xf32>,
    %1047 = vector.extract_strided_slice %1022 {offsets = [48, 0], sizes = [8, 128], strides = [1, 1]} : vector<64x128xf32> to vector<8x128xf32>
    %c6_714 = arith.constant 6 : index
    %c0_715 = arith.constant 0 : index
    %c0_716 = arith.constant 0 : index
    %1048 = vector.load %arg12[%c6_714, %c0_715, %c0_716] : memref<8x8x128xf32, #tpu.memory_space<vmem>>, vector<1x8x128xf32>
    %1049 = vector.shape_cast %1048 : vector<1x8x128xf32> to vector<8x128xf32>
    %1050 = vector.shape_cast %1047 : vector<8x128xf32> to vector<1x8x128xf32>
    tpu.vector_store %arg12[%c6_714, %c0_715, %c0_716], %1050 {strides = array<i32>} : memref<8x8x128xf32, #tpu.memory_space<vmem>>, vector<1x8x128xf32>,
    %1051 = vector.extract_strided_slice %1022 {offsets = [56, 0], sizes = [8, 128], strides = [1, 1]} : vector<64x128xf32> to vector<8x128xf32>
    %c7_717 = arith.constant 7 : index
    %c0_718 = arith.constant 0 : index
    %c0_719 = arith.constant 0 : index
    %1052 = vector.load %arg12[%c7_717, %c0_718, %c0_719] : memref<8x8x128xf32, #tpu.memory_space<vmem>>, vector<1x8x128xf32>
    %1053 = vector.shape_cast %1052 : vector<1x8x128xf32> to vector<8x128xf32>
    %1054 = vector.shape_cast %1051 : vector<8x128xf32> to vector<1x8x128xf32>
    tpu.vector_store %arg12[%c7_717, %c0_718, %c0_719], %1054 {strides = array<i32>} : memref<8x8x128xf32, #tpu.memory_space<vmem>>, vector<1x8x128xf32>,
    %c1_720 = arith.constant 1 : index
    %c0_721 = arith.constant 0 : index
    %c0_722 = arith.constant 0 : index
    %1055 = vector.load %arg5[%c1_720, %c0_721, %c0_722] : memref<2x32x128xbf16, #tpu.memory_space<vmem>>, vector<1x32x128xbf16>
    %1056 = vector.shape_cast %1055 : vector<1x32x128xbf16> to vector<32x128xbf16>
    %c1_723 = arith.constant 1 : index
    %c0_724 = arith.constant 0 : index
    %c0_725 = arith.constant 0 : index
    %1057 = vector.load %arg13[%c1_723, %c0_724, %c0_725] : memref<2x8x32xf32, #tpu.memory_space<vmem>>, vector<1x8x32xf32>
    %1058 = vector.shape_cast %1057 : vector<1x8x32xf32> to vector<8x32xf32>
    %c1_726 = arith.constant 1 : index
    %c0_727 = arith.constant 0 : index
    %c0_728 = arith.constant 0 : index
    %1059 = vector.load %arg14[%c1_726, %c0_727, %c0_728] : memref<2x8x32xf32, #tpu.memory_space<vmem>>, vector<1x8x32xf32>
    %1060 = vector.shape_cast %1059 : vector<1x8x32xf32> to vector<8x32xf32>
    %c0_729 = arith.constant 0 : index
    %c0_730 = arith.constant 0 : index
    %c0_731 = arith.constant 0 : index
    %1061 = vector.load %arg12[%c0_729, %c0_730, %c0_731] : memref<8x8x128xf32, #tpu.memory_space<vmem>>, vector<1x8x128xf32>
    %1062 = vector.shape_cast %1061 : vector<1x8x128xf32> to vector<8x128xf32>
    %1063 = arith.truncf %1058 : vector<8x32xf32> to vector<8x32xbf16>
    %cst_732 = arith.constant dense<0.000000e+00> : vector<8x128xf32>
    %1064 = tpu.matmul %1063, %1056, %cst_732 {dimension_numbers = #tpu.dot_dimension_numbers<[1], [0], [0], [1], [0, 0, 1, 1], [], []>} : vector<8x32xbf16>, vector<32x128xbf16>, vector<8x128xf32> -> vector<8x128xf32>
    %1065 = arith.addf %1062, %1064 : vector<8x128xf32>
    %1066 = vector.extract_strided_slice %1065 {offsets = [0, 0], sizes = [8, 32], strides = [1, 1]} : vector<8x128xf32> to vector<8x32xf32>
    %1067 = arith.negf %1066 : vector<8x32xf32>
    %1068 = math.exp %1067 : vector<8x32xf32>
    %cst_733 = arith.constant 1.000000e+00 : f32
    %1069 = vector.broadcast %cst_733 : f32 to vector<8x32xf32>
    %1070 = arith.addf %1069, %1068 : vector<8x32xf32>
    %1071 = arith.divf %1069, %1070 : vector<8x32xf32>
    %1072 = vector.extract_strided_slice %1065 {offsets = [0, 32], sizes = [8, 32], strides = [1, 1]} : vector<8x128xf32> to vector<8x32xf32>
    %1073 = arith.negf %1072 : vector<8x32xf32>
    %1074 = math.exp %1073 : vector<8x32xf32>
    %cst_734 = arith.constant 1.000000e+00 : f32
    %1075 = vector.broadcast %cst_734 : f32 to vector<8x32xf32>
    %1076 = arith.addf %1075, %1074 : vector<8x32xf32>
    %1077 = arith.divf %1075, %1076 : vector<8x32xf32>
    %1078 = vector.extract_strided_slice %1065 {offsets = [0, 64], sizes = [8, 32], strides = [1, 1]} : vector<8x128xf32> to vector<8x32xf32>
    %1079 = math.tanh %1078 : vector<8x32xf32>
    %1080 = vector.extract_strided_slice %1065 {offsets = [0, 96], sizes = [8, 32], strides = [1, 1]} : vector<8x128xf32> to vector<8x32xf32>
    %1081 = arith.negf %1080 : vector<8x32xf32>
    %1082 = math.exp %1081 : vector<8x32xf32>
    %cst_735 = arith.constant 1.000000e+00 : f32
    %1083 = vector.broadcast %cst_735 : f32 to vector<8x32xf32>
    %1084 = arith.addf %1083, %1082 : vector<8x32xf32>
    %1085 = arith.divf %1083, %1084 : vector<8x32xf32>
    %1086 = arith.mulf %1077, %1060 : vector<8x32xf32>
    %1087 = arith.mulf %1071, %1079 : vector<8x32xf32>
    %1088 = arith.addf %1086, %1087 : vector<8x32xf32>
    %1089 = math.tanh %1088 : vector<8x32xf32>
    %1090 = arith.mulf %1085, %1089 : vector<8x32xf32>
    %c0_736 = arith.constant 0 : index
    %c0_737 = arith.constant 0 : index
    %c0_738 = arith.constant 0 : index
    %1091 = vector.load %arg7[%c0_736, %c0_737, %c0_738] : memref<8x8x32xf32, #tpu.memory_space<vmem>>, vector<1x8x32xf32>
    %1092 = vector.shape_cast %1091 : vector<1x8x32xf32> to vector<8x32xf32>
    %1093 = vector.shape_cast %1090 : vector<8x32xf32> to vector<1x8x32xf32>
    tpu.vector_store %arg7[%c0_736, %c0_737, %c0_738], %1093 {strides = array<i32>} : memref<8x8x32xf32, #tpu.memory_space<vmem>>, vector<1x8x32xf32>,
    %c1_739 = arith.constant 1 : index
    %c0_740 = arith.constant 0 : index
    %c0_741 = arith.constant 0 : index
    %1094 = vector.load %arg12[%c1_739, %c0_740, %c0_741] : memref<8x8x128xf32, #tpu.memory_space<vmem>>, vector<1x8x128xf32>
    %1095 = vector.shape_cast %1094 : vector<1x8x128xf32> to vector<8x128xf32>
    %1096 = arith.truncf %1090 : vector<8x32xf32> to vector<8x32xbf16>
    %cst_742 = arith.constant dense<0.000000e+00> : vector<8x128xf32>
    %1097 = tpu.matmul %1096, %1056, %cst_742 {dimension_numbers = #tpu.dot_dimension_numbers<[1], [0], [0], [1], [0, 0, 1, 1], [], []>} : vector<8x32xbf16>, vector<32x128xbf16>, vector<8x128xf32> -> vector<8x128xf32>
    %1098 = arith.addf %1095, %1097 : vector<8x128xf32>
    %1099 = vector.extract_strided_slice %1098 {offsets = [0, 0], sizes = [8, 32], strides = [1, 1]} : vector<8x128xf32> to vector<8x32xf32>
    %1100 = arith.negf %1099 : vector<8x32xf32>
    %1101 = math.exp %1100 : vector<8x32xf32>
    %cst_743 = arith.constant 1.000000e+00 : f32
    %1102 = vector.broadcast %cst_743 : f32 to vector<8x32xf32>
    %1103 = arith.addf %1102, %1101 : vector<8x32xf32>
    %1104 = arith.divf %1102, %1103 : vector<8x32xf32>
    %1105 = vector.extract_strided_slice %1098 {offsets = [0, 32], sizes = [8, 32], strides = [1, 1]} : vector<8x128xf32> to vector<8x32xf32>
    %1106 = arith.negf %1105 : vector<8x32xf32>
    %1107 = math.exp %1106 : vector<8x32xf32>
    %cst_744 = arith.constant 1.000000e+00 : f32
    %1108 = vector.broadcast %cst_744 : f32 to vector<8x32xf32>
    %1109 = arith.addf %1108, %1107 : vector<8x32xf32>
    %1110 = arith.divf %1108, %1109 : vector<8x32xf32>
    %1111 = vector.extract_strided_slice %1098 {offsets = [0, 64], sizes = [8, 32], strides = [1, 1]} : vector<8x128xf32> to vector<8x32xf32>
    %1112 = math.tanh %1111 : vector<8x32xf32>
    %1113 = vector.extract_strided_slice %1098 {offsets = [0, 96], sizes = [8, 32], strides = [1, 1]} : vector<8x128xf32> to vector<8x32xf32>
    %1114 = arith.negf %1113 : vector<8x32xf32>
    %1115 = math.exp %1114 : vector<8x32xf32>
    %cst_745 = arith.constant 1.000000e+00 : f32
    %1116 = vector.broadcast %cst_745 : f32 to vector<8x32xf32>
    %1117 = arith.addf %1116, %1115 : vector<8x32xf32>
    %1118 = arith.divf %1116, %1117 : vector<8x32xf32>
    %1119 = arith.mulf %1110, %1088 : vector<8x32xf32>
    %1120 = arith.mulf %1104, %1112 : vector<8x32xf32>
    %1121 = arith.addf %1119, %1120 : vector<8x32xf32>
    %1122 = math.tanh %1121 : vector<8x32xf32>
    %1123 = arith.mulf %1118, %1122 : vector<8x32xf32>
    %c1_746 = arith.constant 1 : index
    %c0_747 = arith.constant 0 : index
    %c0_748 = arith.constant 0 : index
    %1124 = vector.load %arg7[%c1_746, %c0_747, %c0_748] : memref<8x8x32xf32, #tpu.memory_space<vmem>>, vector<1x8x32xf32>
    %1125 = vector.shape_cast %1124 : vector<1x8x32xf32> to vector<8x32xf32>
    %1126 = vector.shape_cast %1123 : vector<8x32xf32> to vector<1x8x32xf32>
    tpu.vector_store %arg7[%c1_746, %c0_747, %c0_748], %1126 {strides = array<i32>} : memref<8x8x32xf32, #tpu.memory_space<vmem>>, vector<1x8x32xf32>,
    %c2_749 = arith.constant 2 : index
    %c0_750 = arith.constant 0 : index
    %c0_751 = arith.constant 0 : index
    %1127 = vector.load %arg12[%c2_749, %c0_750, %c0_751] : memref<8x8x128xf32, #tpu.memory_space<vmem>>, vector<1x8x128xf32>
    %1128 = vector.shape_cast %1127 : vector<1x8x128xf32> to vector<8x128xf32>
    %1129 = arith.truncf %1123 : vector<8x32xf32> to vector<8x32xbf16>
    %cst_752 = arith.constant dense<0.000000e+00> : vector<8x128xf32>
    %1130 = tpu.matmul %1129, %1056, %cst_752 {dimension_numbers = #tpu.dot_dimension_numbers<[1], [0], [0], [1], [0, 0, 1, 1], [], []>} : vector<8x32xbf16>, vector<32x128xbf16>, vector<8x128xf32> -> vector<8x128xf32>
    %1131 = arith.addf %1128, %1130 : vector<8x128xf32>
    %1132 = vector.extract_strided_slice %1131 {offsets = [0, 0], sizes = [8, 32], strides = [1, 1]} : vector<8x128xf32> to vector<8x32xf32>
    %1133 = arith.negf %1132 : vector<8x32xf32>
    %1134 = math.exp %1133 : vector<8x32xf32>
    %cst_753 = arith.constant 1.000000e+00 : f32
    %1135 = vector.broadcast %cst_753 : f32 to vector<8x32xf32>
    %1136 = arith.addf %1135, %1134 : vector<8x32xf32>
    %1137 = arith.divf %1135, %1136 : vector<8x32xf32>
    %1138 = vector.extract_strided_slice %1131 {offsets = [0, 32], sizes = [8, 32], strides = [1, 1]} : vector<8x128xf32> to vector<8x32xf32>
    %1139 = arith.negf %1138 : vector<8x32xf32>
    %1140 = math.exp %1139 : vector<8x32xf32>
    %cst_754 = arith.constant 1.000000e+00 : f32
    %1141 = vector.broadcast %cst_754 : f32 to vector<8x32xf32>
    %1142 = arith.addf %1141, %1140 : vector<8x32xf32>
    %1143 = arith.divf %1141, %1142 : vector<8x32xf32>
    %1144 = vector.extract_strided_slice %1131 {offsets = [0, 64], sizes = [8, 32], strides = [1, 1]} : vector<8x128xf32> to vector<8x32xf32>
    %1145 = math.tanh %1144 : vector<8x32xf32>
    %1146 = vector.extract_strided_slice %1131 {offsets = [0, 96], sizes = [8, 32], strides = [1, 1]} : vector<8x128xf32> to vector<8x32xf32>
    %1147 = arith.negf %1146 : vector<8x32xf32>
    %1148 = math.exp %1147 : vector<8x32xf32>
    %cst_755 = arith.constant 1.000000e+00 : f32
    %1149 = vector.broadcast %cst_755 : f32 to vector<8x32xf32>
    %1150 = arith.addf %1149, %1148 : vector<8x32xf32>
    %1151 = arith.divf %1149, %1150 : vector<8x32xf32>
    %1152 = arith.mulf %1143, %1121 : vector<8x32xf32>
    %1153 = arith.mulf %1137, %1145 : vector<8x32xf32>
    %1154 = arith.addf %1152, %1153 : vector<8x32xf32>
    %1155 = math.tanh %1154 : vector<8x32xf32>
    %1156 = arith.mulf %1151, %1155 : vector<8x32xf32>
    %c2_756 = arith.constant 2 : index
    %c0_757 = arith.constant 0 : index
    %c0_758 = arith.constant 0 : index
    %1157 = vector.load %arg7[%c2_756, %c0_757, %c0_758] : memref<8x8x32xf32, #tpu.memory_space<vmem>>, vector<1x8x32xf32>
    %1158 = vector.shape_cast %1157 : vector<1x8x32xf32> to vector<8x32xf32>
    %1159 = vector.shape_cast %1156 : vector<8x32xf32> to vector<1x8x32xf32>
    tpu.vector_store %arg7[%c2_756, %c0_757, %c0_758], %1159 {strides = array<i32>} : memref<8x8x32xf32, #tpu.memory_space<vmem>>, vector<1x8x32xf32>,
    %c3_759 = arith.constant 3 : index
    %c0_760 = arith.constant 0 : index
    %c0_761 = arith.constant 0 : index
    %1160 = vector.load %arg12[%c3_759, %c0_760, %c0_761] : memref<8x8x128xf32, #tpu.memory_space<vmem>>, vector<1x8x128xf32>
    %1161 = vector.shape_cast %1160 : vector<1x8x128xf32> to vector<8x128xf32>
    %1162 = arith.truncf %1156 : vector<8x32xf32> to vector<8x32xbf16>
    %cst_762 = arith.constant dense<0.000000e+00> : vector<8x128xf32>
    %1163 = tpu.matmul %1162, %1056, %cst_762 {dimension_numbers = #tpu.dot_dimension_numbers<[1], [0], [0], [1], [0, 0, 1, 1], [], []>} : vector<8x32xbf16>, vector<32x128xbf16>, vector<8x128xf32> -> vector<8x128xf32>
    %1164 = arith.addf %1161, %1163 : vector<8x128xf32>
    %1165 = vector.extract_strided_slice %1164 {offsets = [0, 0], sizes = [8, 32], strides = [1, 1]} : vector<8x128xf32> to vector<8x32xf32>
    %1166 = arith.negf %1165 : vector<8x32xf32>
    %1167 = math.exp %1166 : vector<8x32xf32>
    %cst_763 = arith.constant 1.000000e+00 : f32
    %1168 = vector.broadcast %cst_763 : f32 to vector<8x32xf32>
    %1169 = arith.addf %1168, %1167 : vector<8x32xf32>
    %1170 = arith.divf %1168, %1169 : vector<8x32xf32>
    %1171 = vector.extract_strided_slice %1164 {offsets = [0, 32], sizes = [8, 32], strides = [1, 1]} : vector<8x128xf32> to vector<8x32xf32>
    %1172 = arith.negf %1171 : vector<8x32xf32>
    %1173 = math.exp %1172 : vector<8x32xf32>
    %cst_764 = arith.constant 1.000000e+00 : f32
    %1174 = vector.broadcast %cst_764 : f32 to vector<8x32xf32>
    %1175 = arith.addf %1174, %1173 : vector<8x32xf32>
    %1176 = arith.divf %1174, %1175 : vector<8x32xf32>
    %1177 = vector.extract_strided_slice %1164 {offsets = [0, 64], sizes = [8, 32], strides = [1, 1]} : vector<8x128xf32> to vector<8x32xf32>
    %1178 = math.tanh %1177 : vector<8x32xf32>
    %1179 = vector.extract_strided_slice %1164 {offsets = [0, 96], sizes = [8, 32], strides = [1, 1]} : vector<8x128xf32> to vector<8x32xf32>
    %1180 = arith.negf %1179 : vector<8x32xf32>
    %1181 = math.exp %1180 : vector<8x32xf32>
    %cst_765 = arith.constant 1.000000e+00 : f32
    %1182 = vector.broadcast %cst_765 : f32 to vector<8x32xf32>
    %1183 = arith.addf %1182, %1181 : vector<8x32xf32>
    %1184 = arith.divf %1182, %1183 : vector<8x32xf32>
    %1185 = arith.mulf %1176, %1154 : vector<8x32xf32>
    %1186 = arith.mulf %1170, %1178 : vector<8x32xf32>
    %1187 = arith.addf %1185, %1186 : vector<8x32xf32>
    %1188 = math.tanh %1187 : vector<8x32xf32>
    %1189 = arith.mulf %1184, %1188 : vector<8x32xf32>
    %c3_766 = arith.constant 3 : index
    %c0_767 = arith.constant 0 : index
    %c0_768 = arith.constant 0 : index
    %1190 = vector.load %arg7[%c3_766, %c0_767, %c0_768] : memref<8x8x32xf32, #tpu.memory_space<vmem>>, vector<1x8x32xf32>
    %1191 = vector.shape_cast %1190 : vector<1x8x32xf32> to vector<8x32xf32>
    %1192 = vector.shape_cast %1189 : vector<8x32xf32> to vector<1x8x32xf32>
    tpu.vector_store %arg7[%c3_766, %c0_767, %c0_768], %1192 {strides = array<i32>} : memref<8x8x32xf32, #tpu.memory_space<vmem>>, vector<1x8x32xf32>,
    %c4_769 = arith.constant 4 : index
    %c0_770 = arith.constant 0 : index
    %c0_771 = arith.constant 0 : index
    %1193 = vector.load %arg12[%c4_769, %c0_770, %c0_771] : memref<8x8x128xf32, #tpu.memory_space<vmem>>, vector<1x8x128xf32>
    %1194 = vector.shape_cast %1193 : vector<1x8x128xf32> to vector<8x128xf32>
    %1195 = arith.truncf %1189 : vector<8x32xf32> to vector<8x32xbf16>
    %cst_772 = arith.constant dense<0.000000e+00> : vector<8x128xf32>
    %1196 = tpu.matmul %1195, %1056, %cst_772 {dimension_numbers = #tpu.dot_dimension_numbers<[1], [0], [0], [1], [0, 0, 1, 1], [], []>} : vector<8x32xbf16>, vector<32x128xbf16>, vector<8x128xf32> -> vector<8x128xf32>
    %1197 = arith.addf %1194, %1196 : vector<8x128xf32>
    %1198 = vector.extract_strided_slice %1197 {offsets = [0, 0], sizes = [8, 32], strides = [1, 1]} : vector<8x128xf32> to vector<8x32xf32>
    %1199 = arith.negf %1198 : vector<8x32xf32>
    %1200 = math.exp %1199 : vector<8x32xf32>
    %cst_773 = arith.constant 1.000000e+00 : f32
    %1201 = vector.broadcast %cst_773 : f32 to vector<8x32xf32>
    %1202 = arith.addf %1201, %1200 : vector<8x32xf32>
    %1203 = arith.divf %1201, %1202 : vector<8x32xf32>
    %1204 = vector.extract_strided_slice %1197 {offsets = [0, 32], sizes = [8, 32], strides = [1, 1]} : vector<8x128xf32> to vector<8x32xf32>
    %1205 = arith.negf %1204 : vector<8x32xf32>
    %1206 = math.exp %1205 : vector<8x32xf32>
    %cst_774 = arith.constant 1.000000e+00 : f32
    %1207 = vector.broadcast %cst_774 : f32 to vector<8x32xf32>
    %1208 = arith.addf %1207, %1206 : vector<8x32xf32>
    %1209 = arith.divf %1207, %1208 : vector<8x32xf32>
    %1210 = vector.extract_strided_slice %1197 {offsets = [0, 64], sizes = [8, 32], strides = [1, 1]} : vector<8x128xf32> to vector<8x32xf32>
    %1211 = math.tanh %1210 : vector<8x32xf32>
    %1212 = vector.extract_strided_slice %1197 {offsets = [0, 96], sizes = [8, 32], strides = [1, 1]} : vector<8x128xf32> to vector<8x32xf32>
    %1213 = arith.negf %1212 : vector<8x32xf32>
    %1214 = math.exp %1213 : vector<8x32xf32>
    %cst_775 = arith.constant 1.000000e+00 : f32
    %1215 = vector.broadcast %cst_775 : f32 to vector<8x32xf32>
    %1216 = arith.addf %1215, %1214 : vector<8x32xf32>
    %1217 = arith.divf %1215, %1216 : vector<8x32xf32>
    %1218 = arith.mulf %1209, %1187 : vector<8x32xf32>
    %1219 = arith.mulf %1203, %1211 : vector<8x32xf32>
    %1220 = arith.addf %1218, %1219 : vector<8x32xf32>
    %1221 = math.tanh %1220 : vector<8x32xf32>
    %1222 = arith.mulf %1217, %1221 : vector<8x32xf32>
    %c4_776 = arith.constant 4 : index
    %c0_777 = arith.constant 0 : index
    %c0_778 = arith.constant 0 : index
    %1223 = vector.load %arg7[%c4_776, %c0_777, %c0_778] : memref<8x8x32xf32, #tpu.memory_space<vmem>>, vector<1x8x32xf32>
    %1224 = vector.shape_cast %1223 : vector<1x8x32xf32> to vector<8x32xf32>
    %1225 = vector.shape_cast %1222 : vector<8x32xf32> to vector<1x8x32xf32>
    tpu.vector_store %arg7[%c4_776, %c0_777, %c0_778], %1225 {strides = array<i32>} : memref<8x8x32xf32, #tpu.memory_space<vmem>>, vector<1x8x32xf32>,
    %c5_779 = arith.constant 5 : index
    %c0_780 = arith.constant 0 : index
    %c0_781 = arith.constant 0 : index
    %1226 = vector.load %arg12[%c5_779, %c0_780, %c0_781] : memref<8x8x128xf32, #tpu.memory_space<vmem>>, vector<1x8x128xf32>
    %1227 = vector.shape_cast %1226 : vector<1x8x128xf32> to vector<8x128xf32>
    %1228 = arith.truncf %1222 : vector<8x32xf32> to vector<8x32xbf16>
    %cst_782 = arith.constant dense<0.000000e+00> : vector<8x128xf32>
    %1229 = tpu.matmul %1228, %1056, %cst_782 {dimension_numbers = #tpu.dot_dimension_numbers<[1], [0], [0], [1], [0, 0, 1, 1], [], []>} : vector<8x32xbf16>, vector<32x128xbf16>, vector<8x128xf32> -> vector<8x128xf32>
    %1230 = arith.addf %1227, %1229 : vector<8x128xf32>
    %1231 = vector.extract_strided_slice %1230 {offsets = [0, 0], sizes = [8, 32], strides = [1, 1]} : vector<8x128xf32> to vector<8x32xf32>
    %1232 = arith.negf %1231 : vector<8x32xf32>
    %1233 = math.exp %1232 : vector<8x32xf32>
    %cst_783 = arith.constant 1.000000e+00 : f32
    %1234 = vector.broadcast %cst_783 : f32 to vector<8x32xf32>
    %1235 = arith.addf %1234, %1233 : vector<8x32xf32>
    %1236 = arith.divf %1234, %1235 : vector<8x32xf32>
    %1237 = vector.extract_strided_slice %1230 {offsets = [0, 32], sizes = [8, 32], strides = [1, 1]} : vector<8x128xf32> to vector<8x32xf32>
    %1238 = arith.negf %1237 : vector<8x32xf32>
    %1239 = math.exp %1238 : vector<8x32xf32>
    %cst_784 = arith.constant 1.000000e+00 : f32
    %1240 = vector.broadcast %cst_784 : f32 to vector<8x32xf32>
    %1241 = arith.addf %1240, %1239 : vector<8x32xf32>
    %1242 = arith.divf %1240, %1241 : vector<8x32xf32>
    %1243 = vector.extract_strided_slice %1230 {offsets = [0, 64], sizes = [8, 32], strides = [1, 1]} : vector<8x128xf32> to vector<8x32xf32>
    %1244 = math.tanh %1243 : vector<8x32xf32>
    %1245 = vector.extract_strided_slice %1230 {offsets = [0, 96], sizes = [8, 32], strides = [1, 1]} : vector<8x128xf32> to vector<8x32xf32>
    %1246 = arith.negf %1245 : vector<8x32xf32>
    %1247 = math.exp %1246 : vector<8x32xf32>
    %cst_785 = arith.constant 1.000000e+00 : f32
    %1248 = vector.broadcast %cst_785 : f32 to vector<8x32xf32>
    %1249 = arith.addf %1248, %1247 : vector<8x32xf32>
    %1250 = arith.divf %1248, %1249 : vector<8x32xf32>
    %1251 = arith.mulf %1242, %1220 : vector<8x32xf32>
    %1252 = arith.mulf %1236, %1244 : vector<8x32xf32>
    %1253 = arith.addf %1251, %1252 : vector<8x32xf32>
    %1254 = math.tanh %1253 : vector<8x32xf32>
    %1255 = arith.mulf %1250, %1254 : vector<8x32xf32>
    %c5_786 = arith.constant 5 : index
    %c0_787 = arith.constant 0 : index
    %c0_788 = arith.constant 0 : index
    %1256 = vector.load %arg7[%c5_786, %c0_787, %c0_788] : memref<8x8x32xf32, #tpu.memory_space<vmem>>, vector<1x8x32xf32>
    %1257 = vector.shape_cast %1256 : vector<1x8x32xf32> to vector<8x32xf32>
    %1258 = vector.shape_cast %1255 : vector<8x32xf32> to vector<1x8x32xf32>
    tpu.vector_store %arg7[%c5_786, %c0_787, %c0_788], %1258 {strides = array<i32>} : memref<8x8x32xf32, #tpu.memory_space<vmem>>, vector<1x8x32xf32>,
    %c6_789 = arith.constant 6 : index
    %c0_790 = arith.constant 0 : index
    %c0_791 = arith.constant 0 : index
    %1259 = vector.load %arg12[%c6_789, %c0_790, %c0_791] : memref<8x8x128xf32, #tpu.memory_space<vmem>>, vector<1x8x128xf32>
    %1260 = vector.shape_cast %1259 : vector<1x8x128xf32> to vector<8x128xf32>
    %1261 = arith.truncf %1255 : vector<8x32xf32> to vector<8x32xbf16>
    %cst_792 = arith.constant dense<0.000000e+00> : vector<8x128xf32>
    %1262 = tpu.matmul %1261, %1056, %cst_792 {dimension_numbers = #tpu.dot_dimension_numbers<[1], [0], [0], [1], [0, 0, 1, 1], [], []>} : vector<8x32xbf16>, vector<32x128xbf16>, vector<8x128xf32> -> vector<8x128xf32>
    %1263 = arith.addf %1260, %1262 : vector<8x128xf32>
    %1264 = vector.extract_strided_slice %1263 {offsets = [0, 0], sizes = [8, 32], strides = [1, 1]} : vector<8x128xf32> to vector<8x32xf32>
    %1265 = arith.negf %1264 : vector<8x32xf32>
    %1266 = math.exp %1265 : vector<8x32xf32>
    %cst_793 = arith.constant 1.000000e+00 : f32
    %1267 = vector.broadcast %cst_793 : f32 to vector<8x32xf32>
    %1268 = arith.addf %1267, %1266 : vector<8x32xf32>
    %1269 = arith.divf %1267, %1268 : vector<8x32xf32>
    %1270 = vector.extract_strided_slice %1263 {offsets = [0, 32], sizes = [8, 32], strides = [1, 1]} : vector<8x128xf32> to vector<8x32xf32>
    %1271 = arith.negf %1270 : vector<8x32xf32>
    %1272 = math.exp %1271 : vector<8x32xf32>
    %cst_794 = arith.constant 1.000000e+00 : f32
    %1273 = vector.broadcast %cst_794 : f32 to vector<8x32xf32>
    %1274 = arith.addf %1273, %1272 : vector<8x32xf32>
    %1275 = arith.divf %1273, %1274 : vector<8x32xf32>
    %1276 = vector.extract_strided_slice %1263 {offsets = [0, 64], sizes = [8, 32], strides = [1, 1]} : vector<8x128xf32> to vector<8x32xf32>
    %1277 = math.tanh %1276 : vector<8x32xf32>
    %1278 = vector.extract_strided_slice %1263 {offsets = [0, 96], sizes = [8, 32], strides = [1, 1]} : vector<8x128xf32> to vector<8x32xf32>
    %1279 = arith.negf %1278 : vector<8x32xf32>
    %1280 = math.exp %1279 : vector<8x32xf32>
    %cst_795 = arith.constant 1.000000e+00 : f32
    %1281 = vector.broadcast %cst_795 : f32 to vector<8x32xf32>
    %1282 = arith.addf %1281, %1280 : vector<8x32xf32>
    %1283 = arith.divf %1281, %1282 : vector<8x32xf32>
    %1284 = arith.mulf %1275, %1253 : vector<8x32xf32>
    %1285 = arith.mulf %1269, %1277 : vector<8x32xf32>
    %1286 = arith.addf %1284, %1285 : vector<8x32xf32>
    %1287 = math.tanh %1286 : vector<8x32xf32>
    %1288 = arith.mulf %1283, %1287 : vector<8x32xf32>
    %c6_796 = arith.constant 6 : index
    %c0_797 = arith.constant 0 : index
    %c0_798 = arith.constant 0 : index
    %1289 = vector.load %arg7[%c6_796, %c0_797, %c0_798] : memref<8x8x32xf32, #tpu.memory_space<vmem>>, vector<1x8x32xf32>
    %1290 = vector.shape_cast %1289 : vector<1x8x32xf32> to vector<8x32xf32>
    %1291 = vector.shape_cast %1288 : vector<8x32xf32> to vector<1x8x32xf32>
    tpu.vector_store %arg7[%c6_796, %c0_797, %c0_798], %1291 {strides = array<i32>} : memref<8x8x32xf32, #tpu.memory_space<vmem>>, vector<1x8x32xf32>,
    %c7_799 = arith.constant 7 : index
    %c0_800 = arith.constant 0 : index
    %c0_801 = arith.constant 0 : index
    %1292 = vector.load %arg12[%c7_799, %c0_800, %c0_801] : memref<8x8x128xf32, #tpu.memory_space<vmem>>, vector<1x8x128xf32>
    %1293 = vector.shape_cast %1292 : vector<1x8x128xf32> to vector<8x128xf32>
    %1294 = arith.truncf %1288 : vector<8x32xf32> to vector<8x32xbf16>
    %cst_802 = arith.constant dense<0.000000e+00> : vector<8x128xf32>
    %1295 = tpu.matmul %1294, %1056, %cst_802 {dimension_numbers = #tpu.dot_dimension_numbers<[1], [0], [0], [1], [0, 0, 1, 1], [], []>} : vector<8x32xbf16>, vector<32x128xbf16>, vector<8x128xf32> -> vector<8x128xf32>
    %1296 = arith.addf %1293, %1295 : vector<8x128xf32>
    %1297 = vector.extract_strided_slice %1296 {offsets = [0, 0], sizes = [8, 32], strides = [1, 1]} : vector<8x128xf32> to vector<8x32xf32>
    %1298 = arith.negf %1297 : vector<8x32xf32>
    %1299 = math.exp %1298 : vector<8x32xf32>
    %cst_803 = arith.constant 1.000000e+00 : f32
    %1300 = vector.broadcast %cst_803 : f32 to vector<8x32xf32>
    %1301 = arith.addf %1300, %1299 : vector<8x32xf32>
    %1302 = arith.divf %1300, %1301 : vector<8x32xf32>
    %1303 = vector.extract_strided_slice %1296 {offsets = [0, 32], sizes = [8, 32], strides = [1, 1]} : vector<8x128xf32> to vector<8x32xf32>
    %1304 = arith.negf %1303 : vector<8x32xf32>
    %1305 = math.exp %1304 : vector<8x32xf32>
    %cst_804 = arith.constant 1.000000e+00 : f32
    %1306 = vector.broadcast %cst_804 : f32 to vector<8x32xf32>
    %1307 = arith.addf %1306, %1305 : vector<8x32xf32>
    %1308 = arith.divf %1306, %1307 : vector<8x32xf32>
    %1309 = vector.extract_strided_slice %1296 {offsets = [0, 64], sizes = [8, 32], strides = [1, 1]} : vector<8x128xf32> to vector<8x32xf32>
    %1310 = math.tanh %1309 : vector<8x32xf32>
    %1311 = vector.extract_strided_slice %1296 {offsets = [0, 96], sizes = [8, 32], strides = [1, 1]} : vector<8x128xf32> to vector<8x32xf32>
    %1312 = arith.negf %1311 : vector<8x32xf32>
    %1313 = math.exp %1312 : vector<8x32xf32>
    %cst_805 = arith.constant 1.000000e+00 : f32
    %1314 = vector.broadcast %cst_805 : f32 to vector<8x32xf32>
    %1315 = arith.addf %1314, %1313 : vector<8x32xf32>
    %1316 = arith.divf %1314, %1315 : vector<8x32xf32>
    %1317 = arith.mulf %1308, %1286 : vector<8x32xf32>
    %1318 = arith.mulf %1302, %1310 : vector<8x32xf32>
    %1319 = arith.addf %1317, %1318 : vector<8x32xf32>
    %1320 = math.tanh %1319 : vector<8x32xf32>
    %1321 = arith.mulf %1316, %1320 : vector<8x32xf32>
    %c7_806 = arith.constant 7 : index
    %c0_807 = arith.constant 0 : index
    %c0_808 = arith.constant 0 : index
    %1322 = vector.load %arg7[%c7_806, %c0_807, %c0_808] : memref<8x8x32xf32, #tpu.memory_space<vmem>>, vector<1x8x32xf32>
    %1323 = vector.shape_cast %1322 : vector<1x8x32xf32> to vector<8x32xf32>
    %1324 = vector.shape_cast %1321 : vector<8x32xf32> to vector<1x8x32xf32>
    tpu.vector_store %arg7[%c7_806, %c0_807, %c0_808], %1324 {strides = array<i32>} : memref<8x8x32xf32, #tpu.memory_space<vmem>>, vector<1x8x32xf32>,
    %c1_809 = arith.constant 1 : index
    %c0_810 = arith.constant 0 : index
    %c0_811 = arith.constant 0 : index
    %1325 = vector.load %arg13[%c1_809, %c0_810, %c0_811] : memref<2x8x32xf32, #tpu.memory_space<vmem>>, vector<1x8x32xf32>
    %1326 = vector.shape_cast %1325 : vector<1x8x32xf32> to vector<8x32xf32>
    %1327 = vector.shape_cast %1321 : vector<8x32xf32> to vector<1x8x32xf32>
    tpu.vector_store %arg13[%c1_809, %c0_810, %c0_811], %1327 {strides = array<i32>} : memref<2x8x32xf32, #tpu.memory_space<vmem>>, vector<1x8x32xf32>,
    %c1_812 = arith.constant 1 : index
    %c0_813 = arith.constant 0 : index
    %c0_814 = arith.constant 0 : index
    %1328 = vector.load %arg14[%c1_812, %c0_813, %c0_814] : memref<2x8x32xf32, #tpu.memory_space<vmem>>, vector<1x8x32xf32>
    %1329 = vector.shape_cast %1328 : vector<1x8x32xf32> to vector<8x32xf32>
    %1330 = vector.shape_cast %1319 : vector<8x32xf32> to vector<1x8x32xf32>
    tpu.vector_store %arg14[%c1_812, %c0_813, %c0_814], %1330 {strides = array<i32>} : memref<2x8x32xf32, #tpu.memory_space<vmem>>, vector<1x8x32xf32>,
    %c1_815 = arith.constant 1 : index
    %c0_816 = arith.constant 0 : index
    %c0_817 = arith.constant 0 : index
    %1331 = vector.load %arg8[%c1_815, %c0_816, %c0_817] : memref<2x8x32xf32, #tpu.memory_space<vmem>>, vector<1x8x32xf32>
    %1332 = vector.shape_cast %1331 : vector<1x8x32xf32> to vector<8x32xf32>
    %1333 = vector.shape_cast %1321 : vector<8x32xf32> to vector<1x8x32xf32>
    tpu.vector_store %arg8[%c1_815, %c0_816, %c0_817], %1333 {strides = array<i32>} : memref<2x8x32xf32, #tpu.memory_space<vmem>>, vector<1x8x32xf32>,
    %c1_818 = arith.constant 1 : index
    %c0_819 = arith.constant 0 : index
    %c0_820 = arith.constant 0 : index
    %1334 = vector.load %arg9[%c1_818, %c0_819, %c0_820] : memref<2x8x32xf32, #tpu.memory_space<vmem>>, vector<1x8x32xf32>
    %1335 = vector.shape_cast %1334 : vector<1x8x32xf32> to vector<8x32xf32>
    %1336 = vector.shape_cast %1319 : vector<8x32xf32> to vector<1x8x32xf32>
    tpu.vector_store %arg9[%c1_818, %c0_819, %c0_820], %1336 {strides = array<i32>} : memref<2x8x32xf32, #tpu.memory_space<vmem>>, vector<1x8x32xf32>,
    return
  }
  func.func @transform_1(%arg0: i32, %arg1: memref<64xi32, #tpu.memory_space<smem>>) -> (i32, i32) {
    %c0_i32 = arith.constant 0 : i32
    %c0_i32_0 = arith.constant 0 : i32
    %c0_i32_1 = arith.constant 0 : i32
    return %c0_i32, %c0_i32_0 : i32, i32
  }
  func.func @transform_2(%arg0: i32, %arg1: memref<64xi32, #tpu.memory_space<smem>>) -> (i32, i32, i32) {
    %c0_i32 = arith.constant 0 : i32
    %c0_i32_0 = arith.constant 0 : i32
    %c0_i32_1 = arith.constant 0 : i32
    %c0_i32_2 = arith.constant 0 : i32
    return %c0_i32, %c0_i32_0, %c0_i32_1 : i32, i32, i32
  }
  func.func @transform_3(%arg0: i32, %arg1: memref<64xi32, #tpu.memory_space<smem>>) -> (i32, i32, i32) {
    %c0_i32 = arith.constant 0 : i32
    %c0_i32_0 = arith.constant 0 : i32
    %c0_i32_1 = arith.constant 0 : i32
    %c0_i32_2 = arith.constant 0 : i32
    return %c0_i32, %c0_i32_0, %c0_i32_1 : i32, i32, i32
  }
  func.func @transform_4(%arg0: i32, %arg1: memref<64xi32, #tpu.memory_space<smem>>) -> (i32, i32, i32) {
    %c0_i32 = arith.constant 0 : i32
    %c0_i32_0 = arith.constant 0 : i32
    %c0_i32_1 = arith.constant 0 : i32
    %c0_i32_2 = arith.constant 0 : i32
    return %c0_i32, %c0_i32_0, %c0_i32_1 : i32, i32, i32
  }
  func.func @transform_5(%arg0: i32, %arg1: memref<64xi32, #tpu.memory_space<smem>>) -> (i32, i32, i32) {
    %c0_i32 = arith.constant 0 : i32
    %c0_i32_0 = arith.constant 0 : i32
    %c0_i32_1 = arith.constant 0 : i32
    return %arg0, %c0_i32, %c0_i32_0 : i32, i32, i32
  }
  func.func @transform_6(%arg0: i32, %arg1: memref<64xi32, #tpu.memory_space<smem>>) -> (i32, i32, i32) {
    %c0_i32 = arith.constant 0 : i32
    %c0_i32_0 = arith.constant 0 : i32
    %c0_i32_1 = arith.constant 0 : i32
    %c0_i32_2 = arith.constant 0 : i32
    return %c0_i32, %c0_i32_0, %c0_i32_1 : i32, i32, i32
  }
  func.func @transform_7(%arg0: i32, %arg1: memref<64xi32, #tpu.memory_space<smem>>) -> (i32, i32, i32) {
    %c0_i32 = arith.constant 0 : i32
    %c0_i32_0 = arith.constant 0 : i32
    %c0_i32_1 = arith.constant 0 : i32
    %c0_i32_2 = arith.constant 0 : i32
    return %c0_i32, %c0_i32_0, %c0_i32_1 : i32, i32, i32
  }
}

</mosaic_0001>

<bundles_post_ra>
// kernel: tpu_custom_call.1
= control target key start
LH: loop header
LB: loop body
LE: loop exit
PB: predicated region body
PF: predicated region fallthrough
CT: control target
= control target key end

     0   :  { %s4749_s30 = smov [#allocation9]   ;;  %s5851_s0 = inlined_call_operand.hbm [shape: s32[64], index: 0, kind: input, shape index: {}]   ;;  %s5852_s1 = inlined_call_operand.hbm [shape: f32[16,32], index: 1, kind: input, shape index: {}]   ;;  %s5853_s2 = inlined_call_operand.hbm [shape: bf16[32,128], index: 2, kind: input, shape index: {}]   ;;  %s5854_s3 = inlined_call_operand.hbm [shape: bf16[1,32,128], index: 3, kind: input, shape index: {}]   ;;  %s5855_s4 = inlined_call_operand.hbm [shape: bf16[2,32,128], index: 4, kind: input, shape index: {}]   ;;  %s5856_s5 = inlined_call_operand.vmem [shape: f32[2,1,128], index: 5, kind: input, shape index: {}]   ;;  %s5857_s6 = inlined_call_operand.hbm [shape: f32[8,8,32], index: 6, kind: output, shape index: {0}]   ;;  %s5858_s7 = inlined_call_operand.hbm [shape: f32[2,8,32], index: 7, kind: output, shape index: {1}]   ;;  %s5859_s8 = inlined_call_operand.hbm [shape: f32[2,8,32], index: 8, kind: output, shape index: {2}]  }
   0x1   :  { %s15_s29 = sshll.u32 %s5851_s0, 4  ;;  %s16_s29 = int_to_ptr.hbm [resolvable:$true] %s15_s29 }
   0x2   :  { %18 = dma.hbm_to_smem %s16_s29, 16, %s4749_s30, [#allocation8] }
   0x3   :  { %4737 = dma.done.wait [#allocation8], 16 }
   0x4   :  { %4738 = vsyncadd [#allocation8], 4294967280 }
   0x5   :  { %21 = sfence }
   0x6   :  { %22 = vsyncpa [#allocation11], 0 }
   0x7   :  { %23 = vsyncpa [#allocation14], 0 }
   0x8   :  { %24 = vsyncpa [#allocation12], 0 }
   0x9   :  { %25 = vsyncpa [#allocation18], 0  ;;  %s43_s11 = sshll.u32 %s5854_s3, 4  ;;  %s4750_s12 = smov [#allocation13]   ;;  %s44_s11 = int_to_ptr.hbm [resolvable:$true] %s43_s11 }
   0xa   :  { %s45_s13 = sshll.u32 %s4750_s12, 4  ;;  %s30_s15 = sshll.u32 %s5853_s2, 4  ;;  %s46_s13 = int_to_ptr.vmem [resolvable:$true] %s45_s13  ;;  %s31_s15 = int_to_ptr.hbm [resolvable:$true] %s30_s15 }
   0xb   :  { %s4751_s16 = smov 64   ;;  %s4752_s17 = smov 4  }
   0xc   :  { %51 = dma.hbm_to_vmem [thread:$0]  %s44_s11, 256, %s46_s13, [#allocation14], %s4751_s16, %s4751_s16, %s4752_s17  }
   0xd   :  { %s4753_s18 = smov [#allocation10]   ;;  %s56_s3 = sshll.u32 %s5855_s4, 4  ;;  %s57_s3 = int_to_ptr.hbm [resolvable:$true] %s56_s3 }
   0xe   :  { %s32_s19 = sshll.u32 %s4753_s18, 4  ;;  %s4754_s22 = smov [#allocation15]   ;;  %s33_s19 = int_to_ptr.vmem [resolvable:$true] %s32_s19 }
   0xf   :  { %38 = dma.hbm_to_vmem [thread:$0]  %s31_s15, 256, %s33_s19, [#allocation11], %s4751_s16, %s4751_s16, %s4752_s17  }
  0x10   :  { %s58_s23 = sshll.u32 %s4754_s22, 4  ;;  %s59_s23 = int_to_ptr.vmem [resolvable:$true] %s58_s23 }
  0x11   :  { %64 = dma.hbm_to_vmem [thread:$0]  %s57_s3, 512, %s59_s23, [#allocation14], %s4751_s16, %s4751_s16, %s4752_s17  }
  0x12   :  { %4739 = dma.done.wait [#allocation11], 256  }
  0x13   :  { %4740 = vsyncadd [#allocation11], 4294967040 }
  0x14   :  { %4741 = dma.done.wait [#allocation14], 768  }
  0x15   :  { %4742 = vsyncadd [#allocation14], 4294966528  ;;  %s90_s2 = sld [smem:[#allocation9]]  ;;  %s4755_s24 = smov [#allocation2]  }
  0x16   :  { %s4890_s25 = sshll.u32 %s4755_s24, 4  ;;  %s2691_s4 = sld [smem:[#allocation9 + $0x1]]  ;;  %s102_s25 = int_to_ptr.vmem [resolvable:$true] %s4890_s25 }
  0x17   :  { %s4756_s26 = smov [#allocation2 + $0x1]   ;;  %s4895_s28 = sld [smem:[#allocation9 + $0x2]] }
  0x18   :  { %s4893_s27 = sshll.u32 %s4756_s26, 4  ;;  %s4757_s29 = smov [#allocation2 + $0x2]   ;;  %s119_s27 = int_to_ptr.vmem [resolvable:$true] %s4893_s27 }
  0x19   :  { %s4898_s30 = sshll.u32 %s4757_s29, 4  ;;  %s4900_s9 = sld [smem:[#allocation9 + $0x3]]  ;;  %s136_s30 = int_to_ptr.vmem [resolvable:$true] %s4898_s30 }
  0x1a   :  { %s4758_s13 = smov [#allocation2 + $0x3]   ;;  %s4914_s23 = scalar_lea.hbm %s5852_s1, 16 }
  0x1b   :  { %s91_s12 = scalar_lea.hbm %s5852_s1, %s90_s2  ;;  %s4906_s14 = sshll.u32 %s4758_s13, 4  ;;  %s153_s14 = int_to_ptr.vmem [resolvable:$true] %s4906_s14 }
  0x1c   :  { %s99_s0 = sshll.u32 %s91_s12, 4  ;;  %s107_s18 = scalar_lea.hbm %s5852_s1, %s2691_s4  ;;  %s100_s0 = int_to_ptr.hbm [resolvable:$true] %s99_s0 }
  0x1d   :  { %s116_s19 = sshll.u32 %s107_s18, 4  ;;  %s3129_s20 = sshra.s32 %s100_s0, 4  ;;  %s3130_s20 = int_to_ptr.hbm [resolvable:$true] %s3129_s20  ;;  %s117_s19 = int_to_ptr.hbm [resolvable:$true] %s116_s19 }
  0x1e   :  { %s3131_s21 = scalar_lea.hbm %s3130_s20, 1  ;;  %p3134_p1 = scmp.lt.s32.totalorder %s3130_s20, %s5852_s1 }
  0x1f   :  { %p3132_p0 = scmp.ne.s32.totalorder %s3130_s20, %s3131_s21  ;;  %p3135_p2 = scmp.lt.s32.totalorder %s4914_s23, %s3131_s21 }
  0x21   :  { %p3136_p3 = por %p3135_p2, %p3134_p1 }
  0x23   :  { %p3137_p4 = pnand %p3136_p3, %p3132_p0 }
  0x25   :  { %3140 = shalt.err (!%p3137_p4)  }
  0x26   :  { %104 = dma.hbm_to_vmem [thread:$0]  %s100_s0, 16, %s102_s25, [#allocation7] }
  0x27   :  { %s124_s29 = scalar_lea.hbm %s5852_s1, %s4895_s28  ;;  %s3153_s10 = sshra.s32 %s117_s19, 4  ;;  %s3154_s10 = int_to_ptr.hbm [resolvable:$true] %s3153_s10 }
  0x28   :  { %s3155_s11 = scalar_lea.hbm %s3154_s10, 1  ;;  %p3158_p6 = scmp.lt.s32.totalorder %s3154_s10, %s5852_s1 }
  0x29   :  { %p3156_p5 = scmp.ne.s32.totalorder %s3154_s10, %s3155_s11  ;;  %p3159_p7 = scmp.lt.s32.totalorder %s4914_s23, %s3155_s11 }
  0x2b   :  { %p3160_p8 = por %p3159_p7, %p3158_p6 }
  0x2d   :  { %p3161_p9 = pnand %p3160_p8, %p3156_p5 }
  0x2f   :  { %3164 = shalt.err (!%p3161_p9)  }
  0x30   :  { %121 = dma.hbm_to_vmem [thread:$0]  %s117_s19, 16, %s119_s27, [#allocation7] }
  0x31   :  { %s133_s25 = sshll.u32 %s124_s29, 4  ;;  %s141_s15 = scalar_lea.hbm %s5852_s1, %s4900_s9  ;;  %s134_s25 = int_to_ptr.hbm [resolvable:$true] %s133_s25 }
  0x32   :  { %s150_s17 = sshll.u32 %s141_s15, 4  ;;  %s3177_s18 = sshra.s32 %s134_s25, 4  ;;  %s3178_s18 = int_to_ptr.hbm [resolvable:$true] %s3177_s18  ;;  %s151_s17 = int_to_ptr.hbm [resolvable:$true] %s150_s17 }
  0x33   :  { %s3179_s20 = scalar_lea.hbm %s3178_s18, 1  ;;  %p3182_p11 = scmp.lt.s32.totalorder %s3178_s18, %s5852_s1 }
  0x34   :  { %p3180_p10 = scmp.ne.s32.totalorder %s3178_s18, %s3179_s20  ;;  %p3183_p12 = scmp.lt.s32.totalorder %s4914_s23, %s3179_s20 }
  0x36   :  { %p3184_p13 = por %p3183_p12, %p3182_p11 }
  0x38   :  { %p3185_p0 = pnand %p3184_p13, %p3180_p10 }
  0x3a   :  { %3188 = shalt.err (!%p3185_p0)  }
  0x3b   :  { %138 = dma.hbm_to_vmem [thread:$0]  %s134_s25, 16, %s136_s30, [#allocation7] }
  0x3c   :  { %s3201_s27 = sshra.s32 %s151_s17, 4  ;;  %s3202_s27 = int_to_ptr.hbm [resolvable:$true] %s3201_s27 }
  0x3d   :  { %s3203_s9 = scalar_lea.hbm %s3202_s27, 1  ;;  %p3206_p2 = scmp.lt.s32.totalorder %s3202_s27, %s5852_s1 }
  0x3e   :  { %p3204_p1 = scmp.ne.s32.totalorder %s3202_s27, %s3203_s9  ;;  %p3207_p3 = scmp.lt.s32.totalorder %s4914_s23, %s3203_s9 }
  0x40   :  { %p3208_p4 = por %p3207_p3, %p3206_p2 }
  0x42   :  { %p3209_p5 = pnand %p3208_p4, %p3204_p1 }
  0x44   :  { %3212 = shalt.err (!%p3209_p5)  }
  0x45   :  { %155 = dma.hbm_to_vmem [thread:$0]  %s151_s17, 16, %s153_s14, [#allocation7] }
  0x46   :  { %s2694_s2 = sld [smem:[#allocation9 + $0x4]]  ;;  %s4759_s24 = smov [#allocation2 + $0x4]  }
  0x47   :  { %s169_s4 = sshll.u32 %s4759_s24, 4  ;;  %s2695_s26 = sld [smem:[#allocation9 + $0x5]]  ;;  %s170_s4 = int_to_ptr.vmem [resolvable:$true] %s169_s4 }
  0x48   :  { %s4760_s30 = smov [#allocation2 + $0x5]   ;;  %s4947_s10 = sld [smem:[#allocation9 + $0x6]] }
  0x49   :  { %s4945_s29 = sshll.u32 %s4760_s30, 4  ;;  %s4761_s11 = smov [#allocation2 + $0x6]   ;;  %s187_s29 = int_to_ptr.vmem [resolvable:$true] %s4945_s29 }
  0x4a   :  { %s4950_s12 = sshll.u32 %s4761_s11, 4  ;;  %s4952_s13 = sld [smem:[#allocation9 + $0x7]]  ;;  %s204_s12 = int_to_ptr.vmem [resolvable:$true] %s4950_s12 }
  0x4c   :  { %s158_s0 = scalar_lea.hbm %s5852_s1, %s2694_s2 }
  0x4d   :  { %s167_s28 = sshll.u32 %s158_s0, 4  ;;  %s175_s18 = scalar_lea.hbm %s5852_s1, %s2695_s26  ;;  %s168_s28 = int_to_ptr.hbm [resolvable:$true] %s167_s28 }
  0x4e   :  { %s184_s20 = sshll.u32 %s175_s18, 4  ;;  %s3225_s21 = sshra.s32 %s168_s28, 4  ;;  %s3226_s21 = int_to_ptr.hbm [resolvable:$true] %s3225_s21  ;;  %s185_s20 = int_to_ptr.hbm [resolvable:$true] %s184_s20 }
  0x4f   :  { %s3227_s3 = scalar_lea.hbm %s3226_s21, 1  ;;  %p3230_p7 = scmp.lt.s32.totalorder %s3226_s21, %s5852_s1 }
  0x50   :  { %p3228_p6 = scmp.ne.s32.totalorder %s3226_s21, %s3227_s3  ;;  %p3231_p8 = scmp.lt.s32.totalorder %s4914_s23, %s3227_s3 }
  0x52   :  { %p3232_p9 = por %p3231_p8, %p3230_p7 }
  0x54   :  { %p3233_p10 = pnand %p3232_p9, %p3228_p6 }
  0x56   :  { %3236 = shalt.err (!%p3233_p10)  }
  0x57   :  { %172 = dma.hbm_to_vmem [thread:$0]  %s168_s28, 16, %s170_s4, [#allocation7] }
  0x58   :  { %s192_s2 = scalar_lea.hbm %s5852_s1, %s4947_s10  ;;  %s3249_s24 = sshra.s32 %s185_s20, 4  ;;  %s3250_s24 = int_to_ptr.hbm [resolvable:$true] %s3249_s24 }
  0x59   :  { %s3251_s26 = scalar_lea.hbm %s3250_s24, 1  ;;  %p3254_p12 = scmp.lt.s32.totalorder %s3250_s24, %s5852_s1 }
  0x5a   :  { %p3252_p11 = scmp.ne.s32.totalorder %s3250_s24, %s3251_s26  ;;  %p3255_p13 = scmp.lt.s32.totalorder %s4914_s23, %s3251_s26 }
  0x5c   :  { %p3256_p0 = por %p3255_p13, %p3254_p12 }
  0x5e   :  { %p3257_p1 = pnand %p3256_p0, %p3252_p11 }
  0x60   :  { %3260 = shalt.err (!%p3257_p1)  }
  0x61   :  { %189 = dma.hbm_to_vmem [thread:$0]  %s185_s20, 16, %s187_s29, [#allocation7] }
  0x62   :  { %s201_s4 = sshll.u32 %s192_s2, 4  ;;  %s209_s25 = scalar_lea.hbm %s5852_s1, %s4952_s13  ;;  %s202_s4 = int_to_ptr.hbm [resolvable:$true] %s201_s4 }
  0x63   :  { %s218_s0 = sshll.u32 %s209_s25, 4  ;;  %s3273_s28 = sshra.s32 %s202_s4, 4  ;;  %s3274_s28 = int_to_ptr.hbm [resolvable:$true] %s3273_s28  ;;  %s219_s0 = int_to_ptr.hbm [resolvable:$true] %s218_s0 }
  0x64   :  { %s3275_s15 = scalar_lea.hbm %s3274_s28, 1  ;;  %p3278_p3 = scmp.lt.s32.totalorder %s3274_s28, %s5852_s1 }
  0x65   :  { %p3276_p2 = scmp.ne.s32.totalorder %s3274_s28, %s3275_s15  ;;  %p3279_p4 = scmp.lt.s32.totalorder %s4914_s23, %s3275_s15 }
  0x67   :  { %p3280_p5 = por %p3279_p4, %p3278_p3 }
  0x69   :  { %p3281_p6 = pnand %p3280_p5, %p3276_p2 }
  0x6b   :  { %3284 = shalt.err (!%p3281_p6)  }
  0x6c   :  { %206 = dma.hbm_to_vmem [thread:$0]  %s202_s4, 16, %s204_s12, [#allocation7] }
  0x6d   :  { %s4762_s29 = smov [#allocation2 + $0x7]   ;;  %s2698_s20 = sld [smem:[#allocation9 + $0x8]] }
  0x6e   :  { %s220_s13 = sshll.u32 %s4762_s29, 4  ;;  %s3297_s21 = sshra.s32 %s219_s0, 4  ;;  %s221_s13 = int_to_ptr.vmem [resolvable:$true] %s220_s13  ;;  %s3298_s21 = int_to_ptr.hbm [resolvable:$true] %s3297_s21 }
  0x6f   :  { %s3299_s3 = scalar_lea.hbm %s3298_s21, 1  ;;  %p3302_p8 = scmp.lt.s32.totalorder %s3298_s21, %s5852_s1 }
  0x70   :  { %p3300_p7 = scmp.ne.s32.totalorder %s3298_s21, %s3299_s3  ;;  %p3303_p9 = scmp.lt.s32.totalorder %s4914_s23, %s3299_s3 }
  0x72   :  { %p3304_p10 = por %p3303_p9, %p3302_p8 }
  0x74   :  { %p3305_p11 = pnand %p3304_p10, %p3300_p7 }
  0x76   :  { %3308 = shalt.err (!%p3305_p11)  }
  0x77   :  { %223 = dma.hbm_to_vmem [thread:$0]  %s219_s0, 16, %s221_s13, [#allocation7] }
  0x78   :  { %s4763_s19 = smov [#allocation2 + $0x8]   ;;  %s2699_s22 = sld [smem:[#allocation9 + $0x9]] }
  0x79   :  { %s237_s12 = sshll.u32 %s4763_s19, 4  ;;  %s4764_s2 = smov [#allocation2 + $0x9]   ;;  %s238_s12 = int_to_ptr.vmem [resolvable:$true] %s237_s12 }
  0x7a   :  { %s4989_s24 = sshll.u32 %s4764_s2, 4  ;;  %s2700_s26 = sld [smem:[#allocation9 + $0xa]]  ;;  %s255_s24 = int_to_ptr.vmem [resolvable:$true] %s4989_s24 }
  0x7b   :  { %s226_s4 = scalar_lea.hbm %s5852_s1, %s2698_s20  ;;  %s4765_s10 = smov [#allocation2 + $0xa]  }
  0x7c   :  { %s235_s14 = sshll.u32 %s226_s4, 4  ;;  %s4995_s25 = sshll.u32 %s4765_s10, 4  ;;  %s236_s14 = int_to_ptr.hbm [resolvable:$true] %s235_s14  ;;  %s272_s25 = int_to_ptr.vmem [resolvable:$true] %s4995_s25 }
  0x7d   :  { %s3321_s0 = sshra.s32 %s236_s14, 4  ;;  %s3322_s0 = int_to_ptr.hbm [resolvable:$true] %s3321_s0 }
  0x7e   :  { %s3323_s28 = scalar_lea.hbm %s3322_s0, 1  ;;  %p3326_p13 = scmp.lt.s32.totalorder %s3322_s0, %s5852_s1 }
  0x7f   :  { %p3324_p12 = scmp.ne.s32.totalorder %s3322_s0, %s3323_s28  ;;  %p3327_p0 = scmp.lt.s32.totalorder %s4914_s23, %s3323_s28 }
  0x81   :  { %p3328_p1 = por %p3327_p0, %p3326_p13 }
  0x83   :  { %p3329_p2 = pnand %p3328_p1, %p3324_p12 }
  0x85   :  { %3332 = shalt.err (!%p3329_p2)  }
  0x86   :  { %240 = dma.hbm_to_vmem [thread:$0]  %s236_s14, 16, %s238_s12, [#allocation7] }
  0x87   :  { %s243_s13 = scalar_lea.hbm %s5852_s1, %s2699_s22  ;;  %s260_s27 = scalar_lea.hbm %s5852_s1, %s2700_s26 }
  0x88   :  { %s252_s20 = sshll.u32 %s243_s13, 4  ;;  %s269_s9 = sshll.u32 %s260_s27, 4  ;;  %s253_s20 = int_to_ptr.hbm [resolvable:$true] %s252_s20  ;;  %s270_s9 = int_to_ptr.hbm [resolvable:$true] %s269_s9 }
  0x89   :  { %s3345_s19 = sshra.s32 %s253_s20, 4  ;;  %s3346_s19 = int_to_ptr.hbm [resolvable:$true] %s3345_s19 }
  0x8a   :  { %s3347_s2 = scalar_lea.hbm %s3346_s19, 1  ;;  %p3350_p4 = scmp.lt.s32.totalorder %s3346_s19, %s5852_s1 }
  0x8b   :  { %p3348_p3 = scmp.ne.s32.totalorder %s3346_s19, %s3347_s2  ;;  %p3351_p5 = scmp.lt.s32.totalorder %s4914_s23, %s3347_s2 }
  0x8d   :  { %p3352_p6 = por %p3351_p5, %p3350_p4 }
  0x8f   :  { %p3353_p7 = pnand %p3352_p6, %p3348_p3 }
  0x91   :  { %3356 = shalt.err (!%p3353_p7)  }
  0x92   :  { %257 = dma.hbm_to_vmem [thread:$0]  %s253_s20, 16, %s255_s24, [#allocation7] }
  0x93   :  { %s2701_s22 = sld [smem:[#allocation9 + $0xb]]  ;;  %s3369_s26 = sshra.s32 %s270_s9, 4  ;;  %s3370_s26 = int_to_ptr.hbm [resolvable:$true] %s3369_s26 }
  0x94   :  { %s3371_s11 = scalar_lea.hbm %s3370_s26, 1  ;;  %p3374_p9 = scmp.lt.s32.totalorder %s3370_s26, %s5852_s1 }
  0x95   :  { %p3372_p8 = scmp.ne.s32.totalorder %s3370_s26, %s3371_s11  ;;  %p3375_p10 = scmp.lt.s32.totalorder %s4914_s23, %s3371_s11 }
  0x97   :  { %p3376_p11 = por %p3375_p10, %p3374_p9 }
  0x99   :  { %p3377_p12 = pnand %p3376_p11, %p3372_p8 }
  0x9b   :  { %3380 = shalt.err (!%p3377_p12)  }
  0x9c   :  { %274 = dma.hbm_to_vmem [thread:$0]  %s270_s9, 16, %s272_s25, [#allocation7] }
  0x9d   :  { %s2702_s10 = sld [smem:[#allocation9 + $0xc]]  ;;  %s4766_s0 = smov [#allocation2 + $0xb]  }
  0x9e   :  { %s288_s28 = sshll.u32 %s4766_s0, 4  ;;  %s4767_s24 = smov [#allocation2 + $0xc]   ;;  %s289_s28 = int_to_ptr.vmem [resolvable:$true] %s288_s28 }
  0x9f   :  { %s5018_s15 = sshll.u32 %s4767_s24, 4  ;;  %s5021_s17 = sld [smem:[#allocation9 + $0xd]]  ;;  %s306_s15 = int_to_ptr.vmem [resolvable:$true] %s5018_s15 }
  0xa0   :  { %s277_s13 = scalar_lea.hbm %s5852_s1, %s2701_s22  ;;  %s4768_s21 = smov [#allocation2 + $0xd]  }
  0xa1   :  { %s286_s20 = sshll.u32 %s277_s13, 4  ;;  %s5026_s3 = sshll.u32 %s4768_s21, 4  ;;  %s287_s20 = int_to_ptr.hbm [resolvable:$true] %s286_s20  ;;  %s323_s3 = int_to_ptr.vmem [resolvable:$true] %s5026_s3 }
  0xa2   :  { %s3393_s19 = sshra.s32 %s287_s20, 4  ;;  %s3394_s19 = int_to_ptr.hbm [resolvable:$true] %s3393_s19 }
  0xa3   :  { %s294_s9 = scalar_lea.hbm %s5852_s1, %s2702_s10  ;;  %s3395_s2 = scalar_lea.hbm %s3394_s19, 1 }
  0xa4   :  { %p3396_p13 = scmp.ne.s32.totalorder %s3394_s19, %s3395_s2  ;;  %p3398_p0 = scmp.lt.s32.totalorder %s3394_s19, %s5852_s1 }
  0xa5   :  { %p3399_p1 = scmp.lt.s32.totalorder %s4914_s23, %s3395_s2 }
  0xa7   :  { %p3400_p2 = por %p3399_p1, %p3398_p0 }
  0xa9   :  { %p3401_p3 = pnand %p3400_p2, %p3396_p13 }
  0xab   :  { %3404 = shalt.err (!%p3401_p3)  }
  0xac   :  { %291 = dma.hbm_to_vmem [thread:$0]  %s287_s20, 16, %s289_s28, [#allocation7] }
  0xad   :  { %s303_s22 = sshll.u32 %s294_s9, 4  ;;  %s311_s4 = scalar_lea.hbm %s5852_s1, %s5021_s17  ;;  %s304_s22 = int_to_ptr.hbm [resolvable:$true] %s303_s22 }
  0xae   :  { %s3417_s14 = sshra.s32 %s304_s22, 4  ;;  %s3418_s14 = int_to_ptr.hbm [resolvable:$true] %s3417_s14 }
  0xaf   :  { %s3419_s10 = scalar_lea.hbm %s3418_s14, 1  ;;  %p3422_p5 = scmp.lt.s32.totalorder %s3418_s14, %s5852_s1 }
  0xb0   :  { %p3420_p4 = scmp.ne.s32.totalorder %s3418_s14, %s3419_s10  ;;  %p3423_p6 = scmp.lt.s32.totalorder %s4914_s23, %s3419_s10 }
  0xb2   :  { %p3424_p7 = por %p3423_p6, %p3422_p5 }
  0xb4   :  { %p3425_p8 = pnand %p3424_p7, %p3420_p4 }
  0xb6   :  { %3428 = shalt.err (!%p3425_p8)  }
  0xb7   :  { %308 = dma.hbm_to_vmem [thread:$0]  %s304_s22, 16, %s306_s15, [#allocation7] }
  0xb8   :  { %s320_s28 = sshll.u32 %s311_s4, 4  ;;  %s2704_s18 = sld [smem:[#allocation9 + $0xe]]  ;;  %s321_s28 = int_to_ptr.hbm [resolvable:$true] %s320_s28 }
  0xb9   :  { %s3441_s17 = sshra.s32 %s321_s28, 4  ;;  %s3442_s17 = int_to_ptr.hbm [resolvable:$true] %s3441_s17 }
  0xba   :  { %s3443_s29 = scalar_lea.hbm %s3442_s17, 1  ;;  %p3446_p10 = scmp.lt.s32.totalorder %s3442_s17, %s5852_s1 }
  0xbb   :  { %p3444_p9 = scmp.ne.s32.totalorder %s3442_s17, %s3443_s29  ;;  %p3447_p11 = scmp.lt.s32.totalorder %s4914_s23, %s3443_s29 }
  0xbd   :  { %p3448_p12 = por %p3447_p11, %p3446_p10 }
  0xbf   :  { %p3449_p13 = pnand %p3448_p12, %p3444_p9 }
  0xc1   :  { %3452 = shalt.err (!%p3449_p13)  }
  0xc2   :  { %325 = dma.hbm_to_vmem [thread:$0]  %s321_s28, 16, %s323_s3, [#allocation7] }
  0xc3   :  { %s4769_s21 = smov [#allocation2 + $0xe]   ;;  %s2705_s27 = sld [smem:[#allocation9 + $0xf]] }
  0xc4   :  { %s339_s25 = sshll.u32 %s4769_s21, 4  ;;  %s4770_s15 = smov [#allocation2 + $0xf]   ;;  %s340_s25 = int_to_ptr.vmem [resolvable:$true] %s339_s25 }
  0xc5   :  { %s5050_s9 = sshll.u32 %s4770_s15, 4  ;;  %s2706_s19 = sld [smem:[#allocation9 + $0x10]]  ;;  %s357_s9 = int_to_ptr.vmem [resolvable:$true] %s5050_s9 }
  0xc6   :  { %s328_s12 = scalar_lea.hbm %s5852_s1, %s2704_s18  ;;  %s4771_s26 = smov [#allocation2 + $0x10]  }
  0xc7   :  { %s337_s22 = sshll.u32 %s328_s12, 4  ;;  %s5056_s11 = sshll.u32 %s4771_s26, 4  ;;  %s338_s22 = int_to_ptr.hbm [resolvable:$true] %s337_s22  ;;  %s374_s11 = int_to_ptr.vmem [resolvable:$true] %s5056_s11 }
  0xc8   :  { %s3465_s3 = sshra.s32 %s338_s22, 4  ;;  %s3466_s3 = int_to_ptr.hbm [resolvable:$true] %s3465_s3 }
  0xc9   :  { %s3467_s4 = scalar_lea.hbm %s3466_s3, 1  ;;  %p3470_p1 = scmp.lt.s32.totalorder %s3466_s3, %s5852_s1 }
  0xca   :  { %p3468_p0 = scmp.ne.s32.totalorder %s3466_s3, %s3467_s4  ;;  %p3471_p2 = scmp.lt.s32.totalorder %s4914_s23, %s3467_s4 }
  0xcc   :  { %p3472_p3 = por %p3471_p2, %p3470_p1 }
  0xce   :  { %p3473_p4 = pnand %p3472_p3, %p3468_p0 }
  0xd0   :  { %3476 = shalt.err (!%p3473_p4)  }
  0xd1   :  { %342 = dma.hbm_to_vmem [thread:$0]  %s338_s22, 16, %s340_s25, [#allocation7] }
  0xd2   :  { %s345_s28 = scalar_lea.hbm %s5852_s1, %s2705_s27  ;;  %s362_s13 = scalar_lea.hbm %s5852_s1, %s2706_s19 }
  0xd3   :  { %s354_s18 = sshll.u32 %s345_s28, 4  ;;  %s371_s20 = sshll.u32 %s362_s13, 4  ;;  %s355_s18 = int_to_ptr.hbm [resolvable:$true] %s354_s18  ;;  %s372_s20 = int_to_ptr.hbm [resolvable:$true] %s371_s20 }
  0xd4   :  { %s3489_s21 = sshra.s32 %s355_s18, 4  ;;  %s3490_s21 = int_to_ptr.hbm [resolvable:$true] %s3489_s21 }
  0xd5   :  { %s3491_s15 = scalar_lea.hbm %s3490_s21, 1  ;;  %p3494_p6 = scmp.lt.s32.totalorder %s3490_s21, %s5852_s1 }
  0xd6   :  { %p3492_p5 = scmp.ne.s32.totalorder %s3490_s21, %s3491_s15  ;;  %p3495_p7 = scmp.lt.s32.totalorder %s4914_s23, %s3491_s15 }
  0xd8   :  { %p3496_p8 = por %p3495_p7, %p3494_p6 }
  0xda   :  { %p3497_p9 = pnand %p3496_p8, %p3492_p5 }
  0xdc   :  { %3500 = shalt.err (!%p3497_p9)  }
  0xdd   :  { %359 = dma.hbm_to_vmem [thread:$0]  %s355_s18, 16, %s357_s9, [#allocation7] }
  0xde   :  { %s2707_s27 = sld [smem:[#allocation9 + $0x11]]  ;;  %s3513_s19 = sshra.s32 %s372_s20, 4  ;;  %s3514_s19 = int_to_ptr.hbm [resolvable:$true] %s3513_s19 }
  0xdf   :  { %s3515_s30 = scalar_lea.hbm %s3514_s19, 1  ;;  %p3518_p11 = scmp.lt.s32.totalorder %s3514_s19, %s5852_s1 }
  0xe0   :  { %p3516_p10 = scmp.ne.s32.totalorder %s3514_s19, %s3515_s30  ;;  %p3519_p12 = scmp.lt.s32.totalorder %s4914_s23, %s3515_s30 }
  0xe2   :  { %p3520_p13 = por %p3519_p12, %p3518_p11 }
  0xe4   :  { %p3521_p0 = pnand %p3520_p13, %p3516_p10 }
  0xe6   :  { %3524 = shalt.err (!%p3521_p0)  }
  0xe7   :  { %376 = dma.hbm_to_vmem [thread:$0]  %s372_s20, 16, %s374_s11, [#allocation7] }
  0xe8   :  { %s2708_s26 = sld [smem:[#allocation9 + $0x12]]  ;;  %s4772_s3 = smov [#allocation2 + $0x11]  }
  0xe9   :  { %s390_s4 = sshll.u32 %s4772_s3, 4  ;;  %s4773_s9 = smov [#allocation2 + $0x12]   ;;  %s391_s4 = int_to_ptr.vmem [resolvable:$true] %s390_s4 }
  0xea   :  { %s5079_s14 = sshll.u32 %s4773_s9, 4  ;;  %s5082_s10 = sld [smem:[#allocation9 + $0x13]]  ;;  %s408_s14 = int_to_ptr.vmem [resolvable:$true] %s5079_s14 }
  0xeb   :  { %s379_s28 = scalar_lea.hbm %s5852_s1, %s2707_s27  ;;  %s4774_s17 = smov [#allocation2 + $0x13]  }
  0xec   :  { %s388_s18 = sshll.u32 %s379_s28, 4  ;;  %s5087_s29 = sshll.u32 %s4774_s17, 4  ;;  %s389_s18 = int_to_ptr.hbm [resolvable:$true] %s388_s18  ;;  %s425_s29 = int_to_ptr.vmem [resolvable:$true] %s5087_s29 }
  0xed   :  { %s3537_s21 = sshra.s32 %s389_s18, 4  ;;  %s3538_s21 = int_to_ptr.hbm [resolvable:$true] %s3537_s21 }
  0xee   :  { %s396_s20 = scalar_lea.hbm %s5852_s1, %s2708_s26  ;;  %s3539_s15 = scalar_lea.hbm %s3538_s21, 1 }
  0xef   :  { %p3540_p1 = scmp.ne.s32.totalorder %s3538_s21, %s3539_s15  ;;  %p3542_p2 = scmp.lt.s32.totalorder %s3538_s21, %s5852_s1 }
  0xf0   :  { %p3543_p3 = scmp.lt.s32.totalorder %s4914_s23, %s3539_s15 }
  0xf2   :  { %p3544_p4 = por %p3543_p3, %p3542_p2 }
  0xf4   :  { %p3545_p5 = pnand %p3544_p4, %p3540_p1 }
  0xf6   :  { %3548 = shalt.err (!%p3545_p5)  }
  0xf7   :  { %393 = dma.hbm_to_vmem [thread:$0]  %s389_s18, 16, %s391_s4, [#allocation7] }
  0xf8   :  { %s405_s27 = sshll.u32 %s396_s20, 4  ;;  %s413_s12 = scalar_lea.hbm %s5852_s1, %s5082_s10  ;;  %s406_s27 = int_to_ptr.hbm [resolvable:$true] %s405_s27 }
  0xf9   :  { %s3561_s22 = sshra.s32 %s406_s27, 4  ;;  %s3562_s22 = int_to_ptr.hbm [resolvable:$true] %s3561_s22 }
  0xfa   :  { %s3563_s26 = scalar_lea.hbm %s3562_s22, 1  ;;  %p3566_p7 = scmp.lt.s32.totalorder %s3562_s22, %s5852_s1 }
  0xfb   :  { %p3564_p6 = scmp.ne.s32.totalorder %s3562_s22, %s3563_s26  ;;  %p3567_p8 = scmp.lt.s32.totalorder %s4914_s23, %s3563_s26 }
  0xfd   :  { %p3568_p9 = por %p3567_p8, %p3566_p7 }
  0xff   :  { %p3569_p10 = pnand %p3568_p9, %p3564_p6 }
 0x101   :  { %3572 = shalt.err (!%p3569_p10)  }
 0x102   :  { %410 = dma.hbm_to_vmem [thread:$0]  %s406_s27, 16, %s408_s14, [#allocation7] }
 0x103   :  { %s422_s4 = sshll.u32 %s413_s12, 4  ;;  %s2710_s0 = sld [smem:[#allocation9 + $0x14]]  ;;  %s423_s4 = int_to_ptr.hbm [resolvable:$true] %s422_s4 }
 0x104   :  { %s3585_s10 = sshra.s32 %s423_s4, 4  ;;  %s3586_s10 = int_to_ptr.hbm [resolvable:$true] %s3585_s10 }
 0x105   :  { %s3587_s24 = scalar_lea.hbm %s3586_s10, 1  ;;  %p3590_p12 = scmp.lt.s32.totalorder %s3586_s10, %s5852_s1 }
 0x106   :  { %p3588_p11 = scmp.ne.s32.totalorder %s3586_s10, %s3587_s24  ;;  %p3591_p13 = scmp.lt.s32.totalorder %s4914_s23, %s3587_s24 }
 0x108   :  { %p3592_p0 = por %p3591_p13, %p3590_p12 }
 0x10a   :  { %p3593_p1 = pnand %p3592_p0, %p3588_p11 }
 0x10c   :  { %3596 = shalt.err (!%p3593_p1)  }
 0x10d   :  { %427 = dma.hbm_to_vmem [thread:$0]  %s423_s4, 16, %s425_s29, [#allocation7] }
 0x10e   :  { %s4775_s17 = smov [#allocation2 + $0x14]   ;;  %s2711_s13 = sld [smem:[#allocation9 + $0x15]] }
 0x10f   :  { %s441_s11 = sshll.u32 %s4775_s17, 4  ;;  %s4776_s14 = smov [#allocation2 + $0x15]   ;;  %s442_s11 = int_to_ptr.vmem [resolvable:$true] %s441_s11 }
 0x110   :  { %s5111_s20 = sshll.u32 %s4776_s14, 4  ;;  %s2712_s21 = sld [smem:[#allocation9 + $0x16]]  ;;  %s459_s20 = int_to_ptr.vmem [resolvable:$true] %s5111_s20 }
 0x111   :  { %s430_s25 = scalar_lea.hbm %s5852_s1, %s2710_s0  ;;  %s4777_s19 = smov [#allocation2 + $0x16]  }
 0x112   :  { %s439_s27 = sshll.u32 %s430_s25, 4  ;;  %s5117_s30 = sshll.u32 %s4777_s19, 4  ;;  %s440_s27 = int_to_ptr.hbm [resolvable:$true] %s439_s27  ;;  %s476_s30 = int_to_ptr.vmem [resolvable:$true] %s5117_s30 }
 0x113   :  { %s3609_s29 = sshra.s32 %s440_s27, 4  ;;  %s3610_s29 = int_to_ptr.hbm [resolvable:$true] %s3609_s29 }
 0x114   :  { %s3611_s12 = scalar_lea.hbm %s3610_s29, 1  ;;  %p3614_p3 = scmp.lt.s32.totalorder %s3610_s29, %s5852_s1 }
 0x115   :  { %p3612_p2 = scmp.ne.s32.totalorder %s3610_s29, %s3611_s12  ;;  %p3615_p4 = scmp.lt.s32.totalorder %s4914_s23, %s3611_s12 }
 0x117   :  { %p3616_p5 = por %p3615_p4, %p3614_p3 }
 0x119   :  { %p3617_p6 = pnand %p3616_p5, %p3612_p2 }
 0x11b   :  { %3620 = shalt.err (!%p3617_p6)  }
 0x11c   :  { %444 = dma.hbm_to_vmem [thread:$0]  %s440_s27, 16, %s442_s11, [#allocation7] }
 0x11d   :  { %s447_s4 = scalar_lea.hbm %s5852_s1, %s2711_s13  ;;  %s464_s28 = scalar_lea.hbm %s5852_s1, %s2712_s21 }
 0x11e   :  { %s456_s0 = sshll.u32 %s447_s4, 4  ;;  %s473_s18 = sshll.u32 %s464_s28, 4  ;;  %s457_s0 = int_to_ptr.hbm [resolvable:$true] %s456_s0  ;;  %s474_s18 = int_to_ptr.hbm [resolvable:$true] %s473_s18 }
 0x11f   :  { %s3633_s17 = sshra.s32 %s457_s0, 4  ;;  %s3634_s17 = int_to_ptr.hbm [resolvable:$true] %s3633_s17 }
 0x120   :  { %s3635_s14 = scalar_lea.hbm %s3634_s17, 1  ;;  %p3638_p8 = scmp.lt.s32.totalorder %s3634_s17, %s5852_s1 }
 0x121   :  { %p3636_p7 = scmp.ne.s32.totalorder %s3634_s17, %s3635_s14  ;;  %p3639_p9 = scmp.lt.s32.totalorder %s4914_s23, %s3635_s14 }
 0x123   :  { %p3640_p10 = por %p3639_p9, %p3638_p8 }
 0x125   :  { %p3641_p11 = pnand %p3640_p10, %p3636_p7 }
 0x127   :  { %3644 = shalt.err (!%p3641_p11)  }
 0x128   :  { %461 = dma.hbm_to_vmem [thread:$0]  %s457_s0, 16, %s459_s20, [#allocation7] }
 0x129   :  { %s2713_s13 = sld [smem:[#allocation9 + $0x17]]  ;;  %s3657_s21 = sshra.s32 %s474_s18, 4  ;;  %s3658_s21 = int_to_ptr.hbm [resolvable:$true] %s3657_s21 }
 0x12a   :  { %s3659_s2 = scalar_lea.hbm %s3658_s21, 1  ;;  %p3662_p13 = scmp.lt.s32.totalorder %s3658_s21, %s5852_s1 }
 0x12b   :  { %p3660_p12 = scmp.ne.s32.totalorder %s3658_s21, %s3659_s2  ;;  %p3663_p0 = scmp.lt.s32.totalorder %s4914_s23, %s3659_s2 }
 0x12d   :  { %p3664_p1 = por %p3663_p0, %p3662_p13 }
 0x12f   :  { %p3665_p2 = pnand %p3664_p1, %p3660_p12 }
 0x131   :  { %3668 = shalt.err (!%p3665_p2)  }
 0x132   :  { %478 = dma.hbm_to_vmem [thread:$0]  %s474_s18, 16, %s476_s30, [#allocation7] }
 0x133   :  { %s2714_s19 = sld [smem:[#allocation9 + $0x18]]  ;;  %s4778_s29 = smov [#allocation2 + $0x17]  }
 0x134   :  { %s492_s12 = sshll.u32 %s4778_s29, 4  ;;  %s4779_s20 = smov [#allocation2 + $0x18]   ;;  %s493_s12 = int_to_ptr.vmem [resolvable:$true] %s492_s12 }
 0x135   :  { %s5140_s22 = sshll.u32 %s4779_s20, 4  ;;  %s5143_s26 = sld [smem:[#allocation9 + $0x19]]  ;;  %s510_s22 = int_to_ptr.vmem [resolvable:$true] %s5140_s22 }
 0x136   :  { %s481_s4 = scalar_lea.hbm %s5852_s1, %s2713_s13  ;;  %s4780_s10 = smov [#allocation2 + $0x19]  }
 0x137   :  { %s490_s0 = sshll.u32 %s481_s4, 4  ;;  %s5148_s24 = sshll.u32 %s4780_s10, 4  ;;  %s491_s0 = int_to_ptr.hbm [resolvable:$true] %s490_s0  ;;  %s527_s24 = int_to_ptr.vmem [resolvable:$true] %s5148_s24 }
 0x138   :  { %s3681_s17 = sshra.s32 %s491_s0, 4  ;;  %s3682_s17 = int_to_ptr.hbm [resolvable:$true] %s3681_s17 }
 0x139   :  { %s498_s18 = scalar_lea.hbm %s5852_s1, %s2714_s19  ;;  %s3683_s14 = scalar_lea.hbm %s3682_s17, 1 }
 0x13a   :  { %p3684_p3 = scmp.ne.s32.totalorder %s3682_s17, %s3683_s14  ;;  %p3686_p4 = scmp.lt.s32.totalorder %s3682_s17, %s5852_s1 }
 0x13b   :  { %p3687_p5 = scmp.lt.s32.totalorder %s4914_s23, %s3683_s14 }
 0x13d   :  { %p3688_p6 = por %p3687_p5, %p3686_p4 }
 0x13f   :  { %p3689_p7 = pnand %p3688_p6, %p3684_p3 }
 0x141   :  { %3692 = shalt.err (!%p3689_p7)  }
 0x142   :  { %495 = dma.hbm_to_vmem [thread:$0]  %s491_s0, 16, %s493_s12, [#allocation7] }
 0x143   :  { %s507_s13 = sshll.u32 %s498_s18, 4  ;;  %s515_s25 = scalar_lea.hbm %s5852_s1, %s5143_s26  ;;  %s508_s13 = int_to_ptr.hbm [resolvable:$true] %s507_s13 }
 0x144   :  { %s3705_s27 = sshra.s32 %s508_s13, 4  ;;  %s3706_s27 = int_to_ptr.hbm [resolvable:$true] %s3705_s27 }
 0x145   :  { %s3707_s19 = scalar_lea.hbm %s3706_s27, 1  ;;  %p3710_p9 = scmp.lt.s32.totalorder %s3706_s27, %s5852_s1 }
 0x146   :  { %p3708_p8 = scmp.ne.s32.totalorder %s3706_s27, %s3707_s19  ;;  %p3711_p10 = scmp.lt.s32.totalorder %s4914_s23, %s3707_s19 }
 0x148   :  { %p3712_p11 = por %p3711_p10, %p3710_p9 }
 0x14a   :  { %p3713_p12 = pnand %p3712_p11, %p3708_p8 }
 0x14c   :  { %3716 = shalt.err (!%p3713_p12)  }
 0x14d   :  { %512 = dma.hbm_to_vmem [thread:$0]  %s508_s13, 16, %s510_s22, [#allocation7] }
 0x14e   :  { %s524_s12 = sshll.u32 %s515_s25, 4  ;;  %s2716_s3 = sld [smem:[#allocation9 + $0x1a]]  ;;  %s525_s12 = int_to_ptr.hbm [resolvable:$true] %s524_s12 }
 0x14f   :  { %s3729_s26 = sshra.s32 %s525_s12, 4  ;;  %s3730_s26 = int_to_ptr.hbm [resolvable:$true] %s3729_s26 }
 0x150   :  { %s3731_s9 = scalar_lea.hbm %s3730_s26, 1  ;;  %p3734_p0 = scmp.lt.s32.totalorder %s3730_s26, %s5852_s1 }
 0x151   :  { %p3732_p13 = scmp.ne.s32.totalorder %s3730_s26, %s3731_s9  ;;  %p3735_p1 = scmp.lt.s32.totalorder %s4914_s23, %s3731_s9 }
 0x153   :  { %p3736_p2 = por %p3735_p1, %p3734_p0 }
 0x155   :  { %p3737_p3 = pnand %p3736_p2, %p3732_p13 }
 0x157   :  { %3740 = shalt.err (!%p3737_p3)  }
 0x158   :  { %529 = dma.hbm_to_vmem [thread:$0]  %s525_s12, 16, %s527_s24, [#allocation7] }
 0x159   :  { %s4781_s10 = smov [#allocation2 + $0x1a]   ;;  %s2717_s28 = sld [smem:[#allocation9 + $0x1b]] }
 0x15a   :  { %s543_s30 = sshll.u32 %s4781_s10, 4  ;;  %s4782_s22 = smov [#allocation2 + $0x1b]   ;;  %s544_s30 = int_to_ptr.vmem [resolvable:$true] %s543_s30 }
 0x15b   :  { %s5172_s18 = sshll.u32 %s4782_s22, 4  ;;  %s2718_s17 = sld [smem:[#allocation9 + $0x1c]]  ;;  %s561_s18 = int_to_ptr.vmem [resolvable:$true] %s5172_s18 }
 0x15c   :  { %s532_s11 = scalar_lea.hbm %s5852_s1, %s2716_s3  ;;  %s4783_s21 = smov [#allocation2 + $0x1c]  }
 0x15d   :  { %s541_s13 = sshll.u32 %s532_s11, 4  ;;  %s5178_s2 = sshll.u32 %s4783_s21, 4  ;;  %s542_s13 = int_to_ptr.hbm [resolvable:$true] %s541_s13  ;;  %s578_s2 = int_to_ptr.vmem [resolvable:$true] %s5178_s2 }
 0x15e   :  { %s3753_s24 = sshra.s32 %s542_s13, 4  ;;  %s3754_s24 = int_to_ptr.hbm [resolvable:$true] %s3753_s24 }
 0x15f   :  { %s3755_s25 = scalar_lea.hbm %s3754_s24, 1  ;;  %p3758_p5 = scmp.lt.s32.totalorder %s3754_s24, %s5852_s1 }
 0x160   :  { %p3756_p4 = scmp.ne.s32.totalorder %s3754_s24, %s3755_s25  ;;  %p3759_p6 = scmp.lt.s32.totalorder %s4914_s23, %s3755_s25 }
 0x162   :  { %p3760_p7 = por %p3759_p6, %p3758_p5 }
 0x164   :  { %p3761_p8 = pnand %p3760_p7, %p3756_p4 }
 0x166   :  { %3764 = shalt.err (!%p3761_p8)  }
 0x167   :  { %546 = dma.hbm_to_vmem [thread:$0]  %s542_s13, 16, %s544_s30, [#allocation7] }
 0x168   :  { %s549_s12 = scalar_lea.hbm %s5852_s1, %s2717_s28  ;;  %s566_s4 = scalar_lea.hbm %s5852_s1, %s2718_s17 }
 0x169   :  { %s558_s3 = sshll.u32 %s549_s12, 4  ;;  %s575_s0 = sshll.u32 %s566_s4, 4  ;;  %s559_s3 = int_to_ptr.hbm [resolvable:$true] %s558_s3  ;;  %s576_s0 = int_to_ptr.hbm [resolvable:$true] %s575_s0 }
 0x16a   :  { %s3777_s10 = sshra.s32 %s559_s3, 4  ;;  %s3778_s10 = int_to_ptr.hbm [resolvable:$true] %s3777_s10 }
 0x16b   :  { %s3779_s22 = scalar_lea.hbm %s3778_s10, 1  ;;  %p3782_p10 = scmp.lt.s32.totalorder %s3778_s10, %s5852_s1 }
 0x16c   :  { %p3780_p9 = scmp.ne.s32.totalorder %s3778_s10, %s3779_s22  ;;  %p3783_p11 = scmp.lt.s32.totalorder %s4914_s23, %s3779_s22 }
 0x16e   :  { %p3784_p12 = por %p3783_p11, %p3782_p10 }
 0x170   :  { %p3785_p13 = pnand %p3784_p12, %p3780_p9 }
 0x172   :  { %3788 = shalt.err (!%p3785_p13)  }
 0x173   :  { %563 = dma.hbm_to_vmem [thread:$0]  %s559_s3, 16, %s561_s18, [#allocation7] }
 0x174   :  { %s2719_s28 = sld [smem:[#allocation9 + $0x1d]]  ;;  %s3801_s17 = sshra.s32 %s576_s0, 4  ;;  %s3802_s17 = int_to_ptr.hbm [resolvable:$true] %s3801_s17 }
 0x175   :  { %s3803_s15 = scalar_lea.hbm %s3802_s17, 1  ;;  %p3806_p1 = scmp.lt.s32.totalorder %s3802_s17, %s5852_s1 }
 0x176   :  { %p3804_p0 = scmp.ne.s32.totalorder %s3802_s17, %s3803_s15  ;;  %p3807_p2 = scmp.lt.s32.totalorder %s4914_s23, %s3803_s15 }
 0x178   :  { %p3808_p3 = por %p3807_p2, %p3806_p1 }
 0x17a   :  { %p3809_p4 = pnand %p3808_p3, %p3804_p0 }
 0x17c   :  { %3812 = shalt.err (!%p3809_p4)  }
 0x17d   :  { %580 = dma.hbm_to_vmem [thread:$0]  %s576_s0, 16, %s578_s2, [#allocation7] }
 0x17e   :  { %s2720_s21 = sld [smem:[#allocation9 + $0x1e]]  ;;  %s4784_s24 = smov [#allocation2 + $0x1d]  }
 0x17f   :  { %s594_s25 = sshll.u32 %s4784_s24, 4  ;;  %s4785_s18 = smov [#allocation2 + $0x1e]   ;;  %s595_s25 = int_to_ptr.vmem [resolvable:$true] %s594_s25 }
 0x180   :  { %s5201_s27 = sshll.u32 %s4785_s18, 4  ;;  %s5204_s19 = sld [smem:[#allocation9 + $0x1f]]  ;;  %s612_s27 = int_to_ptr.vmem [resolvable:$true] %s5201_s27 }
 0x181   :  { %s583_s12 = scalar_lea.hbm %s5852_s1, %s2719_s28  ;;  %s4786_s26 = smov [#allocation2 + $0x1f]  }
 0x182   :  { %s592_s3 = sshll.u32 %s583_s12, 4  ;;  %s5209_s9 = sshll.u32 %s4786_s26, 4  ;;  %s593_s3 = int_to_ptr.hbm [resolvable:$true] %s592_s3  ;;  %s629_s9 = int_to_ptr.vmem [resolvable:$true] %s5209_s9 }
 0x183   :  { %s3825_s10 = sshra.s32 %s593_s3, 4  ;;  %s3826_s10 = int_to_ptr.hbm [resolvable:$true] %s3825_s10 }
 0x184   :  { %s600_s0 = scalar_lea.hbm %s5852_s1, %s2720_s21  ;;  %s3827_s22 = scalar_lea.hbm %s3826_s10, 1 }
 0x185   :  { %p3828_p5 = scmp.ne.s32.totalorder %s3826_s10, %s3827_s22  ;;  %p3830_p6 = scmp.lt.s32.totalorder %s3826_s10, %s5852_s1 }
 0x186   :  { %p3831_p7 = scmp.lt.s32.totalorder %s4914_s23, %s3827_s22 }
 0x188   :  { %p3832_p8 = por %p3831_p7, %p3830_p6 }
 0x18a   :  { %p3833_p9 = pnand %p3832_p8, %p3828_p5 }
 0x18c   :  { %3836 = shalt.err (!%p3833_p9)  }
 0x18d   :  { %597 = dma.hbm_to_vmem [thread:$0]  %s593_s3, 16, %s595_s25, [#allocation7] }
 0x18e   :  { %s609_s28 = sshll.u32 %s600_s0, 4  ;;  %s617_s11 = scalar_lea.hbm %s5852_s1, %s5204_s19  ;;  %s610_s28 = int_to_ptr.hbm [resolvable:$true] %s609_s28 }
 0x18f   :  { %s3849_s13 = sshra.s32 %s610_s28, 4  ;;  %s3850_s13 = int_to_ptr.hbm [resolvable:$true] %s3849_s13 }
 0x190   :  { %s3851_s21 = scalar_lea.hbm %s3850_s13, 1  ;;  %p3854_p11 = scmp.lt.s32.totalorder %s3850_s13, %s5852_s1 }
 0x191   :  { %p3852_p10 = scmp.ne.s32.totalorder %s3850_s13, %s3851_s21  ;;  %p3855_p12 = scmp.lt.s32.totalorder %s4914_s23, %s3851_s21 }
 0x193   :  { %p3856_p13 = por %p3855_p12, %p3854_p11 }
 0x195   :  { %p3857_p0 = pnand %p3856_p13, %p3852_p10 }
 0x197   :  { %3860 = shalt.err (!%p3857_p0)  }
 0x198   :  { %614 = dma.hbm_to_vmem [thread:$0]  %s610_s28, 16, %s612_s27, [#allocation7] }
 0x199   :  { %s626_s25 = sshll.u32 %s617_s11, 4  ;;  %s2722_s29 = sld [smem:[#allocation9 + $0x20]]  ;;  %s627_s25 = int_to_ptr.hbm [resolvable:$true] %s626_s25 }
 0x19a   :  { %s3873_s19 = sshra.s32 %s627_s25, 4  ;;  %s3874_s19 = int_to_ptr.hbm [resolvable:$true] %s3873_s19 }
 0x19b   :  { %s3875_s20 = scalar_lea.hbm %s3874_s19, 1  ;;  %p3878_p2 = scmp.lt.s32.totalorder %s3874_s19, %s5852_s1 }
 0x19c   :  { %p3876_p1 = scmp.ne.s32.totalorder %s3874_s19, %s3875_s20  ;;  %p3879_p3 = scmp.lt.s32.totalorder %s4914_s23, %s3875_s20 }
 0x19e   :  { %p3880_p4 = por %p3879_p3, %p3878_p2 }
 0x1a0   :  { %p3881_p5 = pnand %p3880_p4, %p3876_p1 }
 0x1a2   :  { %3884 = shalt.err (!%p3881_p5)  }
 0x1a3   :  { %631 = dma.hbm_to_vmem [thread:$0]  %s627_s25, 16, %s629_s9, [#allocation7] }
 0x1a4   :  { %s4787_s26 = smov [#allocation2 + $0x20]   ;;  %s2723_s4 = sld [smem:[#allocation9 + $0x21]] }
 0x1a5   :  { %s645_s2 = sshll.u32 %s4787_s26, 4  ;;  %s4788_s27 = smov [#allocation2 + $0x21]   ;;  %s646_s2 = int_to_ptr.vmem [resolvable:$true] %s645_s2 }
 0x1a6   :  { %s5233_s0 = sshll.u32 %s4788_s27, 4  ;;  %s2724_s10 = sld [smem:[#allocation9 + $0x22]]  ;;  %s663_s0 = int_to_ptr.vmem [resolvable:$true] %s5233_s0 }
 0x1a7   :  { %s634_s30 = scalar_lea.hbm %s5852_s1, %s2722_s29  ;;  %s4789_s17 = smov [#allocation2 + $0x22]  }
 0x1a8   :  { %s643_s28 = sshll.u32 %s634_s30, 4  ;;  %s5239_s15 = sshll.u32 %s4789_s17, 4  ;;  %s644_s28 = int_to_ptr.hbm [resolvable:$true] %s643_s28  ;;  %s680_s15 = int_to_ptr.vmem [resolvable:$true] %s5239_s15 }
 0x1a9   :  { %s3897_s9 = sshra.s32 %s644_s28, 4  ;;  %s3898_s9 = int_to_ptr.hbm [resolvable:$true] %s3897_s9 }
 0x1aa   :  { %s3899_s11 = scalar_lea.hbm %s3898_s9, 1  ;;  %p3902_p7 = scmp.lt.s32.totalorder %s3898_s9, %s5852_s1 }
 0x1ab   :  { %p3900_p6 = scmp.ne.s32.totalorder %s3898_s9, %s3899_s11  ;;  %p3903_p8 = scmp.lt.s32.totalorder %s4914_s23, %s3899_s11 }
 0x1ad   :  { %p3904_p9 = por %p3903_p8, %p3902_p7 }
 0x1af   :  { %p3905_p10 = pnand %p3904_p9, %p3900_p6 }
 0x1b1   :  { %3908 = shalt.err (!%p3905_p10)  }
 0x1b2   :  { %648 = dma.hbm_to_vmem [thread:$0]  %s644_s28, 16, %s646_s2, [#allocation7] }
 0x1b3   :  { %s651_s25 = scalar_lea.hbm %s5852_s1, %s2723_s4  ;;  %s668_s12 = scalar_lea.hbm %s5852_s1, %s2724_s10 }
 0x1b4   :  { %s660_s29 = sshll.u32 %s651_s25, 4  ;;  %s677_s3 = sshll.u32 %s668_s12, 4  ;;  %s661_s29 = int_to_ptr.hbm [resolvable:$true] %s660_s29  ;;  %s678_s3 = int_to_ptr.hbm [resolvable:$true] %s677_s3 }
 0x1b5   :  { %s3921_s26 = sshra.s32 %s661_s29, 4  ;;  %s3922_s26 = int_to_ptr.hbm [resolvable:$true] %s3921_s26 }
 0x1b6   :  { %s3923_s27 = scalar_lea.hbm %s3922_s26, 1  ;;  %p3926_p12 = scmp.lt.s32.totalorder %s3922_s26, %s5852_s1 }
 0x1b7   :  { %p3924_p11 = scmp.ne.s32.totalorder %s3922_s26, %s3923_s27  ;;  %p3927_p13 = scmp.lt.s32.totalorder %s4914_s23, %s3923_s27 }
 0x1b9   :  { %p3928_p0 = por %p3927_p13, %p3926_p12 }
 0x1bb   :  { %p3929_p1 = pnand %p3928_p0, %p3924_p11 }
 0x1bd   :  { %3932 = shalt.err (!%p3929_p1)  }
 0x1be   :  { %665 = dma.hbm_to_vmem [thread:$0]  %s661_s29, 16, %s663_s0, [#allocation7] }
 0x1bf   :  { %s2725_s4 = sld [smem:[#allocation9 + $0x23]]  ;;  %s3945_s10 = sshra.s32 %s678_s3, 4  ;;  %s3946_s10 = int_to_ptr.hbm [resolvable:$true] %s3945_s10 }
 0x1c0   :  { %s3947_s14 = scalar_lea.hbm %s3946_s10, 1  ;;  %p3950_p3 = scmp.lt.s32.totalorder %s3946_s10, %s5852_s1 }
 0x1c1   :  { %p3948_p2 = scmp.ne.s32.totalorder %s3946_s10, %s3947_s14  ;;  %p3951_p4 = scmp.lt.s32.totalorder %s4914_s23, %s3947_s14 }
 0x1c3   :  { %p3952_p5 = por %p3951_p4, %p3950_p3 }
 0x1c5   :  { %p3953_p6 = pnand %p3952_p5, %p3948_p2 }
 0x1c7   :  { %3956 = shalt.err (!%p3953_p6)  }
 0x1c8   :  { %682 = dma.hbm_to_vmem [thread:$0]  %s678_s3, 16, %s680_s15, [#allocation7] }
 0x1c9   :  { %s2726_s17 = sld [smem:[#allocation9 + $0x24]]  ;;  %s4790_s9 = smov [#allocation2 + $0x23]  }
 0x1ca   :  { %s696_s11 = sshll.u32 %s4790_s9, 4  ;;  %s4791_s0 = smov [#allocation2 + $0x24]   ;;  %s697_s11 = int_to_ptr.vmem [resolvable:$true] %s696_s11 }
 0x1cb   :  { %s5262_s13 = sshll.u32 %s4791_s0, 4  ;;  %s5265_s21 = sld [smem:[#allocation9 + $0x25]]  ;;  %s714_s13 = int_to_ptr.vmem [resolvable:$true] %s5262_s13 }
 0x1cc   :  { %s685_s25 = scalar_lea.hbm %s5852_s1, %s2725_s4  ;;  %s4792_s19 = smov [#allocation2 + $0x25]  }
 0x1cd   :  { %s694_s29 = sshll.u32 %s685_s25, 4  ;;  %s5270_s20 = sshll.u32 %s4792_s19, 4  ;;  %s695_s29 = int_to_ptr.hbm [resolvable:$true] %s694_s29  ;;  %s731_s20 = int_to_ptr.vmem [resolvable:$true] %s5270_s20 }
 0x1ce   :  { %s3969_s26 = sshra.s32 %s695_s29, 4  ;;  %s3970_s26 = int_to_ptr.hbm [resolvable:$true] %s3969_s26 }
 0x1cf   :  { %s702_s3 = scalar_lea.hbm %s5852_s1, %s2726_s17  ;;  %s3971_s27 = scalar_lea.hbm %s3970_s26, 1 }
 0x1d0   :  { %p3972_p7 = scmp.ne.s32.totalorder %s3970_s26, %s3971_s27  ;;  %p3974_p8 = scmp.lt.s32.totalorder %s3970_s26, %s5852_s1 }
 0x1d1   :  { %p3975_p9 = scmp.lt.s32.totalorder %s4914_s23, %s3971_s27 }
 0x1d3   :  { %p3976_p10 = por %p3975_p9, %p3974_p8 }
 0x1d5   :  { %p3977_p11 = pnand %p3976_p10, %p3972_p7 }
 0x1d7   :  { %3980 = shalt.err (!%p3977_p11)  }
 0x1d8   :  { %699 = dma.hbm_to_vmem [thread:$0]  %s695_s29, 16, %s697_s11, [#allocation7] }
 0x1d9   :  { %s711_s4 = sshll.u32 %s702_s3, 4  ;;  %s719_s30 = scalar_lea.hbm %s5852_s1, %s5265_s21  ;;  %s712_s4 = int_to_ptr.hbm [resolvable:$true] %s711_s4 }
 0x1da   :  { %s3993_s28 = sshra.s32 %s712_s4, 4  ;;  %s3994_s28 = int_to_ptr.hbm [resolvable:$true] %s3993_s28 }
 0x1db   :  { %s3995_s17 = scalar_lea.hbm %s3994_s28, 1  ;;  %p3998_p13 = scmp.lt.s32.totalorder %s3994_s28, %s5852_s1 }
 0x1dc   :  { %p3996_p12 = scmp.ne.s32.totalorder %s3994_s28, %s3995_s17  ;;  %p3999_p0 = scmp.lt.s32.totalorder %s4914_s23, %s3995_s17 }
 0x1de   :  { %p4000_p1 = por %p3999_p0, %p3998_p13 }
 0x1e0   :  { %p4001_p2 = pnand %p4000_p1, %p3996_p12 }
 0x1e2   :  { %4004 = shalt.err (!%p4001_p2)  }
 0x1e3   :  { %716 = dma.hbm_to_vmem [thread:$0]  %s712_s4, 16, %s714_s13, [#allocation7] }
 0x1e4   :  { %s728_s11 = sshll.u32 %s719_s30, 4  ;;  %s2728_s24 = sld [smem:[#allocation9 + $0x26]]  ;;  %s729_s11 = int_to_ptr.hbm [resolvable:$true] %s728_s11 }
 0x1e5   :  { %s4017_s21 = sshra.s32 %s729_s11, 4  ;;  %s4018_s21 = int_to_ptr.hbm [resolvable:$true] %s4017_s21 }
 0x1e6   :  { %s4019_s18 = scalar_lea.hbm %s4018_s21, 1  ;;  %p4022_p4 = scmp.lt.s32.totalorder %s4018_s21, %s5852_s1 }
 0x1e7   :  { %p4020_p3 = scmp.ne.s32.totalorder %s4018_s21, %s4019_s18  ;;  %p4023_p5 = scmp.lt.s32.totalorder %s4914_s23, %s4019_s18 }
 0x1e9   :  { %p4024_p6 = por %p4023_p5, %p4022_p4 }
 0x1eb   :  { %p4025_p7 = pnand %p4024_p6, %p4020_p3 }
 0x1ed   :  { %4028 = shalt.err (!%p4025_p7)  }
 0x1ee   :  { %733 = dma.hbm_to_vmem [thread:$0]  %s729_s11, 16, %s731_s20, [#allocation7] }
 0x1ef   :  { %s4793_s19 = smov [#allocation2 + $0x26]   ;;  %s2729_s12 = sld [smem:[#allocation9 + $0x27]] }
 0x1f0   :  { %s747_s15 = sshll.u32 %s4793_s19, 4  ;;  %s4794_s13 = smov [#allocation2 + $0x27]   ;;  %s748_s15 = int_to_ptr.vmem [resolvable:$true] %s747_s15 }
 0x1f1   :  { %s5294_s3 = sshll.u32 %s4794_s13, 4  ;;  %s2730_s26 = sld [smem:[#allocation9 + $0x28]]  ;;  %s765_s3 = int_to_ptr.vmem [resolvable:$true] %s5294_s3 }
 0x1f2   :  { %s736_s2 = scalar_lea.hbm %s5852_s1, %s2728_s24  ;;  %s4795_s10 = smov [#allocation2 + $0x28]  }
 0x1f3   :  { %s745_s4 = sshll.u32 %s736_s2, 4  ;;  %s5300_s14 = sshll.u32 %s4795_s10, 4  ;;  %s746_s4 = int_to_ptr.hbm [resolvable:$true] %s745_s4  ;;  %s782_s14 = int_to_ptr.vmem [resolvable:$true] %s5300_s14 }
 0x1f4   :  { %s4041_s20 = sshra.s32 %s746_s4, 4  ;;  %s4042_s20 = int_to_ptr.hbm [resolvable:$true] %s4041_s20 }
 0x1f5   :  { %s4043_s30 = scalar_lea.hbm %s4042_s20, 1  ;;  %p4046_p9 = scmp.lt.s32.totalorder %s4042_s20, %s5852_s1 }
 0x1f6   :  { %p4044_p8 = scmp.ne.s32.totalorder %s4042_s20, %s4043_s30  ;;  %p4047_p10 = scmp.lt.s32.totalorder %s4914_s23, %s4043_s30 }
 0x1f8   :  { %p4048_p11 = por %p4047_p10, %p4046_p9 }
 0x1fa   :  { %p4049_p12 = pnand %p4048_p11, %p4044_p8 }
 0x1fc   :  { %4052 = shalt.err (!%p4049_p12)  }
 0x1fd   :  { %750 = dma.hbm_to_vmem [thread:$0]  %s746_s4, 16, %s748_s15, [#allocation7] }
 0x1fe   :  { %s753_s11 = scalar_lea.hbm %s5852_s1, %s2729_s12  ;;  %s770_s25 = scalar_lea.hbm %s5852_s1, %s2730_s26 }
 0x1ff   :  { %s762_s24 = sshll.u32 %s753_s11, 4  ;;  %s779_s29 = sshll.u32 %s770_s25, 4  ;;  %s763_s24 = int_to_ptr.hbm [resolvable:$true] %s762_s24  ;;  %s780_s29 = int_to_ptr.hbm [resolvable:$true] %s779_s29 }
 0x200   :  { %s4065_s19 = sshra.s32 %s763_s24, 4  ;;  %s4066_s19 = int_to_ptr.hbm [resolvable:$true] %s4065_s19 }
 0x201   :  { %s4067_s13 = scalar_lea.hbm %s4066_s19, 1  ;;  %p4070_p0 = scmp.lt.s32.totalorder %s4066_s19, %s5852_s1 }
 0x202   :  { %p4068_p13 = scmp.ne.s32.totalorder %s4066_s19, %s4067_s13  ;;  %p4071_p1 = scmp.lt.s32.totalorder %s4914_s23, %s4067_s13 }
 0x204   :  { %p4072_p2 = por %p4071_p1, %p4070_p0 }
 0x206   :  { %p4073_p3 = pnand %p4072_p2, %p4068_p13 }
 0x208   :  { %4076 = shalt.err (!%p4073_p3)  }
 0x209   :  { %767 = dma.hbm_to_vmem [thread:$0]  %s763_s24, 16, %s765_s3, [#allocation7] }
 0x20a   :  { %s2731_s12 = sld [smem:[#allocation9 + $0x29]]  ;;  %s4089_s26 = sshra.s32 %s780_s29, 4  ;;  %s4090_s26 = int_to_ptr.hbm [resolvable:$true] %s4089_s26 }
 0x20b   :  { %s4091_s22 = scalar_lea.hbm %s4090_s26, 1  ;;  %p4094_p5 = scmp.lt.s32.totalorder %s4090_s26, %s5852_s1 }
 0x20c   :  { %p4092_p4 = scmp.ne.s32.totalorder %s4090_s26, %s4091_s22  ;;  %p4095_p6 = scmp.lt.s32.totalorder %s4914_s23, %s4091_s22 }
 0x20e   :  { %p4096_p7 = por %p4095_p6, %p4094_p5 }
 0x210   :  { %p4097_p8 = pnand %p4096_p7, %p4092_p4 }
 0x212   :  { %4100 = shalt.err (!%p4097_p8)  }
 0x213   :  { %784 = dma.hbm_to_vmem [thread:$0]  %s780_s29, 16, %s782_s14, [#allocation7] }
 0x214   :  { %s2732_s10 = sld [smem:[#allocation9 + $0x2a]]  ;;  %s4796_s20 = smov [#allocation2 + $0x29]  }
 0x215   :  { %s798_s30 = sshll.u32 %s4796_s20, 4  ;;  %s4797_s3 = smov [#allocation2 + $0x2a]   ;;  %s799_s30 = int_to_ptr.vmem [resolvable:$true] %s798_s30 }
 0x216   :  { %s5323_s28 = sshll.u32 %s4797_s3, 4  ;;  %s5326_s17 = sld [smem:[#allocation9 + $0x2b]]  ;;  %s816_s28 = int_to_ptr.vmem [resolvable:$true] %s5323_s28 }
 0x217   :  { %s787_s11 = scalar_lea.hbm %s5852_s1, %s2731_s12  ;;  %s4798_s21 = smov [#allocation2 + $0x2b]  }
 0x218   :  { %s796_s24 = sshll.u32 %s787_s11, 4  ;;  %s5331_s18 = sshll.u32 %s4798_s21, 4  ;;  %s797_s24 = int_to_ptr.hbm [resolvable:$true] %s796_s24  ;;  %s833_s18 = int_to_ptr.vmem [resolvable:$true] %s5331_s18 }
 0x219   :  { %s4113_s19 = sshra.s32 %s797_s24, 4  ;;  %s4114_s19 = int_to_ptr.hbm [resolvable:$true] %s4113_s19 }
 0x21a   :  { %s804_s29 = scalar_lea.hbm %s5852_s1, %s2732_s10  ;;  %s4115_s13 = scalar_lea.hbm %s4114_s19, 1 }
 0x21b   :  { %p4116_p9 = scmp.ne.s32.totalorder %s4114_s19, %s4115_s13  ;;  %p4118_p10 = scmp.lt.s32.totalorder %s4114_s19, %s5852_s1 }
 0x21c   :  { %p4119_p11 = scmp.lt.s32.totalorder %s4914_s23, %s4115_s13 }
 0x21e   :  { %p4120_p12 = por %p4119_p11, %p4118_p10 }
 0x220   :  { %p4121_p13 = pnand %p4120_p12, %p4116_p9 }
 0x222   :  { %4124 = shalt.err (!%p4121_p13)  }
 0x223   :  { %801 = dma.hbm_to_vmem [thread:$0]  %s797_s24, 16, %s799_s30, [#allocation7] }
 0x224   :  { %s813_s12 = sshll.u32 %s804_s29, 4  ;;  %s821_s2 = scalar_lea.hbm %s5852_s1, %s5326_s17  ;;  %s814_s12 = int_to_ptr.hbm [resolvable:$true] %s813_s12 }
 0x225   :  { %s4137_s4 = sshra.s32 %s814_s12, 4  ;;  %s4138_s4 = int_to_ptr.hbm [resolvable:$true] %s4137_s4 }
 0x226   :  { %s4139_s10 = scalar_lea.hbm %s4138_s4, 1  ;;  %p4142_p1 = scmp.lt.s32.totalorder %s4138_s4, %s5852_s1 }
 0x227   :  { %p4140_p0 = scmp.ne.s32.totalorder %s4138_s4, %s4139_s10  ;;  %p4143_p2 = scmp.lt.s32.totalorder %s4914_s23, %s4139_s10 }
 0x229   :  { %p4144_p3 = por %p4143_p2, %p4142_p1 }
 0x22b   :  { %p4145_p4 = pnand %p4144_p3, %p4140_p0 }
 0x22d   :  { %4148 = shalt.err (!%p4145_p4)  }
 0x22e   :  { %818 = dma.hbm_to_vmem [thread:$0]  %s814_s12, 16, %s816_s28, [#allocation7] }
 0x22f   :  { %s830_s30 = sshll.u32 %s821_s2, 4  ;;  %s2734_s9 = sld [smem:[#allocation9 + $0x2c]]  ;;  %s831_s30 = int_to_ptr.hbm [resolvable:$true] %s830_s30 }
 0x230   :  { %s4161_s17 = sshra.s32 %s831_s30, 4  ;;  %s4162_s17 = int_to_ptr.hbm [resolvable:$true] %s4161_s17 }
 0x231   :  { %s4163_s0 = scalar_lea.hbm %s4162_s17, 1  ;;  %p4166_p6 = scmp.lt.s32.totalorder %s4162_s17, %s5852_s1 }
 0x232   :  { %p4164_p5 = scmp.ne.s32.totalorder %s4162_s17, %s4163_s0  ;;  %p4167_p7 = scmp.lt.s32.totalorder %s4914_s23, %s4163_s0 }
 0x234   :  { %p4168_p8 = por %p4167_p7, %p4166_p6 }
 0x236   :  { %p4169_p9 = pnand %p4168_p8, %p4164_p5 }
 0x238   :  { %4172 = shalt.err (!%p4169_p9)  }
 0x239   :  { %835 = dma.hbm_to_vmem [thread:$0]  %s831_s30, 16, %s833_s18, [#allocation7] }
 0x23a   :  { %s4799_s21 = smov [#allocation2 + $0x2c]   ;;  %s2735_s25 = sld [smem:[#allocation9 + $0x2d]] }
 0x23b   :  { %s849_s14 = sshll.u32 %s4799_s21, 4  ;;  %s4800_s28 = smov [#allocation2 + $0x2d]   ;;  %s850_s14 = int_to_ptr.vmem [resolvable:$true] %s849_s14 }
 0x23c   :  { %s5355_s29 = sshll.u32 %s4800_s28, 4  ;;  %s2736_s19 = sld [smem:[#allocation9 + $0x2e]]  ;;  %s867_s29 = int_to_ptr.vmem [resolvable:$true] %s5355_s29 }
 0x23d   :  { %s838_s15 = scalar_lea.hbm %s5852_s1, %s2734_s9  ;;  %s4801_s26 = smov [#allocation2 + $0x2e]  }
 0x23e   :  { %s847_s12 = sshll.u32 %s838_s15, 4  ;;  %s5361_s22 = sshll.u32 %s4801_s26, 4  ;;  %s848_s12 = int_to_ptr.hbm [resolvable:$true] %s847_s12  ;;  %s884_s22 = int_to_ptr.vmem [resolvable:$true] %s5361_s22 }
 0x23f   :  { %s4185_s18 = sshra.s32 %s848_s12, 4  ;;  %s4186_s18 = int_to_ptr.hbm [resolvable:$true] %s4185_s18 }
 0x240   :  { %s4187_s2 = scalar_lea.hbm %s4186_s18, 1  ;;  %p4190_p11 = scmp.lt.s32.totalorder %s4186_s18, %s5852_s1 }
 0x241   :  { %p4188_p10 = scmp.ne.s32.totalorder %s4186_s18, %s4187_s2  ;;  %p4191_p12 = scmp.lt.s32.totalorder %s4914_s23, %s4187_s2 }
 0x243   :  { %p4192_p13 = por %p4191_p12, %p4190_p11 }
 0x245   :  { %p4193_p0 = pnand %p4192_p13, %p4188_p10 }
 0x247   :  { %4196 = shalt.err (!%p4193_p0)  }
 0x248   :  { %852 = dma.hbm_to_vmem [thread:$0]  %s848_s12, 16, %s850_s14, [#allocation7] }
 0x249   :  { %s855_s30 = scalar_lea.hbm %s5852_s1, %s2735_s25  ;;  %s872_s11 = scalar_lea.hbm %s5852_s1, %s2736_s19 }
 0x24a   :  { %s864_s9 = sshll.u32 %s855_s30, 4  ;;  %s881_s24 = sshll.u32 %s872_s11, 4  ;;  %s865_s9 = int_to_ptr.hbm [resolvable:$true] %s864_s9  ;;  %s882_s24 = int_to_ptr.hbm [resolvable:$true] %s881_s24 }
 0x24b   :  { %s4209_s21 = sshra.s32 %s865_s9, 4  ;;  %s4210_s21 = int_to_ptr.hbm [resolvable:$true] %s4209_s21 }
 0x24c   :  { %s4211_s28 = scalar_lea.hbm %s4210_s21, 1  ;;  %p4214_p2 = scmp.lt.s32.totalorder %s4210_s21, %s5852_s1 }
 0x24d   :  { %p4212_p1 = scmp.ne.s32.totalorder %s4210_s21, %s4211_s28  ;;  %p4215_p3 = scmp.lt.s32.totalorder %s4914_s23, %s4211_s28 }
 0x24f   :  { %p4216_p4 = por %p4215_p3, %p4214_p2 }
 0x251   :  { %p4217_p5 = pnand %p4216_p4, %p4212_p1 }
 0x253   :  { %4220 = shalt.err (!%p4217_p5)  }
 0x254   :  { %869 = dma.hbm_to_vmem [thread:$0]  %s865_s9, 16, %s867_s29, [#allocation7] }
 0x255   :  { %s2737_s25 = sld [smem:[#allocation9 + $0x2f]]  ;;  %s4233_s19 = sshra.s32 %s882_s24, 4  ;;  %s4234_s19 = int_to_ptr.hbm [resolvable:$true] %s4233_s19 }
 0x256   :  { %s4235_s27 = scalar_lea.hbm %s4234_s19, 1  ;;  %p4238_p7 = scmp.lt.s32.totalorder %s4234_s19, %s5852_s1 }
 0x257   :  { %p4236_p6 = scmp.ne.s32.totalorder %s4234_s19, %s4235_s27  ;;  %p4239_p8 = scmp.lt.s32.totalorder %s4914_s23, %s4235_s27 }
 0x259   :  { %p4240_p9 = por %p4239_p8, %p4238_p7 }
 0x25b   :  { %p4241_p10 = pnand %p4240_p9, %p4236_p6 }
 0x25d   :  { %4244 = shalt.err (!%p4241_p10)  }
 0x25e   :  { %886 = dma.hbm_to_vmem [thread:$0]  %s882_s24, 16, %s884_s22, [#allocation7] }
 0x25f   :  { %s2738_s26 = sld [smem:[#allocation9 + $0x30]]  ;;  %s4802_s18 = smov [#allocation2 + $0x2f]  }
 0x260   :  { %s900_s2 = sshll.u32 %s4802_s18, 4  ;;  %s4803_s29 = smov [#allocation2 + $0x30]   ;;  %s901_s2 = int_to_ptr.vmem [resolvable:$true] %s900_s2 }
 0x261   :  { %s5384_s4 = sshll.u32 %s4803_s29, 4  ;;  %s5387_s10 = sld [smem:[#allocation9 + $0x31]]  ;;  %s918_s4 = int_to_ptr.vmem [resolvable:$true] %s5384_s4 }
 0x262   :  { %s889_s30 = scalar_lea.hbm %s5852_s1, %s2737_s25  ;;  %s4804_s17 = smov [#allocation2 + $0x31]  }
 0x263   :  { %s898_s9 = sshll.u32 %s889_s30, 4  ;;  %s5392_s0 = sshll.u32 %s4804_s17, 4  ;;  %s899_s9 = int_to_ptr.hbm [resolvable:$true] %s898_s9  ;;  %s935_s0 = int_to_ptr.vmem [resolvable:$true] %s5392_s0 }
 0x264   :  { %s4257_s21 = sshra.s32 %s899_s9, 4  ;;  %s4258_s21 = int_to_ptr.hbm [resolvable:$true] %s4257_s21 }
 0x265   :  { %s906_s24 = scalar_lea.hbm %s5852_s1, %s2738_s26  ;;  %s4259_s28 = scalar_lea.hbm %s4258_s21, 1 }
 0x266   :  { %p4260_p11 = scmp.ne.s32.totalorder %s4258_s21, %s4259_s28  ;;  %p4262_p12 = scmp.lt.s32.totalorder %s4258_s21, %s5852_s1 }
 0x267   :  { %p4263_p13 = scmp.lt.s32.totalorder %s4914_s23, %s4259_s28 }
 0x269   :  { %p4264_p0 = por %p4263_p13, %p4262_p12 }
 0x26b   :  { %p4265_p1 = pnand %p4264_p0, %p4260_p11 }
 0x26d   :  { %4268 = shalt.err (!%p4265_p1)  }
 0x26e   :  { %903 = dma.hbm_to_vmem [thread:$0]  %s899_s9, 16, %s901_s2, [#allocation7] }
 0x26f   :  { %s915_s25 = sshll.u32 %s906_s24, 4  ;;  %s923_s15 = scalar_lea.hbm %s5852_s1, %s5387_s10  ;;  %s916_s25 = int_to_ptr.hbm [resolvable:$true] %s915_s25 }
 0x270   :  { %s4281_s12 = sshra.s32 %s916_s25, 4  ;;  %s4282_s12 = int_to_ptr.hbm [resolvable:$true] %s4281_s12 }
 0x271   :  { %s4283_s26 = scalar_lea.hbm %s4282_s12, 1  ;;  %p4286_p3 = scmp.lt.s32.totalorder %s4282_s12, %s5852_s1 }
 0x272   :  { %p4284_p2 = scmp.ne.s32.totalorder %s4282_s12, %s4283_s26  ;;  %p4287_p4 = scmp.lt.s32.totalorder %s4914_s23, %s4283_s26 }
 0x274   :  { %p4288_p5 = por %p4287_p4, %p4286_p3 }
 0x276   :  { %p4289_p6 = pnand %p4288_p5, %p4284_p2 }
 0x278   :  { %4292 = shalt.err (!%p4289_p6)  }
 0x279   :  { %920 = dma.hbm_to_vmem [thread:$0]  %s916_s25, 16, %s918_s4, [#allocation7] }
 0x27a   :  { %s932_s2 = sshll.u32 %s923_s15, 4  ;;  %s2740_s20 = sld [smem:[#allocation9 + $0x32]]  ;;  %s933_s2 = int_to_ptr.hbm [resolvable:$true] %s932_s2 }
 0x27b   :  { %s4305_s10 = sshra.s32 %s933_s2, 4  ;;  %s4306_s10 = int_to_ptr.hbm [resolvable:$true] %s4305_s10 }
 0x27c   :  { %s4307_s3 = scalar_lea.hbm %s4306_s10, 1  ;;  %p4310_p8 = scmp.lt.s32.totalorder %s4306_s10, %s5852_s1 }
 0x27d   :  { %p4308_p7 = scmp.ne.s32.totalorder %s4306_s10, %s4307_s3  ;;  %p4311_p9 = scmp.lt.s32.totalorder %s4914_s23, %s4307_s3 }
 0x27f   :  { %p4312_p10 = por %p4311_p9, %p4310_p8 }
 0x281   :  { %p4313_p11 = pnand %p4312_p10, %p4308_p7 }
 0x283   :  { %4316 = shalt.err (!%p4313_p11)  }
 0x284   :  { %937 = dma.hbm_to_vmem [thread:$0]  %s933_s2, 16, %s935_s0, [#allocation7] }
 0x285   :  { %s4805_s17 = smov [#allocation2 + $0x32]   ;;  %s2741_s11 = sld [smem:[#allocation9 + $0x33]] }
 0x286   :  { %s951_s22 = sshll.u32 %s4805_s17, 4  ;;  %s4806_s4 = smov [#allocation2 + $0x33]   ;;  %s952_s22 = int_to_ptr.vmem [resolvable:$true] %s951_s22 }
 0x287   :  { %s5416_s24 = sshll.u32 %s4806_s4, 4  ;;  %s2742_s21 = sld [smem:[#allocation9 + $0x34]]  ;;  %s969_s24 = int_to_ptr.vmem [resolvable:$true] %s5416_s24 }
 0x288   :  { %s940_s14 = scalar_lea.hbm %s5852_s1, %s2740_s20  ;;  %s4807_s19 = smov [#allocation2 + $0x34]  }
 0x289   :  { %s949_s25 = sshll.u32 %s940_s14, 4  ;;  %s5422_s27 = sshll.u32 %s4807_s19, 4  ;;  %s950_s25 = int_to_ptr.hbm [resolvable:$true] %s949_s25  ;;  %s986_s27 = int_to_ptr.vmem [resolvable:$true] %s5422_s27 }
 0x28a   :  { %s4329_s0 = sshra.s32 %s950_s25, 4  ;;  %s4330_s0 = int_to_ptr.hbm [resolvable:$true] %s4329_s0 }
 0x28b   :  { %s4331_s15 = scalar_lea.hbm %s4330_s0, 1  ;;  %p4334_p13 = scmp.lt.s32.totalorder %s4330_s0, %s5852_s1 }
 0x28c   :  { %p4332_p12 = scmp.ne.s32.totalorder %s4330_s0, %s4331_s15  ;;  %p4335_p0 = scmp.lt.s32.totalorder %s4914_s23, %s4331_s15 }
 0x28e   :  { %p4336_p1 = por %p4335_p0, %p4334_p13 }
 0x290   :  { %p4337_p2 = pnand %p4336_p1, %p4332_p12 }
 0x292   :  { %4340 = shalt.err (!%p4337_p2)  }
 0x293   :  { %954 = dma.hbm_to_vmem [thread:$0]  %s950_s25, 16, %s952_s22, [#allocation7] }
 0x294   :  { %s957_s2 = scalar_lea.hbm %s5852_s1, %s2741_s11  ;;  %s974_s30 = scalar_lea.hbm %s5852_s1, %s2742_s21 }
 0x295   :  { %s966_s20 = sshll.u32 %s957_s2, 4  ;;  %s983_s9 = sshll.u32 %s974_s30, 4  ;;  %s967_s20 = int_to_ptr.hbm [resolvable:$true] %s966_s20  ;;  %s984_s9 = int_to_ptr.hbm [resolvable:$true] %s983_s9 }
 0x296   :  { %s4353_s17 = sshra.s32 %s967_s20, 4  ;;  %s4354_s17 = int_to_ptr.hbm [resolvable:$true] %s4353_s17 }
 0x297   :  { %s4355_s4 = scalar_lea.hbm %s4354_s17, 1  ;;  %p4358_p4 = scmp.lt.s32.totalorder %s4354_s17, %s5852_s1 }
 0x298   :  { %p4356_p3 = scmp.ne.s32.totalorder %s4354_s17, %s4355_s4  ;;  %p4359_p5 = scmp.lt.s32.totalorder %s4914_s23, %s4355_s4 }
 0x29a   :  { %p4360_p6 = por %p4359_p5, %p4358_p4 }
 0x29c   :  { %p4361_p7 = pnand %p4360_p6, %p4356_p3 }
 0x29e   :  { %4364 = shalt.err (!%p4361_p7)  }
 0x29f   :  { %971 = dma.hbm_to_vmem [thread:$0]  %s967_s20, 16, %s969_s24, [#allocation7] }
 0x2a0   :  { %s2743_s11 = sld [smem:[#allocation9 + $0x35]]  ;;  %s4377_s21 = sshra.s32 %s984_s9, 4  ;;  %s4378_s21 = int_to_ptr.hbm [resolvable:$true] %s4377_s21 }
 0x2a1   :  { %s4379_s13 = scalar_lea.hbm %s4378_s21, 1  ;;  %p4382_p9 = scmp.lt.s32.totalorder %s4378_s21, %s5852_s1 }
 0x2a2   :  { %p4380_p8 = scmp.ne.s32.totalorder %s4378_s21, %s4379_s13  ;;  %p4383_p10 = scmp.lt.s32.totalorder %s4914_s23, %s4379_s13 }
 0x2a4   :  { %p4384_p11 = por %p4383_p10, %p4382_p9 }
 0x2a6   :  { %p4385_p12 = pnand %p4384_p11, %p4380_p8 }
 0x2a8   :  { %4388 = shalt.err (!%p4385_p12)  }
 0x2a9   :  { %988 = dma.hbm_to_vmem [thread:$0]  %s984_s9, 16, %s986_s27, [#allocation7] }
 0x2aa   :  { %s2744_s19 = sld [smem:[#allocation9 + $0x36]]  ;;  %s4808_s0 = smov [#allocation2 + $0x35]  }
 0x2ab   :  { %s1002_s15 = sshll.u32 %s4808_s0, 4  ;;  %s4809_s24 = smov [#allocation2 + $0x36]   ;;  %s1003_s15 = int_to_ptr.vmem [resolvable:$true] %s1002_s15 }
 0x2ac   :  { %s5445_s12 = sshll.u32 %s4809_s24, 4  ;;  %s5448_s26 = sld [smem:[#allocation9 + $0x37]]  ;;  %s1020_s12 = int_to_ptr.vmem [resolvable:$true] %s5445_s12 }
 0x2ad   :  { %s991_s2 = scalar_lea.hbm %s5852_s1, %s2743_s11  ;;  %s4810_s10 = smov [#allocation2 + $0x37]  }
 0x2ae   :  { %s1000_s20 = sshll.u32 %s991_s2, 4  ;;  %s5453_s3 = sshll.u32 %s4810_s10, 4  ;;  %s1001_s20 = int_to_ptr.hbm [resolvable:$true] %s1000_s20  ;;  %s1037_s3 = int_to_ptr.vmem [resolvable:$true] %s5453_s3 }
 0x2af   :  { %s4401_s17 = sshra.s32 %s1001_s20, 4  ;;  %s4402_s17 = int_to_ptr.hbm [resolvable:$true] %s4401_s17 }
 0x2b0   :  { %s1008_s9 = scalar_lea.hbm %s5852_s1, %s2744_s19  ;;  %s4403_s4 = scalar_lea.hbm %s4402_s17, 1 }
 0x2b1   :  { %p4404_p13 = scmp.ne.s32.totalorder %s4402_s17, %s4403_s4  ;;  %p4406_p0 = scmp.lt.s32.totalorder %s4402_s17, %s5852_s1 }
 0x2b2   :  { %p4407_p1 = scmp.lt.s32.totalorder %s4914_s23, %s4403_s4 }
 0x2b4   :  { %p4408_p2 = por %p4407_p1, %p4406_p0 }
 0x2b6   :  { %p4409_p3 = pnand %p4408_p2, %p4404_p13 }
 0x2b8   :  { %4412 = shalt.err (!%p4409_p3)  }
 0x2b9   :  { %1005 = dma.hbm_to_vmem [thread:$0]  %s1001_s20, 16, %s1003_s15, [#allocation7] }
 0x2ba   :  { %s1017_s11 = sshll.u32 %s1008_s9, 4  ;;  %s1025_s14 = scalar_lea.hbm %s5852_s1, %s5448_s26  ;;  %s1018_s11 = int_to_ptr.hbm [resolvable:$true] %s1017_s11 }
 0x2bb   :  { %s4425_s25 = sshra.s32 %s1018_s11, 4  ;;  %s4426_s25 = int_to_ptr.hbm [resolvable:$true] %s4425_s25 }
 0x2bc   :  { %s4427_s19 = scalar_lea.hbm %s4426_s25, 1  ;;  %p4430_p5 = scmp.lt.s32.totalorder %s4426_s25, %s5852_s1 }
 0x2bd   :  { %p4428_p4 = scmp.ne.s32.totalorder %s4426_s25, %s4427_s19  ;;  %p4431_p6 = scmp.lt.s32.totalorder %s4914_s23, %s4427_s19 }
 0x2bf   :  { %p4432_p7 = por %p4431_p6, %p4430_p5 }
 0x2c1   :  { %p4433_p8 = pnand %p4432_p7, %p4428_p4 }
 0x2c3   :  { %4436 = shalt.err (!%p4433_p8)  }
 0x2c4   :  { %1022 = dma.hbm_to_vmem [thread:$0]  %s1018_s11, 16, %s1020_s12, [#allocation7] }
 0x2c5   :  { %s1034_s15 = sshll.u32 %s1025_s14, 4  ;;  %s2746_s18 = sld [smem:[#allocation9 + $0x38]]  ;;  %s1035_s15 = int_to_ptr.hbm [resolvable:$true] %s1034_s15 }
 0x2c6   :  { %s4449_s26 = sshra.s32 %s1035_s15, 4  ;;  %s4450_s26 = int_to_ptr.hbm [resolvable:$true] %s4449_s26 }
 0x2c7   :  { %s4451_s29 = scalar_lea.hbm %s4450_s26, 1  ;;  %p4454_p10 = scmp.lt.s32.totalorder %s4450_s26, %s5852_s1 }
 0x2c8   :  { %p4452_p9 = scmp.ne.s32.totalorder %s4450_s26, %s4451_s29  ;;  %p4455_p11 = scmp.lt.s32.totalorder %s4914_s23, %s4451_s29 }
 0x2ca   :  { %p4456_p12 = por %p4455_p11, %p4454_p10 }
 0x2cc   :  { %p4457_p13 = pnand %p4456_p12, %p4452_p9 }
 0x2ce   :  { %4460 = shalt.err (!%p4457_p13)  }
 0x2cf   :  { %1039 = dma.hbm_to_vmem [thread:$0]  %s1035_s15, 16, %s1037_s3, [#allocation7]  ;;  %vm84_vm0 = vcmask 261120   ;;  %v4813_v0 = vmov 0.0  }
 0x2d0   :  { %s4811_s10 = smov [#allocation2 + $0x38]   ;;  %s5477_s30 = sld [smem:[#allocation9 + $0x39]]  ;;  %85 = vst.msk [vmem:[#allocation5] sm:$0xff] %vm84_vm0, %v4813_v0 }
 0x2d1   :  { %s1053_s27 = sshll.u32 %s4811_s10, 4  ;;  %s4812_s12 = smov [#allocation2 + $0x39]   ;;  %86 = vst.msk [vmem:[#allocation5 + $0x8] sm:$0xff] %vm84_vm0, %v4813_v0  ;;  %s1054_s27 = int_to_ptr.vmem [resolvable:$true] %s1053_s27 }
 0x2d2   :  { %s5479_s9 = sshll.u32 %s4812_s12, 4  ;;  %s2748_s17 = sld [smem:[#allocation9 + $0x3a]]  ;;  %87 = vst.msk [vmem:[#allocation6] sm:$0xff] %vm84_vm0, %v4813_v0  ;;  %s1071_s9 = int_to_ptr.vmem [resolvable:$true] %s5479_s9 }
 0x2d3   :  { %s1042_s22 = scalar_lea.hbm %s5852_s1, %s2746_s18  ;;  %s4814_s11 = smov [#allocation2 + $0x3a]   ;;  %88 = vst.msk [vmem:[#allocation6 + $0x8] sm:$0xff] %vm84_vm0, %v4813_v0 }
 0x2d4   :  { %s1051_s3 = sshll.u32 %s1042_s22, 4  ;;  %s5488_s21 = sshll.u32 %s4814_s11, 4  ;;  %s1052_s3 = int_to_ptr.hbm [resolvable:$true] %s1051_s3  ;;  %s1088_s21 = int_to_ptr.vmem [resolvable:$true] %s5488_s21 }
 0x2d5   :  { %s4473_s13 = sshra.s32 %s1052_s3, 4  ;;  %s4474_s13 = int_to_ptr.hbm [resolvable:$true] %s4473_s13 }
 0x2d6   :  { %s4475_s14 = scalar_lea.hbm %s4474_s13, 1  ;;  %p4478_p1 = scmp.lt.s32.totalorder %s4474_s13, %s5852_s1 }
 0x2d7   :  { %p4476_p0 = scmp.ne.s32.totalorder %s4474_s13, %s4475_s14  ;;  %p4479_p2 = scmp.lt.s32.totalorder %s4914_s23, %s4475_s14 }
 0x2d9   :  { %p4480_p3 = por %p4479_p2, %p4478_p1 }
 0x2db   :  { %p4481_p4 = pnand %p4480_p3, %p4476_p0 }
 0x2dd   :  { %4484 = shalt.err (!%p4481_p4)  }
 0x2de   :  { %1056 = dma.hbm_to_vmem [thread:$0]  %s1052_s3, 16, %s1054_s27, [#allocation7] }
 0x2df   :  { %s1059_s15 = scalar_lea.hbm %s5852_s1, %s5477_s30  ;;  %s1076_s2 = scalar_lea.hbm %s5852_s1, %s2748_s17 }
 0x2e0   :  { %s1068_s18 = sshll.u32 %s1059_s15, 4  ;;  %s1085_s20 = sshll.u32 %s1076_s2, 4  ;;  %s1069_s18 = int_to_ptr.hbm [resolvable:$true] %s1068_s18  ;;  %s1086_s20 = int_to_ptr.hbm [resolvable:$true] %s1085_s20 }
 0x2e1   :  { %s4497_s10 = sshra.s32 %s1069_s18, 4  ;;  %s4498_s10 = int_to_ptr.hbm [resolvable:$true] %s4497_s10 }
 0x2e2   :  { %s4499_s12 = scalar_lea.hbm %s4498_s10, 1  ;;  %p4502_p6 = scmp.lt.s32.totalorder %s4498_s10, %s5852_s1 }
 0x2e3   :  { %p4500_p5 = scmp.ne.s32.totalorder %s4498_s10, %s4499_s12  ;;  %p4503_p7 = scmp.lt.s32.totalorder %s4914_s23, %s4499_s12 }
 0x2e5   :  { %p4504_p8 = por %p4503_p7, %p4502_p6 }
 0x2e7   :  { %p4505_p9 = pnand %p4504_p8, %p4500_p5 }
 0x2e9   :  { %4508 = shalt.err (!%p4505_p9)  }
 0x2ea   :  { %1073 = dma.hbm_to_vmem [thread:$0]  %s1069_s18, 16, %s1071_s9, [#allocation7] }
 0x2eb   :  { %s2749_s30 = sld [smem:[#allocation9 + $0x3b]]  ;;  %s4521_s17 = sshra.s32 %s1086_s20, 4  ;;  %s4522_s17 = int_to_ptr.hbm [resolvable:$true] %s4521_s17 }
 0x2ec   :  { %s4523_s28 = scalar_lea.hbm %s4522_s17, 1  ;;  %p4526_p11 = scmp.lt.s32.totalorder %s4522_s17, %s5852_s1 }
 0x2ed   :  { %p4524_p10 = scmp.ne.s32.totalorder %s4522_s17, %s4523_s28  ;;  %p4527_p12 = scmp.lt.s32.totalorder %s4914_s23, %s4523_s28 }
 0x2ef   :  { %p4528_p13 = por %p4527_p12, %p4526_p11 }
 0x2f1   :  { %p4529_p0 = pnand %p4528_p13, %p4524_p10 }
 0x2f3   :  { %4532 = shalt.err (!%p4529_p0)  }
 0x2f4   :  { %1090 = dma.hbm_to_vmem [thread:$0]  %s1086_s20, 16, %s1088_s21, [#allocation7] }
 0x2f5   :  { %s2750_s11 = sld [smem:[#allocation9 + $0x3c]]  ;;  %s4815_s13 = smov [#allocation2 + $0x3b]  }
 0x2f6   :  { %s1104_s14 = sshll.u32 %s4815_s13, 4  ;;  %s4816_s9 = smov [#allocation2 + $0x3c]   ;;  %s1105_s14 = int_to_ptr.vmem [resolvable:$true] %s1104_s14 }
 0x2f7   :  { %s5513_s25 = sshll.u32 %s4816_s9, 4  ;;  %s5516_s19 = sld [smem:[#allocation9 + $0x3d]]  ;;  %s1122_s25 = int_to_ptr.vmem [resolvable:$true] %s5513_s25 }
 0x2f8   :  { %s1093_s15 = scalar_lea.hbm %s5852_s1, %s2749_s30  ;;  %s4817_s26 = smov [#allocation2 + $0x3d]  }
 0x2f9   :  { %s1102_s18 = sshll.u32 %s1093_s15, 4  ;;  %s5521_s29 = sshll.u32 %s4817_s26, 4  ;;  %s1103_s18 = int_to_ptr.hbm [resolvable:$true] %s1102_s18  ;;  %s1139_s29 = int_to_ptr.vmem [resolvable:$true] %s5521_s29 }
 0x2fa   :  { %s4545_s10 = sshra.s32 %s1103_s18, 4  ;;  %s4546_s10 = int_to_ptr.hbm [resolvable:$true] %s4545_s10 }
 0x2fb   :  { %s1110_s20 = scalar_lea.hbm %s5852_s1, %s2750_s11  ;;  %s4547_s12 = scalar_lea.hbm %s4546_s10, 1 }
 0x2fc   :  { %p4548_p1 = scmp.ne.s32.totalorder %s4546_s10, %s4547_s12  ;;  %p4550_p2 = scmp.lt.s32.totalorder %s4546_s10, %s5852_s1 }
 0x2fd   :  { %p4551_p3 = scmp.lt.s32.totalorder %s4914_s23, %s4547_s12 }
 0x2ff   :  { %p4552_p4 = por %p4551_p3, %p4550_p2 }
 0x301   :  { %p4553_p5 = pnand %p4552_p4, %p4548_p1 }
 0x303   :  { %4556 = shalt.err (!%p4553_p5)  }
 0x304   :  { %1107 = dma.hbm_to_vmem [thread:$0]  %s1103_s18, 16, %s1105_s14, [#allocation7] }
 0x305   :  { %s1119_s30 = sshll.u32 %s1110_s20, 4  ;;  %s1127_s22 = scalar_lea.hbm %s5852_s1, %s5516_s19  ;;  %s1120_s30 = int_to_ptr.hbm [resolvable:$true] %s1119_s30 }
 0x306   :  { %s4569_s3 = sshra.s32 %s1120_s30, 4  ;;  %s4570_s3 = int_to_ptr.hbm [resolvable:$true] %s4569_s3 }
 0x307   :  { %s4571_s11 = scalar_lea.hbm %s4570_s3, 1  ;;  %p4574_p7 = scmp.lt.s32.totalorder %s4570_s3, %s5852_s1 }
 0x308   :  { %p4572_p6 = scmp.ne.s32.totalorder %s4570_s3, %s4571_s11  ;;  %p4575_p8 = scmp.lt.s32.totalorder %s4914_s23, %s4571_s11 }
 0x30a   :  { %p4576_p9 = por %p4575_p8, %p4574_p7 }
 0x30c   :  { %p4577_p10 = pnand %p4576_p9, %p4572_p6 }
 0x30e   :  { %4580 = shalt.err (!%p4577_p10)  }
 0x30f   :  { %1124 = dma.hbm_to_vmem [thread:$0]  %s1120_s30, 16, %s1122_s25, [#allocation7] }
 0x310   :  { %s1136_s14 = sshll.u32 %s1127_s22, 4  ;;  %s2752_s0 = sld [smem:[#allocation9 + $0x3e]]  ;;  %s1137_s14 = int_to_ptr.hbm [resolvable:$true] %s1136_s14 }
 0x311   :  { %s4593_s19 = sshra.s32 %s1137_s14, 4  ;;  %s4594_s19 = int_to_ptr.hbm [resolvable:$true] %s4593_s19 }
 0x312   :  { %s4595_s24 = scalar_lea.hbm %s4594_s19, 1  ;;  %p4598_p12 = scmp.lt.s32.totalorder %s4594_s19, %s5852_s1 }
 0x313   :  { %p4596_p11 = scmp.ne.s32.totalorder %s4594_s19, %s4595_s24  ;;  %p4599_p13 = scmp.lt.s32.totalorder %s4914_s23, %s4595_s24 }
 0x315   :  { %p4600_p0 = por %p4599_p13, %p4598_p12 }
 0x317   :  { %p4601_p1 = pnand %p4600_p0, %p4596_p11 }
 0x319   :  { %4604 = shalt.err (!%p4601_p1)  }
 0x31a   :  { %1141 = dma.hbm_to_vmem [thread:$0]  %s1137_s14, 16, %s1139_s29, [#allocation7] }
 0x31b   :  { %s4818_s26 = smov [#allocation2 + $0x3e]   ;;  %s2753_s25 = sld [smem:[#allocation9 + $0x3f]] }
 0x31c   :  { %s1155_s21 = sshll.u32 %s4818_s26, 4  ;;  %s1144_s10 = scalar_lea.hbm %s5852_s1, %s2752_s0  ;;  %s1156_s21 = int_to_ptr.vmem [resolvable:$true] %s1155_s21 }
 0x31d   :  { %s1153_s12 = sshll.u32 %s1144_s10, 4  ;;  %s4819_s27 = smov [#allocation2 + $0x3f]   ;;  %s1154_s12 = int_to_ptr.hbm [resolvable:$true] %s1153_s12 }
 0x31e   :  { %s1172_s4 = sshll.u32 %s4819_s27, 4  ;;  %s4617_s30 = sshra.s32 %s1154_s12, 4  ;;  %s4618_s30 = int_to_ptr.hbm [resolvable:$true] %s4617_s30  ;;  %s1173_s4 = int_to_ptr.vmem [resolvable:$true] %s1172_s4 }
 0x31f   :  { %s4619_s17 = scalar_lea.hbm %s4618_s30, 1  ;;  %p4622_p3 = scmp.lt.s32.totalorder %s4618_s30, %s5852_s1 }
 0x320   :  { %p4620_p2 = scmp.ne.s32.totalorder %s4618_s30, %s4619_s17  ;;  %p4623_p4 = scmp.lt.s32.totalorder %s4914_s23, %s4619_s17 }
 0x322   :  { %p4624_p5 = por %p4623_p4, %p4622_p3 }
 0x324   :  { %p4625_p6 = pnand %p4624_p5, %p4620_p2 }
 0x326   :  { %4628 = shalt.err (!%p4625_p6)  }
 0x327   :  { %1158 = dma.hbm_to_vmem [thread:$0]  %s1154_s12, 16, %s1156_s21, [#allocation7] }
 0x328   :  { %s1161_s11 = scalar_lea.hbm %s5852_s1, %s2753_s25 }
 0x329   :  { %s1170_s13 = sshll.u32 %s1161_s11, 4  ;;  %s1171_s13 = int_to_ptr.hbm [resolvable:$true] %s1170_s13 }
 0x32a   :  { %s4641_s9 = sshra.s32 %s1171_s13, 4  ;;  %s4642_s9 = int_to_ptr.hbm [resolvable:$true] %s4641_s9 }
 0x32b   :  { %s4643_s14 = scalar_lea.hbm %s4642_s9, 1  ;;  %p4646_p8 = scmp.lt.s32.totalorder %s4642_s9, %s5852_s1 }
 0x32c   :  { %p4644_p7 = scmp.ne.s32.totalorder %s4642_s9, %s4643_s14  ;;  %p4647_p9 = scmp.lt.s32.totalorder %s4914_s23, %s4643_s14 }
 0x32e   :  { %p4648_p10 = por %p4647_p9, %p4646_p8 }
 0x330   :  { %p4649_p11 = pnand %p4648_p10, %p4644_p7 }
 0x332   :  { %4652 = shalt.err (!%p4649_p11)  }
 0x333   :  { %1175 = dma.hbm_to_vmem [thread:$0]  %s1171_s13, 16, %s1173_s4, [#allocation7] }
 0x334   :  { %4743 = dma.done.wait [#allocation7], 1024 }
 0x335   :  { %4744 = vsyncadd [#allocation7], 4294966272  ;;  %v2829_v1 = vld [vmem:[#allocation10 + $0x8] sm:$0xff]  ;;  %v2828_v3 = vld [vmem:[#allocation10] sm:$0xff]  ;;  %s4820_s24 = smov 32   ;;  %s2572_s10 = sshll.u32 %s5857_s6, 4  ;;  %s2573_s10 = int_to_ptr.hbm [resolvable:$true] %s2572_s10 }
 0x336   :  { %v5559_v2 = vld [vmem:[#allocation15 + $0x8] sm:$0xff]  ;;  %v5561_v4 = vld [vmem:[#allocation15] sm:$0xff]  ;;  %1356 = vmatpush.bf16.msra.mxu0 %v2829_v1  ;;  %v5582_v10 = vld [vmem:[%s5856_s5] ss:$0 sm:$0xff]  ;;  %s4823_s12 = smov [#allocation17]   ;;  %s2585_s17 = sshll.u32 %s5858_s7, 4  ;;  %s2586_s17 = int_to_ptr.hbm [resolvable:$true] %s2585_s17 }
 0x337   :  { %v1305_v5 = vld [vmem:[#allocation2] sm:$0xff]  ;;  %1423 = vmatpush.bf16.msra.mxu1 %v5559_v2  ;;  %v1306_v6 = vld [vmem:[#allocation2 + $0x8] sm:$0xff]  ;;  %1491 = vmatpush.bf16.msra.mxu2 %v5559_v2  ;;  %v1399_v17 = vld [vmem:[#allocation6] sm:$0xff]  ;;  %s2583_s27 = sshll.u32 %s4823_s12, 4  ;;  %s4824_s28 = smov 128   ;;  %s2584_s27 = int_to_ptr.vmem [resolvable:$true] %s2583_s27 }
 0x338   :  { %v1398_v7 = vld [vmem:[#allocation5] sm:$0xff]  ;;  %1555 = vmatpush.bf16.msra.mxu3 %v5559_v2  ;;  %v1317_v8 = vpack.c.bf16 %v1306_v6, %v1305_v5  ;;  %s4825_s22 = smov 8   ;;  %s4826_s6 = smov [#allocation19]  }
 0x339   :  { %v1401_v9 = vpack.c.bf16 %v1398_v7, %v1398_v7  ;;  %s2596_s29 = sshll.u32 %s4826_s6, 4  ;;  %s2598_s7 = sshll.u32 %s5859_s8, 4  ;;  %s2597_s29 = int_to_ptr.vmem [resolvable:$true] %s2596_s29  ;;  %s2599_s7 = int_to_ptr.hbm [resolvable:$true] %s2598_s7 }
 0x33a   :  { %1357 = vmatpush.bf16.msra.mxu0 %v2828_v3  ;;  %v1307_v3 = vld [vmem:[#allocation2 + $0x10] sm:$0xff] }
 0x33b   :  { %1424 = vmatpush.bf16.msra.mxu1 %v5561_v4  ;;  %1492 = vmatpush.bf16.msra.mxu2 %v5561_v4 }
 0x33c   :  { %1556 = vmatpush.bf16.msra.mxu3 %v5561_v4 }
 0x33d   :  { %2762 = vmatmul.msk.bf16.vlgmr.msra.gmra.mxu0 %vm84_vm0, %v1317_v8 }
 0x33e   :  { %2774 = vmatmul.msk.bf16.vlgmr.msra.gmra.mxu1 %vm84_vm0, %v1401_v9 }
 0x33f   :  { %1619 = vmatpush.bf16.msrb.mxu1 %v5559_v2  ;;  %1683 = vmatpush.bf16.msrb.mxu2 %v5559_v2 }
 0x340   :  { %1747 = vmatpush.bf16.msrb.mxu3 %v5559_v2 }
 0x343   :  { %1620 = vmatpush.bf16.msrb.mxu1 %v5561_v4  ;;  %1684 = vmatpush.bf16.msrb.mxu2 %v5561_v4 }
 0x344   :  { %1748 = vmatpush.bf16.msrb.mxu3 %v5561_v4 }
 0x347   :  { %1811 = vmatpush.bf16.msra.mxu1 %v5559_v2 }
 0x34b   :  { %1812 = vmatpush.bf16.msra.mxu1 %v5561_v4 }
 0x3ba   :  { %v1359_v11 = vpop.f32.mrf.mxu0 }
 0x3bb   :  { %v1426_v12 = vpop.f32.mrf.mxu1  ;;  %v1360_v13 = vadd.f32 %v5582_v10, %v1359_v11 }
 0x3bd   :  { %v1430_v14 = vadd.f32 %v1426_v12, %v1360_v13 }
 0x3bf   :  { %2916 = vtanh.f32 %v1430_v14  ;;  %v2775_v18 = vmul.f32 -1.442695, %v1430_v14 }
 0x3c1   :  { %2918 = vpow2.f32 %v2775_v18 }
 0x3c2   :  { %v1361_v42 = vpop.f32.mrf.mxu0 }
 0x3c3   :  { %v1428_v15 = vpop.f32.mrf.mxu1  ;;  %v1362_v43 = vadd.f32 %v5582_v10, %v1361_v42 }
 0x3c5   :  { %v2917_v16 = vpop.eup %2916 }
 0x3c6   :  { %1457 = vrot.lane.b32.xlu0 %v2917_v16, %s4751_s16 }
 0x3c7   :  { %v2919_v19 = vpop.eup %2918 }
 0x3c8   :  { %v1434_v20 = vadd.f32 1.0, %v2919_v19 }
 0x3ca   :  { %2920 = vrcp.f32 %v1434_v20  ;;  %v1446_v26 = vand.u32 2147483648, %v1434_v20  ;;  %vm1440_vm2 = vweird.f32 %v1434_v20  ;;  %v1444_v27 = vand.u32 2147483647, %v1434_v20 }
 0x3cc   :  { %v1447_v29 = vor.u32 1.1754944e-38, %v1446_v26  ;;  %vm1445_vm4 = vcmp.eq.f32.partialorder %v1444_v27, 8.507059e+37 }
 0x3ce   :  { %1452 = vrot.lane.b32.xlu0 %v1399_v17, %s4820_s24 }
 0x3d0   :  { %v2921_v21 = vpop.eup %2920 }
 0x3d1   :  { %v1436_v22 = vmul.f32 %v2921_v21, %v1434_v20  ;;  %vm1441_vm1 = vweird.f32 %v2921_v21 }
 0x3d2   :  { %vm1442_vm3 = vmor %vm1440_vm2, %vm1441_vm1 }
 0x3d3   :  { %v1437_v23 = vsub.f32 1.0, %v1436_v22 }
 0x3d5   :  { %v1438_v24 = vmul.f32 %v2921_v21, %v1437_v23 }
 0x3d7   :  { %v1439_v25 = vadd.f32 %v2921_v21, %v1438_v24 }
 0x3d9   :  { %v1443_v28 = vsel %vm1442_vm3, %v2921_v21, %v1439_v25 }
 0x3da   :  { %v1448_v31 = vsel %vm1445_vm4, %v1447_v29, %v1443_v28 }
 0x438   :  { %v1458_v30 = vpop.permute.xlu0 %1457 }
 0x439   :  { %v1460_v32 = vmul.f32 %v1458_v30, %v1448_v31 }
 0x43b   :  { %1462 = vrot.lane.b32.xlu1 %v1460_v32, %s4820_s24 }
 0x440   :  { %v1453_v33 = vpop.permute.xlu0 %1452 }
 0x441   :  { %v1455_v34 = vmul.f32 %v1453_v33, %v1448_v31 }
 0x4ad   :  { %v1463_v35 = vpop.permute.xlu1 %1462 }
 0x4ae   :  { %v1465_v36 = vadd.f32 %v1463_v35, %v1455_v34 }
 0x4b0   :  { %2922 = vtanh.f32 %v1465_v36 }
 0x4b6   :  { %v2923_v37 = vpop.eup %2922 }
 0x4b7   :  { %1468 = vrot.lane.b32.xlu1 %v2923_v37, %s4751_s16 }
 0x529   :  { %v1469_v38 = vpop.permute.xlu1 %1468 }
 0x52a   :  { %v5589_v39 = vmul.f32 %v1469_v38, %v1448_v31 }
 0x52c   :  { %v1478_v40 = vpack.c.bf16 %v5589_v39, %v5589_v39 }
 0x52e   :  { %1480 = vrot.lane.b32.xlu2 %v1478_v40, %s4820_s24 }
 0x588   :  { %v1481_v41 = vpop.permute.xlu2 %1480 }
 0x589   :  { %2776 = vmatmul.msk.bf16.vlgmr.msra.gmra.mxu2 %vm84_vm0, %v1481_v41 }
 0x58a   :  { %1875 = vmatpush.bf16.msra.mxu2 %v5559_v2 }
 0x58e   :  { %1876 = vmatpush.bf16.msra.mxu2 %v5561_v4  ;;  %v1308_v4 = vld [vmem:[#allocation2 + $0x18] sm:$0xff] }
 0x58f   :  { %v1318_v5 = vpack.c.bf16 %v1308_v4, %v1307_v3  ;;  %v1310_v3 = vld [vmem:[#allocation2 + $0x28] sm:$0xff] }
 0x591   :  { %2763 = vmatmul.msk.bf16.gmra.mxu0 %vm84_vm0, %v1318_v5 }
 0x60c   :  { %v1494_v44 = vpop.f32.mrf.mxu2 }
 0x60d   :  { %v1498_v45 = vadd.f32 %v1494_v44, %v1362_v43 }
 0x60e   :  { %v1364_v11 = vpop.f32.mrf.mxu0 }
 0x60f   :  { %2924 = vtanh.f32 %v1498_v45  ;;  %v2777_v48 = vmul.f32 -1.442695, %v1498_v45  ;;  %v1365_v12 = vadd.f32 %v5582_v10, %v1364_v11 }
 0x611   :  { %2926 = vpow2.f32 %v2777_v48 }
 0x614   :  { %v1496_v46 = vpop.f32.mrf.mxu2 }
 0x615   :  { %v2925_v47 = vpop.eup %2924 }
 0x616   :  { %1521 = vrot.lane.b32.xlu2 %v2925_v47, %s4751_s16  ;;  %v1366_v41 = vpop.f32.mrf.mxu0 }
 0x617   :  { %v2927_v49 = vpop.eup %2926  ;;  %v1367_v42 = vadd.f32 %v5582_v10, %v1366_v41 }
 0x618   :  { %v1502_v50 = vadd.f32 1.0, %v2927_v49 }
 0x61a   :  { %2928 = vrcp.f32 %v1502_v50  ;;  %v1514_v56 = vand.u32 2147483648, %v1502_v50  ;;  %vm1508_vm6 = vweird.f32 %v1502_v50  ;;  %v1512_v57 = vand.u32 2147483647, %v1502_v50 }
 0x61c   :  { %v1515_v59 = vor.u32 1.1754944e-38, %v1514_v56  ;;  %vm1513_vm8 = vcmp.eq.f32.partialorder %v1512_v57, 8.507059e+37 }
 0x620   :  { %v2929_v51 = vpop.eup %2928 }
 0x621   :  { %v1504_v52 = vmul.f32 %v2929_v51, %v1502_v50  ;;  %vm1509_vm5 = vweird.f32 %v2929_v51 }
 0x622   :  { %vm1510_vm7 = vmor %vm1508_vm6, %vm1509_vm5 }
 0x623   :  { %v1505_v53 = vsub.f32 1.0, %v1504_v52 }
 0x625   :  { %v1506_v54 = vmul.f32 %v2929_v51, %v1505_v53 }
 0x627   :  { %v1507_v55 = vadd.f32 %v2929_v51, %v1506_v54 }
 0x629   :  { %v1511_v58 = vsel %vm1510_vm7, %v2929_v51, %v1507_v55 }
 0x62a   :  { %v1516_v61 = vsel %vm1513_vm8, %v1515_v59, %v1511_v58 }
 0x62b   :  { %v1519_v63 = vmul.f32 %v1516_v61, %v1465_v36 }
 0x670   :  { %v1522_v60 = vpop.permute.xlu2 %1521 }
 0x671   :  { %v1524_v62 = vmul.f32 %v1522_v60, %v1516_v61 }
 0x673   :  { %1526 = vrot.lane.b32.xlu0 %v1524_v62, %s4820_s24 }
 0x6e5   :  { %v1527_v0 = vpop.permute.xlu0 %1526 }
 0x6e6   :  { %v1529_v1 = vadd.f32 %v1527_v0, %v1519_v63 }
 0x6e8   :  { %2930 = vtanh.f32 %v1529_v1 }
 0x6ee   :  { %v2931_v2 = vpop.eup %2930 }
 0x6ef   :  { %1532 = vrot.lane.b32.xlu1 %v2931_v2, %s4751_s16  ;;  %v1309_v2 = vld [vmem:[#allocation2 + $0x20] sm:$0xff] }
 0x6f0   :  { %v1319_v4 = vpack.c.bf16 %v1310_v3, %v1309_v2 }
 0x6f2   :  { %2764 = vmatmul.msk.bf16.gmra.mxu0 %vm84_vm0, %v1319_v4 }
 0x761   :  { %v1533_v6 = vpop.permute.xlu1 %1532 }
 0x762   :  { %v5602_v7 = vmul.f32 %v1533_v6, %v1516_v61 }
 0x764   :  { %v1542_v8 = vpack.c.bf16 %v5602_v7, %v5602_v7 }
 0x766   :  { %1544 = vrot.lane.b32.xlu2 %v1542_v8, %s4820_s24 }
 0x76f   :  { %v1369_v11 = vpop.f32.mrf.mxu0 }
 0x7c0   :  { %v1545_v9 = vpop.permute.xlu2 %1544 }
 0x7c1   :  { %2778 = vmatmul.msk.bf16.vlgmr.msra.gmra.mxu3 %vm84_vm0, %v1545_v9 }
 0x844   :  { %v1558_v13 = vpop.f32.mrf.mxu3 }
 0x845   :  { %v1562_v14 = vadd.f32 %v1558_v13, %v1365_v12  ;;  %v1370_v12 = vadd.f32 %v5582_v10, %v1369_v11 }
 0x847   :  { %2932 = vtanh.f32 %v1562_v14  ;;  %v2779_v17 = vmul.f32 -1.442695, %v1562_v14 }
 0x849   :  { %2934 = vpow2.f32 %v2779_v17 }
 0x84c   :  { %v1560_v15 = vpop.f32.mrf.mxu3 }
 0x84d   :  { %v2933_v16 = vpop.eup %2932 }
 0x84e   :  { %1585 = vrot.lane.b32.xlu0 %v2933_v16, %s4751_s16 }
 0x84f   :  { %v2935_v18 = vpop.eup %2934 }
 0x850   :  { %v1566_v19 = vadd.f32 1.0, %v2935_v18 }
 0x852   :  { %2936 = vrcp.f32 %v1566_v19  ;;  %v1578_v25 = vand.u32 2147483648, %v1566_v19  ;;  %vm1572_vm10 = vweird.f32 %v1566_v19  ;;  %v1576_v26 = vand.u32 2147483647, %v1566_v19 }
 0x854   :  { %v1579_v28 = vor.u32 1.1754944e-38, %v1578_v25  ;;  %vm1577_vm12 = vcmp.eq.f32.partialorder %v1576_v26, 8.507059e+37 }
 0x858   :  { %v2937_v20 = vpop.eup %2936 }
 0x859   :  { %v1568_v21 = vmul.f32 %v2937_v20, %v1566_v19  ;;  %vm1573_vm9 = vweird.f32 %v2937_v20 }
 0x85a   :  { %vm1574_vm11 = vmor %vm1572_vm10, %vm1573_vm9 }
 0x85b   :  { %v1569_v22 = vsub.f32 1.0, %v1568_v21 }
 0x85d   :  { %v1570_v23 = vmul.f32 %v2937_v20, %v1569_v22 }
 0x85f   :  { %v1571_v24 = vadd.f32 %v2937_v20, %v1570_v23 }
 0x861   :  { %v1575_v27 = vsel %vm1574_vm11, %v2937_v20, %v1571_v24 }
 0x862   :  { %v1580_v30 = vsel %vm1577_vm12, %v1579_v28, %v1575_v27 }
 0x863   :  { %v1583_v32 = vmul.f32 %v1580_v30, %v1529_v1 }
 0x8c0   :  { %v1586_v29 = vpop.permute.xlu0 %1585 }
 0x8c1   :  { %v1588_v31 = vmul.f32 %v1586_v29, %v1580_v30 }
 0x8c3   :  { %1590 = vrot.lane.b32.xlu1 %v1588_v31, %s4820_s24 }
 0x935   :  { %v1591_v33 = vpop.permute.xlu1 %1590 }
 0x936   :  { %v1593_v34 = vadd.f32 %v1591_v33, %v1583_v32 }
 0x938   :  { %2938 = vtanh.f32 %v1593_v34 }
 0x93e   :  { %v2939_v35 = vpop.eup %2938 }
 0x93f   :  { %1596 = vrot.lane.b32.xlu2 %v2939_v35, %s4751_s16 }
 0x999   :  { %v1597_v36 = vpop.permute.xlu2 %1596 }
 0x99a   :  { %v5612_v37 = vmul.f32 %v1597_v36, %v1580_v30 }
 0x99c   :  { %v1606_v38 = vpack.c.bf16 %v5612_v37, %v5612_v37 }
 0x99e   :  { %1608 = vrot.lane.b32.xlu0 %v1606_v38, %s4820_s24 }
 0xa10   :  { %v1609_v40 = vpop.permute.xlu0 %1608 }
 0xa11   :  { %2780 = vmatmul.msk.bf16.vlgmr.msrb.gmra.mxu1 %vm84_vm0, %v1609_v40 }
 0xa8e   :  { %v1622_v43 = vpop.f32.mrf.mxu1 }
 0xa8f   :  { %v1626_v44 = vadd.f32 %v1622_v43, %v1367_v42  ;;  %v1371_v42 = vpop.f32.mrf.mxu0 }
 0xa90   :  { %v1372_v43 = vadd.f32 %v5582_v10, %v1371_v42 }
 0xa91   :  { %2940 = vtanh.f32 %v1626_v44  ;;  %v2781_v47 = vmul.f32 -1.442695, %v1626_v44 }
 0xa93   :  { %2942 = vpow2.f32 %v2781_v47 }
 0xa96   :  { %v1624_v45 = vpop.f32.mrf.mxu1 }
 0xa97   :  { %v2941_v46 = vpop.eup %2940 }
 0xa98   :  { %1649 = vrot.lane.b32.xlu1 %v2941_v46, %s4751_s16 }
 0xa99   :  { %v2943_v48 = vpop.eup %2942 }
 0xa9a   :  { %v1630_v49 = vadd.f32 1.0, %v2943_v48 }
 0xa9c   :  { %2944 = vrcp.f32 %v1630_v49  ;;  %v1642_v55 = vand.u32 2147483648, %v1630_v49  ;;  %vm1636_vm14 = vweird.f32 %v1630_v49  ;;  %v1640_v56 = vand.u32 2147483647, %v1630_v49 }
 0xa9e   :  { %v1643_v58 = vor.u32 1.1754944e-38, %v1642_v55  ;;  %vm1641_vm1 = vcmp.eq.f32.partialorder %v1640_v56, 8.507059e+37 }
 0xaa2   :  { %v2945_v50 = vpop.eup %2944 }
 0xaa3   :  { %v1632_v51 = vmul.f32 %v2945_v50, %v1630_v49  ;;  %vm1637_vm13 = vweird.f32 %v2945_v50 }
 0xaa4   :  { %vm1638_vm15 = vmor %vm1636_vm14, %vm1637_vm13 }
 0xaa5   :  { %v1633_v52 = vsub.f32 1.0, %v1632_v51 }
 0xaa7   :  { %v1634_v53 = vmul.f32 %v2945_v50, %v1633_v52 }
 0xaa9   :  { %v1635_v54 = vadd.f32 %v2945_v50, %v1634_v53 }
 0xaab   :  { %v1639_v57 = vsel %vm1638_vm15, %v2945_v50, %v1635_v54 }
 0xaac   :  { %v1644_v60 = vsel %vm1641_vm1, %v1643_v58, %v1639_v57 }
 0xaad   :  { %v1647_v62 = vmul.f32 %v1644_v60, %v1593_v34 }
 0xb0a   :  { %v1650_v59 = vpop.permute.xlu1 %1649 }
 0xb0b   :  { %v1652_v61 = vmul.f32 %v1650_v59, %v1644_v60 }
 0xb0d   :  { %1654 = vrot.lane.b32.xlu2 %v1652_v61, %s4820_s24 }
 0xb67   :  { %v1655_v63 = vpop.permute.xlu2 %1654 }
 0xb68   :  { %v1657_v0 = vadd.f32 %v1655_v63, %v1647_v62  ;;  %v2833_v63 = vld [vmem:[#allocation13 + $0x8] sm:$0xff] }
 0xb69   :  { %1984 = vmatpush.bf16.msra.mxu3 %v2833_v63 }
 0xb6a   :  { %2946 = vtanh.f32 %v1657_v0 }
 0xb70   :  { %v2947_v1 = vpop.eup %2946 }
 0xb71   :  { %1660 = vrot.lane.b32.xlu0 %v2947_v1, %s4751_s16 }
 0xbe3   :  { %v1661_v5 = vpop.permute.xlu0 %1660 }
 0xbe4   :  { %v5623_v6 = vmul.f32 %v1661_v5, %v1644_v60 }
 0xbe6   :  { %v1670_v8 = vpack.c.bf16 %v5623_v6, %v5623_v6 }
 0xbe8   :  { %1672 = vrot.lane.b32.xlu1 %v1670_v8, %s4820_s24 }
 0xc5a   :  { %v1673_v9 = vpop.permute.xlu1 %1672 }
 0xc5b   :  { %2782 = vmatmul.msk.bf16.vlgmr.msrb.gmra.mxu2 %vm84_vm0, %v1673_v9 }
 0xcde   :  { %v1686_v13 = vpop.f32.mrf.mxu2 }
 0xcdf   :  { %v1690_v14 = vadd.f32 %v1686_v13, %v1370_v12 }
 0xce1   :  { %2948 = vtanh.f32 %v1690_v14  ;;  %v2783_v17 = vmul.f32 -1.442695, %v1690_v14  ;;  %v1311_v14 = vld [vmem:[#allocation2 + $0x30] sm:$0xff] }
 0xce3   :  { %2950 = vpow2.f32 %v2783_v17  ;;  %v5659_v17 = vld [vmem:[#allocation15 + $0x18] sm:$0xff] }
 0xce4   :  { %2047 = vmatpush.bf16.msrb.mxu1 %v5659_v17  ;;  %2115 = vmatpush.bf16.msrb.mxu2 %v5659_v17 }
 0xce5   :  { %2180 = vmatpush.bf16.msrb.mxu0 %v5659_v17 }
 0xce6   :  { %v1688_v15 = vpop.f32.mrf.mxu2 }
 0xce7   :  { %v2949_v16 = vpop.eup %2948  ;;  %v1312_v15 = vld [vmem:[#allocation2 + $0x38] sm:$0xff] }
 0xce8   :  { %1713 = vrot.lane.b32.xlu2 %v2949_v16, %s4751_s16  ;;  %v1320_v16 = vpack.c.bf16 %v1312_v15, %v1311_v14 }
 0xce9   :  { %v2951_v18 = vpop.eup %2950 }
 0xcea   :  { %v1694_v19 = vadd.f32 1.0, %v2951_v18  ;;  %2765 = vmatmul.msk.bf16.gmra.mxu0 %vm84_vm0, %v1320_v16  ;;  %v5662_v18 = vld [vmem:[#allocation15 + $0x10] sm:$0xff] }
 0xceb   :  { %2048 = vmatpush.bf16.msrb.mxu1 %v5662_v18  ;;  %2116 = vmatpush.bf16.msrb.mxu2 %v5662_v18 }
 0xcec   :  { %2952 = vrcp.f32 %v1694_v19  ;;  %v1706_v25 = vand.u32 2147483648, %v1694_v19  ;;  %vm1700_vm3 = vweird.f32 %v1694_v19  ;;  %v1704_v26 = vand.u32 2147483647, %v1694_v19  ;;  %2181 = vmatpush.bf16.msrb.mxu0 %v5662_v18 }
 0xcee   :  { %v1707_v28 = vor.u32 1.1754944e-38, %v1706_v25  ;;  %vm1705_vm5 = vcmp.eq.f32.partialorder %v1704_v26, 8.507059e+37 }
 0xcf0   :  { %2375 = vmatpush.bf16.msra.mxu0 %v5659_v17 }
 0xcf2   :  { %v2953_v20 = vpop.eup %2952 }
 0xcf3   :  { %v1696_v21 = vmul.f32 %v2953_v20, %v1694_v19  ;;  %vm1701_vm2 = vweird.f32 %v2953_v20 }
 0xcf4   :  { %vm1702_vm4 = vmor %vm1700_vm3, %vm1701_vm2  ;;  %2376 = vmatpush.bf16.msra.mxu0 %v5662_v18 }
 0xcf5   :  { %v1697_v22 = vsub.f32 1.0, %v1696_v21 }
 0xcf7   :  { %v1698_v23 = vmul.f32 %v2953_v20, %v1697_v22 }
 0xcf9   :  { %v1699_v24 = vadd.f32 %v2953_v20, %v1698_v23 }
 0xcfb   :  { %v1703_v27 = vsel %vm1702_vm4, %v2953_v20, %v1699_v24  ;;  %v2021_v20 = vld [vmem:[#allocation5 + $0x8] sm:$0xff] }
 0xcfc   :  { %v1708_v30 = vsel %vm1705_vm5, %v1707_v28, %v1703_v27  ;;  %v2025_v21 = vpack.c.bf16 %v2021_v20, %v2021_v20  ;;  %v5682_v28 = vld [vmem:[%s5856_s5 + $0x1] ss:$0 sm:$0xff] }
 0xcfd   :  { %v1711_v32 = vmul.f32 %v1708_v30, %v1657_v0  ;;  %v2832_v0 = vld [vmem:[#allocation13] sm:$0xff] }
 0xcfe   :  { %1985 = vmatpush.bf16.msra.mxu3 %v2832_v0 }
 0xd42   :  { %v1714_v29 = vpop.permute.xlu2 %1713 }
 0xd43   :  { %v1716_v31 = vmul.f32 %v1714_v29, %v1708_v30 }
 0xd45   :  { %1718 = vrot.lane.b32.xlu0 %v1716_v31, %s4820_s24  ;;  %v2023_v31 = vld [vmem:[#allocation6 + $0x8] sm:$0xff] }
 0xd67   :  { %v1374_v22 = vpop.f32.mrf.mxu0 }
 0xd68   :  { %v1375_v23 = vadd.f32 %v5582_v10, %v1374_v22 }
 0xdb7   :  { %v1719_v33 = vpop.permute.xlu0 %1718 }
 0xdb8   :  { %v1721_v34 = vadd.f32 %v1719_v33, %v1711_v32 }
 0xdba   :  { %2954 = vtanh.f32 %v1721_v34 }
 0xdc0   :  { %v2955_v35 = vpop.eup %2954 }
 0xdc1   :  { %1724 = vrot.lane.b32.xlu1 %v2955_v35, %s4751_s16 }
 0xe33   :  { %v1725_v36 = vpop.permute.xlu1 %1724 }
 0xe34   :  { %v5633_v38 = vmul.f32 %v1725_v36, %v1708_v30 }
 0xe36   :  { %v1734_v40 = vpack.c.bf16 %v5633_v38, %v5633_v38 }
 0xe38   :  { %1736 = vrot.lane.b32.xlu2 %v1734_v40, %s4820_s24 }
 0xe92   :  { %v1737_v41 = vpop.permute.xlu2 %1736 }
 0xe93   :  { %2784 = vmatmul.msk.bf16.vlgmr.msrb.gmra.mxu3 %vm84_vm0, %v1737_v41 }
 0xf16   :  { %v1750_v44 = vpop.f32.mrf.mxu3 }
 0xf17   :  { %v1754_v45 = vadd.f32 %v1750_v44, %v1372_v43 }
 0xf19   :  { %2956 = vtanh.f32 %v1754_v45  ;;  %v2785_v48 = vmul.f32 -1.442695, %v1754_v45 }
 0xf1b   :  { %2958 = vpow2.f32 %v2785_v48 }
 0xf1e   :  { %v1752_v46 = vpop.f32.mrf.mxu3 }
 0xf1f   :  { %v2957_v47 = vpop.eup %2956 }
 0xf20   :  { %1777 = vrot.lane.b32.xlu0 %v2957_v47, %s4751_s16 }
 0xf21   :  { %v2959_v49 = vpop.eup %2958 }
 0xf22   :  { %v1758_v50 = vadd.f32 1.0, %v2959_v49 }
 0xf24   :  { %2960 = vrcp.f32 %v1758_v50  ;;  %v1770_v56 = vand.u32 2147483648, %v1758_v50  ;;  %vm1764_vm7 = vweird.f32 %v1758_v50  ;;  %v1768_v57 = vand.u32 2147483647, %v1758_v50 }
 0xf26   :  { %v1771_v59 = vor.u32 1.1754944e-38, %v1770_v56  ;;  %vm1769_vm9 = vcmp.eq.f32.partialorder %v1768_v57, 8.507059e+37 }
 0xf28   :  { %1473 = vrot.lane.b32.xlu0 %v5589_v39, %s4820_s24 }
 0xf2a   :  { %v2961_v51 = vpop.eup %2960 }
 0xf2b   :  { %v1760_v52 = vmul.f32 %v2961_v51, %v1758_v50  ;;  %vm1765_vm6 = vweird.f32 %v2961_v51 }
 0xf2c   :  { %vm1766_vm8 = vmor %vm1764_vm7, %vm1765_vm6 }
 0xf2d   :  { %v1761_v53 = vsub.f32 1.0, %v1760_v52 }
 0xf2f   :  { %v1762_v54 = vmul.f32 %v2961_v51, %v1761_v53 }
 0xf31   :  { %v1763_v55 = vadd.f32 %v2961_v51, %v1762_v54 }
 0xf33   :  { %v1767_v58 = vsel %vm1766_vm8, %v2961_v51, %v1763_v55 }
 0xf34   :  { %v1772_v39 = vsel %vm1769_vm9, %v1771_v59, %v1767_v58 }
 0xf35   :  { %v1775_v1 = vmul.f32 %v1772_v39, %v1721_v34 }
 0xf92   :  { %v1778_v60 = vpop.permute.xlu0 %1777 }
 0xf93   :  { %v1780_v61 = vmul.f32 %v1778_v60, %v1772_v39 }
 0xf95   :  { %1782 = vrot.lane.b32.xlu1 %v1780_v61, %s4820_s24 }
 0xf9a   :  { %v1474_v62 = vpop.permute.xlu0 %1473 }
 0xf9b   :  { %1476 = vst.msk [vmem:[#allocation3] sm:$0xff] %vm84_vm0, %v1474_v62 }
 0xf9d   :  { %1537 = vrot.lane.b32.xlu1 %v5602_v7, %s4820_s24 }
 0xfa2   :  { %v1933_v8 = vld [vmem:[#allocation3] sm:$0xff] }
0x1007   :  { %v1783_v2 = vpop.permute.xlu1 %1782 }
0x1008   :  { %v5647_v3 = vadd.f32 %v1783_v2, %v1775_v1 }
0x100a   :  { %2962 = vtanh.f32 %v5647_v3 }
0x100f   :  { %v1538_v4 = vpop.permute.xlu1 %1537 }
0x1010   :  { %v2963_v5 = vpop.eup %2962  ;;  %1540 = vst.msk [vmem:[#allocation3 + $0x8] sm:$0xff] %vm84_vm0, %v1538_v4 }
0x1011   :  { %1788 = vrot.lane.b32.xlu2 %v2963_v5, %s4751_s16 }
0x1017   :  { %v1934_v9 = vld [vmem:[#allocation3 + $0x8] sm:$0xff] }
0x1018   :  { %v1945_v11 = vpack.c.bf16 %v1934_v9, %v1933_v8 }
0x101a   :  { %2799 = vmatmul.msk.bf16.vlgmr.msra.gmra.mxu3 %vm84_vm0, %v1945_v11 }
0x106b   :  { %v1789_v7 = vpop.permute.xlu2 %1788 }
0x106c   :  { %v5653_v12 = vmul.f32 %v1789_v7, %v1772_v39 }
0x106e   :  { %v1798_v13 = vpack.c.bf16 %v5653_v12, %v5653_v12 }
0x1070   :  { %1800 = vrot.lane.b32.xlu2 %v1798_v13, %s4820_s24 }
0x109d   :  { %v1987_v29 = vpop.f32.mrf.mxu3 }
0x109e   :  { %v1988_v30 = vadd.f32 %v5682_v28, %v1987_v29 }
0x10ca   :  { %v1801_v19 = vpop.permute.xlu2 %1800 }
0x10cb   :  { %2786 = vmatmul.msk.bf16.vlgmr.msra.gmra.mxu1 %vm84_vm0, %v1801_v19 }
0x10cc   :  { %2245 = vmatpush.bf16.msra.mxu1 %v5659_v17 }
0x10d0   :  { %2246 = vmatpush.bf16.msra.mxu1 %v5662_v18 }
0x10db   :  { %2811 = vmatmul.msk.bf16.vlgmr.msrb.gmra.mxu1 %vm84_vm0, %v2025_v21 }
0x10dc   :  { %2440 = vmatpush.bf16.msrb.mxu1 %v5659_v17 }
0x10e0   :  { %2441 = vmatpush.bf16.msrb.mxu1 %v5662_v18 }
0x1148   :  { %v1814_v24 = vpop.f32.mrf.mxu1 }
0x1149   :  { %v1818_v25 = vadd.f32 %v1814_v24, %v1375_v23 }
0x114b   :  { %2964 = vtanh.f32 %v1818_v25  ;;  %v2787_v35 = vmul.f32 -1.442695, %v1818_v25 }
0x1150   :  { %v1816_v26 = vpop.f32.mrf.mxu1 }
0x1151   :  { %v2965_v27 = vpop.eup %2964 }
0x1152   :  { %1841 = vrot.lane.b32.xlu0 %v2965_v27, %s4751_s16  ;;  %v1989_v27 = vpop.f32.mrf.mxu3 }
0x1153   :  { %v1990_v29 = vadd.f32 %v5682_v28, %v1989_v27 }
0x1158   :  { %v2050_v32 = vpop.f32.mrf.mxu1 }
0x1159   :  { %v2054_v33 = vadd.f32 %v2050_v32, %v1988_v30 }
0x115a   :  { %2076 = vrot.lane.b32.xlu0 %v2023_v31, %s4820_s24 }
0x115b   :  { %2966 = vtanh.f32 %v2054_v33  ;;  %v2812_v41 = vmul.f32 -1.442695, %v2054_v33 }
0x115c   :  { %2968 = vpow2.f32 %v2787_v35 }
0x1160   :  { %v2052_v10 = vpop.f32.mrf.mxu1 }
0x1161   :  { %v2967_v34 = vpop.eup %2966 }
0x1162   :  { %2081 = vrot.lane.b32.xlu1 %v2967_v34, %s4751_s16  ;;  %v2969_v36 = vpop.eup %2968 }
0x1163   :  { %v1822_v40 = vadd.f32 1.0, %v2969_v36 }
0x1165   :  { %2970 = vrcp.f32 %v1822_v40  ;;  %v1834_v50 = vand.u32 2147483648, %v1822_v40  ;;  %vm1828_vm11 = vweird.f32 %v1822_v40  ;;  %v1832_v51 = vand.u32 2147483647, %v1822_v40 }
0x1166   :  { %2972 = vpow2.f32 %v2812_v41 }
0x1167   :  { %v1835_v54 = vor.u32 1.1754944e-38, %v1834_v50  ;;  %vm1833_vm13 = vcmp.eq.f32.partialorder %v1832_v51, 8.507059e+37 }
0x116b   :  { %v2971_v42 = vpop.eup %2970 }
0x116c   :  { %v2973_v43 = vpop.eup %2972  ;;  %v1824_v44 = vmul.f32 %v2971_v42, %v1822_v40  ;;  %vm1829_vm10 = vweird.f32 %v2971_v42 }
0x116d   :  { %v2058_v45 = vadd.f32 1.0, %v2973_v43  ;;  %vm1830_vm12 = vmor %vm1828_vm11, %vm1829_vm10 }
0x116e   :  { %v1825_v46 = vsub.f32 1.0, %v1824_v44 }
0x116f   :  { %2974 = vrcp.f32 %v2058_v45  ;;  %v2070_v39 = vand.u32 2147483648, %v2058_v45  ;;  %vm2064_vm15 = vweird.f32 %v2058_v45  ;;  %v2068_v61 = vand.u32 2147483647, %v2058_v45 }
0x1170   :  { %v1826_v47 = vmul.f32 %v2971_v42, %v1825_v46 }
0x1171   :  { %v2071_v63 = vor.u32 1.1754944e-38, %v2070_v39  ;;  %vm2069_vm2 = vcmp.eq.f32.partialorder %v2068_v61, 8.507059e+37 }
0x1172   :  { %v1827_v48 = vadd.f32 %v2971_v42, %v1826_v47 }
0x1174   :  { %v1831_v52 = vsel %vm1830_vm12, %v2971_v42, %v1827_v48 }
0x1175   :  { %v2975_v49 = vpop.eup %2974  ;;  %v1836_v56 = vsel %vm1833_vm13, %v1835_v54, %v1831_v52 }
0x1176   :  { %v2060_v53 = vmul.f32 %v2975_v49, %v2058_v45  ;;  %vm2065_vm14 = vweird.f32 %v2975_v49  ;;  %v1839_v4 = vmul.f32 %v1836_v56, %v5647_v3 }
0x1177   :  { %vm2066_vm1 = vmor %vm2064_vm15, %vm2065_vm14 }
0x1178   :  { %v2061_v58 = vsub.f32 1.0, %v2060_v53 }
0x117a   :  { %v2062_v59 = vmul.f32 %v2975_v49, %v2061_v58 }
0x117c   :  { %v2063_v60 = vadd.f32 %v2975_v49, %v2062_v59 }
0x117e   :  { %v2067_v62 = vsel %vm2066_vm1, %v2975_v49, %v2063_v60  ;;  %v5730_v60 = vpop.f32.mrf.mxu0 }
0x117f   :  { %v2072_v0 = vsel %vm2069_vm2, %v2071_v63, %v2067_v62 }
0x11c4   :  { %v1842_v55 = vpop.permute.xlu0 %1841 }
0x11c5   :  { %v1844_v57 = vmul.f32 %v1842_v55, %v1836_v56 }
0x11c7   :  { %1846 = vrot.lane.b32.xlu2 %v1844_v57, %s4820_s24 }
0x11cc   :  { %v2077_v11 = vpop.permute.xlu0 %2076 }
0x11cd   :  { %v2079_v7 = vmul.f32 %v2077_v11, %v2072_v0 }
0x11d4   :  { %v2082_v1 = vpop.permute.xlu1 %2081 }
0x11d5   :  { %v2084_v2 = vmul.f32 %v2082_v1, %v2072_v0 }
0x11d7   :  { %2086 = vrot.lane.b32.xlu1 %v2084_v2, %s4820_s24 }
0x1221   :  { %v1847_v5 = vpop.permute.xlu2 %1846 }
0x1222   :  { %v5690_v8 = vadd.f32 %v1847_v5, %v1839_v4 }
0x1224   :  { %2976 = vtanh.f32 %v5690_v8 }
0x122a   :  { %v2977_v9 = vpop.eup %2976 }
0x122b   :  { %1852 = vrot.lane.b32.xlu2 %v2977_v9, %s4751_s16 }
0x1249   :  { %v2087_v13 = vpop.permute.xlu1 %2086 }
0x124a   :  { %v2089_v14 = vadd.f32 %v2087_v13, %v2079_v7 }
0x124c   :  { %2978 = vtanh.f32 %v2089_v14 }
0x1252   :  { %v2979_v15 = vpop.eup %2978 }
0x1253   :  { %2092 = vrot.lane.b32.xlu0 %v2979_v15, %s4751_s16 }
0x1285   :  { %v1853_v16 = vpop.permute.xlu2 %1852 }
0x1286   :  { %v5695_v19 = vmul.f32 %v1853_v16, %v1836_v56 }
0x1288   :  { %v1862_v3 = vpack.c.bf16 %v5695_v19, %v5695_v19 }
0x128a   :  { %1864 = vrot.lane.b32.xlu1 %v1862_v3, %s4820_s24 }
0x12c5   :  { %v2093_v20 = vpop.permute.xlu0 %2092 }
0x12c6   :  { %v5700_v21 = vmul.f32 %v2093_v20, %v2072_v0 }
0x12c8   :  { %v2102_v22 = vpack.c.bf16 %v5700_v21, %v5700_v21 }
0x12ca   :  { %2104 = vrot.lane.b32.xlu2 %v2102_v22, %s4820_s24 }
0x12fc   :  { %v1865_v23 = vpop.permute.xlu1 %1864 }
0x12fd   :  { %2788 = vmatmul.msk.bf16.vlgmr.msra.gmra.mxu2 %vm84_vm0, %v1865_v23 }
0x12fe   :  { %2310 = vmatpush.bf16.msra.mxu2 %v5659_v17 }
0x1302   :  { %2311 = vmatpush.bf16.msra.mxu2 %v5662_v18 }
0x1324   :  { %v2105_v24 = vpop.permute.xlu2 %2104 }
0x1325   :  { %2813 = vmatmul.msk.bf16.vlgmr.msrb.gmra.mxu2 %vm84_vm0, %v2105_v24 }
0x1326   :  { %2505 = vmatpush.bf16.msrb.mxu2 %v5659_v17 }
0x132a   :  { %2506 = vmatpush.bf16.msrb.mxu2 %v5662_v18 }
0x1380   :  { %v5711_v25 = vpop.f32.mrf.mxu2 }
0x1388   :  { %v1880_v26 = vpop.f32.mrf.mxu2 }
0x13a8   :  { %v2118_v30 = vpop.f32.mrf.mxu2 }
0x13a9   :  { %v2122_v31 = vadd.f32 %v2118_v30, %v1990_v29 }
0x13ab   :  { %2980 = vtanh.f32 %v2122_v31  ;;  %v2814_v10 = vmul.f32 -1.442695, %v2122_v31 }
0x13ad   :  { %2982 = vpow2.f32 %v2814_v10 }
0x13b0   :  { %v2120_v32 = vpop.f32.mrf.mxu2 }
0x13b1   :  { %v2981_v33 = vpop.eup %2980 }
0x13b2   :  { %2145 = vrot.lane.b32.xlu0 %v2981_v33, %s4751_s16 }
0x13b3   :  { %v2983_v17 = vpop.eup %2982 }
0x13b4   :  { %v2126_v18 = vadd.f32 1.0, %v2983_v17 }
0x13b6   :  { %2984 = vrcp.f32 %v2126_v18  ;;  %v2138_v42 = vand.u32 2147483648, %v2126_v18  ;;  %vm2132_vm4 = vweird.f32 %v2126_v18  ;;  %v2136_v43 = vand.u32 2147483647, %v2126_v18 }
0x13b8   :  { %v2139_v45 = vor.u32 1.1754944e-38, %v2138_v42  ;;  %vm2137_vm6 = vcmp.eq.f32.partialorder %v2136_v43, 8.507059e+37 }
0x13ba   :  { %1601 = vrot.lane.b32.xlu0 %v5612_v37, %s4820_s24 }
0x13bc   :  { %v2985_v34 = vpop.eup %2984 }
0x13bd   :  { %v2128_v35 = vmul.f32 %v2985_v34, %v2126_v18  ;;  %vm2133_vm3 = vweird.f32 %v2985_v34 }
0x13be   :  { %vm2134_vm5 = vmor %vm2132_vm4, %vm2133_vm3 }
0x13bf   :  { %v2129_v36 = vsub.f32 1.0, %v2128_v35 }
0x13c1   :  { %v2130_v40 = vmul.f32 %v2985_v34, %v2129_v36 }
0x13c3   :  { %v2131_v41 = vadd.f32 %v2985_v34, %v2130_v40 }
0x13c5   :  { %v2135_v44 = vsel %vm2134_vm5, %v2985_v34, %v2131_v41 }
0x13c6   :  { %v2140_v37 = vsel %vm2137_vm6, %v2139_v45, %v2135_v44 }
0x13c7   :  { %v2143_v49 = vmul.f32 %v2140_v37, %v2089_v14 }
0x1424   :  { %v2146_v46 = vpop.permute.xlu0 %2145 }
0x1425   :  { %v2148_v47 = vmul.f32 %v2146_v46, %v2140_v37 }
0x1427   :  { %2150 = vrot.lane.b32.xlu1 %v2148_v47, %s4820_s24 }
0x142c   :  { %v1602_v48 = vpop.permute.xlu0 %1601 }
0x142d   :  { %1604 = vst.msk [vmem:[#allocation3 + $0x10] sm:$0xff] %vm84_vm0, %v1602_v48 }
0x142f   :  { %1665 = vrot.lane.b32.xlu1 %v5623_v6, %s4820_s24 }
0x1434   :  { %v1935_v54 = vld [vmem:[#allocation3 + $0x10] sm:$0xff] }
0x1499   :  { %v2151_v50 = vpop.permute.xlu1 %2150 }
0x149a   :  { %v2153_v51 = vadd.f32 %v2151_v50, %v2143_v49 }
0x149c   :  { %2986 = vtanh.f32 %v2153_v51 }
0x14a1   :  { %v1666_v52 = vpop.permute.xlu1 %1665 }
0x14a2   :  { %v2987_v53 = vpop.eup %2986  ;;  %1668 = vst.msk [vmem:[#allocation3 + $0x18] sm:$0xff] %vm84_vm0, %v1666_v52 }
0x14a3   :  { %2156 = vrot.lane.b32.xlu2 %v2987_v53, %s4751_s16 }
0x14a9   :  { %v1936_v55 = vld [vmem:[#allocation3 + $0x18] sm:$0xff] }
0x14aa   :  { %v1946_v56 = vpack.c.bf16 %v1936_v55, %v1935_v54 }
0x14ac   :  { %2800 = vmatmul.msk.bf16.gmra.mxu3 %vm84_vm0, %v1946_v56 }
0x14fd   :  { %v2157_v57 = vpop.permute.xlu2 %2156 }
0x14fe   :  { %v5724_v58 = vmul.f32 %v2157_v57, %v2140_v37 }
0x1500   :  { %v2167_v6 = vpack.c.bf16 %v5724_v58, %v5724_v58 }
0x1502   :  { %2169 = vrot.lane.b32.xlu2 %v2167_v6, %s4820_s24 }
0x152f   :  { %v1992_v39 = vpop.f32.mrf.mxu3 }
0x1530   :  { %v1993_v61 = vadd.f32 %v5682_v28, %v1992_v39 }
0x1537   :  { %v1994_v17 = vpop.f32.mrf.mxu3 }
0x1538   :  { %v1995_v18 = vadd.f32 %v5682_v28, %v1994_v17 }
0x155c   :  { %v2170_v59 = vpop.permute.xlu2 %2169 }
0x155d   :  { %2815 = vmatmul.msk.bf16.vlgmr.msrb.gmra.mxu0 %vm84_vm0, %v2170_v59 }
0x15da   :  { %v2183_v62 = vpop.f32.mrf.mxu0 }
0x15db   :  { %v2187_v63 = vadd.f32 %v2183_v62, %v1993_v61 }
0x15dd   :  { %2988 = vtanh.f32 %v2187_v63  ;;  %v2816_v2 = vmul.f32 -1.442695, %v2187_v63 }
0x15df   :  { %2990 = vpow2.f32 %v2816_v2 }
0x15e2   :  { %v2185_v0 = vpop.f32.mrf.mxu0 }
0x15e3   :  { %v2989_v1 = vpop.eup %2988 }
0x15e4   :  { %2210 = vrot.lane.b32.xlu0 %v2989_v1, %s4751_s16 }
0x15e5   :  { %v2991_v4 = vpop.eup %2990 }
0x15e6   :  { %v2191_v5 = vadd.f32 1.0, %v2991_v4 }
0x15e8   :  { %2992 = vrcp.f32 %v2191_v5  ;;  %v2203_v15 = vand.u32 2147483648, %v2191_v5  ;;  %vm2197_vm8 = vweird.f32 %v2191_v5  ;;  %v2201_v16 = vand.u32 2147483647, %v2191_v5 }
0x15ea   :  { %v2204_v20 = vor.u32 1.1754944e-38, %v2203_v15  ;;  %vm2202_vm10 = vcmp.eq.f32.partialorder %v2201_v16, 8.507059e+37 }
0x15ee   :  { %v2993_v9 = vpop.eup %2992 }
0x15ef   :  { %v2193_v11 = vmul.f32 %v2993_v9, %v2191_v5  ;;  %vm2198_vm7 = vweird.f32 %v2993_v9 }
0x15f0   :  { %vm2199_vm9 = vmor %vm2197_vm8, %vm2198_vm7 }
0x15f1   :  { %v2194_v7 = vsub.f32 1.0, %v2193_v11 }
0x15f3   :  { %v2195_v13 = vmul.f32 %v2993_v9, %v2194_v7 }
0x15f5   :  { %v2196_v14 = vadd.f32 %v2993_v9, %v2195_v13 }
0x15f7   :  { %v2200_v3 = vsel %vm2199_vm9, %v2993_v9, %v2196_v14 }
0x15f8   :  { %v2205_v23 = vsel %vm2202_vm10, %v2204_v20, %v2200_v3 }
0x15f9   :  { %v2208_v26 = vmul.f32 %v2205_v23, %v2153_v51 }
0x1656   :  { %v2211_v22 = vpop.permute.xlu0 %2210 }
0x1657   :  { %v2213_v24 = vmul.f32 %v2211_v22, %v2205_v23 }
0x1659   :  { %2215 = vrot.lane.b32.xlu1 %v2213_v24, %s4820_s24 }
0x16cb   :  { %v2216_v27 = vpop.permute.xlu1 %2215 }
0x16cc   :  { %v2218_v29 = vadd.f32 %v2216_v27, %v2208_v26 }
0x16ce   :  { %2994 = vtanh.f32 %v2218_v29 }
0x16d4   :  { %v2995_v30 = vpop.eup %2994 }
0x16d5   :  { %2221 = vrot.lane.b32.xlu2 %v2995_v30, %s4751_s16 }
0x172f   :  { %v2222_v31 = vpop.permute.xlu2 %2221 }
0x1730   :  { %v5736_v32 = vmul.f32 %v2222_v31, %v2205_v23 }
0x1732   :  { %v2232_v33 = vpack.c.bf16 %v5736_v32, %v5736_v32 }
0x1734   :  { %2234 = vrot.lane.b32.xlu0 %v2232_v33, %s4820_s24 }
0x17a6   :  { %v2235_v10 = vpop.permute.xlu0 %2234 }
0x17a7   :  { %2817 = vmatmul.msk.bf16.vlgmr.msra.gmra.mxu1 %vm84_vm0, %v2235_v10 }
0x1824   :  { %v2248_v34 = vpop.f32.mrf.mxu1 }
0x1825   :  { %v2252_v35 = vadd.f32 %v2248_v34, %v1995_v18 }
0x1827   :  { %2996 = vtanh.f32 %v2252_v35  ;;  %v2818_v41 = vmul.f32 -1.442695, %v2252_v35 }
0x1829   :  { %2998 = vpow2.f32 %v2818_v41 }
0x182c   :  { %v2250_v36 = vpop.f32.mrf.mxu1 }
0x182d   :  { %v2997_v40 = vpop.eup %2996 }
0x182e   :  { %2275 = vrot.lane.b32.xlu1 %v2997_v40, %s4751_s16 }
0x182f   :  { %v2999_v42 = vpop.eup %2998 }
0x1830   :  { %v2256_v43 = vadd.f32 1.0, %v2999_v42 }
0x1832   :  { %3000 = vrcp.f32 %v2256_v43  ;;  %v2268_v48 = vand.u32 2147483648, %v2256_v43  ;;  %vm2262_vm12 = vweird.f32 %v2256_v43  ;;  %v2266_v49 = vand.u32 2147483647, %v2256_v43 }
0x1834   :  { %v2269_v51 = vor.u32 1.1754944e-38, %v2268_v48  ;;  %vm2267_vm14 = vcmp.eq.f32.partialorder %v2266_v49, 8.507059e+37 }
0x1836   :  { %1729 = vrot.lane.b32.xlu1 %v5633_v38, %s4820_s24 }
0x1838   :  { %v3001_v44 = vpop.eup %3000 }
0x1839   :  { %v2258_v45 = vmul.f32 %v3001_v44, %v2256_v43  ;;  %vm2263_vm11 = vweird.f32 %v3001_v44 }
0x183a   :  { %vm2264_vm13 = vmor %vm2262_vm12, %vm2263_vm11 }
0x183b   :  { %v2259_v46 = vsub.f32 1.0, %v2258_v45 }
0x183d   :  { %v2260_v37 = vmul.f32 %v3001_v44, %v2259_v46 }
0x183f   :  { %v2261_v47 = vadd.f32 %v3001_v44, %v2260_v37 }
0x1841   :  { %v2265_v50 = vsel %vm2264_vm13, %v3001_v44, %v2261_v47 }
0x1842   :  { %v2270_v38 = vsel %vm2267_vm14, %v2269_v51, %v2265_v50 }
0x1843   :  { %v2273_v55 = vmul.f32 %v2270_v38, %v2218_v29  ;;  %v3044_v29 = vld [vmem:[%s5856_s5] ss:$0 sm:$0xff]  ;;  %s4821_s5 = smov 96  }
0x1844   :  { %v1377_v30 = vadd.f32 %v3044_v29, %v5730_v60 }
0x1846   :  { %v1882_v33 = vadd.f32 %v5711_v25, %v1377_v30 }
0x1848   :  { %v2789_v41 = vmul.f32 -1.442695, %v1882_v33 }
0x18a0   :  { %v2276_v52 = vpop.permute.xlu1 %2275 }
0x18a1   :  { %v2278_v53 = vmul.f32 %v2276_v52, %v2270_v38 }
0x18a3   :  { %2280 = vrot.lane.b32.xlu2 %v2278_v53, %s4820_s24 }
0x18a8   :  { %v1730_v54 = vpop.permute.xlu1 %1729 }
0x18a9   :  { %1732 = vst.msk [vmem:[#allocation3 + $0x20] sm:$0xff] %vm84_vm0, %v1730_v54 }
0x18ab   :  { %1793 = vrot.lane.b32.xlu2 %v5653_v12, %s4820_s24 }
0x18b0   :  { %v1937_v39 = vld [vmem:[#allocation3 + $0x20] sm:$0xff] }
0x18fd   :  { %v2281_v56 = vpop.permute.xlu2 %2280 }
0x18fe   :  { %v2283_v57 = vadd.f32 %v2281_v56, %v2273_v55 }
0x1900   :  { %3002 = vtanh.f32 %v2283_v57 }
0x1905   :  { %v1794_v6 = vpop.permute.xlu2 %1793 }
0x1906   :  { %v3003_v59 = vpop.eup %3002  ;;  %1796 = vst.msk [vmem:[#allocation3 + $0x28] sm:$0xff] %vm84_vm0, %v1794_v6 }
0x1907   :  { %2286 = vrot.lane.b32.xlu0 %v3003_v59, %s4751_s16 }
0x190d   :  { %v1938_v61 = vld [vmem:[#allocation3 + $0x28] sm:$0xff] }
0x190e   :  { %v1947_v62 = vpack.c.bf16 %v1938_v61, %v1937_v39 }
0x1910   :  { %2801 = vmatmul.msk.bf16.gmra.mxu3 %vm84_vm0, %v1947_v62 }
0x1979   :  { %v2287_v63 = vpop.permute.xlu0 %2286 }
0x197a   :  { %v5753_v0 = vmul.f32 %v2287_v63, %v2270_v38 }
0x197c   :  { %v2297_v12 = vpack.c.bf16 %v5753_v0, %v5753_v0 }
0x197e   :  { %2299 = vrot.lane.b32.xlu0 %v2297_v12, %s4820_s24 }
0x1993   :  { %v1997_v2 = vpop.f32.mrf.mxu3 }
0x1994   :  { %v1998_v4 = vadd.f32 %v5682_v28, %v1997_v2 }
0x19f0   :  { %v2300_v1 = vpop.permute.xlu0 %2299 }
0x19f1   :  { %2819 = vmatmul.msk.bf16.vlgmr.msra.gmra.mxu2 %vm84_vm0, %v2300_v1 }
0x1a74   :  { %v2313_v5 = vpop.f32.mrf.mxu2 }
0x1a75   :  { %v2317_v9 = vadd.f32 %v2313_v5, %v1998_v4 }
0x1a77   :  { %3004 = vtanh.f32 %v2317_v9  ;;  %v2820_v13 = vmul.f32 -1.442695, %v2317_v9 }
0x1a79   :  { %3006 = vpow2.f32 %v2820_v13 }
0x1a7c   :  { %v2315_v11 = vpop.f32.mrf.mxu2 }
0x1a7d   :  { %v3005_v7 = vpop.eup %3004 }
0x1a7e   :  { %2340 = vrot.lane.b32.xlu1 %v3005_v7, %s4751_s16 }
0x1a7f   :  { %v3007_v14 = vpop.eup %3006 }
0x1a80   :  { %v2321_v15 = vadd.f32 1.0, %v3007_v14 }
0x1a82   :  { %3008 = vrcp.f32 %v2321_v15  ;;  %v2333_v24 = vand.u32 2147483648, %v2321_v15  ;;  %vm2327_vm1 = vweird.f32 %v2321_v15  ;;  %v2331_v26 = vand.u32 2147483647, %v2321_v15 }
0x1a83   :  { %3010 = vtanh.f32 %v1882_v33 }
0x1a84   :  { %v2334_v31 = vor.u32 1.1754944e-38, %v2333_v24  ;;  %vm2332_vm3 = vcmp.eq.f32.partialorder %v2331_v26, 8.507059e+37 }
0x1a88   :  { %v3009_v16 = vpop.eup %3008 }
0x1a89   :  { %v2323_v3 = vmul.f32 %v3009_v16, %v2321_v15  ;;  %vm2328_vm15 = vweird.f32 %v3009_v16  ;;  %v3011_v34 = vpop.eup %3010 }
0x1a8a   :  { %vm2329_vm2 = vmor %vm2327_vm1, %vm2328_vm15 }
0x1a8b   :  { %v2324_v20 = vsub.f32 1.0, %v2323_v3 }
0x1a8d   :  { %v2325_v22 = vmul.f32 %v3009_v16, %v2324_v20 }
0x1a8f   :  { %v2326_v23 = vadd.f32 %v3009_v16, %v2325_v22 }
0x1a91   :  { %v2330_v27 = vsel %vm2329_vm2, %v3009_v16, %v2326_v23 }
0x1a92   :  { %v2335_v17 = vsel %vm2332_vm3, %v2334_v31, %v2330_v27 }
0x1a93   :  { %v2338_v35 = vmul.f32 %v2335_v17, %v2283_v57  ;;  %v1999_v57 = vpop.f32.mrf.mxu3 }
0x1a94   :  { %v2000_v6 = vadd.f32 %v5682_v28, %v1999_v57 }
0x1af0   :  { %v2341_v10 = vpop.permute.xlu1 %2340 }
0x1af1   :  { %v2343_v18 = vmul.f32 %v2341_v10, %v2335_v17 }
0x1af3   :  { %2345 = vrot.lane.b32.xlu2 %v2343_v18, %s4820_s24 }
0x1afb   :  { %1905 = vrot.lane.b32.xlu2 %v3011_v34, %s4751_s16 }
0x1b4d   :  { %v2346_v36 = vpop.permute.xlu2 %2345 }
0x1b4e   :  { %v5768_v40 = vadd.f32 %v2346_v36, %v2338_v35 }
0x1b50   :  { %3012 = vtanh.f32 %v5768_v40 }
0x1b51   :  { %3014 = vpow2.f32 %v2789_v41 }
0x1b55   :  { %v1906_v53 = vpop.permute.xlu2 %1905 }
0x1b56   :  { %v3013_v60 = vpop.eup %3012 }
0x1b57   :  { %2351 = vrot.lane.b32.xlu0 %v3013_v60, %s4751_s16  ;;  %v3015_v25 = vpop.eup %3014 }
0x1b58   :  { %v1886_v42 = vadd.f32 1.0, %v3015_v25 }
0x1b5a   :  { %3016 = vrcp.f32 %v1886_v42  ;;  %v1898_v50 = vand.u32 2147483648, %v1886_v42  ;;  %vm1892_vm5 = vweird.f32 %v1886_v42  ;;  %v1896_v51 = vand.u32 2147483647, %v1886_v42 }
0x1b5c   :  { %v1899_v38 = vor.u32 1.1754944e-38, %v1898_v50  ;;  %vm1897_vm7 = vcmp.eq.f32.partialorder %v1896_v51, 8.507059e+37 }
0x1b60   :  { %v3017_v43 = vpop.eup %3016 }
0x1b61   :  { %v1888_v44 = vmul.f32 %v3017_v43, %v1886_v42  ;;  %vm1893_vm4 = vweird.f32 %v3017_v43 }
0x1b62   :  { %vm1894_vm6 = vmor %vm1892_vm5, %vm1893_vm4 }
0x1b63   :  { %v1889_v45 = vsub.f32 1.0, %v1888_v44 }
0x1b65   :  { %v1890_v46 = vmul.f32 %v3017_v43, %v1889_v45 }
0x1b67   :  { %v1891_v48 = vadd.f32 %v3017_v43, %v1890_v46 }
0x1b69   :  { %v1895_v52 = vsel %vm1894_vm6, %v3017_v43, %v1891_v48 }
0x1b6a   :  { %v1900_v54 = vsel %vm1897_vm7, %v1899_v38, %v1895_v52 }
0x1b6b   :  { %v1908_v55 = vmul.f32 %v1906_v53, %v1900_v54  ;;  %v1903_v62 = vmul.f32 %v1900_v54, %v5690_v8 }
0x1bc9   :  { %v2352_v37 = vpop.permute.xlu0 %2351 }
0x1bca   :  { %v5772_v47 = vmul.f32 %v2352_v37, %v2335_v17 }
0x1bcc   :  { %v2362_v49 = vpack.c.bf16 %v5772_v47, %v5772_v47 }
0x1bce   :  { %2364 = vrot.lane.b32.xlu1 %v2362_v49, %s4820_s24 }
0x1bd6   :  { %1910 = vrot.lane.b32.xlu1 %v1908_v55, %s4820_s24 }
0x1c40   :  { %v2365_v56 = vpop.permute.xlu1 %2364 }
0x1c41   :  { %2821 = vmatmul.msk.bf16.vlgmr.msra.gmra.mxu0 %vm84_vm0, %v2365_v56 }
0x1c48   :  { %v1911_v61 = vpop.permute.xlu1 %1910 }
0x1c49   :  { %v5781_v63 = vadd.f32 %v1911_v61, %v1903_v62 }
0x1cbe   :  { %v2378_v59 = vpop.f32.mrf.mxu0 }
0x1cbf   :  { %v2382_v39 = vadd.f32 %v2378_v59, %v2000_v6 }
0x1cc1   :  { %3018 = vtanh.f32 %v2382_v39  ;;  %v2822_v4 = vmul.f32 -1.442695, %v2382_v39 }
0x1cc2   :  { %3020 = vtanh.f32 %v5781_v63 }
0x1cc3   :  { %3022 = vpow2.f32 %v2822_v4 }
0x1cc6   :  { %v2380_v12 = vpop.f32.mrf.mxu0 }
0x1cc7   :  { %v3019_v1 = vpop.eup %3018 }
0x1cc8   :  { %2405 = vrot.lane.b32.xlu0 %v3019_v1, %s4751_s16  ;;  %v3021_v2 = vpop.eup %3020 }
0x1cc9   :  { %v3023_v5 = vpop.eup %3022 }
0x1cca   :  { %v2386_v9 = vadd.f32 1.0, %v3023_v5 }
0x1ccc   :  { %3024 = vrcp.f32 %v2386_v9  ;;  %v2398_v15 = vand.u32 2147483648, %v2386_v9  ;;  %vm2392_vm9 = vweird.f32 %v2386_v9  ;;  %v2396_v16 = vand.u32 2147483647, %v2386_v9 }
0x1cce   :  { %v2399_v20 = vor.u32 1.1754944e-38, %v2398_v15  ;;  %vm2397_vm11 = vcmp.eq.f32.partialorder %v2396_v16, 8.507059e+37 }
0x1cd0   :  { %1916 = vrot.lane.b32.xlu0 %v3021_v2, %s4751_s16 }
0x1cd2   :  { %v3025_v11 = vpop.eup %3024 }
0x1cd3   :  { %v2388_v7 = vmul.f32 %v3025_v11, %v2386_v9  ;;  %vm2393_vm8 = vweird.f32 %v3025_v11 }
0x1cd4   :  { %vm2394_vm10 = vmor %vm2392_vm9, %vm2393_vm8 }
0x1cd5   :  { %v2389_v13 = vsub.f32 1.0, %v2388_v7 }
0x1cd7   :  { %v2390_v8 = vmul.f32 %v3025_v11, %v2389_v13 }
0x1cd9   :  { %v2391_v14 = vadd.f32 %v3025_v11, %v2390_v8 }
0x1cdb   :  { %v2395_v3 = vsel %vm2394_vm10, %v3025_v11, %v2391_v14 }
0x1cdc   :  { %v2400_v23 = vsel %vm2397_vm11, %v2399_v20, %v2395_v3 }
0x1cdd   :  { %v2403_v29 = vmul.f32 %v2400_v23, %v5768_v40 }
0x1d3a   :  { %v2406_v22 = vpop.permute.xlu0 %2405 }
0x1d3b   :  { %v2408_v24 = vmul.f32 %v2406_v22, %v2400_v23 }
0x1d3d   :  { %2410 = vrot.lane.b32.xlu2 %v2408_v24, %s4820_s24 }
0x1d42   :  { %v1917_v26 = vpop.permute.xlu0 %1916 }
0x1d43   :  { %v1919_v27 = vmul.f32 %v1917_v26, %v1900_v54 }
0x1d45   :  { %1857 = vrot.lane.b32.xlu2 %v5695_v19, %s4820_s24  ;;  %1921 = vrot.lane.b32.xlu0 %v1919_v27, %s4820_s24 }
0x1d97   :  { %v2411_v30 = vpop.permute.xlu2 %2410 }
0x1d98   :  { %v2413_v31 = vadd.f32 %v2411_v30, %v2403_v29 }
0x1d9a   :  { %3026 = vtanh.f32 %v2413_v31 }
0x1d9f   :  { %v1858_v33 = vpop.permute.xlu2 %1857 }
0x1da0   :  { %v3027_v10 = vpop.eup %3026  ;;  %1860 = vst.msk [vmem:[#allocation3 + $0x30] sm:$0xff] %vm84_vm0, %v1858_v33 }
0x1da1   :  { %2416 = vrot.lane.b32.xlu1 %v3027_v10, %s4751_s16 }
0x1da7   :  { %v1939_v19 = vld [vmem:[#allocation3 + $0x30] sm:$0xff] }
0x1db7   :  { %v1922_v17 = vpop.permute.xlu0 %1921 }
0x1db8   :  { %1924 = vst.msk [vmem:[#allocation3 + $0x38] sm:$0xff] %vm84_vm0, %v1922_v17 }
0x1db9   :  { %1925 = vst.msk [vmem:[#allocation5] sm:$0xff] %vm84_vm0, %v1922_v17 }
0x1dba   :  { %1931 = vst.msk [vmem:[#allocation17] sm:$0xff] %vm84_vm0, %v1922_v17 }
0x1dbf   :  { %v1940_v18 = vld [vmem:[#allocation3 + $0x38] sm:$0xff] }
0x1dc0   :  { %v1948_v34 = vpack.c.bf16 %v1940_v18, %v1939_v19 }
0x1dc2   :  { %2802 = vmatmul.msk.bf16.gmra.mxu3 %vm84_vm0, %v1948_v34 }
0x1e13   :  { %v2417_v35 = vpop.permute.xlu1 %2416 }
0x1e14   :  { %v5797_v36 = vmul.f32 %v2417_v35, %v2400_v23 }
0x1e16   :  { %v2427_v40 = vpack.c.bf16 %v5797_v36, %v5797_v36 }
0x1e18   :  { %2429 = vrot.lane.b32.xlu1 %v2427_v40, %s4820_s24 }
0x1e45   :  { %v2002_v41 = vpop.f32.mrf.mxu3 }
0x1e46   :  { %v2003_v25 = vadd.f32 %v5682_v28, %v2002_v41 }
0x1e4d   :  { %v2004_v9 = vpop.f32.mrf.mxu3 }
0x1e4e   :  { %v2005_v11 = vadd.f32 %v5682_v28, %v2004_v9 }
0x1e8a   :  { %v2430_v60 = vpop.permute.xlu1 %2429 }
0x1e8b   :  { %2823 = vmatmul.msk.bf16.vlgmr.msrb.gmra.mxu1 %vm84_vm0, %v2430_v60 }
0x1f08   :  { %v2443_v42 = vpop.f32.mrf.mxu1 }
0x1f09   :  { %v2447_v43 = vadd.f32 %v2443_v42, %v2003_v25 }
0x1f0b   :  { %3028 = vtanh.f32 %v2447_v43  ;;  %v2824_v46 = vmul.f32 -1.442695, %v2447_v43 }
0x1f0d   :  { %3030 = vpow2.f32 %v2824_v46 }
0x1f10   :  { %v2445_v44 = vpop.f32.mrf.mxu1 }
0x1f11   :  { %v3029_v45 = vpop.eup %3028 }
0x1f12   :  { %2470 = vrot.lane.b32.xlu2 %v3029_v45, %s4751_s16 }
0x1f13   :  { %v3031_v37 = vpop.eup %3030 }
0x1f14   :  { %v2451_v48 = vadd.f32 1.0, %v3031_v37 }
0x1f16   :  { %3032 = vrcp.f32 %v2451_v48  ;;  %v2463_v53 = vand.u32 2147483648, %v2451_v48  ;;  %vm2457_vm13 = vweird.f32 %v2451_v48  ;;  %v2461_v54 = vand.u32 2147483647, %v2451_v48 }
0x1f18   :  { %v2464_v56 = vor.u32 1.1754944e-38, %v2463_v53  ;;  %vm2462_vm15 = vcmp.eq.f32.partialorder %v2461_v54, 8.507059e+37 }
0x1f1c   :  { %v3033_v49 = vpop.eup %3032 }
0x1f1d   :  { %v2453_v50 = vmul.f32 %v3033_v49, %v2451_v48  ;;  %vm2458_vm12 = vweird.f32 %v3033_v49 }
0x1f1e   :  { %vm2459_vm14 = vmor %vm2457_vm13, %vm2458_vm12 }
0x1f1f   :  { %v2454_v51 = vsub.f32 1.0, %v2453_v50 }
0x1f21   :  { %v2455_v52 = vmul.f32 %v3033_v49, %v2454_v51 }
0x1f23   :  { %v2456_v38 = vadd.f32 %v3033_v49, %v2455_v52 }
0x1f25   :  { %v2460_v55 = vsel %vm2459_vm14, %v3033_v49, %v2456_v38 }
0x1f26   :  { %v2465_v6 = vsel %vm2462_vm15, %v2464_v56, %v2460_v55 }
0x1f27   :  { %v2468_v39 = vmul.f32 %v2465_v6, %v2413_v31 }
0x1f6c   :  { %v2471_v57 = vpop.permute.xlu2 %2470 }
0x1f6d   :  { %v2473_v59 = vmul.f32 %v2471_v57, %v2465_v6 }
0x1f6f   :  { %2475 = vrot.lane.b32.xlu0 %v2473_v59, %s4820_s24 }
0x1fe1   :  { %v2476_v61 = vpop.permute.xlu0 %2475 }
0x1fe2   :  { %v2478_v62 = vadd.f32 %v2476_v61, %v2468_v39 }
0x1fe4   :  { %3034 = vtanh.f32 %v2478_v62 }
0x1fea   :  { %v3035_v12 = vpop.eup %3034 }
0x1feb   :  { %2481 = vrot.lane.b32.xlu1 %v3035_v12, %s4751_s16 }
0x205d   :  { %v2482_v1 = vpop.permute.xlu1 %2481 }
0x205e   :  { %v2484_v2 = vmul.f32 %v2482_v1, %v2465_v6 }
0x2060   :  { %v2492_v4 = vpack.c.bf16 %v2484_v2, %v2484_v2 }
0x2062   :  { %2494 = vrot.lane.b32.xlu2 %v2492_v4, %s4820_s24 }
0x20bc   :  { %v2495_v5 = vpop.permute.xlu2 %2494 }
0x20bd   :  { %2825 = vmatmul.msk.bf16.vlgmr.msrb.gmra.mxu2 %vm84_vm0, %v2495_v5 }
0x2140   :  { %v2508_v7 = vpop.f32.mrf.mxu2 }
0x2141   :  { %v2512_v13 = vadd.f32 %v2508_v7, %v2005_v11 }
0x2143   :  { %3036 = vtanh.f32 %v2512_v13  ;;  %v2826_v15 = vmul.f32 -1.442695, %v2512_v13 }
0x2145   :  { %3038 = vpow2.f32 %v2826_v15 }
0x2148   :  { %v2510_v8 = vpop.f32.mrf.mxu2 }
0x2149   :  { %v3037_v14 = vpop.eup %3036 }
0x214a   :  { %2535 = vrot.lane.b32.xlu0 %v3037_v14, %s4751_s16 }
0x214b   :  { %v3039_v16 = vpop.eup %3038 }
0x214c   :  { %v2516_v3 = vadd.f32 1.0, %v3039_v16 }
0x214e   :  { %3040 = vrcp.f32 %v2516_v3  ;;  %v2528_v26 = vand.u32 2147483648, %v2516_v3  ;;  %vm2522_vm2 = vweird.f32 %v2516_v3  ;;  %v2526_v27 = vand.u32 2147483647, %v2516_v3 }
0x2150   :  { %vm2527_vm4 = vcmp.eq.f32.partialorder %v2526_v27, 8.507059e+37 }
0x2152   :  { %2161 = vrot.lane.b32.xlu0 %v5724_v58, %s4820_s24  ;;  %v2529_v58 = vor.u32 1.1754944e-38, %v2528_v26 }
0x2154   :  { %v3041_v20 = vpop.eup %3040 }
0x2155   :  { %v2518_v28 = vmul.f32 %v3041_v20, %v2516_v3  ;;  %vm2523_vm1 = vweird.f32 %v3041_v20 }
0x2156   :  { %vm2524_vm3 = vmor %vm2522_vm2, %vm2523_vm1 }
0x2157   :  { %v2519_v22 = vsub.f32 1.0, %v2518_v28 }
0x2159   :  { %v2520_v23 = vmul.f32 %v3041_v20, %v2519_v22 }
0x215a   :  { %2356 = vrot.lane.b32.xlu0 %v5772_v47, %s4820_s24 }
0x215b   :  { %v2521_v24 = vadd.f32 %v3041_v20, %v2520_v23 }
0x215d   :  { %v2525_v29 = vsel %vm2524_vm3, %v3041_v20, %v2521_v24 }
0x215e   :  { %v2530_v47 = vsel %vm2527_vm4, %v2529_v58, %v2525_v29 }
0x215f   :  { %v2533_v17 = vmul.f32 %v2530_v47, %v2478_v62 }
0x21bc   :  { %v2536_v30 = vpop.permute.xlu0 %2535 }
0x21bd   :  { %v2538_v31 = vmul.f32 %v2536_v30, %v2530_v47 }
0x21bf   :  { %2540 = vrot.lane.b32.xlu1 %v2538_v31, %s4820_s24 }
0x21c4   :  { %v2162_v33 = vpop.permute.xlu0 %2161 }
0x21c5   :  { %2165 = vst.msk [vmem:[#allocation16 + $0x8] sm:$0xff] %vm84_vm0, %v2162_v33 }
0x21c7   :  { %1927 = vrot.lane.b32.xlu1 %v5781_v63, %s4821_s5 }
0x21cc   :  { %v2357_v10 = vpop.permute.xlu0 %2356 }
0x21cd   :  { %2360 = vst.msk [vmem:[#allocation16 + $0x20] sm:$0xff] %vm84_vm0, %v2357_v10 }
0x21cf   :  { %2226 = vrot.lane.b32.xlu1 %v5736_v32, %s4820_s24 }
0x21d7   :  { %2421 = vrot.lane.b32.xlu1 %v5797_v36, %s4820_s24 }
0x2231   :  { %v2541_v19 = vpop.permute.xlu1 %2540 }
0x2232   :  { %v2543_v18 = vadd.f32 %v2541_v19, %v2533_v17 }
0x2234   :  { %3042 = vtanh.f32 %v2543_v18 }
0x2239   :  { %v1928_v34 = vpop.permute.xlu1 %1927 }
0x223a   :  { %v3043_v35 = vpop.eup %3042  ;;  %1930 = vst.msk [vmem:[#allocation6] sm:$0xff] %vm84_vm0, %v1928_v34 }
0x223b   :  { %1932 = vst.msk [vmem:[#allocation19] sm:$0xff] %vm84_vm0, %v1928_v34  ;;  %2546 = vrot.lane.b32.xlu2 %v3043_v35, %s4751_s16  ;;  %s4822_s16 = smov [#allocation16]  }
0x223c   :  { %s2570_s25 = sshll.u32 %s4822_s16, 4  ;;  %s2571_s25 = int_to_ptr.vmem [resolvable:$true] %s2570_s25 }
0x2241   :  { %v2227_v63 = vpop.permute.xlu1 %2226 }
0x2242   :  { %2230 = vst.msk [vmem:[#allocation16 + $0x10] sm:$0xff] %vm84_vm0, %v2227_v63 }
0x2243   :  { %2097 = vrot.lane.b32.xlu2 %v5700_v21, %s4820_s24 }
0x2249   :  { %v2422_v32 = vpop.permute.xlu1 %2421 }
0x224a   :  { %2425 = vst.msk [vmem:[#allocation16 + $0x28] sm:$0xff] %vm84_vm0, %v2422_v32 }
0x224b   :  { %2291 = vrot.lane.b32.xlu2 %v5753_v0, %s4820_s24 }
0x2253   :  { %2486 = vrot.lane.b32.xlu2 %v2484_v2, %s4820_s24 }
0x2295   :  { %v2547_v36 = vpop.permute.xlu2 %2546 }
0x2296   :  { %v2549_v40 = vmul.f32 %v2547_v36, %v2530_v47 }
0x2298   :  { %2551 = vrot.lane.b32.xlu0 %v2549_v40, %s4820_s24 }
0x229d   :  { %v2098_v60 = vpop.permute.xlu2 %2097 }
0x229e   :  { %2100 = vst.msk [vmem:[#allocation16] sm:$0xff] %vm84_vm0, %v2098_v60 }
0x22a0   :  { %2558 = vrot.lane.b32.xlu0 %v2543_v18, %s4821_s5 }
0x22a5   :  { %v2292_v41 = vpop.permute.xlu2 %2291 }
0x22a6   :  { %2295 = vst.msk [vmem:[#allocation16 + $0x18] sm:$0xff] %vm84_vm0, %v2292_v41 }
0x22ad   :  { %v2487_v21 = vpop.permute.xlu2 %2486 }
0x22ae   :  { %2490 = vst.msk [vmem:[#allocation16 + $0x30] sm:$0xff] %vm84_vm0, %v2487_v21 }
0x230a   :  { %v2552_v0 = vpop.permute.xlu0 %2551 }
0x230b   :  { %2555 = vst.msk [vmem:[#allocation16 + $0x38] sm:$0xff] %vm84_vm0, %v2552_v0 }
0x230c   :  { %2556 = vst.msk [vmem:[#allocation5 + $0x8] sm:$0xff] %vm84_vm0, %v2552_v0  ;;  %2578 = dma.vmem_to_hbm [thread:$0]  %s2571_s25, 1024, %s2573_s10, [#allocation12], %s4824_s28, %s4824_s28, %s4825_s22  }
0x230d   :  { %2563 = vst.msk [vmem:[#allocation17 + $0x8] sm:$0xff] %vm84_vm0, %v2552_v0 }
0x230e   :  { %2591 = dma.vmem_to_hbm [thread:$0]  %s2584_s27, 256, %s2586_s17, [#allocation18], %s4824_s28, %s4824_s28, %s4825_s22  }
0x2312   :  { %v2559_v25 = vpop.permute.xlu0 %2558 }
0x2313   :  { %2561 = vst.msk [vmem:[#allocation6 + $0x8] sm:$0xff] %vm84_vm0, %v2559_v25 }
0x2314   :  { %2565 = vst.msk [vmem:[#allocation19 + $0x8] sm:$0xff] %vm84_vm0, %v2559_v25 }
0x2315   :  { %2604 = dma.vmem_to_hbm [thread:$0]  %s2597_s29, 256, %s2599_s7, [#allocation18], %s4824_s28, %s4824_s28, %s4825_s22  }
0x2316   :  { %4745 = dma.done.wait [#allocation12], 1024  }
0x2317   :  { %4746 = vsyncadd [#allocation12], 4294966272 }
0x2318   :  { %4747 = dma.done.wait [#allocation18], 512  }
0x2319   :  { %4748 = vsyncadd [#allocation18], 4294966784 }
0x231a   :  { %2617 = vsyncpa [#allocation11], 1 }
0x231b   :  { %2618 = vsyncpa [#allocation14], 1 }
0x231c   :  { %2619 = vsyncpa [#allocation12], 1 }
0x231d   :  { %2620 = vsyncpa [#allocation18], 1 }
0x231e   :  { %2621 = vsyncmov [#allocation7] }
0x2321   :  { %s2622_s13 = vpop.sfrf %2621 }
0x2322   :  { %p2827_p12 = scmp.ne.s32.totalorder %s2622_s13, 0 }
0x2324   :  { %2626 = shalt.err (%p2827_p12)  }

</bundles_post_ra>
